<compile_context>
chip_gen: v5e
topology: v5e:2x2
jax: 0.10.0
libtpu: 0.0.40
codegen_flags: <defaults>
</compile_context>

<pallas_src>
import functools
from typing import NamedTuple

import numpy as np
import jax
import jax.numpy as jnp
from jax.experimental import pallas as pl
from jax.experimental.pallas import tpu as pltpu

LANE = 128  # lane width: channel padding target


def _round_up(n, m):
    return ((n + m - 1) // m) * m


def _row_tile(m):
    """Row-tile size: large tiles to amortise the per-grid-step overhead, but
    keep >=2 grid steps so the 'parallel' axis can shard across v7x's 2 TCs."""
    if m >= 1024:
        return 512
    if m >= 64:
        return max(16, ((m // 2) // 16) * 16)
    return m  # tiny: single full-extent block (block == array dim is legal)


# ---------------------------------------------------------------------------
# Pallas kernels
# ---------------------------------------------------------------------------
def _conv_mm_kernel(p_ref, w_ref, b_ref, o_ref, *, relu):
    """o = relu?(patches @ w + b); bf16 operands, f32 accumulation."""
    acc = jnp.dot(p_ref[...], w_ref[...], preferred_element_type=jnp.float32)
    acc = acc + b_ref[...]                       # (1, Npad) broadcast over rows
    if relu:
        acc = jnp.maximum(acc, 0.0)
    o_ref[...] = acc.astype(o_ref.dtype)


def _conv_finalize_kernel(p_ref, w_ref, b_ref, ma_ref, out_ref, ma_new_ref, *,
                          bootstrap):
    """Final conv fused with MA update + subtract + channel-wise L2 normalize."""
    acc = jnp.dot(p_ref[...], w_ref[...], preferred_element_type=jnp.float32)
    acc = acc + b_ref[...]
    # First call: MA bootstraps from the features themselves (PyTorch semantics
    # give a ~zero, rounding-noise output on that call; this is intentional).
    ma_old = acc if bootstrap else ma_ref[...]
    ma_new = ma_old * 0.999 + acc * 0.001
    y = acc - ma_new
    norm = jnp.sqrt(jnp.sum(y * y, axis=-1, keepdims=True))   # power=2 norm
    inv = pl.reciprocal(norm + 1e-7, approx=True)             # EUP reciprocal
    out_ref[...] = (y * inv).astype(out_ref.dtype)
    ma_new_ref[...] = ma_new.astype(ma_new_ref.dtype)


# ---------------------------------------------------------------------------
# pallas_call wrappers
# ---------------------------------------------------------------------------
def _matmul_bias_act(patches, w_mat, b_row, relu):
    m, k = patches.shape
    _, n_pad = w_mat.shape
    tm = _row_tile(m)
    return pl.pallas_call(
        functools.partial(_conv_mm_kernel, relu=relu),
        out_shape=jax.ShapeDtypeStruct((m, n_pad), jnp.bfloat16),
        grid=(pl.cdiv(m, tm),),
        in_specs=[
            pl.BlockSpec((tm, k), lambda i: (i, 0)),
            pl.BlockSpec((k, n_pad), lambda i: (0, 0)),
            pl.BlockSpec((1, n_pad), lambda i: (0, 0)),
        ],
        out_specs=pl.BlockSpec((tm, n_pad), lambda i: (i, 0)),
        compiler_params=pltpu.CompilerParams(dimension_semantics=("parallel",)),
    )(patches, w_mat, b_row)


def _matmul_finalize(patches, w_mat, b_row, ma_flat, bootstrap):
    m, k = patches.shape
    _, n_pad = w_mat.shape
    tm = _row_tile(m)
    out, ma_new = pl.pallas_call(
        functools.partial(_conv_finalize_kernel, bootstrap=bootstrap),
        out_shape=(jax.ShapeDtypeStruct((m, n_pad), jnp.float32),
                   jax.ShapeDtypeStruct((m, n_pad), jnp.float32)),
        grid=(pl.cdiv(m, tm),),
        in_specs=[
            pl.BlockSpec((tm, k), lambda i: (i, 0)),
            pl.BlockSpec((k, n_pad), lambda i: (0, 0)),
            pl.BlockSpec((1, n_pad), lambda i: (0, 0)),
            pl.BlockSpec((tm, n_pad), lambda i: (i, 0)),
        ],
        out_specs=(pl.BlockSpec((tm, n_pad), lambda i: (i, 0)),
                   pl.BlockSpec((tm, n_pad), lambda i: (i, 0))),
        compiler_params=pltpu.CompilerParams(dimension_semantics=("parallel",)),
    )(patches, w_mat, b_row, ma_flat)
    return out, ma_new


def _im2col(x_nhwc, kh, kw, stride):
    """Patches (VALID padding), column order = (kh, kw, cin). Single XLA pass
    over a small bf16 activation tensor (glue; heavy math stays in Pallas)."""
    n, h, w, c = x_nhwc.shape
    ho = (h - kh) // stride + 1
    wo = (w - kw) // stride + 1
    cols = [x_nhwc[:, i:i + stride * (ho - 1) + 1:stride,
                   j:j + stride * (wo - 1) + 1:stride, :]
            for i in range(kh) for j in range(kw)]
    patches = jnp.concatenate(cols, axis=-1)           # (n, ho, wo, kh*kw*c)
    return patches.reshape(n * ho * wo, kh * kw * c), n, ho, wo


# ---------------------------------------------------------------------------
# Parameters (mirrors StridedConvF.create_mlp + init_weights('normal'))
# ---------------------------------------------------------------------------
def create_mlp_params(C, H, key, init_gain=0.02):
    n_down = int(np.rint(np.log2(H / 32)))
    params = []
    for _ in range(n_down):
        cout = max(C // 2, 64)
        key, k = jax.random.split(key)
        w = jax.random.normal(k, (3, 3, C, cout), jnp.float32) * init_gain  # HWIO
        b = jnp.zeros((cout,), jnp.float32)
        params.append(dict(w=w, b=b, stride=2, relu=True))
        C = cout
    key, k = jax.random.split(key)
    w = jax.random.normal(k, (3, 3, C, 64), jnp.float32) * init_gain
    b = jnp.zeros((64,), jnp.float32)
    params.append(dict(w=w, b=b, stride=1, relu=False))
    return params


class LayerMeta(NamedTuple):
    stride: int
    relu: bool
    kh: int
    kw: int
    cout_true: int
    cout_pad: int


def prepare_params(params, c_in_raw):
    """Pad Cout (and Cin for non-first layers) to multiples of 128, reshape to
    (K, Cout_pad) matmul form, cast weights to bf16. Bias stays f32."""
    weights, meta = [], []
    cin_true, cin_pad = c_in_raw, c_in_raw       # raw input channels unpadded
    for p in params:
        w = p["w"]
        kh, kw, wc_in, cout_true = w.shape
        assert wc_in == cin_true
        cout_pad = _round_up(cout_true, LANE)
        w_pad = jnp.zeros((kh, kw, cin_pad, cout_pad), jnp.float32)
        w_pad = w_pad.at[:, :, :cin_true, :cout_true].set(w)
        w_mat = w_pad.reshape(kh * kw * cin_pad, cout_pad).astype(jnp.bfloat16)
        b_row = jnp.zeros((1, cout_pad), jnp.float32).at[0, :cout_true].set(p["b"])
        weights.append((w_mat, b_row))
        meta.append(LayerMeta(stride=p["stride"], relu=p["relu"], kh=kh, kw=kw,
                              cout_true=cout_true, cout_pad=cout_pad))
        cin_true, cin_pad = cout_true, cout_pad
    return weights, tuple(meta)


# ---------------------------------------------------------------------------
# StridedConvF forward
# ---------------------------------------------------------------------------
@functools.partial(jax.jit, static_argnames=("meta",))
def strided_conv_f_forward(x_nchw, weights, moving_average, *, meta):
    """Returns (out_nchw f32 with the true channel count,
                new moving-average state: NHWC f32, channel-padded to 128)."""
    x = jnp.transpose(x_nchw, (0, 2, 3, 1)).astype(jnp.bfloat16)   # NCHW -> NHWC
    # hidden layers: conv + bias + ReLU (bf16 activations, 128-padded channels)
    for (w_mat, b_row), m in zip(weights[:-1], meta[:-1]):
        patches, n, ho, wo = _im2col(x, m.kh, m.kw, m.stride)
        y = _matmul_bias_act(patches, w_mat, b_row, m.relu)
        x = y.reshape(n, ho, wo, m.cout_pad)
    # final conv with fused MA update + subtract + L2 normalize
    (w_mat, b_row), m = weights[-1], meta[-1]
    patches, n, ho, wo = _im2col(x, m.kh, m.kw, m.stride)
    rows = n * ho * wo
    if moving_average is None:
        ma_flat = jnp.zeros((rows, m.cout_pad), jnp.float32)   # unused (bootstrap)
        bootstrap = True
    else:
        ma_flat = moving_average.reshape(rows, m.cout_pad)
        bootstrap = False
    out_flat, ma_new_flat = _matmul_finalize(patches, w_mat, b_row, ma_flat,
                                             bootstrap)
    out = jnp.transpose(out_flat.reshape(n, ho, wo, m.cout_pad)[..., :m.cout_true],
                        (0, 3, 1, 2))                          # -> NCHW, true ch
    ma_new = ma_new_flat.reshape(n, ho, wo, m.cout_pad)        # padded NHWC state
    # TODO(synk): use_instance_norm=True branch (F.instance_norm) not implemented;
    #             the PyTorch default (use_instance_norm=False) is reproduced.
    return out, ma_new


if __name__ == "__main__":
    key = jax.random.PRNGKey(0)
    k_x1, k_x2, k_p = jax.random.split(key, 3)

    # H=64 -> n_down = 1: one strided conv + ReLU, then the final 3x3 conv to 64ch.
    x1 = jax.random.normal(k_x1, (2, 4, 64, 64), jnp.float32)
    x2 = jax.random.normal(k_x2, (2, 4, 64, 64), jnp.float32)
    params = create_mlp_params(C=4, H=64, key=k_p)
    weights, meta = prepare_params(params, c_in_raw=4)

    # First call: moving average bootstraps from the features themselves
    # (output is rounding-noise-scale, matching the PyTorch reference).
    out1, ma = strided_conv_f_forward(x1, weights, None, meta=meta)
    # Second call carries the moving-average state -> non-trivial output.
    out2, ma = strided_conv_f_forward(x2, weights, ma, meta=meta)
    jax.block_until_ready((out1, out2, ma))

    assert out1.shape == (2, 64, 29, 29), out1.shape
    assert out2.shape == (2, 64, 29, 29), out2.shape
    assert ma.shape == (2, 29, 29, 128), ma.shape
    assert bool(jnp.all(jnp.isfinite(out1)))
    assert bool(jnp.all(jnp.isfinite(out2)))
    assert bool(jnp.all(jnp.isfinite(ma)))
    # Second-call outputs must be unit-L2-normalized over channels.
    norms = jnp.sqrt(jnp.sum(out2.astype(jnp.float32) ** 2, axis=1))
    assert bool(jnp.all(jnp.abs(norms - 1.0) < 5e-2)), "L2 normalization check failed"
    print("KERNEL_OK")
</pallas_src>

<mosaic_0001>
module attributes {stable_mosaic.version = 11 : i64} {
  func.func @_conv_mm_kernel(%arg0: i32, %arg1: memref<512x36xbf16, #tpu.memory_space<vmem>>, %arg2: memref<36x128xbf16, #tpu.memory_space<vmem>>, %arg3: memref<1x128xf32, #tpu.memory_space<vmem>>, %arg4: memref<512x128xbf16, #tpu.memory_space<vmem>>) attributes {dimension_semantics = [#tpu.dimension_semantics<parallel>], iteration_bounds = array<i64: 4>, scalar_prefetch = 0 : i64, scratch_operands = 0 : i64, tpu.core_type = #tpu.core_type<tc>, window_params = [{transform_indices = @transform_0, window_bounds = array<i64: 512, 36>}, {pipeline_mode = #tpu.pipeline_mode<synchronous>, transform_indices = @transform_1, window_bounds = array<i64: 36, 128>}, {pipeline_mode = #tpu.pipeline_mode<synchronous>, transform_indices = @transform_2, window_bounds = array<i64: 1, 128>}, {transform_indices = @transform_3, window_bounds = array<i64: 512, 128>}]} {
    %c0 = arith.constant 0 : index
    %c0_0 = arith.constant 0 : index
    %0 = vector.load %arg1[%c0, %c0_0] : memref<512x36xbf16, #tpu.memory_space<vmem>>, vector<512x36xbf16>
    %c0_1 = arith.constant 0 : index
    %c0_2 = arith.constant 0 : index
    %1 = vector.load %arg2[%c0_1, %c0_2] : memref<36x128xbf16, #tpu.memory_space<vmem>>, vector<36x128xbf16>
    %cst = arith.constant dense<0.000000e+00> : vector<512x128xf32>
    %2 = tpu.matmul %0, %1, %cst {dimension_numbers = #tpu.dot_dimension_numbers<[1], [0], [0], [1], [0, 0, 1, 1], [], []>} : vector<512x36xbf16>, vector<36x128xbf16>, vector<512x128xf32> -> vector<512x128xf32>
    %c0_3 = arith.constant 0 : index
    %c0_4 = arith.constant 0 : index
    %3 = vector.load %arg3[%c0_3, %c0_4] : memref<1x128xf32, #tpu.memory_space<vmem>>, vector<1x128xf32>
    %4 = vector.broadcast %3 : vector<1x128xf32> to vector<512x128xf32>
    %5 = arith.addf %2, %4 : vector<512x128xf32>
    %cst_5 = arith.constant 0.000000e+00 : f32
    %6 = vector.broadcast %cst_5 : f32 to vector<512x128xf32>
    %7 = arith.maximumf %5, %6 : vector<512x128xf32>
    %8 = arith.truncf %7 : vector<512x128xf32> to vector<512x128xbf16>
    %c0_6 = arith.constant 0 : index
    %c0_7 = arith.constant 0 : index
    %9 = vector.load %arg4[%c0_6, %c0_7] : memref<512x128xbf16, #tpu.memory_space<vmem>>, vector<512x128xbf16>
    tpu.vector_store %arg4[%c0_6, %c0_7], %8 {strides = array<i32>} : memref<512x128xbf16, #tpu.memory_space<vmem>>, vector<512x128xbf16>,
    return
  }
  func.func @transform_0(%arg0: i32) -> (i32, i32) {
    %c0_i32 = arith.constant 0 : i32
    %c0_i32_0 = arith.constant 0 : i32
    return %arg0, %c0_i32 : i32, i32
  }
  func.func @transform_1(%arg0: i32) -> (i32, i32) {
    %c0_i32 = arith.constant 0 : i32
    %c0_i32_0 = arith.constant 0 : i32
    %c0_i32_1 = arith.constant 0 : i32
    return %c0_i32, %c0_i32_0 : i32, i32
  }
  func.func @transform_2(%arg0: i32) -> (i32, i32) {
    %c0_i32 = arith.constant 0 : i32
    %c0_i32_0 = arith.constant 0 : i32
    %c0_i32_1 = arith.constant 0 : i32
    return %c0_i32, %c0_i32_0 : i32, i32
  }
  func.func @transform_3(%arg0: i32) -> (i32, i32) {
    %c0_i32 = arith.constant 0 : i32
    %c0_i32_0 = arith.constant 0 : i32
    return %arg0, %c0_i32 : i32, i32
  }
}

module attributes {stable_mosaic.version = 11 : i64} {
  func.func @_conv_finalize_kernel(%arg0: i32, %arg1: memref<512x1152xbf16, #tpu.memory_space<vmem>>, %arg2: memref<1152x128xbf16, #tpu.memory_space<vmem>>, %arg3: memref<1x128xf32, #tpu.memory_space<vmem>>, %arg4: memref<512x128xf32, #tpu.memory_space<vmem>>, %arg5: memref<512x128xf32, #tpu.memory_space<vmem>>, %arg6: memref<512x128xf32, #tpu.memory_space<vmem>>) attributes {dimension_semantics = [#tpu.dimension_semantics<parallel>], iteration_bounds = array<i64: 4>, scalar_prefetch = 0 : i64, scratch_operands = 0 : i64, tpu.core_type = #tpu.core_type<tc>, window_params = [{transform_indices = @transform_0, window_bounds = array<i64: 512, 1152>}, {pipeline_mode = #tpu.pipeline_mode<synchronous>, transform_indices = @transform_1, window_bounds = array<i64: 1152, 128>}, {pipeline_mode = #tpu.pipeline_mode<synchronous>, transform_indices = @transform_2, window_bounds = array<i64: 1, 128>}, {transform_indices = @transform_3, window_bounds = array<i64: 512, 128>}, {transform_indices = @transform_4, window_bounds = array<i64: 512, 128>}, {transform_indices = @transform_5, window_bounds = array<i64: 512, 128>}]} {
    %c0 = arith.constant 0 : index
    %c0_0 = arith.constant 0 : index
    %0 = vector.load %arg1[%c0, %c0_0] : memref<512x1152xbf16, #tpu.memory_space<vmem>>, vector<512x1152xbf16>
    %c0_1 = arith.constant 0 : index
    %c0_2 = arith.constant 0 : index
    %1 = vector.load %arg2[%c0_1, %c0_2] : memref<1152x128xbf16, #tpu.memory_space<vmem>>, vector<1152x128xbf16>
    %cst = arith.constant dense<0.000000e+00> : vector<512x128xf32>
    %2 = tpu.matmul %0, %1, %cst {dimension_numbers = #tpu.dot_dimension_numbers<[1], [0], [0], [1], [0, 0, 1, 1], [], []>} : vector<512x1152xbf16>, vector<1152x128xbf16>, vector<512x128xf32> -> vector<512x128xf32>
    %c0_3 = arith.constant 0 : index
    %c0_4 = arith.constant 0 : index
    %3 = vector.load %arg3[%c0_3, %c0_4] : memref<1x128xf32, #tpu.memory_space<vmem>>, vector<1x128xf32>
    %4 = vector.broadcast %3 : vector<1x128xf32> to vector<512x128xf32>
    %5 = arith.addf %2, %4 : vector<512x128xf32>
    %cst_5 = arith.constant 9.990000e-01 : f32
    %6 = vector.broadcast %cst_5 : f32 to vector<512x128xf32>
    %7 = arith.mulf %5, %6 : vector<512x128xf32>
    %cst_6 = arith.constant 1.000000e-03 : f32
    %8 = vector.broadcast %cst_6 : f32 to vector<512x128xf32>
    %9 = arith.mulf %5, %8 : vector<512x128xf32>
    %10 = arith.addf %7, %9 : vector<512x128xf32>
    %11 = arith.subf %5, %10 : vector<512x128xf32>
    %12 = arith.mulf %11, %11 : vector<512x128xf32>
    %cst_7 = arith.constant dense<0.000000e+00> : vector<512xf32>
    %13 = vector.multi_reduction <add>, %12, %cst_7 [1] : vector<512x128xf32> to vector<512xf32>
    %14 = vector.shape_cast %13 : vector<512xf32> to vector<512x1xf32>
    %15 = math.sqrt %14 : vector<512x1xf32>
    %cst_8 = arith.constant 1.000000e-07 : f32
    %16 = vector.broadcast %cst_8 : f32 to vector<512x1xf32>
    %17 = arith.addf %15, %16 : vector<512x1xf32>
    %18 = tpu.reciprocal %17 {approx = true} : vector<512x1xf32> -> vector<512x1xf32>
    %19 = vector.broadcast %18 : vector<512x1xf32> to vector<512x128xf32>
    %20 = arith.mulf %11, %19 : vector<512x128xf32>
    %c0_9 = arith.constant 0 : index
    %c0_10 = arith.constant 0 : index
    %21 = vector.load %arg5[%c0_9, %c0_10] : memref<512x128xf32, #tpu.memory_space<vmem>>, vector<512x128xf32>
    tpu.vector_store %arg5[%c0_9, %c0_10], %20 {strides = array<i32>} : memref<512x128xf32, #tpu.memory_space<vmem>>, vector<512x128xf32>,
    %c0_11 = arith.constant 0 : index
    %c0_12 = arith.constant 0 : index
    %22 = vector.load %arg6[%c0_11, %c0_12] : memref<512x128xf32, #tpu.memory_space<vmem>>, vector<512x128xf32>
    tpu.vector_store %arg6[%c0_11, %c0_12], %10 {strides = array<i32>} : memref<512x128xf32, #tpu.memory_space<vmem>>, vector<512x128xf32>,
    return
  }
  func.func @transform_0(%arg0: i32) -> (i32, i32) {
    %c0_i32 = arith.constant 0 : i32
    %c0_i32_0 = arith.constant 0 : i32
    return %arg0, %c0_i32 : i32, i32
  }
  func.func @transform_1(%arg0: i32) -> (i32, i32) {
    %c0_i32 = arith.constant 0 : i32
    %c0_i32_0 = arith.constant 0 : i32
    %c0_i32_1 = arith.constant 0 : i32
    return %c0_i32, %c0_i32_0 : i32, i32
  }
  func.func @transform_2(%arg0: i32) -> (i32, i32) {
    %c0_i32 = arith.constant 0 : i32
    %c0_i32_0 = arith.constant 0 : i32
    %c0_i32_1 = arith.constant 0 : i32
    return %c0_i32, %c0_i32_0 : i32, i32
  }
  func.func @transform_3(%arg0: i32) -> (i32, i32) {
    %c0_i32 = arith.constant 0 : i32
    %c0_i32_0 = arith.constant 0 : i32
    return %arg0, %c0_i32 : i32, i32
  }
  func.func @transform_4(%arg0: i32) -> (i32, i32) {
    %c0_i32 = arith.constant 0 : i32
    %c0_i32_0 = arith.constant 0 : i32
    return %arg0, %c0_i32 : i32, i32
  }
  func.func @transform_5(%arg0: i32) -> (i32, i32) {
    %c0_i32 = arith.constant 0 : i32
    %c0_i32_0 = arith.constant 0 : i32
    return %arg0, %c0_i32 : i32, i32
  }
}

</mosaic_0001>

<bundles_post_ra>
// kernel: strided_conv_f_forward.2
= control target key start
LH: loop header
LB: loop body
LE: loop exit
PB: predicated region body
PF: predicated region fallthrough
CT: control target
= control target key end

     0   :  { %s1869_s12 = smov 0   ;;  %s1871_s13 = smov 0   ;;  %s2227_s0 = inlined_call_operand.vmem [shape: bf16[1922,36], index: 0, kind: input, shape index: {}]   ;;  %s2228_s1 = inlined_call_operand.vmem [shape: bf16[36,128], index: 1, kind: input, shape index: {}]   ;;  %s2229_s2 = inlined_call_operand.vmem [shape: f32[1,128], index: 2, kind: input, shape index: {}]   ;;  %s2230_s3 = inlined_call_operand.vmem [shape: bf16[1922,128], index: 3, kind: output, shape index: {}]  }
   0x1   :  { %s1873_s14 = smov 0  }
   0x2 LB: > { %s1882_s15 = sadd.s32 4294967295, %s1815_s14   ;;  %s1884_s16 = sadd.s32 1, %s1815_s14   ;;  %s1815_s14 = sphi %s1873_s14, %s2239_s14   ;;  %s1811_s13 = sphi %s1871_s13, %s2238_s13   ;;  %s1807_s12 = sphi %s1869_s12, %s2237_s12  }
   0x3   : > { %s85_s17 = ssub.s32 %s1815_s14, %s1884_s16  ;;  %s88_s18 = sadd.s32 1, %s1811_s13 }
   0x4   : > { %p86_p0 = scmp.eq.s32.totalorder %s85_s17, 0  ;;  %p98_p1 = scmp.ne.s32.totalorder %s1811_s13, %s1807_s12 }
   0x5   : > { %p99_p2 = scmp.eq.s32.totalorder %s1882_s15, 3  ;;  %p1246_p3 = scmp.ge.s32.totalorder %s1815_s14, 1 }
   0x6   : > { %s1892_s19 = scalar_select %p86_p0, %s1811_s13, %s88_s18  }
   0x7   : > { %p1894_p4 = por %p99_p2, %p98_p1  ;;  %p146_p5 = scmp.lt.s32.totalorder %s1815_s14, 5 }
   0x9   : > { %p147_p6 = pnand %p1246_p3, %p146_p5 }
   0xa   : > { %s1902_s23 = sshll.u32 (!%p147_p6), %s1882_s15, 6  ;;  %s170_s8 = sand.u32 (!%p147_p6), 1, %s1807_s12  }
   0xb   : > { %150 = sbr.rel (%p147_p6) target bundleno = 358 (0x166), region = 32  ;;  %p178_p7 = scmp.lt.s32.totalorder (!%p147_p6), %s1902_s23, 240 }
   0xc   : > { %s1247_s9 = sshll.u32 (!%p147_p6), %s170_s8, 8 }
   0xd   : > { %s1993_s10 = scalar_lea.vmem (!%p147_p6), [#allocation2], %s1247_s9  }
  0x10   : > { %v261_v0 = vld [vmem:[%s2228_s1 + $0x10] sm:$0x3]  ;;  %vm538_vm0 = vcmask 1041408   ;;  %s179_s24 = scalar_select %p178_p7, %s1902_s23, 240  ;;  %v1468_v4 = vld [vmem:[%s2228_s1 + $0x8] sm:$0xff]  ;;  %v1467_v5 = vld [vmem:[%s2228_s1] sm:$0xff] }
  0x11   : > { %v435_v1 = vunpack.c.l.b16 %v261_v0  ;;  %vm441_vm1 = vcmask 293888   ;;  %v1984_v40 = vld [vmem:[%s2229_s2] ss:$0 sm:$0xff]  ;;  %s911_s11 = ssub.s32 (%p1894_p4), 241, %s1902_s23  ;;  %s1469_s12 = sshll.u32 (%p1894_p4), %s1882_s15, 8 }
  0x12   : > { %s1249_s27 = sshll.u32 %s179_s24, 2  ;;  %p912_p8 = scmp.lt.s32.totalorder (%p1894_p4), %s911_s11, 64 }
  0x13   : > { %v438_v2 = vpack.c.b16 %v435_v1, %v435_v1  ;;  %s1915_s5 = scalar_lea.vmem %s2227_s0, %s1249_s27  ;;  %s2092_s18 = scalar_lea.vmem (%p1894_p4), %s2230_s3, %s1469_s12  }
  0x14   : > { %v1435_v6 = vld [vmem:[%s1915_s5] sm:$0xff]  ;;  %v1436_v10 = vld [vmem:[%s1915_s5 + $0x8] sm:$0xff]  ;;  %v1437_v14 = vld [vmem:[%s1915_s5 + $0x10] sm:$0xff] }
  0x15   : > { %v540_v3 = vsel %vm538_vm0, %v438_v2, 0  ;;  %v1443_v7 = vld [vmem:[%s1915_s5 + $0x40] sm:$0xff]  ;;  %v1444_v11 = vld [vmem:[%s1915_s5 + $0x48] sm:$0xff]  ;;  %v1445_v15 = vld [vmem:[%s1915_s5 + $0x50] sm:$0xff] }
  0x16   : > { %547 = vmatpush.bf16.msra.mxu0 %v540_v3  ;;  %1663 = vmatpush.bf16.msra.mxu1 %v540_v3  ;;  %v1451_v8 = vld [vmem:[%s1915_s5 + $0x80] sm:$0xff]  ;;  %v1452_v12 = vld [vmem:[%s1915_s5 + $0x88] sm:$0xff]  ;;  %v1453_v16 = vld [vmem:[%s1915_s5 + $0x90] sm:$0xff] }
  0x17   : > { %1664 = vmatpush.bf16.msra.mxu2 %v540_v3  ;;  %1665 = vmatpush.bf16.msra.mxu3 %v540_v3  ;;  %v1459_v9 = vld [vmem:[%s1915_s5 + $0xc0] sm:$0xff]  ;;  %v1460_v13 = vld [vmem:[%s1915_s5 + $0xc8] sm:$0xff]  ;;  %v1461_v17 = vld [vmem:[%s1915_s5 + $0xd0] sm:$0xff] }
  0x18   : > { %v1438_v18 = vld [vmem:[%s1915_s5 + $0x18] sm:$0xff]  ;;  %v1439_v22 = vld [vmem:[%s1915_s5 + $0x20] sm:$0xff]  ;;  %v1440_v26 = vld [vmem:[%s1915_s5 + $0x28] sm:$0xff] }
  0x19   : > { %v1446_v19 = vld [vmem:[%s1915_s5 + $0x58] sm:$0xff]  ;;  %v1447_v23 = vld [vmem:[%s1915_s5 + $0x60] sm:$0xff]  ;;  %v1448_v27 = vld [vmem:[%s1915_s5 + $0x68] sm:$0xff] }
  0x1a   : > { %548 = vmatpush.bf16.msra.mxu0 %v1468_v4  ;;  %1666 = vmatpush.bf16.msra.mxu1 %v1468_v4  ;;  %v1454_v20 = vld [vmem:[%s1915_s5 + $0x98] sm:$0xff]  ;;  %v1455_v24 = vld [vmem:[%s1915_s5 + $0xa0] sm:$0xff]  ;;  %v1456_v28 = vld [vmem:[%s1915_s5 + $0xa8] sm:$0xff] }
  0x1b   : > { %1667 = vmatpush.bf16.msra.mxu2 %v1468_v4  ;;  %1668 = vmatpush.bf16.msra.mxu3 %v1468_v4  ;;  %v1462_v21 = vld [vmem:[%s1915_s5 + $0xd8] sm:$0xff]  ;;  %v1463_v25 = vld [vmem:[%s1915_s5 + $0xe0] sm:$0xff]  ;;  %v1464_v29 = vld [vmem:[%s1915_s5 + $0xe8] sm:$0xff] }
  0x1c   : > { %v1441_v30 = vld [vmem:[%s1915_s5 + $0x30] sm:$0xff]  ;;  %v1442_v34 = vld [vmem:[%s1915_s5 + $0x38] sm:$0xff] }
  0x1d   : > { %v1449_v31 = vld [vmem:[%s1915_s5 + $0x70] sm:$0xff]  ;;  %v1450_v35 = vld [vmem:[%s1915_s5 + $0x78] sm:$0xff] }
  0x1e   : > { %549 = vmatpush.bf16.msra.mxu0 %v1467_v5  ;;  %1669 = vmatpush.bf16.msra.mxu1 %v1467_v5  ;;  %v1457_v32 = vld [vmem:[%s1915_s5 + $0xb0] sm:$0xff]  ;;  %v1458_v36 = vld [vmem:[%s1915_s5 + $0xb8] sm:$0xff] }
  0x1f   : > { %1670 = vmatpush.bf16.msra.mxu2 %v1467_v5  ;;  %1671 = vmatpush.bf16.msra.mxu3 %v1467_v5  ;;  %v1465_v33 = vld [vmem:[%s1915_s5 + $0xf0] sm:$0xff]  ;;  %v1466_v37 = vld [vmem:[%s1915_s5 + $0xf8] sm:$0xff] }
  0x21   : > { %1386 = vmatmul.msk.bf16.vlgmr.msra.gmra.mxu0 %vm441_vm1, %v1435_v6  ;;  %1394 = vmatmul.msk.bf16.vlgmr.msra.gmra.mxu1 %vm441_vm1, %v1443_v7 }
  0x22   : > { %1402 = vmatmul.msk.bf16.vlgmr.msra.gmra.mxu2 %vm441_vm1, %v1451_v8  ;;  %1410 = vmatmul.msk.bf16.vlgmr.msra.gmra.mxu3 %vm441_vm1, %v1459_v9 }
  0x31   : > { %1387 = vmatmul.msk.bf16.gmra.mxu0 %vm441_vm1, %v1436_v10  ;;  %1395 = vmatmul.msk.bf16.gmra.mxu1 %vm441_vm1, %v1444_v11 }
  0x32   : > { %1403 = vmatmul.msk.bf16.gmra.mxu2 %vm441_vm1, %v1452_v12  ;;  %1411 = vmatmul.msk.bf16.gmra.mxu3 %vm441_vm1, %v1460_v13 }
  0x41   : > { %1388 = vmatmul.msk.bf16.gmra.mxu0 %vm441_vm1, %v1437_v14  ;;  %1396 = vmatmul.msk.bf16.gmra.mxu1 %vm441_vm1, %v1445_v15 }
  0x42   : > { %1404 = vmatmul.msk.bf16.gmra.mxu2 %vm441_vm1, %v1453_v16  ;;  %1412 = vmatmul.msk.bf16.gmra.mxu3 %vm441_vm1, %v1461_v17 }
  0x51   : > { %1389 = vmatmul.msk.bf16.gmra.mxu0 %vm441_vm1, %v1438_v18  ;;  %1397 = vmatmul.msk.bf16.gmra.mxu1 %vm441_vm1, %v1446_v19 }
  0x52   : > { %1405 = vmatmul.msk.bf16.gmra.mxu2 %vm441_vm1, %v1454_v20  ;;  %1413 = vmatmul.msk.bf16.gmra.mxu3 %vm441_vm1, %v1462_v21 }
  0x61   : > { %1390 = vmatmul.msk.bf16.gmra.mxu0 %vm441_vm1, %v1439_v22  ;;  %1398 = vmatmul.msk.bf16.gmra.mxu1 %vm441_vm1, %v1447_v23 }
  0x62   : > { %1406 = vmatmul.msk.bf16.gmra.mxu2 %vm441_vm1, %v1455_v24  ;;  %1414 = vmatmul.msk.bf16.gmra.mxu3 %vm441_vm1, %v1463_v25 }
  0x71   : > { %1391 = vmatmul.msk.bf16.gmra.mxu0 %vm441_vm1, %v1440_v26  ;;  %1399 = vmatmul.msk.bf16.gmra.mxu1 %vm441_vm1, %v1448_v27 }
  0x72   : > { %1407 = vmatmul.msk.bf16.gmra.mxu2 %vm441_vm1, %v1456_v28  ;;  %1415 = vmatmul.msk.bf16.gmra.mxu3 %vm441_vm1, %v1464_v29 }
  0x81   : > { %1392 = vmatmul.msk.bf16.gmra.mxu0 %vm441_vm1, %v1441_v30  ;;  %1400 = vmatmul.msk.bf16.gmra.mxu1 %vm441_vm1, %v1449_v31 }
  0x82   : > { %1408 = vmatmul.msk.bf16.gmra.mxu2 %vm441_vm1, %v1457_v32  ;;  %1416 = vmatmul.msk.bf16.gmra.mxu3 %vm441_vm1, %v1465_v33 }
  0x91   : > { %1393 = vmatmul.msk.bf16.gmra.mxu0 %vm441_vm1, %v1442_v34  ;;  %1401 = vmatmul.msk.bf16.gmra.mxu1 %vm441_vm1, %v1450_v35 }
  0x92   : > { %1409 = vmatmul.msk.bf16.gmra.mxu2 %vm441_vm1, %v1458_v36  ;;  %1417 = vmatmul.msk.bf16.gmra.mxu3 %vm441_vm1, %v1466_v37 }
  0x9e   : > { %v551_v38 = vpop.f32.mrf.mxu0  ;;  %v591_v39 = vpop.f32.mrf.mxu1 }
  0x9f   : > { %v552_v41 = vadd.f32 %v1984_v40, %v551_v38  ;;  %v592_v42 = vadd.f32 %v1984_v40, %v591_v39 }
  0xa1   : > { %v711_v49 = vmax.f32 %v552_v41, 0.0  ;;  %v727_v50 = vmax.f32 %v592_v42, 0.0 }
  0xa5   : > { %v631_v43 = vpop.f32.mrf.mxu2  ;;  %v671_v44 = vpop.f32.mrf.mxu3 }
  0xa6   : > { %v553_v45 = vpop.f32.mrf.mxu0  ;;  %v593_v46 = vpop.f32.mrf.mxu1  ;;  %v632_v55 = vadd.f32 %v1984_v40, %v631_v43  ;;  %v672_v56 = vadd.f32 %v1984_v40, %v671_v44 }
  0xa7   : > { %v554_v47 = vadd.f32 %v1984_v40, %v553_v45  ;;  %v594_v48 = vadd.f32 %v1984_v40, %v593_v46 }
  0xa8   : > { %v743_v63 = vmax.f32 %v632_v55, 0.0  ;;  %v759_v0 = vmax.f32 %v672_v56, 0.0 }
  0xa9   : > { %v712_v51 = vmax.f32 %v554_v47, 0.0  ;;  %v728_v52 = vmax.f32 %v594_v48, 0.0 }
  0xab   : > { %v1475_v53 = vpack.c.bf16 %v712_v51, %v711_v49  ;;  %v1515_v54 = vpack.c.bf16 %v728_v52, %v727_v50 }
  0xad   : > { %1476 = vst [vmem:[%s1993_s10] sm:$0xff] %v1475_v53   ;;  %v633_v57 = vpop.f32.mrf.mxu2  ;;  %v673_v58 = vpop.f32.mrf.mxu3 }
  0xae   : > { %1639 = vst [vmem:[%s1993_s10 + $0x40] sm:$0xff] %v1515_v54   ;;  %v634_v59 = vadd.f32 %v1984_v40, %v633_v57  ;;  %v674_v60 = vadd.f32 %v1984_v40, %v673_v58  ;;  %v556_v61 = vpop.f32.mrf.mxu0  ;;  %v596_v62 = vpop.f32.mrf.mxu1 }
  0xaf   : > { %v557_v5 = vadd.f32 %v1984_v40, %v556_v61  ;;  %v597_v6 = vadd.f32 %v1984_v40, %v596_v62 }
  0xb0   : > { %v744_v1 = vmax.f32 %v634_v59, 0.0  ;;  %v760_v2 = vmax.f32 %v674_v60, 0.0 }
  0xb1   : > { %v713_v13 = vmax.f32 %v557_v5, 0.0  ;;  %v729_v14 = vmax.f32 %v597_v6, 0.0 }
  0xb2   : > { %v1555_v3 = vpack.c.bf16 %v744_v1, %v743_v63  ;;  %v1595_v4 = vpack.c.bf16 %v760_v2, %v759_v0 }
  0xb4   : > { %1647 = vst [vmem:[%s1993_s10 + $0x80] sm:$0xff] %v1555_v3  }
  0xb5   : > { %1655 = vst [vmem:[%s1993_s10 + $0xc0] sm:$0xff] %v1595_v4   ;;  %v636_v7 = vpop.f32.mrf.mxu2  ;;  %v676_v8 = vpop.f32.mrf.mxu3 }
  0xb6   : > { %v558_v9 = vpop.f32.mrf.mxu0  ;;  %v598_v10 = vpop.f32.mrf.mxu1  ;;  %v637_v19 = vadd.f32 %v1984_v40, %v636_v7  ;;  %v677_v20 = vadd.f32 %v1984_v40, %v676_v8 }
  0xb7   : > { %v559_v11 = vadd.f32 %v1984_v40, %v558_v9  ;;  %v599_v12 = vadd.f32 %v1984_v40, %v598_v10 }
  0xb8   : > { %v745_v27 = vmax.f32 %v637_v19, 0.0  ;;  %v761_v28 = vmax.f32 %v677_v20, 0.0 }
  0xb9   : > { %v714_v15 = vmax.f32 %v559_v11, 0.0  ;;  %v730_v16 = vmax.f32 %v599_v12, 0.0 }
  0xbb   : > { %v1480_v17 = vpack.c.bf16 %v714_v15, %v713_v13  ;;  %v1520_v18 = vpack.c.bf16 %v730_v16, %v729_v14 }
  0xbd   : > { %1632 = vst [vmem:[%s1993_s10 + $0x8] sm:$0xff] %v1480_v17   ;;  %v638_v21 = vpop.f32.mrf.mxu2  ;;  %v678_v22 = vpop.f32.mrf.mxu3 }
  0xbe   : > { %1640 = vst [vmem:[%s1993_s10 + $0x48] sm:$0xff] %v1520_v18   ;;  %v639_v23 = vadd.f32 %v1984_v40, %v638_v21  ;;  %v679_v24 = vadd.f32 %v1984_v40, %v678_v22  ;;  %v561_v25 = vpop.f32.mrf.mxu0  ;;  %v601_v26 = vpop.f32.mrf.mxu1 }
  0xbf   : > { %v562_v33 = vadd.f32 %v1984_v40, %v561_v25  ;;  %v602_v34 = vadd.f32 %v1984_v40, %v601_v26 }
  0xc0   : > { %v746_v29 = vmax.f32 %v639_v23, 0.0  ;;  %v762_v30 = vmax.f32 %v679_v24, 0.0 }
  0xc1   : > { %v715_v42 = vmax.f32 %v562_v33, 0.0  ;;  %v731_v43 = vmax.f32 %v602_v34, 0.0 }
  0xc2   : > { %v1560_v31 = vpack.c.bf16 %v746_v29, %v745_v27  ;;  %v1600_v32 = vpack.c.bf16 %v762_v30, %v761_v28 }
  0xc4   : > { %1648 = vst [vmem:[%s1993_s10 + $0x88] sm:$0xff] %v1560_v31  }
  0xc5   : > { %1656 = vst [vmem:[%s1993_s10 + $0xc8] sm:$0xff] %v1600_v32   ;;  %v641_v35 = vpop.f32.mrf.mxu2  ;;  %v681_v36 = vpop.f32.mrf.mxu3 }
  0xc6   : > { %v563_v37 = vpop.f32.mrf.mxu0  ;;  %v603_v38 = vpop.f32.mrf.mxu1  ;;  %v642_v48 = vadd.f32 %v1984_v40, %v641_v35  ;;  %v682_v49 = vadd.f32 %v1984_v40, %v681_v36 }
  0xc7   : > { %v564_v39 = vadd.f32 %v1984_v40, %v563_v37  ;;  %v604_v41 = vadd.f32 %v1984_v40, %v603_v38 }
  0xc8   : > { %v747_v56 = vmax.f32 %v642_v48, 0.0  ;;  %v763_v57 = vmax.f32 %v682_v49, 0.0 }
  0xc9   : > { %v716_v44 = vmax.f32 %v564_v39, 0.0  ;;  %v732_v45 = vmax.f32 %v604_v41, 0.0 }
  0xcb   : > { %v1485_v46 = vpack.c.bf16 %v716_v44, %v715_v42  ;;  %v1525_v47 = vpack.c.bf16 %v732_v45, %v731_v43 }
  0xcd   : > { %1633 = vst [vmem:[%s1993_s10 + $0x10] sm:$0xff] %v1485_v46   ;;  %v643_v50 = vpop.f32.mrf.mxu2  ;;  %v683_v51 = vpop.f32.mrf.mxu3 }
  0xce   : > { %1641 = vst [vmem:[%s1993_s10 + $0x50] sm:$0xff] %v1525_v47   ;;  %v644_v52 = vadd.f32 %v1984_v40, %v643_v50  ;;  %v684_v53 = vadd.f32 %v1984_v40, %v683_v51  ;;  %v566_v54 = vpop.f32.mrf.mxu0  ;;  %v606_v55 = vpop.f32.mrf.mxu1 }
  0xcf   : > { %v567_v62 = vadd.f32 %v1984_v40, %v566_v54  ;;  %v607_v63 = vadd.f32 %v1984_v40, %v606_v55 }
  0xd0   : > { %v748_v58 = vmax.f32 %v644_v52, 0.0  ;;  %v764_v59 = vmax.f32 %v684_v53, 0.0 }
  0xd1   : > { %v717_v6 = vmax.f32 %v567_v62, 0.0  ;;  %v733_v7 = vmax.f32 %v607_v63, 0.0 }
  0xd2   : > { %v1565_v60 = vpack.c.bf16 %v748_v58, %v747_v56  ;;  %v1605_v61 = vpack.c.bf16 %v764_v59, %v763_v57 }
  0xd4   : > { %1649 = vst [vmem:[%s1993_s10 + $0x90] sm:$0xff] %v1565_v60  }
  0xd5   : > { %1657 = vst [vmem:[%s1993_s10 + $0xd0] sm:$0xff] %v1605_v61   ;;  %v646_v0 = vpop.f32.mrf.mxu2  ;;  %v686_v1 = vpop.f32.mrf.mxu3 }
  0xd6   : > { %v568_v2 = vpop.f32.mrf.mxu0  ;;  %v608_v3 = vpop.f32.mrf.mxu1  ;;  %v647_v12 = vadd.f32 %v1984_v40, %v646_v0  ;;  %v687_v13 = vadd.f32 %v1984_v40, %v686_v1 }
  0xd7   : > { %v569_v4 = vadd.f32 %v1984_v40, %v568_v2  ;;  %v609_v5 = vadd.f32 %v1984_v40, %v608_v3 }
  0xd8   : > { %v749_v20 = vmax.f32 %v647_v12, 0.0  ;;  %v765_v21 = vmax.f32 %v687_v13, 0.0 }
  0xd9   : > { %v718_v8 = vmax.f32 %v569_v4, 0.0  ;;  %v734_v9 = vmax.f32 %v609_v5, 0.0 }
  0xdb   : > { %v1490_v10 = vpack.c.bf16 %v718_v8, %v717_v6  ;;  %v1530_v11 = vpack.c.bf16 %v734_v9, %v733_v7 }
  0xdd   : > { %1634 = vst [vmem:[%s1993_s10 + $0x18] sm:$0xff] %v1490_v10   ;;  %v648_v14 = vpop.f32.mrf.mxu2  ;;  %v688_v15 = vpop.f32.mrf.mxu3 }
  0xde   : > { %1642 = vst [vmem:[%s1993_s10 + $0x58] sm:$0xff] %v1530_v11   ;;  %v649_v16 = vadd.f32 %v1984_v40, %v648_v14  ;;  %v689_v17 = vadd.f32 %v1984_v40, %v688_v15  ;;  %v571_v18 = vpop.f32.mrf.mxu0  ;;  %v611_v19 = vpop.f32.mrf.mxu1 }
  0xdf   : > { %v572_v26 = vadd.f32 %v1984_v40, %v571_v18  ;;  %v612_v27 = vadd.f32 %v1984_v40, %v611_v19 }
  0xe0   : > { %v750_v22 = vmax.f32 %v649_v16, 0.0  ;;  %v766_v23 = vmax.f32 %v689_v17, 0.0 }
  0xe1   : > { %v719_v34 = vmax.f32 %v572_v26, 0.0  ;;  %v735_v35 = vmax.f32 %v612_v27, 0.0 }
  0xe2   : > { %v1570_v24 = vpack.c.bf16 %v750_v22, %v749_v20  ;;  %v1610_v25 = vpack.c.bf16 %v766_v23, %v765_v21 }
  0xe4   : > { %1650 = vst [vmem:[%s1993_s10 + $0x98] sm:$0xff] %v1570_v24  }
  0xe5   : > { %1658 = vst [vmem:[%s1993_s10 + $0xd8] sm:$0xff] %v1610_v25   ;;  %v651_v28 = vpop.f32.mrf.mxu2  ;;  %v691_v29 = vpop.f32.mrf.mxu3 }
  0xe6   : > { %v573_v30 = vpop.f32.mrf.mxu0  ;;  %v613_v31 = vpop.f32.mrf.mxu1  ;;  %v652_v41 = vadd.f32 %v1984_v40, %v651_v28  ;;  %v692_v42 = vadd.f32 %v1984_v40, %v691_v29 }
  0xe7   : > { %v574_v32 = vadd.f32 %v1984_v40, %v573_v30  ;;  %v614_v33 = vadd.f32 %v1984_v40, %v613_v31 }
  0xe8   : > { %v751_v49 = vmax.f32 %v652_v41, 0.0  ;;  %v767_v50 = vmax.f32 %v692_v42, 0.0 }
  0xe9   : > { %v720_v36 = vmax.f32 %v574_v32, 0.0  ;;  %v736_v37 = vmax.f32 %v614_v33, 0.0 }
  0xeb   : > { %v1495_v38 = vpack.c.bf16 %v720_v36, %v719_v34  ;;  %v1535_v39 = vpack.c.bf16 %v736_v37, %v735_v35 }
  0xed   : > { %1635 = vst [vmem:[%s1993_s10 + $0x20] sm:$0xff] %v1495_v38   ;;  %v653_v43 = vpop.f32.mrf.mxu2  ;;  %v693_v44 = vpop.f32.mrf.mxu3 }
  0xee   : > { %1643 = vst [vmem:[%s1993_s10 + $0x60] sm:$0xff] %v1535_v39   ;;  %v654_v45 = vadd.f32 %v1984_v40, %v653_v43  ;;  %v694_v46 = vadd.f32 %v1984_v40, %v693_v44  ;;  %v576_v47 = vpop.f32.mrf.mxu0  ;;  %v616_v48 = vpop.f32.mrf.mxu1 }
  0xef   : > { %v577_v55 = vadd.f32 %v1984_v40, %v576_v47  ;;  %v617_v56 = vadd.f32 %v1984_v40, %v616_v48 }
  0xf0   : > { %v752_v51 = vmax.f32 %v654_v45, 0.0  ;;  %v768_v52 = vmax.f32 %v694_v46, 0.0 }
  0xf1   : > { %v721_v63 = vmax.f32 %v577_v55, 0.0  ;;  %v737_v0 = vmax.f32 %v617_v56, 0.0 }
  0xf2   : > { %v1575_v53 = vpack.c.bf16 %v752_v51, %v751_v49  ;;  %v1615_v54 = vpack.c.bf16 %v768_v52, %v767_v50 }
  0xf4   : > { %1651 = vst [vmem:[%s1993_s10 + $0xa0] sm:$0xff] %v1575_v53  }
  0xf5   : > { %1659 = vst [vmem:[%s1993_s10 + $0xe0] sm:$0xff] %v1615_v54   ;;  %v656_v57 = vpop.f32.mrf.mxu2  ;;  %v696_v58 = vpop.f32.mrf.mxu3 }
  0xf6   : > { %v578_v59 = vpop.f32.mrf.mxu0  ;;  %v618_v60 = vpop.f32.mrf.mxu1  ;;  %v657_v5 = vadd.f32 %v1984_v40, %v656_v57  ;;  %v697_v6 = vadd.f32 %v1984_v40, %v696_v58 }
  0xf7   : > { %v579_v61 = vadd.f32 %v1984_v40, %v578_v59  ;;  %v619_v62 = vadd.f32 %v1984_v40, %v618_v60 }
  0xf8   : > { %v753_v13 = vmax.f32 %v657_v5, 0.0  ;;  %v769_v14 = vmax.f32 %v697_v6, 0.0 }
  0xf9   : > { %v722_v1 = vmax.f32 %v579_v61, 0.0  ;;  %v738_v2 = vmax.f32 %v619_v62, 0.0 }
  0xfb   : > { %v1500_v3 = vpack.c.bf16 %v722_v1, %v721_v63  ;;  %v1540_v4 = vpack.c.bf16 %v738_v2, %v737_v0 }
  0xfd   : > { %1636 = vst [vmem:[%s1993_s10 + $0x28] sm:$0xff] %v1500_v3   ;;  %v658_v7 = vpop.f32.mrf.mxu2  ;;  %v698_v8 = vpop.f32.mrf.mxu3 }
  0xfe   : > { %1644 = vst [vmem:[%s1993_s10 + $0x68] sm:$0xff] %v1540_v4   ;;  %v659_v9 = vadd.f32 %v1984_v40, %v658_v7  ;;  %v699_v10 = vadd.f32 %v1984_v40, %v698_v8  ;;  %v581_v11 = vpop.f32.mrf.mxu0  ;;  %v621_v12 = vpop.f32.mrf.mxu1 }
  0xff   : > { %v582_v19 = vadd.f32 %v1984_v40, %v581_v11  ;;  %v622_v20 = vadd.f32 %v1984_v40, %v621_v12 }
 0x100   : > { %v754_v15 = vmax.f32 %v659_v9, 0.0  ;;  %v770_v16 = vmax.f32 %v699_v10, 0.0 }
 0x101   : > { %v723_v27 = vmax.f32 %v582_v19, 0.0  ;;  %v739_v28 = vmax.f32 %v622_v20, 0.0 }
 0x102   : > { %v1580_v17 = vpack.c.bf16 %v754_v15, %v753_v13  ;;  %v1620_v18 = vpack.c.bf16 %v770_v16, %v769_v14 }
 0x104   : > { %1652 = vst [vmem:[%s1993_s10 + $0xa8] sm:$0xff] %v1580_v17  }
 0x105   : > { %1660 = vst [vmem:[%s1993_s10 + $0xe8] sm:$0xff] %v1620_v18   ;;  %v661_v21 = vpop.f32.mrf.mxu2  ;;  %v701_v22 = vpop.f32.mrf.mxu3 }
 0x106   : > { %v583_v23 = vpop.f32.mrf.mxu0  ;;  %v623_v24 = vpop.f32.mrf.mxu1  ;;  %v662_v33 = vadd.f32 %v1984_v40, %v661_v21  ;;  %v702_v34 = vadd.f32 %v1984_v40, %v701_v22 }
 0x107   : > { %v584_v25 = vadd.f32 %v1984_v40, %v583_v23  ;;  %v624_v26 = vadd.f32 %v1984_v40, %v623_v24 }
 0x108   : > { %v755_v42 = vmax.f32 %v662_v33, 0.0  ;;  %v771_v43 = vmax.f32 %v702_v34, 0.0 }
 0x109   : > { %v724_v29 = vmax.f32 %v584_v25, 0.0  ;;  %v740_v30 = vmax.f32 %v624_v26, 0.0 }
 0x10b   : > { %v1505_v31 = vpack.c.bf16 %v724_v29, %v723_v27  ;;  %v1545_v32 = vpack.c.bf16 %v740_v30, %v739_v28 }
 0x10d   : > { %1637 = vst [vmem:[%s1993_s10 + $0x30] sm:$0xff] %v1505_v31   ;;  %v663_v35 = vpop.f32.mrf.mxu2  ;;  %v703_v36 = vpop.f32.mrf.mxu3 }
 0x10e   : > { %1645 = vst [vmem:[%s1993_s10 + $0x70] sm:$0xff] %v1545_v32   ;;  %v664_v37 = vadd.f32 %v1984_v40, %v663_v35  ;;  %v704_v38 = vadd.f32 %v1984_v40, %v703_v36  ;;  %v586_v39 = vpop.f32.mrf.mxu0  ;;  %v626_v41 = vpop.f32.mrf.mxu1 }
 0x10f   : > { %v587_v48 = vadd.f32 %v1984_v40, %v586_v39  ;;  %v627_v49 = vadd.f32 %v1984_v40, %v626_v41 }
 0x110   : > { %v756_v44 = vmax.f32 %v664_v37, 0.0  ;;  %v772_v45 = vmax.f32 %v704_v38, 0.0 }
 0x111   : > { %v725_v56 = vmax.f32 %v587_v48, 0.0  ;;  %v741_v57 = vmax.f32 %v627_v49, 0.0 }
 0x112   : > { %v1585_v46 = vpack.c.bf16 %v756_v44, %v755_v42  ;;  %v1625_v47 = vpack.c.bf16 %v772_v45, %v771_v43 }
 0x114   : > { %1653 = vst [vmem:[%s1993_s10 + $0xb0] sm:$0xff] %v1585_v46  }
 0x115   : > { %1661 = vst [vmem:[%s1993_s10 + $0xf0] sm:$0xff] %v1625_v47   ;;  %v666_v50 = vpop.f32.mrf.mxu2  ;;  %v706_v51 = vpop.f32.mrf.mxu3 }
 0x116   : > { %v588_v52 = vpop.f32.mrf.mxu0  ;;  %v628_v53 = vpop.f32.mrf.mxu1  ;;  %v667_v62 = vadd.f32 %v1984_v40, %v666_v50  ;;  %v707_v63 = vadd.f32 %v1984_v40, %v706_v51 }
 0x117   : > { %v589_v54 = vadd.f32 %v1984_v40, %v588_v52  ;;  %v629_v55 = vadd.f32 %v1984_v40, %v628_v53 }
 0x118   : > { %v757_v4 = vmax.f32 %v667_v62, 0.0  ;;  %v773_v5 = vmax.f32 %v707_v63, 0.0 }
 0x119   : > { %v726_v58 = vmax.f32 %v589_v54, 0.0  ;;  %v742_v59 = vmax.f32 %v629_v55, 0.0 }
 0x11b   : > { %v1510_v60 = vpack.c.bf16 %v726_v58, %v725_v56  ;;  %v1550_v61 = vpack.c.bf16 %v742_v59, %v741_v57 }
 0x11d   : > { %1638 = vst [vmem:[%s1993_s10 + $0x38] sm:$0xff] %v1510_v60   ;;  %v668_v0 = vpop.f32.mrf.mxu2  ;;  %v708_v1 = vpop.f32.mrf.mxu3 }
 0x11e   : > { %1646 = vst [vmem:[%s1993_s10 + $0x78] sm:$0xff] %v1550_v61   ;;  %v669_v2 = vadd.f32 %v1984_v40, %v668_v0  ;;  %v709_v3 = vadd.f32 %v1984_v40, %v708_v1 }
 0x120   : > { %v758_v6 = vmax.f32 %v669_v2, 0.0  ;;  %v774_v7 = vmax.f32 %v709_v3, 0.0 }
 0x121   : > { %909 = sbr.rel (!%p1894_p4) target bundleno = 358 (0x166), region = 36 }
 0x122   : > { %v1590_v8 = vpack.c.bf16 %v758_v6, %v757_v4  ;;  %v1630_v9 = vpack.c.bf16 %v774_v7, %v773_v5 }
 0x124   : > { %1654 = vst [vmem:[%s1993_s10 + $0xb8] sm:$0xff] %v1590_v8  }
 0x125   : > { %1662 = vst [vmem:[%s1993_s10 + $0xf8] sm:$0xff] %v1630_v9  }
 0x126   : > { %s2241_s11 = smov (!%p912_p8, %s911_s11), 64 }
 0x127   : > { %s1420_s21 = sshll.u32 %s2241_s11, 2 }
 0x128   : > { %p1423_p9 = scmp.eq.s32.totalorder %s1420_s21, 0 }
 0x129   : > { %s2098_s22 = sshrl.u32 (!%p1423_p9), %s2241_s11, 5 }
 0x12a   : > { %920 = sbr.rel (%p1423_p9) target bundleno = 358 (0x166), region = 40  ;;  %p1424_p10 = scmp.le.s32.totalorder (!%p1423_p9), %s2098_s22, 0 }
 0x12f   : > { %1199 = sbr.rel (%p1424_p10) target bundleno = 341 (0x155), region = 112  ;;  %s2232_s15 = smov (!%p1424_p10), %s2092_s18 }
 0x130   : > { %s2233_s20 = smov (!%p1424_p10), %s1993_s10  ;;  %s2107_s23 = smov (!%p1424_p10), 0  }
 0x131   : > { %s2109_s24 = smov (!%p1424_p10), 0  }
 0x134 LB: >> { %v937_v40 = vld [vmem:[%s1823_s20] sm:$0xf]  ;;  %v939_v10 = vld [vmem:[%s1823_s20 + $0x4] sm:$0xf]  ;;  %v941_v11 = vld [vmem:[%s1823_s20 + $0x8] sm:$0xf]  ;;  %s1831_s24 = sphi %s2109_s24, %s931_s24   ;;  %s1827_s23 = sphi %s2107_s23, %s2236_s23   ;;  %s1823_s20 = sphi %s2233_s20, %s2235_s20   ;;  %s1819_s15 = sphi %s2232_s15, %s2234_s15  }
 0x135   : >> { %938 = vst [vmem:[%s1819_s15] sm:$0xf] %v937_v40  ;;  %v943_v12 = vld [vmem:[%s1823_s20 + $0xc] sm:$0xf]  ;;  %v945_v13 = vld [vmem:[%s1823_s20 + $0x10] sm:$0xf]  ;;  %s1001_s25 = sadd.s32 1, %s1827_s23 }
 0x136   : >> { %940 = vst [vmem:[%s1819_s15 + $0x4] sm:$0xf] %v939_v10  ;;  %v947_v14 = vld [vmem:[%s1823_s20 + $0x14] sm:$0xf]  ;;  %v949_v15 = vld [vmem:[%s1823_s20 + $0x18] sm:$0xf]  ;;  %p1002_p11 = scmp.ge.s32.totalorder %s1001_s25, %s2098_s22 }
 0x137   : >> { %942 = vst [vmem:[%s1819_s15 + $0x8] sm:$0xf] %v941_v11  ;;  %v951_v16 = vld [vmem:[%s1823_s20 + $0x1c] sm:$0xf]  ;;  %v953_v17 = vld [vmem:[%s1823_s20 + $0x20] sm:$0xf] }
 0x138   : >> { %944 = vst [vmem:[%s1819_s15 + $0xc] sm:$0xf] %v943_v12  ;;  %v955_v18 = vld [vmem:[%s1823_s20 + $0x24] sm:$0xf]  ;;  %v957_v19 = vld [vmem:[%s1823_s20 + $0x28] sm:$0xf] }
 0x139   : >> { %946 = vst [vmem:[%s1819_s15 + $0x10] sm:$0xf] %v945_v13  ;;  %v959_v20 = vld [vmem:[%s1823_s20 + $0x2c] sm:$0xf]  ;;  %v961_v21 = vld [vmem:[%s1823_s20 + $0x30] sm:$0xf] }
 0x13a   : >> { %948 = vst [vmem:[%s1819_s15 + $0x14] sm:$0xf] %v947_v14  ;;  %v963_v22 = vld [vmem:[%s1823_s20 + $0x34] sm:$0xf]  ;;  %v965_v23 = vld [vmem:[%s1823_s20 + $0x38] sm:$0xf] }
 0x13b   : >> { %950 = vst [vmem:[%s1819_s15 + $0x18] sm:$0xf] %v949_v15  ;;  %v967_v24 = vld [vmem:[%s1823_s20 + $0x3c] sm:$0xf]  ;;  %v969_v25 = vld [vmem:[%s1823_s20 + $0x40] sm:$0xf] }
 0x13c   : >> { %952 = vst [vmem:[%s1819_s15 + $0x1c] sm:$0xf] %v951_v16  ;;  %v971_v26 = vld [vmem:[%s1823_s20 + $0x44] sm:$0xf]  ;;  %s2243_s25 = smov (%p1002_p11, %s1001_s25), 0  ;;  %s931_s24 = sadd.s32 1, %s1831_s24  }
 0x13d   : >> { %954 = vst [vmem:[%s1819_s15 + $0x20] sm:$0xf] %v953_v17  ;;  %v973_v27 = vld [vmem:[%s1823_s20 + $0x48] sm:$0xf]  ;;  %v975_v28 = vld [vmem:[%s1823_s20 + $0x4c] sm:$0xf]  ;;  %p930_p12 = scmp.ge.s32.totalorder %s931_s24, %s2098_s22  ;;  %s2236_s23 = smov %s2243_s25 }
 0x13e   : >> { %956 = vst [vmem:[%s1819_s15 + $0x24] sm:$0xf] %v955_v18  ;;  %s1425_s26 = sshll.u32 %s2243_s25, 7  ;;  %v977_v29 = vld [vmem:[%s1823_s20 + $0x50] sm:$0xf] }
 0x13f   : >> { %958 = vst [vmem:[%s1819_s15 + $0x28] sm:$0xf] %v957_v19  ;;  %s2168_s27 = scalar_lea.vmem %s1993_s10, %s1425_s26 [#allocation2]   ;;  %s1007_s28 = scalar_lea.vmem %s2092_s18, %s1425_s26   ;;  %v979_v30 = vld [vmem:[%s1823_s20 + $0x54] sm:$0xf]  ;;  %v981_v31 = vld [vmem:[%s1823_s20 + $0x58] sm:$0xf] }
 0x140   : >> { %960 = vst [vmem:[%s1819_s15 + $0x2c] sm:$0xf] %v959_v20  ;;  %v983_v32 = vld [vmem:[%s1823_s20 + $0x5c] sm:$0xf]  ;;  %v985_v33 = vld [vmem:[%s1823_s20 + $0x60] sm:$0xf] }
 0x141   : >> { %962 = vst [vmem:[%s1819_s15 + $0x30] sm:$0xf] %v961_v21  ;;  %v987_v34 = vld [vmem:[%s1823_s20 + $0x64] sm:$0xf]  ;;  %v989_v35 = vld [vmem:[%s1823_s20 + $0x68] sm:$0xf] }
 0x142   : >> { %964 = vst [vmem:[%s1819_s15 + $0x34] sm:$0xf] %v963_v22  ;;  %v991_v36 = vld [vmem:[%s1823_s20 + $0x6c] sm:$0xf]  ;;  %v993_v37 = vld [vmem:[%s1823_s20 + $0x70] sm:$0xf] }
 0x143   : >> { %966 = vst [vmem:[%s1819_s15 + $0x38] sm:$0xf] %v965_v23  ;;  %v995_v38 = vld [vmem:[%s1823_s20 + $0x74] sm:$0xf]  ;;  %v997_v39 = vld [vmem:[%s1823_s20 + $0x78] sm:$0xf] }
 0x144   : >> { %968 = vst [vmem:[%s1819_s15 + $0x3c] sm:$0xf] %v967_v24  ;;  %v999_v41 = vld [vmem:[%s1823_s20 + $0x7c] sm:$0xf]  ;;  %s2235_s20 = smov %s2168_s27 }
 0x145   : >> { %970 = vst [vmem:[%s1819_s15 + $0x40] sm:$0xf] %v969_v25 }
 0x146   : >> { %972 = vst [vmem:[%s1819_s15 + $0x44] sm:$0xf] %v971_v26 }
 0x147   : >> { %974 = vst [vmem:[%s1819_s15 + $0x48] sm:$0xf] %v973_v27 }
 0x148   : >> { %976 = vst [vmem:[%s1819_s15 + $0x4c] sm:$0xf] %v975_v28 }
 0x149   : >> { %978 = vst [vmem:[%s1819_s15 + $0x50] sm:$0xf] %v977_v29 }
 0x14a   : >> { %980 = vst [vmem:[%s1819_s15 + $0x54] sm:$0xf] %v979_v30 }
 0x14b   : >> { %982 = vst [vmem:[%s1819_s15 + $0x58] sm:$0xf] %v981_v31 }
 0x14c   : >> { %984 = vst [vmem:[%s1819_s15 + $0x5c] sm:$0xf] %v983_v32 }
 0x14d   : >> { %986 = vst [vmem:[%s1819_s15 + $0x60] sm:$0xf] %v985_v33 }
 0x14e   : >> { %988 = vst [vmem:[%s1819_s15 + $0x64] sm:$0xf] %v987_v34 }
 0x14f   : >> { %990 = vst [vmem:[%s1819_s15 + $0x68] sm:$0xf] %v989_v35 }
 0x150   : >> { %992 = vst [vmem:[%s1819_s15 + $0x6c] sm:$0xf] %v991_v36  ;;  %933 = sbr.rel (!%p930_p12) target bundleno = 308 (0x134), region = 118 }
 0x151   : >> { %994 = vst [vmem:[%s1819_s15 + $0x70] sm:$0xf] %v993_v37 }
 0x152   : >> { %996 = vst [vmem:[%s1819_s15 + $0x74] sm:$0xf] %v995_v38 }
 0x153   : >> { %998 = vst [vmem:[%s1819_s15 + $0x78] sm:$0xf] %v997_v39 }
 0x154   : >> { %1000 = vst [vmem:[%s1819_s15 + $0x7c] sm:$0xf] %v999_v41  ;;  %s2234_s15 = smov %s1007_s28 }
 0x155 PF: > { %s2209_s29 = sand.u32 31, %s2241_s11   ;;  %s1470_s30 = sshll.u32 %s2098_s22, 7 }
 0x156   : > { %s1012_s4 = scalar_lea.vmem %s1993_s10, %s1470_s30 [#allocation2]   ;;  %s1014_s5 = scalar_lea.vmem %s2092_s18, %s1470_s30  }
 0x157   : > { %p1430_p13 = scmp.le.s32.totalorder %s2209_s29, 0 }
 0x158   : > { %s1833_s6 = smov (!%p1430_p13), %s1014_s5   ;;  %s1837_s7 = smov (!%p1430_p13), %s1012_s4  }
 0x159   : > { %1213 = sbr.rel (%p1430_p13) target bundleno = 358 (0x166), region = 123  ;;  %s1841_s8 = smov (!%p1430_p13), 0  }
 0x15a   : > { %s1845_s9 = smov (!%p1430_p13), 0  }
 0x15e LB: >> { %v1024_v42 = vld [vmem:[%s1839_s7] sm:$0xf]  ;;  %s1026_s11 = sadd.s32 1, %s1843_s8  ;;  %s1018_s9 = sadd.s32 1, %s1847_s9   ;;  %s1847_s9 = sphi %s1845_s9, %s1018_s9   ;;  %s1843_s8 = sphi %s1841_s8, %s1842_s8   ;;  %s1839_s7 = sphi %s1837_s7, %s1031_s7   ;;  %s1835_s6 = sphi %s1833_s6, %s1032_s6  }
 0x15f   : >> { %1025 = vst [vmem:[%s1835_s6] sm:$0xf] %v1024_v42  ;;  %p1027_p0 = scmp.ge.s32.totalorder %s1026_s11, %s2209_s29  ;;  %p1017_p1 = scmp.ge.s32.totalorder %s1018_s9, %s2209_s29 }
 0x161   : >> { %s2245_s11 = smov (%p1027_p0, %s1026_s11), 0  ;;  %1020 = sbr.rel (!%p1017_p1) target bundleno = 350 (0x15e), region = 129 }
 0x162   : >> { %s1431_s10 = sshll.u32 %s2245_s11, 2  ;;  %s1842_s8 = smov %s2245_s11  }
 0x163   : >> { %s1031_s7 = scalar_lea.vmem %s1012_s4, %s1431_s10 [#allocation2]   ;;  %s1032_s6 = scalar_lea.vmem %s1014_s5, %s1431_s10  }
 0x166 PF: > { %p10_p2 = scmp.ge.s32.totalorder %s1884_s16, 6   ;;  %s2237_s12 = smov %s1811_s13 }
 0x167   : > { %s2238_s13 = smov %s1892_s19  ;;  %s2239_s14 = smov %s1884_s16 }
 0x168   :  { %12 = sbr.rel (!%p10_p2) target bundleno = 2 (0x2), region = 140 }

// kernel: strided_conv_f_forward.3
= control target key start
LH: loop header
LB: loop body
LE: loop exit
PB: predicated region body
PF: predicated region fallthrough
CT: control target
= control target key end

     0   :  { %s8870_s18 = smov 0   ;;  %s8872_s19 = smov 0   ;;  %s11329_s0 = inlined_call_operand.vmem [shape: bf16[1682,1152], index: 0, kind: input, shape index: {}]   ;;  %s11330_s1 = inlined_call_operand.vmem [shape: bf16[1152,128], index: 1, kind: input, shape index: {}]   ;;  %s11331_s2 = inlined_call_operand.vmem [shape: f32[1,128], index: 2, kind: input, shape index: {}]   ;;  %s11332_s3 = inlined_call_operand.vmem [shape: f32[1682,128], index: 3, kind: input, shape index: {}]   ;;  %s11333_s4 = inlined_call_operand.vmem [shape: f32[1682,128], index: 4, kind: output, shape index: {0}]   ;;  %s11334_s5 = inlined_call_operand.vmem [shape: f32[1682,128], index: 5, kind: output, shape index: {1}]  }
   0x1   :  { %s8874_s20 = smov 0  }
   0x2 LB: > { %s8883_s3 = sadd.s32 4294967295, %s8774_s20   ;;  %s8885_s21 = sadd.s32 1, %s8774_s20   ;;  %s8774_s20 = sphi %s8874_s20, %s11461_s20   ;;  %s8770_s19 = sphi %s8872_s19, %s11460_s19   ;;  %s8766_s18 = sphi %s8870_s18, %s11459_s18  }
   0x3   : > { %s114_s22 = ssub.s32 %s8774_s20, %s8885_s21  ;;  %s117_s23 = sadd.s32 1, %s8770_s19 }
   0x4   : > { %p115_p0 = scmp.eq.s32.totalorder %s114_s22, 0  ;;  %p127_p1 = scmp.ne.s32.totalorder %s8770_s19, %s8766_s18 }
   0x5   : > { %p128_p2 = scmp.eq.s32.totalorder %s8883_s3, 3  ;;  %p6409_p3 = scmp.ge.s32.totalorder %s8774_s20, 1 }
   0x6   : > { %s8893_s24 = scalar_select %p115_p0, %s8770_s19, %s117_s23  }
   0x7   : > { %p8895_p4 = por %p128_p2, %p127_p1  ;;  %p221_p5 = scmp.lt.s32.totalorder %s8774_s20, 5 }
   0x9   : > { %p222_p6 = pnand %p6409_p3, %p221_p5 }
   0xb   : > { %225 = sbr.rel (%p222_p6) target bundleno = 1621 (0x655), region = 36 }
  0x10   : > { %v8181_v0 = vld [vmem:[%s11330_s1 + $0x38] sm:$0xff]  ;;  %v8180_v1 = vld [vmem:[%s11330_s1 + $0x30] sm:$0xff]  ;;  %v8179_v2 = vld [vmem:[%s11330_s1 + $0x28] sm:$0xff]  ;;  %s8909_s7 = sshll.u32 %s8883_s3, 6 }
  0x11   : > { %8252 = vmatpush.bf16.msra.mxu1 %v8181_v0  ;;  %8253 = vmatpush.bf16.msra.mxu2 %v8181_v0  ;;  %v8178_v3 = vld [vmem:[%s11330_s1 + $0x20] sm:$0xff]  ;;  %p273_p7 = scmp.lt.s32.totalorder %s8909_s7, 210  ;;  %v8177_v4 = vld [vmem:[%s11330_s1 + $0x18] sm:$0xff]  ;;  %v8176_v5 = vld [vmem:[%s11330_s1 + $0x10] sm:$0xff] }
  0x12   : > { %8254 = vmatpush.bf16.msra.mxu3 %v8181_v0  ;;  %2680 = vmatpush.bf16.msra.mxu0 %v8181_v0  ;;  %v8175_v6 = vld [vmem:[%s11330_s1 + $0x8] sm:$0xff]  ;;  %v8174_v7 = vld [vmem:[%s11330_s1] sm:$0xff]  ;;  %v8197_v16 = vld [vmem:[%s11330_s1 + $0xb8] sm:$0xff] }
  0x13   : > { %s274_s12 = scalar_select %p273_p7, %s8909_s7, 210  ;;  %v8205_v17 = vld [vmem:[%s11330_s1 + $0xf8] sm:$0xff]  ;;  %v8196_v24 = vld [vmem:[%s11330_s1 + $0xb0] sm:$0xff]  ;;  %v8195_v28 = vld [vmem:[%s11330_s1 + $0xa8] sm:$0xff] }
  0x14   : > { %v8189_v22 = vld [vmem:[%s11330_s1 + $0x78] sm:$0xff]  ;;  %v8204_v25 = vld [vmem:[%s11330_s1 + $0xf0] sm:$0xff]  ;;  %v8203_v29 = vld [vmem:[%s11330_s1 + $0xe8] sm:$0xff] }
  0x15   : > { %8255 = vmatpush.bf16.msra.mxu1 %v8180_v1  ;;  %8256 = vmatpush.bf16.msra.mxu2 %v8180_v1  ;;  %s8276_s15 = smul.u32 36, %s274_s12  ;;  %v8213_v23 = vld [vmem:[%s11330_s1 + $0x138] sm:$0xff]  ;;  %v8188_v26 = vld [vmem:[%s11330_s1 + $0x70] sm:$0xff]  ;;  %v8187_v30 = vld [vmem:[%s11330_s1 + $0x68] sm:$0xff]  ;;  %s258_s12 = sand.u32 1, %s8766_s18  }
  0x16   : > { %8257 = vmatpush.bf16.msra.mxu3 %v8180_v1  ;;  %2681 = vmatpush.bf16.msra.mxu0 %v8180_v1  ;;  %v8212_v27 = vld [vmem:[%s11330_s1 + $0x130] sm:$0xff]  ;;  %v8211_v31 = vld [vmem:[%s11330_s1 + $0x128] sm:$0xff]  ;;  %v8194_v44 = vld [vmem:[%s11330_s1 + $0xa0] sm:$0xff]  ;;  %s9919_s13 = sshll.u32 %s258_s12, 9 }
  0x17   : > { %s8928_s23 = scalar_lea.vmem %s11329_s0, %s8276_s15  ;;  %v8202_v45 = vld [vmem:[%s11330_s1 + $0xe0] sm:$0xff]  ;;  %v8193_v60 = vld [vmem:[%s11330_s1 + $0x98] sm:$0xff]  ;;  %s9932_s18 = scalar_lea.vmem [#allocation3], %s9919_s13  }
  0x18   : > { %v6704_v8 = vld [vmem:[%s8928_s23 + $0x240] sm:$0xf]  ;;  %v7962_v9 = vld [vmem:[%s8928_s23 + $0x260] sm:$0xf0]  ;;  %v6740_v32 = vld [vmem:[%s8928_s23 + $0x288] sm:$0xf] }
  0x19   : > { %8258 = vmatpush.bf16.msra.mxu1 %v8179_v2  ;;  %8259 = vmatpush.bf16.msra.mxu2 %v8179_v2  ;;  %v6992_v10 = vld [vmem:[%s8928_s23 + $0x480] sm:$0xf]  ;;  %v8034_v11 = vld [vmem:[%s8928_s23 + $0x4a0] sm:$0xf0]  ;;  %v6705_v18 = vor.u32 %v7962_v9, %v6704_v8  ;;  %v7971_v33 = vld [vmem:[%s8928_s23 + $0x2a8] sm:$0xf0] }
  0x1a   : > { %8260 = vmatpush.bf16.msra.mxu3 %v8179_v2  ;;  %2682 = vmatpush.bf16.msra.mxu0 %v8179_v2  ;;  %v7280_v12 = vld [vmem:[%s8928_s23 + $0x6c0] sm:$0xf]  ;;  %v8106_v13 = vld [vmem:[%s8928_s23 + $0x6e0] sm:$0xf0]  ;;  %v6993_v19 = vor.u32 %v8034_v11, %v6992_v10  ;;  %v7028_v34 = vld [vmem:[%s8928_s23 + $0x4c8] sm:$0xf]  ;;  %v6741_v40 = vor.u32 %v7971_v33, %v6740_v32 }
  0x1b   : > { %v6416_v14 = vld [vmem:[%s8928_s23] sm:$0xf]  ;;  %v7890_v15 = vld [vmem:[%s8928_s23 + $0x20] sm:$0xf0]  ;;  %v7281_v20 = vor.u32 %v8106_v13, %v7280_v12  ;;  %v8043_v35 = vld [vmem:[%s8928_s23 + $0x4e8] sm:$0xf0] }
  0x1c   : > { %v6417_v21 = vor.u32 %v7890_v15, %v6416_v14  ;;  %v7316_v36 = vld [vmem:[%s8928_s23 + $0x708] sm:$0xf]  ;;  %v8115_v37 = vld [vmem:[%s8928_s23 + $0x728] sm:$0xf0]  ;;  %v7029_v41 = vor.u32 %v8043_v35, %v7028_v34  ;;  %v8186_v46 = vld [vmem:[%s11330_s1 + $0x60] sm:$0xff]  ;;  %s10148_s14 = scalar_lea.vmem [#allocation2], %s9919_s13  }
  0x1d   : > { %8261 = vmatpush.bf16.msra.mxu1 %v8178_v3  ;;  %8262 = vmatpush.bf16.msra.mxu2 %v8178_v3  ;;  %v6452_v38 = vld [vmem:[%s8928_s23 + $0x48] sm:$0xf]  ;;  %v7899_v39 = vld [vmem:[%s8928_s23 + $0x68] sm:$0xf0]  ;;  %v7317_v42 = vor.u32 %v8115_v37, %v7316_v36  ;;  %v8210_v47 = vld [vmem:[%s11330_s1 + $0x120] sm:$0xff]  ;;  %s8246_s15 = sshll.u32 (%p8895_p4), %s8883_s3, 9 }
  0x1e   : > { %8263 = vmatpush.bf16.msra.mxu3 %v8178_v3  ;;  %2683 = vmatpush.bf16.msra.mxu0 %v8178_v3  ;;  %v6453_v43 = vor.u32 %v7899_v39, %v6452_v38  ;;  %v6776_v48 = vld [vmem:[%s8928_s23 + $0x2d0] sm:$0xf]  ;;  %v7980_v49 = vld [vmem:[%s8928_s23 + $0x2f0] sm:$0xf0]  ;;  %v8201_v61 = vld [vmem:[%s11330_s1 + $0xd8] sm:$0xff]  ;;  %s11062_s20 = scalar_lea.vmem (%p8895_p4), %s11333_s4, %s8246_s15  }
  0x1f   : > { %v7064_v50 = vld [vmem:[%s8928_s23 + $0x510] sm:$0xf]  ;;  %v8052_v51 = vld [vmem:[%s8928_s23 + $0x530] sm:$0xf0]  ;;  %v6777_v56 = vor.u32 %v7980_v49, %v6776_v48  ;;  %v8185_v62 = vld [vmem:[%s11330_s1 + $0x58] sm:$0xff] }
  0x20   : > { %v7352_v52 = vld [vmem:[%s8928_s23 + $0x750] sm:$0xf]  ;;  %v8124_v53 = vld [vmem:[%s8928_s23 + $0x770] sm:$0xf0]  ;;  %v7065_v57 = vor.u32 %v8052_v51, %v7064_v50  ;;  %v8209_v63 = vld [vmem:[%s11330_s1 + $0x118] sm:$0xff] }
  0x21   : > { %8264 = vmatpush.bf16.msra.mxu1 %v8177_v4  ;;  %8265 = vmatpush.bf16.msra.mxu2 %v8177_v4  ;;  %v6488_v54 = vld [vmem:[%s8928_s23 + $0x90] sm:$0xf]  ;;  %v7908_v55 = vld [vmem:[%s8928_s23 + $0xb0] sm:$0xf0]  ;;  %v7353_v58 = vor.u32 %v8124_v53, %v7352_v52  ;;  %v6812_v0 = vld [vmem:[%s8928_s23 + $0x318] sm:$0xf] }
  0x22   : > { %8266 = vmatpush.bf16.msra.mxu3 %v8177_v4  ;;  %2684 = vmatpush.bf16.msra.mxu0 %v8177_v4  ;;  %v6489_v59 = vor.u32 %v7908_v55, %v6488_v54  ;;  %v7989_v1 = vld [vmem:[%s8928_s23 + $0x338] sm:$0xf0]  ;;  %v7100_v2 = vld [vmem:[%s8928_s23 + $0x558] sm:$0xf]  ;;  %v8192_v12 = vld [vmem:[%s11330_s1 + $0x90] sm:$0xff] }
  0x23   : > { %v8061_v3 = vld [vmem:[%s8928_s23 + $0x578] sm:$0xf0]  ;;  %v7388_v4 = vld [vmem:[%s8928_s23 + $0x798] sm:$0xf]  ;;  %v6813_v8 = vor.u32 %v7989_v1, %v6812_v0  ;;  %v8200_v13 = vld [vmem:[%s11330_s1 + $0xd0] sm:$0xff] }
  0x24   : > { %v7101_v9 = vor.u32 %v8061_v3, %v7100_v2  ;;  %v8184_v14 = vld [vmem:[%s11330_s1 + $0x50] sm:$0xff]  ;;  %v6884_v32 = vld [vmem:[%s8928_s23 + $0x3a8] sm:$0xf]  ;;  %v8007_v33 = vld [vmem:[%s8928_s23 + $0x3c8] sm:$0xf0] }
  0x25   : > { %8267 = vmatpush.bf16.msra.mxu1 %v8176_v5  ;;  %8268 = vmatpush.bf16.msra.mxu2 %v8176_v5  ;;  %v8208_v15 = vld [vmem:[%s11330_s1 + $0x110] sm:$0xff]  ;;  %v7172_v34 = vld [vmem:[%s8928_s23 + $0x5e8] sm:$0xf]  ;;  %v8079_v35 = vld [vmem:[%s8928_s23 + $0x608] sm:$0xf0] }
  0x26   : > { %8269 = vmatpush.bf16.msra.mxu3 %v8176_v5  ;;  %2685 = vmatpush.bf16.msra.mxu0 %v8176_v5  ;;  %v8133_v5 = vld [vmem:[%s8928_s23 + $0x7b8] sm:$0xf0]  ;;  %v7460_v36 = vld [vmem:[%s8928_s23 + $0x828] sm:$0xf]  ;;  %v8151_v37 = vld [vmem:[%s8928_s23 + $0x848] sm:$0xf0] }
  0x27   : > { %v7389_v10 = vor.u32 %v8133_v5, %v7388_v4  ;;  %v6596_v38 = vld [vmem:[%s8928_s23 + $0x168] sm:$0xf]  ;;  %v7935_v39 = vld [vmem:[%s8928_s23 + $0x188] sm:$0xf0]  ;;  %v6920_v48 = vld [vmem:[%s8928_s23 + $0x3f0] sm:$0xf] }
  0x28   : > { %v8016_v49 = vld [vmem:[%s8928_s23 + $0x410] sm:$0xf0]  ;;  %v7208_v50 = vld [vmem:[%s8928_s23 + $0x630] sm:$0xf]  ;;  %v6956_v0 = vld [vmem:[%s8928_s23 + $0x438] sm:$0xf] }
  0x29   : > { %8270 = vmatpush.bf16.msra.mxu1 %v8175_v6  ;;  %8271 = vmatpush.bf16.msra.mxu2 %v8175_v6  ;;  %v8088_v51 = vld [vmem:[%s8928_s23 + $0x650] sm:$0xf0]  ;;  %v7496_v52 = vld [vmem:[%s8928_s23 + $0x870] sm:$0xf]  ;;  %v8025_v1 = vld [vmem:[%s8928_s23 + $0x458] sm:$0xf0] }
  0x2a   : > { %8272 = vmatpush.bf16.msra.mxu3 %v8175_v6  ;;  %2686 = vmatpush.bf16.msra.mxu0 %v8175_v6  ;;  %v6524_v6 = vld [vmem:[%s8928_s23 + $0xd8] sm:$0xf]  ;;  %v8160_v53 = vld [vmem:[%s8928_s23 + $0x890] sm:$0xf0]  ;;  %v6632_v54 = vld [vmem:[%s8928_s23 + $0x1b0] sm:$0xf] }
  0x2b   : > { %v7944_v55 = vld [vmem:[%s8928_s23 + $0x1d0] sm:$0xf0]  ;;  %v7244_v2 = vld [vmem:[%s8928_s23 + $0x678] sm:$0xf]  ;;  %v8097_v3 = vld [vmem:[%s8928_s23 + $0x698] sm:$0xf0] }
  0x2c   : > { %v7532_v4 = vld [vmem:[%s8928_s23 + $0x8b8] sm:$0xf]  ;;  %v8169_v5 = vld [vmem:[%s8928_s23 + $0x8d8] sm:$0xf0] }
  0x2d   : > { %8273 = vmatpush.bf16.msra.mxu1 %v8174_v7  ;;  %8274 = vmatpush.bf16.msra.mxu2 %v8174_v7 }
  0x2e   : > { %8275 = vmatpush.bf16.msra.mxu3 %v8174_v7  ;;  %2687 = vmatpush.bf16.msra.mxu0 %v8174_v7  ;;  %v7917_v7 = vld [vmem:[%s8928_s23 + $0xf8] sm:$0xf0] }
  0x2f   : > { %v6525_v11 = vor.u32 %v7917_v7, %v6524_v6  ;;  %v6668_v6 = vld [vmem:[%s8928_s23 + $0x1f8] sm:$0xf]  ;;  %v7953_v7 = vld [vmem:[%s8928_s23 + $0x218] sm:$0xf0] }
  0x30   : > { %2728 = vmatmul.bf16.vlgmr.msra.gmra.mxu1 %v6705_v18  ;;  %2768 = vmatmul.bf16.vlgmr.msra.gmra.mxu2 %v6993_v19  ;;  %v7136_v18 = vld [vmem:[%s8928_s23 + $0x5a0] sm:$0xf]  ;;  %v8070_v19 = vld [vmem:[%s8928_s23 + $0x5c0] sm:$0xf0] }
  0x31   : > { %3018 = vmatpush.bf16.msrb.mxu2 %v8197_v16  ;;  %2808 = vmatmul.bf16.vlgmr.msra.gmra.mxu3 %v7281_v20  ;;  %v6848_v16 = vld [vmem:[%s8928_s23 + $0x360] sm:$0xf] }
  0x32   : > { %3187 = vmatpush.bf16.msrb.mxu3 %v8205_v17  ;;  %2688 = vmatmul.bf16.vlgmr.msra.gmra.mxu0 %v6417_v21  ;;  %v7998_v17 = vld [vmem:[%s8928_s23 + $0x380] sm:$0xf0]  ;;  %v7424_v20 = vld [vmem:[%s8928_s23 + $0x7e0] sm:$0xf] }
  0x33   : > { %2849 = vmatpush.bf16.msrb.mxu1 %v8189_v22  ;;  %3356 = vmatpush.bf16.msrb.mxu0 %v8213_v23  ;;  %v8142_v21 = vld [vmem:[%s8928_s23 + $0x800] sm:$0xf0]  ;;  %v6560_v22 = vld [vmem:[%s8928_s23 + $0x120] sm:$0xf] }
  0x34   : > { %v7926_v23 = vld [vmem:[%s8928_s23 + $0x140] sm:$0xf0] }
  0x35   : > { %3019 = vmatpush.bf16.msrb.mxu2 %v8196_v24  ;;  %v6849_v24 = vor.u32 %v7998_v17, %v6848_v16  ;;  %v7887_v16 = vld [vmem:[%s8928_s23 + $0xc] sm:$0xf]  ;;  %v6426_v17 = vld [vmem:[%s8928_s23 + $0x2c] sm:$0xf0] }
  0x36   : > { %3188 = vmatpush.bf16.msrb.mxu3 %v8204_v25  ;;  %v7137_v25 = vor.u32 %v8070_v19, %v7136_v18  ;;  %v6432_v18 = vld [vmem:[%s8928_s23 + $0x10] sm:$0xf]  ;;  %v7892_v19 = vld [vmem:[%s8928_s23 + $0x30] sm:$0xf0] }
  0x37   : > { %2850 = vmatpush.bf16.msrb.mxu1 %v8188_v26  ;;  %3357 = vmatpush.bf16.msrb.mxu0 %v8212_v27  ;;  %v7425_v26 = vor.u32 %v8142_v21, %v7424_v20  ;;  %v6561_v27 = vor.u32 %v7926_v23, %v6560_v22  ;;  %v6429_v23 = vor.u32 %v7887_v16, %v6426_v17  ;;  %v6540_v16 = vld [vmem:[%s8928_s23 + $0xe8] sm:$0xf]  ;;  %v7919_v17 = vld [vmem:[%s8928_s23 + $0x108] sm:$0xf0] }
  0x39   : > { %3020 = vmatpush.bf16.msrb.mxu2 %v8195_v28  ;;  %v8191_v28 = vld [vmem:[%s11330_s1 + $0x88] sm:$0xff] }
  0x3a   : > { %3189 = vmatpush.bf16.msrb.mxu3 %v8203_v29  ;;  %v8199_v29 = vld [vmem:[%s11330_s1 + $0xc8] sm:$0xff] }
  0x3b   : > { %2851 = vmatpush.bf16.msrb.mxu1 %v8187_v30  ;;  %3358 = vmatpush.bf16.msrb.mxu0 %v8211_v31  ;;  %v8183_v30 = vld [vmem:[%s11330_s1 + $0x48] sm:$0xff] }
  0x3c   : > { %v8207_v31 = vld [vmem:[%s11330_s1 + $0x108] sm:$0xff] }
  0x3d   : > { %3021 = vmatpush.bf16.msrb.mxu2 %v8194_v44  ;;  %v8190_v44 = vld [vmem:[%s11330_s1 + $0x80] sm:$0xff] }
  0x3e   : > { %3190 = vmatpush.bf16.msrb.mxu3 %v8202_v45  ;;  %v8198_v45 = vld [vmem:[%s11330_s1 + $0xc0] sm:$0xff] }
  0x3f   : > { %2852 = vmatpush.bf16.msrb.mxu1 %v8186_v46  ;;  %3359 = vmatpush.bf16.msrb.mxu0 %v8210_v47  ;;  %v8182_v46 = vld [vmem:[%s11330_s1 + $0x40] sm:$0xff] }
  0x40   : > { %2733 = vmatmul.bf16.gmra.mxu1 %v6741_v40  ;;  %2773 = vmatmul.bf16.gmra.mxu2 %v7029_v41  ;;  %v6885_v40 = vor.u32 %v8007_v33, %v6884_v32  ;;  %v7173_v41 = vor.u32 %v8079_v35, %v7172_v34  ;;  %v8206_v47 = vld [vmem:[%s11330_s1 + $0x100] sm:$0xff]  ;;  %v6460_v32 = vld [vmem:[%s8928_s23 + $0x50] sm:$0xf]  ;;  %v7900_v33 = vld [vmem:[%s8928_s23 + $0x70] sm:$0xf0] }
  0x41   : > { %2813 = vmatmul.bf16.gmra.mxu3 %v7317_v42  ;;  %3022 = vmatpush.bf16.msrb.mxu2 %v8193_v60  ;;  %v7461_v42 = vor.u32 %v8151_v37, %v7460_v36  ;;  %v8229_v60 = vld [vmem:[%s11330_s1 + $0x1b8] sm:$0xff]  ;;  %v7896_v34 = vld [vmem:[%s8928_s23 + $0x54] sm:$0xf] }
  0x42   : > { %2693 = vmatmul.bf16.gmra.mxu0 %v6453_v43  ;;  %3191 = vmatpush.bf16.msrb.mxu3 %v8201_v61  ;;  %v6597_v43 = vor.u32 %v7935_v39, %v6596_v38  ;;  %v8237_v61 = vld [vmem:[%s11330_s1 + $0x1f8] sm:$0xff] }
  0x43   : > { %2853 = vmatpush.bf16.msrb.mxu1 %v8185_v62  ;;  %3360 = vmatpush.bf16.msrb.mxu0 %v8209_v63  ;;  %v8221_v62 = vld [vmem:[%s11330_s1 + $0x178] sm:$0xff] }
  0x44   : > { %v8245_v63 = vld [vmem:[%s11330_s1 + $0x238] sm:$0xff] }
  0x45   : > { %3023 = vmatpush.bf16.msrb.mxu2 %v8192_v12  ;;  %v7886_v12 = vld [vmem:[%s8928_s23 + $0x4] sm:$0xf]  ;;  %v6462_v35 = vld [vmem:[%s8928_s23 + $0x74] sm:$0xf0]  ;;  %v7901_v37 = vld [vmem:[%s8928_s23 + $0x78] sm:$0xf0] }
  0x46   : > { %3192 = vmatpush.bf16.msrb.mxu3 %v8200_v13  ;;  %v6418_v13 = vld [vmem:[%s8928_s23 + $0x24] sm:$0xf0]  ;;  %v6468_v36 = vld [vmem:[%s8928_s23 + $0x58] sm:$0xf] }
  0x47   : > { %2854 = vmatpush.bf16.msrb.mxu1 %v8184_v14  ;;  %3361 = vmatpush.bf16.msrb.mxu0 %v8208_v15  ;;  %v6424_v14 = vld [vmem:[%s8928_s23 + $0x8] sm:$0xf]  ;;  %v7891_v15 = vld [vmem:[%s8928_s23 + $0x28] sm:$0xf0]  ;;  %v6421_v20 = vor.u32 %v7886_v12, %v6418_v13  ;;  %v6532_v12 = vld [vmem:[%s8928_s23 + $0xe0] sm:$0xf] }
  0x48   : > { %v6425_v21 = vor.u32 %v7891_v15, %v6424_v14  ;;  %v7918_v13 = vld [vmem:[%s8928_s23 + $0x100] sm:$0xf0]  ;;  %v6534_v15 = vld [vmem:[%s8928_s23 + $0x104] sm:$0xf0] }
  0x49   : > { %3024 = vmatpush.bf16.msrb.mxu2 %v8191_v28  ;;  %v7914_v14 = vld [vmem:[%s8928_s23 + $0xe4] sm:$0xf] }
  0x4a   : > { %3193 = vmatpush.bf16.msrb.mxu3 %v8199_v29 }
  0x4b   : > { %2855 = vmatpush.bf16.msrb.mxu1 %v8183_v30  ;;  %3362 = vmatpush.bf16.msrb.mxu0 %v8207_v31  ;;  %v7895_v30 = vld [vmem:[%s8928_s23 + $0x4c] sm:$0xf]  ;;  %v6454_v31 = vld [vmem:[%s8928_s23 + $0x6c] sm:$0xf0] }
  0x4d   : > { %3025 = vmatpush.bf16.msrb.mxu2 %v8190_v44  ;;  %v6469_v44 = vor.u32 %v7901_v37, %v6468_v36  ;;  %v7922_v36 = vld [vmem:[%s8928_s23 + $0x124] sm:$0xf]  ;;  %v6562_v37 = vld [vmem:[%s8928_s23 + $0x144] sm:$0xf0] }
  0x4e   : > { %3194 = vmatpush.bf16.msrb.mxu3 %v8198_v45 }
  0x4f   : > { %2856 = vmatpush.bf16.msrb.mxu1 %v8182_v46  ;;  %3363 = vmatpush.bf16.msrb.mxu0 %v8206_v47 }
  0x50   : > { %2738 = vmatmul.bf16.gmra.mxu1 %v6777_v56  ;;  %2778 = vmatmul.bf16.gmra.mxu2 %v7065_v57  ;;  %v6921_v56 = vor.u32 %v8016_v49, %v6920_v48  ;;  %v7209_v57 = vor.u32 %v8088_v51, %v7208_v50  ;;  %v7904_v50 = vld [vmem:[%s8928_s23 + $0x94] sm:$0xf]  ;;  %v6490_v51 = vld [vmem:[%s8928_s23 + $0xb4] sm:$0xf0] }
  0x51   : > { %2818 = vmatmul.bf16.gmra.mxu3 %v7353_v58  ;;  %v7497_v58 = vor.u32 %v8160_v53, %v7496_v52  ;;  %3694 = vmatpush.bf16.msra.mxu2 %v8229_v60  ;;  %v6496_v52 = vld [vmem:[%s8928_s23 + $0x98] sm:$0xf]  ;;  %v7909_v53 = vld [vmem:[%s8928_s23 + $0xb8] sm:$0xf0]  ;;  %v6493_v60 = vor.u32 %v7904_v50, %v6490_v51  ;;  %v6576_v50 = vld [vmem:[%s8928_s23 + $0x130] sm:$0xf] }
  0x52   : > { %2698 = vmatmul.bf16.gmra.mxu0 %v6489_v59  ;;  %v6633_v59 = vor.u32 %v7944_v55, %v6632_v54  ;;  %3863 = vmatpush.bf16.msra.mxu3 %v8237_v61  ;;  %v7905_v54 = vld [vmem:[%s8928_s23 + $0x9c] sm:$0xf]  ;;  %v6498_v55 = vld [vmem:[%s8928_s23 + $0xbc] sm:$0xf0]  ;;  %v6497_v61 = vor.u32 %v7909_v53, %v6496_v52  ;;  %v7928_v51 = vld [vmem:[%s8928_s23 + $0x150] sm:$0xf0] }
  0x53   : > { %3525 = vmatpush.bf16.msra.mxu1 %v8221_v62  ;;  %4032 = vmatpush.bf16.msra.mxu0 %v8245_v63  ;;  %v6501_v63 = vor.u32 %v7905_v54, %v6498_v55  ;;  %v6565_v54 = vor.u32 %v7922_v36, %v6562_v37 }
  0x60   : > { %2743 = vmatmul.bf16.gmra.mxu1 %v6813_v8  ;;  %2783 = vmatmul.bf16.gmra.mxu2 %v7101_v9  ;;  %v6957_v8 = vor.u32 %v8025_v1, %v6956_v0  ;;  %v7245_v9 = vor.u32 %v8097_v3, %v7244_v2  ;;  %v8228_v2 = vld [vmem:[%s11330_s1 + $0x1b0] sm:$0xff] }
  0x61   : > { %2823 = vmatmul.bf16.gmra.mxu3 %v7389_v10  ;;  %v7533_v10 = vor.u32 %v8169_v5, %v7532_v4  ;;  %v8236_v3 = vld [vmem:[%s11330_s1 + $0x1f0] sm:$0xff]  ;;  %3695 = vmatpush.bf16.msra.mxu2 %v8228_v2 }
  0x62   : > { %2703 = vmatmul.bf16.gmra.mxu0 %v6525_v11  ;;  %v6669_v11 = vor.u32 %v7953_v7, %v6668_v6  ;;  %3864 = vmatpush.bf16.msra.mxu3 %v8236_v3  ;;  %v8220_v7 = vld [vmem:[%s11330_s1 + $0x170] sm:$0xff] }
  0x63   : > { %3526 = vmatpush.bf16.msra.mxu1 %v8220_v7  ;;  %v7931_v7 = vld [vmem:[%s8928_s23 + $0x16c] sm:$0xf] }
  0x70   : > { %2748 = vmatmul.bf16.gmra.mxu1 %v6849_v24  ;;  %2788 = vmatmul.bf16.gmra.mxu2 %v7137_v25  ;;  %v6433_v24 = vor.u32 %v7892_v19, %v6432_v18 }
  0x71   : > { %2828 = vmatmul.bf16.gmra.mxu3 %v7425_v26 }
  0x72   : > { %2708 = vmatmul.bf16.gmra.mxu0 %v6561_v27 }
  0x80   : > { %2753 = vmatmul.bf16.gmra.mxu1 %v6885_v40  ;;  %2793 = vmatmul.bf16.gmra.mxu2 %v7173_v41  ;;  %v6457_v40 = vor.u32 %v7895_v30, %v6454_v31  ;;  %v6461_v41 = vor.u32 %v7900_v33, %v6460_v32  ;;  %v6541_v30 = vor.u32 %v7919_v17, %v6540_v16 }
  0x81   : > { %2833 = vmatmul.bf16.gmra.mxu3 %v7461_v42 }
  0x82   : > { %2713 = vmatmul.bf16.gmra.mxu0 %v6597_v43  ;;  %v6465_v43 = vor.u32 %v7896_v34, %v6462_v35 }
  0x90   : > { %2758 = vmatmul.bf16.gmra.mxu1 %v6921_v56  ;;  %2798 = vmatmul.bf16.gmra.mxu2 %v7209_v57  ;;  %v6504_v56 = vld [vmem:[%s8928_s23 + $0xa0] sm:$0xf]  ;;  %v7910_v57 = vld [vmem:[%s8928_s23 + $0xc0] sm:$0xf0] }
  0x91   : > { %2838 = vmatmul.bf16.gmra.mxu3 %v7497_v58  ;;  %v6505_v0 = vor.u32 %v7910_v57, %v6504_v56 }
  0x92   : > { %2718 = vmatmul.bf16.gmra.mxu0 %v6633_v59 }
  0xa0   : > { %2763 = vmatmul.bf16.gmra.mxu1 %v6957_v8  ;;  %2803 = vmatmul.bf16.gmra.mxu2 %v7245_v9  ;;  %v8244_v9 = vld [vmem:[%s11330_s1 + $0x230] sm:$0xff] }
  0xa1   : > { %2843 = vmatmul.bf16.gmra.mxu3 %v7533_v10  ;;  %v7913_v10 = vld [vmem:[%s8928_s23 + $0xdc] sm:$0xf]  ;;  %4033 = vmatpush.bf16.msra.mxu0 %v8244_v9  ;;  %v6598_v9 = vld [vmem:[%s8928_s23 + $0x18c] sm:$0xf0] }
  0xa2   : > { %2723 = vmatmul.bf16.gmra.mxu0 %v6669_v11  ;;  %v6526_v11 = vld [vmem:[%s8928_s23 + $0xfc] sm:$0xf0] }
  0xad   : > { %v9113_v22 = vpop.f32.mrf.mxu1 }
  0xaf   : > { %v9115_v25 = vpop.f32.mrf.mxu0 }
  0xb0   : > { %2857 = vmatmul.bf16.vlgmr.msrb.gmra.mxu1 %v6421_v20  ;;  %3026 = vmatmul.bf16.vlgmr.msrb.gmra.mxu2 %v6425_v21  ;;  %v6529_v20 = vor.u32 %v7913_v10, %v6526_v11  ;;  %v6533_v21 = vor.u32 %v7918_v13, %v6532_v12  ;;  %v6604_v10 = vld [vmem:[%s8928_s23 + $0x170] sm:$0xf]  ;;  %v7936_v11 = vld [vmem:[%s8928_s23 + $0x190] sm:$0xf0]  ;;  %v6606_v13 = vld [vmem:[%s8928_s23 + $0x194] sm:$0xf0] }
  0xb1   : > { %3195 = vmatmul.bf16.vlgmr.msrb.gmra.mxu3 %v6429_v23  ;;  %v7932_v12 = vld [vmem:[%s8928_s23 + $0x174] sm:$0xf] }
  0xb2   : > { %3364 = vmatmul.bf16.vlgmr.msrb.gmra.mxu0 %v6433_v24  ;;  %v6537_v24 = vor.u32 %v7914_v14, %v6534_v15  ;;  %v6612_v14 = vld [vmem:[%s8928_s23 + $0x178] sm:$0xf]  ;;  %v7937_v15 = vld [vmem:[%s8928_s23 + $0x198] sm:$0xf0] }
  0xb3   : > { %v9117_v26 = vpop.f32.mrf.mxu2  ;;  %v6613_v36 = vor.u32 %v7937_v15, %v6612_v14 }
  0xb4   : > { %v9119_v27 = vpop.f32.mrf.mxu3 }
  0xb5   : > { %11339 = vst [vmem:[#allocation4_spill] sm:$0xff] %v9119_v27  ;;  %v9121_v28 = vpop.f32.mrf.mxu1 }
  0xb7   : > { %v9123_v29 = vpop.f32.mrf.mxu0 }
  0xbb   : > { %v9133_v38 = vpop.f32.mrf.mxu2 }
  0xbc   : > { %v9135_v39 = vpop.f32.mrf.mxu3 }
  0xbd   : > { %11340 = vst [vmem:[#allocation5_spill] sm:$0xff] %v9135_v39  ;;  %v9137_v42 = vpop.f32.mrf.mxu1 }
  0xbf   : > { %v9139_v45 = vpop.f32.mrf.mxu0 }
  0xc0   : > { %2862 = vmatmul.bf16.gmra.mxu1 %v6457_v40  ;;  %3031 = vmatmul.bf16.gmra.mxu2 %v6461_v41  ;;  %v6568_v40 = vld [vmem:[%s8928_s23 + $0x128] sm:$0xf]  ;;  %v7927_v41 = vld [vmem:[%s8928_s23 + $0x148] sm:$0xf0] }
  0xc1   : > { %3200 = vmatmul.bf16.gmra.mxu3 %v6465_v43  ;;  %v7923_v43 = vld [vmem:[%s8928_s23 + $0x12c] sm:$0xf]  ;;  %v6569_v55 = vor.u32 %v7927_v41, %v6568_v40 }
  0xc2   : > { %3369 = vmatmul.bf16.gmra.mxu0 %v6469_v44  ;;  %v6570_v44 = vld [vmem:[%s8928_s23 + $0x14c] sm:$0xf0] }
  0xc3   : > { %v9141_v46 = vpop.f32.mrf.mxu2  ;;  %v6573_v57 = vor.u32 %v7923_v43, %v6570_v44 }
  0xc4   : > { %v9143_v47 = vpop.f32.mrf.mxu3 }
  0xc5   : > { %11341 = vst [vmem:[#allocation6_spill] sm:$0xff] %v9143_v47  ;;  %v9145_v48 = vpop.f32.mrf.mxu1 }
  0xc7   : > { %v9147_v49 = vpop.f32.mrf.mxu0 }
  0xcb   : > { %v9157_v58 = vpop.f32.mrf.mxu2 }
  0xcc   : > { %v9159_v59 = vpop.f32.mrf.mxu3 }
  0xcd   : > { %11342 = vst [vmem:[#allocation7_spill] sm:$0xff] %v9159_v59  ;;  %v9161_v62 = vpop.f32.mrf.mxu1 }
  0xcf   : > { %v9163_v1 = vpop.f32.mrf.mxu0 }
  0xd0   : > { %2867 = vmatmul.bf16.gmra.mxu1 %v6493_v60  ;;  %3036 = vmatmul.bf16.gmra.mxu2 %v6497_v61  ;;  %v6577_v60 = vor.u32 %v7928_v51, %v6576_v50  ;;  %v7940_v50 = vld [vmem:[%s8928_s23 + $0x1b4] sm:$0xf]  ;;  %v6634_v51 = vld [vmem:[%s8928_s23 + $0x1d4] sm:$0xf0] }
  0xd1   : > { %3205 = vmatmul.bf16.gmra.mxu3 %v6501_v63 }
  0xd2   : > { %3374 = vmatmul.bf16.gmra.mxu0 %v6505_v0 }
  0xd3   : > { %v9171_v4 = vpop.f32.mrf.mxu2 }
  0xd4   : > { %v9173_v5 = vpop.f32.mrf.mxu3 }
  0xd5   : > { %11343 = vst [vmem:[#allocation8_spill] sm:$0xff] %v9173_v5  ;;  %v9175_v6 = vpop.f32.mrf.mxu1 }
  0xd7   : > { %v9180_v8 = vpop.f32.mrf.mxu0 }
  0xdb   : > { %v9193_v18 = vpop.f32.mrf.mxu2 }
  0xdc   : > { %v9195_v19 = vpop.f32.mrf.mxu3 }
  0xdd   : > { %11344 = vst [vmem:[#allocation9_spill] sm:$0xff] %v9195_v19  ;;  %v9197_v23 = vpop.f32.mrf.mxu1 }
  0xdf   : > { %v9199_v31 = vpop.f32.mrf.mxu0 }
  0xe0   : > { %2872 = vmatmul.bf16.gmra.mxu1 %v6529_v20  ;;  %3041 = vmatmul.bf16.gmra.mxu2 %v6533_v21  ;;  %v6601_v20 = vor.u32 %v7931_v7, %v6598_v9  ;;  %v6605_v21 = vor.u32 %v7936_v11, %v6604_v10  ;;  %v6648_v7 = vld [vmem:[%s8928_s23 + $0x1c0] sm:$0xf]  ;;  %v7946_v9 = vld [vmem:[%s8928_s23 + $0x1e0] sm:$0xf0] }
  0xe1   : > { %3210 = vmatmul.bf16.gmra.mxu3 %v6537_v24 }
  0xe2   : > { %3379 = vmatmul.bf16.gmra.mxu0 %v6541_v30  ;;  %v6609_v30 = vor.u32 %v7932_v12, %v6606_v13  ;;  %v6637_v12 = vor.u32 %v7940_v50, %v6634_v51 }
  0xe3   : > { %v9201_v32 = vpop.f32.mrf.mxu2 }
  0xe4   : > { %v9203_v33 = vpop.f32.mrf.mxu3 }
  0xe5   : > { %11345 = vst [vmem:[#allocation10_spill] sm:$0xff] %v9203_v33  ;;  %v9205_v34 = vpop.f32.mrf.mxu1 }
  0xe7   : > { %v9207_v35 = vpop.f32.mrf.mxu0 }
  0xeb   : > { %v9217_v52 = vpop.f32.mrf.mxu2 }
  0xec   : > { %v9219_v53 = vpop.f32.mrf.mxu3 }
  0xed   : > { %11346 = vst [vmem:[#allocation11_spill] sm:$0xff] %v9219_v53  ;;  %v9221_v56 = vpop.f32.mrf.mxu1 }
  0xef   : > { %v9223_v61 = vpop.f32.mrf.mxu0 }
  0xf0   : > { %2877 = vmatmul.bf16.gmra.mxu1 %v6565_v54  ;;  %3046 = vmatmul.bf16.gmra.mxu2 %v6569_v55  ;;  %v6640_v54 = vld [vmem:[%s8928_s23 + $0x1b8] sm:$0xf]  ;;  %v7945_v55 = vld [vmem:[%s8928_s23 + $0x1d8] sm:$0xf0] }
  0xf1   : > { %3215 = vmatmul.bf16.gmra.mxu3 %v6573_v57  ;;  %v7941_v57 = vld [vmem:[%s8928_s23 + $0x1bc] sm:$0xf]  ;;  %v6641_v13 = vor.u32 %v7945_v55, %v6640_v54 }
  0xf2   : > { %3384 = vmatmul.bf16.gmra.mxu0 %v6577_v60  ;;  %v6642_v60 = vld [vmem:[%s8928_s23 + $0x1dc] sm:$0xf0] }
  0xf3   : > { %v9225_v63 = vpop.f32.mrf.mxu2  ;;  %v6645_v15 = vor.u32 %v7941_v57, %v6642_v60  ;;  %v8219_v57 = vld [vmem:[%s11330_s1 + $0x168] sm:$0xff] }
  0xf4   : > { %v9227_v0 = vpop.f32.mrf.mxu3  ;;  %v8243_v60 = vld [vmem:[%s11330_s1 + $0x228] sm:$0xff]  ;;  %3527 = vmatpush.bf16.msra.mxu1 %v8219_v57 }
  0xf5   : > { %11347 = vst [vmem:[#allocation12_spill] sm:$0xff] %v9227_v0  ;;  %v9229_v2 = vpop.f32.mrf.mxu1  ;;  %4034 = vmatpush.bf16.msra.mxu0 %v8243_v60 }
  0xf7   : > { %v9231_v3 = vpop.f32.mrf.mxu0 }
  0xfb   : > { %v9241_v16 = vpop.f32.mrf.mxu2 }
  0xfc   : > { %v9243_v17 = vpop.f32.mrf.mxu3 }
  0xfd   : > { %11348 = vst [vmem:[#allocation13_spill] sm:$0xff] %v9243_v17  ;;  %v9245_v24 = vpop.f32.mrf.mxu1 }
  0xff   : > { %v9247_v37 = vpop.f32.mrf.mxu0 }
 0x100   : > { %2882 = vmatmul.bf16.gmra.mxu1 %v6601_v20  ;;  %3051 = vmatmul.bf16.gmra.mxu2 %v6605_v21  ;;  %v6649_v20 = vor.u32 %v7946_v9, %v6648_v7  ;;  %v7949_v7 = vld [vmem:[%s8928_s23 + $0x1fc] sm:$0xf]  ;;  %v6670_v9 = vld [vmem:[%s8928_s23 + $0x21c] sm:$0xf0] }
 0x101   : > { %3220 = vmatmul.bf16.gmra.mxu3 %v6609_v30  ;;  %v8227_v30 = vld [vmem:[%s11330_s1 + $0x1a8] sm:$0xff] }
 0x102   : > { %3389 = vmatmul.bf16.gmra.mxu0 %v6613_v36  ;;  %v8235_v36 = vld [vmem:[%s11330_s1 + $0x1e8] sm:$0xff]  ;;  %3696 = vmatpush.bf16.msra.mxu2 %v8227_v30 }
 0x103   : > { %v9249_v40 = vpop.f32.mrf.mxu2  ;;  %3865 = vmatpush.bf16.msra.mxu3 %v8235_v36  ;;  %v6684_v30 = vld [vmem:[%s8928_s23 + $0x208] sm:$0xf]  ;;  %v7955_v36 = vld [vmem:[%s8928_s23 + $0x228] sm:$0xf0] }
 0x104   : > { %11349 = vst [vmem:[#allocation14_spill] sm:$0xff] %v9249_v40  ;;  %v9251_v41 = vpop.f32.mrf.mxu3  ;;  %v6685_v60 = vor.u32 %v7955_v36, %v6684_v30  ;;  %v7963_v30 = vld [vmem:[%s8928_s23 + $0x268] sm:$0xf0]  ;;  %v6714_v36 = vld [vmem:[%s8928_s23 + $0x26c] sm:$0xf0] }
 0x105   : > { %11350 = vst [vmem:[#allocation15_spill] sm:$0xff] %v9251_v41  ;;  %v9253_v43 = vpop.f32.mrf.mxu1  ;;  %v6673_v41 = vor.u32 %v7949_v7, %v6670_v9 }
 0x107   : > { %v9255_v44 = vpop.f32.mrf.mxu0 }
 0x10b   : > { %v9265_v10 = vpop.f32.mrf.mxu2 }
 0x10c   : > { %11351 = vst [vmem:[#allocation16_spill] sm:$0xff] %v9265_v10  ;;  %v9267_v11 = vpop.f32.mrf.mxu3 }
 0x10d   : > { %11352 = vst [vmem:[#allocation17_spill] sm:$0xff] %v9267_v11  ;;  %v9269_v14 = vpop.f32.mrf.mxu1 }
 0x10f   : > { %v9271_v21 = vpop.f32.mrf.mxu0 }
 0x110   : > { %2887 = vmatmul.bf16.gmra.mxu1 %v6637_v12  ;;  %3056 = vmatmul.bf16.gmra.mxu2 %v6641_v13  ;;  %v6676_v12 = vld [vmem:[%s8928_s23 + $0x200] sm:$0xf]  ;;  %v7954_v13 = vld [vmem:[%s8928_s23 + $0x220] sm:$0xf0] }
 0x111   : > { %3225 = vmatmul.bf16.gmra.mxu3 %v6645_v15  ;;  %v7950_v15 = vld [vmem:[%s8928_s23 + $0x204] sm:$0xf]  ;;  %v6677_v17 = vor.u32 %v7954_v13, %v6676_v12  ;;  %v9320_v13 = vld [vmem:[%s11331_s2] ss:$0 sm:$0xff] }
 0x112   : > { %3394 = vmatmul.bf16.gmra.mxu0 %v6649_v20  ;;  %v6678_v20 = vld [vmem:[%s8928_s23 + $0x224] sm:$0xf0] }
 0x113   : > { %v9279_v50 = vpop.f32.mrf.mxu2  ;;  %v6681_v57 = vor.u32 %v7950_v15, %v6678_v20  ;;  %v7958_v15 = vld [vmem:[%s8928_s23 + $0x244] sm:$0xf]  ;;  %v6706_v20 = vld [vmem:[%s8928_s23 + $0x264] sm:$0xf0] }
 0x114   : > { %11353 = vst [vmem:[#allocation18_spill] sm:$0xff] %v9279_v50  ;;  %v9281_v51 = vpop.f32.mrf.mxu3  ;;  %v6709_v5 = vor.u32 %v7958_v15, %v6706_v20  ;;  %v2692_v15 = vadd.f32 %v9320_v13, %v9123_v29  ;;  %v2695_v29 = vadd.f32 %v9320_v13, %v9139_v45 }
 0x115   : > { %11354 = vst [vmem:[#allocation19_spill] sm:$0xff] %v9281_v51  ;;  %v9283_v54 = vpop.f32.mrf.mxu1 }
 0x117   : > { %v9285_v55 = vpop.f32.mrf.mxu0 }
 0x11b   : > { %v9301_v51 = vpop.f32.mrf.mxu2 }
 0x11c   : > { %11355 = vst [vmem:[#allocation20_spill] sm:$0xff] %v9301_v51  ;;  %v9303_v11 = vpop.f32.mrf.mxu3 }
 0x11d   : > { %11356 = vst [vmem:[#allocation21_spill] sm:$0xff] %v9303_v11  ;;  %v9305_v0 = vpop.f32.mrf.mxu1 }
 0x11f   : > { %v9307_v53 = vpop.f32.mrf.mxu0 }
 0x120   : > { %2892 = vmatmul.bf16.gmra.mxu1 %v6673_v41  ;;  %3061 = vmatmul.bf16.gmra.mxu2 %v6677_v17  ;;  %v6712_v41 = vld [vmem:[%s8928_s23 + $0x248] sm:$0xf]  ;;  %v7959_v17 = vld [vmem:[%s8928_s23 + $0x24c] sm:$0xf] }
 0x121   : > { %3230 = vmatmul.bf16.gmra.mxu3 %v6681_v57  ;;  %v6720_v57 = vld [vmem:[%s8928_s23 + $0x250] sm:$0xf]  ;;  %v6713_v59 = vor.u32 %v7963_v30, %v6712_v41  ;;  %v6717_v39 = vor.u32 %v7959_v17, %v6714_v36  ;;  %v7967_v36 = vld [vmem:[%s8928_s23 + $0x28c] sm:$0xf] }
 0x122   : > { %3399 = vmatmul.bf16.gmra.mxu0 %v6685_v60  ;;  %v7964_v60 = vld [vmem:[%s8928_s23 + $0x270] sm:$0xf0] }
 0x123   : > { %v9309_v11 = vpop.f32.mrf.mxu2  ;;  %v6721_v27 = vor.u32 %v7964_v60, %v6720_v57  ;;  %v7968_v60 = vld [vmem:[%s8928_s23 + $0x294] sm:$0xf] }
 0x124   : > { %11357 = vst [vmem:[#allocation22_spill] sm:$0xff] %v9309_v11  ;;  %v9311_v7 = vpop.f32.mrf.mxu3 }
 0x125   : > { %11358 = vst [vmem:[#allocation23_spill] sm:$0xff] %v9311_v7  ;;  %v9313_v9 = vpop.f32.mrf.mxu1  ;;  %v2690_v7 = vadd.f32 %v9320_v13, %v9115_v25 }
 0x127   : > { %v9315_v12 = vpop.f32.mrf.mxu0 }
 0x12b   : > { %v9330_v33 = vpop.f32.mrf.mxu2 }
 0x12c   : > { %11359 = vst [vmem:[#allocation24_spill] sm:$0xff] %v9330_v33  ;;  %v9334_v19 = vpop.f32.mrf.mxu3  ;;  %v7973_v33 = vld [vmem:[%s8928_s23 + $0x2b8] sm:$0xf0] }
 0x12d   : > { %11360 = vst [vmem:[#allocation25_spill] sm:$0xff] %v9334_v19  ;;  %v2858_v47 = vpop.f32.mrf.mxu1  ;;  %v6756_v19 = vld [vmem:[%s8928_s23 + $0x298] sm:$0xf] }
 0x12e   : > { %v2859_v11 = vadd.f32 %v2858_v47, %v2690_v7 }
 0x12f   : > { %v3365_v51 = vpop.f32.mrf.mxu0 }
 0x130   : > { %2897 = vmatmul.bf16.gmra.mxu1 %v6709_v5  ;;  %3066 = vmatmul.bf16.gmra.mxu2 %v6713_v59  ;;  %v6742_v5 = vld [vmem:[%s8928_s23 + $0x2ac] sm:$0xf0] }
 0x131   : > { %3235 = vmatmul.bf16.gmra.mxu3 %v6717_v39  ;;  %v6748_v59 = vld [vmem:[%s8928_s23 + $0x290] sm:$0xf]  ;;  %v7972_v39 = vld [vmem:[%s8928_s23 + $0x2b0] sm:$0xf0]  ;;  %v6745_v10 = vor.u32 %v7967_v36, %v6742_v5 }
 0x132   : > { %3404 = vmatmul.bf16.gmra.mxu0 %v6721_v27  ;;  %v6750_v27 = vld [vmem:[%s8928_s23 + $0x2b4] sm:$0xf0] }
 0x133   : > { %v3027_v25 = vpop.f32.mrf.mxu2 }
 0x134   : > { %v3028_v20 = vadd.f32 %v3027_v25, %v2859_v11  ;;  %v3196_v41 = vpop.f32.mrf.mxu3 }
 0x135   : > { %v2860_v30 = vpop.f32.mrf.mxu1 }
 0x136   : > { %v3197_v17 = vadd.f32 %v3196_v41, %v3028_v20  ;;  %v2861_v47 = vadd.f32 %v2860_v30, %v2692_v15  ;;  %v6749_v20 = vor.u32 %v7972_v39, %v6748_v59  ;;  %v6753_v41 = vor.u32 %v7968_v60, %v6750_v27  ;;  %v7976_v59 = vld [vmem:[%s8928_s23 + $0x2d4] sm:$0xf]  ;;  %v6778_v39 = vld [vmem:[%s8928_s23 + $0x2f4] sm:$0xf0]  ;;  %v7981_v60 = vld [vmem:[%s8928_s23 + $0x2f8] sm:$0xf0] }
 0x137   : > { %v3367_v7 = vpop.f32.mrf.mxu0  ;;  %v6757_v30 = vor.u32 %v7973_v33, %v6756_v19  ;;  %v2697_v19 = vadd.f32 %v9320_v13, %v9147_v49  ;;  %v7977_v27 = vld [vmem:[%s8928_s23 + $0x2dc] sm:$0xf]  ;;  %v2700_v49 = vadd.f32 %v9320_v13, %v9163_v1  ;;  %v8226_v1 = vld [vmem:[%s11330_s1 + $0x1a0] sm:$0xff] }
 0x138   : > { %v9340_v57 = vadd.f32 %v3365_v51, %v3197_v17  ;;  %3697 = vmatpush.bf16.msra.mxu2 %v8226_v1 }
 0x13a   : > { %11361 = vst [vmem:[#allocation26_spill] sm:$0xff] %v9340_v57 }
 0x13b   : > { %v3029_v50 = vpop.f32.mrf.mxu2 }
 0x13c   : > { %v3030_v11 = vadd.f32 %v3029_v50, %v2861_v47  ;;  %v3198_v25 = vpop.f32.mrf.mxu3 }
 0x13d   : > { %v2863_v15 = vpop.f32.mrf.mxu1 }
 0x13e   : > { %v3199_v40 = vadd.f32 %v3198_v25, %v3030_v11  ;;  %v2864_v51 = vadd.f32 %v2863_v15, %v2695_v29  ;;  %v6786_v29 = vld [vmem:[%s8928_s23 + $0x2fc] sm:$0xf0]  ;;  %v7982_v25 = vld [vmem:[%s8928_s23 + $0x300] sm:$0xf0] }
 0x13f   : > { %v3370_v17 = vpop.f32.mrf.mxu0  ;;  %v6792_v11 = vld [vmem:[%s8928_s23 + $0x2e0] sm:$0xf] }
 0x140   : > { %2902 = vmatmul.bf16.gmra.mxu1 %v6745_v10  ;;  %3071 = vmatmul.bf16.gmra.mxu2 %v6749_v20  ;;  %v9350_v57 = vadd.f32 %v3367_v7, %v3199_v40  ;;  %v6784_v7 = vld [vmem:[%s8928_s23 + $0x2d8] sm:$0xf] }
 0x141   : > { %3240 = vmatmul.bf16.gmra.mxu3 %v6753_v41 }
 0x142   : > { %3409 = vmatmul.bf16.gmra.mxu0 %v6757_v30  ;;  %v6781_v30 = vor.u32 %v7976_v59, %v6778_v39 }
 0x143   : > { %v3032_v45 = vpop.f32.mrf.mxu2 }
 0x144   : > { %v3033_v33 = vadd.f32 %v3032_v45, %v2864_v51  ;;  %v3201_v50 = vpop.f32.mrf.mxu3  ;;  %v6785_v51 = vor.u32 %v7981_v60, %v6784_v7 }
 0x145   : > { %v2865_v47 = vpop.f32.mrf.mxu1 }
 0x146   : > { %v3202_v36 = vadd.f32 %v3201_v50, %v3033_v33  ;;  %v2866_v10 = vadd.f32 %v2865_v47, %v2697_v19  ;;  %v6789_v19 = vor.u32 %v7977_v27, %v6786_v29  ;;  %v6793_v33 = vor.u32 %v7982_v25, %v6792_v11  ;;  %v8218_v25 = vld [vmem:[%s11330_s1 + $0x160] sm:$0xff] }
 0x147   : > { %v3372_v5 = vpop.f32.mrf.mxu0  ;;  %3528 = vmatpush.bf16.msra.mxu1 %v8218_v25 }
 0x148   : > { %v9356_v40 = vadd.f32 %v3370_v17, %v3202_v36 }
 0x14b   : > { %v3034_v20 = vpop.f32.mrf.mxu2 }
 0x14c   : > { %v3035_v15 = vadd.f32 %v3034_v20, %v2866_v10  ;;  %v3203_v41 = vpop.f32.mrf.mxu3  ;;  %v8234_v10 = vld [vmem:[%s11330_s1 + $0x1e0] sm:$0xff] }
 0x14d   : > { %v2868_v45 = vpop.f32.mrf.mxu1  ;;  %3866 = vmatpush.bf16.msra.mxu3 %v8234_v10  ;;  %v8242_v20 = vld [vmem:[%s11330_s1 + $0x220] sm:$0xff] }
 0x14e   : > { %v3204_v50 = vadd.f32 %v3203_v41, %v3035_v15  ;;  %v2869_v17 = vadd.f32 %v2868_v45, %v2700_v49  ;;  %v7985_v49 = vld [vmem:[%s8928_s23 + $0x31c] sm:$0xf]  ;;  %4035 = vmatpush.bf16.msra.mxu0 %v8242_v20  ;;  %v6820_v41 = vld [vmem:[%s8928_s23 + $0x320] sm:$0xf]  ;;  %v6822_v45 = vld [vmem:[%s8928_s23 + $0x344] sm:$0xf0] }
 0x14f   : > { %v3375_v47 = vpop.f32.mrf.mxu0 }
 0x150   : > { %2907 = vmatmul.bf16.gmra.mxu1 %v6781_v30  ;;  %3076 = vmatmul.bf16.gmra.mxu2 %v6785_v51  ;;  %v9366_v36 = vadd.f32 %v3372_v5, %v3204_v50  ;;  %v2702_v5 = vadd.f32 %v9320_v13, %v9180_v8  ;;  %v6814_v8 = vld [vmem:[%s8928_s23 + $0x33c] sm:$0xf0]  ;;  %v7990_v30 = vld [vmem:[%s8928_s23 + $0x340] sm:$0xf0] }
 0x151   : > { %3245 = vmatmul.bf16.gmra.mxu3 %v6789_v19  ;;  %v7986_v51 = vld [vmem:[%s8928_s23 + $0x324] sm:$0xf]  ;;  %v6828_v19 = vld [vmem:[%s8928_s23 + $0x328] sm:$0xf] }
 0x152   : > { %3414 = vmatmul.bf16.gmra.mxu0 %v6793_v33  ;;  %v7991_v33 = vld [vmem:[%s8928_s23 + $0x348] sm:$0xf0] }
 0x153   : > { %v3037_v59 = vpop.f32.mrf.mxu2 }
 0x154   : > { %v3038_v39 = vadd.f32 %v3037_v59, %v2869_v17  ;;  %v3206_v7 = vpop.f32.mrf.mxu3  ;;  %v2705_v17 = vadd.f32 %v9320_v13, %v9199_v31  ;;  %v6817_v59 = vor.u32 %v7985_v49, %v6814_v8 }
 0x155   : > { %v2870_v60 = vpop.f32.mrf.mxu1 }
 0x156   : > { %v3207_v27 = vadd.f32 %v3206_v7, %v3038_v39  ;;  %v2871_v29 = vadd.f32 %v2870_v60, %v2702_v5  ;;  %v6821_v5 = vor.u32 %v7990_v30, %v6820_v41  ;;  %v6825_v7 = vor.u32 %v7986_v51, %v6822_v45 }
 0x157   : > { %v3377_v11 = vpop.f32.mrf.mxu0  ;;  %v6829_v60 = vor.u32 %v7991_v33, %v6828_v19  ;;  %v7994_v19 = vld [vmem:[%s8928_s23 + $0x364] sm:$0xf]  ;;  %v6850_v33 = vld [vmem:[%s8928_s23 + $0x384] sm:$0xf0] }
 0x158   : > { %v9384_v15 = vadd.f32 %v3375_v47, %v3207_v27 }
 0x15b   : > { %v3039_v50 = vpop.f32.mrf.mxu2 }
 0x15c   : > { %v3040_v1 = vadd.f32 %v3039_v50, %v2871_v29  ;;  %v3208_v10 = vpop.f32.mrf.mxu3  ;;  %v2707_v29 = vadd.f32 %v9320_v13, %v9207_v35  ;;  %v6856_v50 = vld [vmem:[%s8928_s23 + $0x368] sm:$0xf]  ;;  %v2710_v35 = vadd.f32 %v9320_v13, %v9223_v61 }
 0x15d   : > { %v2873_v39 = vpop.f32.mrf.mxu1 }
 0x15e   : > { %v3209_v25 = vadd.f32 %v3208_v10, %v3040_v1  ;;  %v2874_v47 = vadd.f32 %v2873_v39, %v2705_v17  ;;  %v7999_v17 = vld [vmem:[%s8928_s23 + $0x388] sm:$0xf0]  ;;  %v6858_v10 = vld [vmem:[%s8928_s23 + $0x38c] sm:$0xf0] }
 0x15f   : > { %v3380_v27 = vpop.f32.mrf.mxu0  ;;  %v7995_v1 = vld [vmem:[%s8928_s23 + $0x36c] sm:$0xf] }
 0x160   : > { %2912 = vmatmul.bf16.gmra.mxu1 %v6817_v59  ;;  %3081 = vmatmul.bf16.gmra.mxu2 %v6821_v5  ;;  %v9394_v20 = vadd.f32 %v3377_v11, %v3209_v25  ;;  %v6864_v59 = vld [vmem:[%s8928_s23 + $0x370] sm:$0xf]  ;;  %v8000_v5 = vld [vmem:[%s8928_s23 + $0x390] sm:$0xf0]  ;;  %v6853_v25 = vor.u32 %v7994_v19, %v6850_v33 }
 0x161   : > { %3250 = vmatmul.bf16.gmra.mxu3 %v6825_v7 }
 0x162   : > { %3419 = vmatmul.bf16.gmra.mxu0 %v6829_v60 }
 0x163   : > { %v3042_v31 = vpop.f32.mrf.mxu2 }
 0x164   : > { %v3043_v49 = vadd.f32 %v3042_v31, %v2874_v47  ;;  %v3211_v8 = vpop.f32.mrf.mxu3  ;;  %v6857_v47 = vor.u32 %v7999_v17, %v6856_v50 }
 0x165   : > { %v2875_v41 = vpop.f32.mrf.mxu1 }
 0x166   : > { %v3212_v30 = vadd.f32 %v3211_v8, %v3043_v49  ;;  %v2876_v51 = vadd.f32 %v2875_v41, %v2707_v29  ;;  %v6861_v29 = vor.u32 %v7995_v1, %v6858_v10  ;;  %v6865_v49 = vor.u32 %v8000_v5, %v6864_v59  ;;  %v8003_v59 = vld [vmem:[%s8928_s23 + $0x3ac] sm:$0xf]  ;;  %v6886_v5 = vld [vmem:[%s8928_s23 + $0x3cc] sm:$0xf0] }
 0x167   : > { %v3382_v45 = vpop.f32.mrf.mxu0 }
 0x168   : > { %v9400_v11 = vadd.f32 %v3380_v27, %v3212_v30 }
 0x16b   : > { %v3044_v39 = vpop.f32.mrf.mxu2 }
 0x16c   : > { %v3045_v7 = vadd.f32 %v3044_v39, %v2876_v51  ;;  %v3213_v60 = vpop.f32.mrf.mxu3  ;;  %v2712_v51 = vadd.f32 %v9320_v13, %v9231_v3  ;;  %v6892_v39 = vld [vmem:[%s8928_s23 + $0x3b0] sm:$0xf]  ;;  %v2715_v3 = vadd.f32 %v9320_v13, %v9247_v37 }
 0x16d   : > { %v2878_v31 = vpop.f32.mrf.mxu1 }
 0x16e   : > { %v3214_v8 = vadd.f32 %v3213_v60, %v3045_v7  ;;  %v2879_v27 = vadd.f32 %v2878_v31, %v2710_v35  ;;  %v8008_v35 = vld [vmem:[%s8928_s23 + $0x3d0] sm:$0xf0]  ;;  %v6894_v60 = vld [vmem:[%s8928_s23 + $0x3d4] sm:$0xf0] }
 0x16f   : > { %v3385_v41 = vpop.f32.mrf.mxu0  ;;  %v8004_v7 = vld [vmem:[%s8928_s23 + $0x3b4] sm:$0xf] }
 0x170   : > { %2917 = vmatmul.bf16.gmra.mxu1 %v6853_v25  ;;  %3086 = vmatmul.bf16.gmra.mxu2 %v6857_v47  ;;  %v9410_v30 = vadd.f32 %v3382_v45, %v3214_v8  ;;  %v6900_v25 = vld [vmem:[%s8928_s23 + $0x3b8] sm:$0xf]  ;;  %v8009_v47 = vld [vmem:[%s8928_s23 + $0x3d8] sm:$0xf0]  ;;  %v6889_v8 = vor.u32 %v8003_v59, %v6886_v5 }
 0x171   : > { %3255 = vmatmul.bf16.gmra.mxu3 %v6861_v29 }
 0x172   : > { %3424 = vmatmul.bf16.gmra.mxu0 %v6865_v49 }
 0x173   : > { %v3047_v61 = vpop.f32.mrf.mxu2 }
 0x174   : > { %v3048_v19 = vadd.f32 %v3047_v61, %v2879_v27  ;;  %v3216_v33 = vpop.f32.mrf.mxu3  ;;  %v6893_v27 = vor.u32 %v8008_v35, %v6892_v39 }
 0x175   : > { %v2880_v50 = vpop.f32.mrf.mxu1 }
 0x176   : > { %v3217_v17 = vadd.f32 %v3216_v33, %v3048_v19  ;;  %v2881_v1 = vadd.f32 %v2880_v50, %v2712_v51  ;;  %v6897_v51 = vor.u32 %v8004_v7, %v6894_v60  ;;  %v6901_v19 = vor.u32 %v8009_v47, %v6900_v25  ;;  %v8012_v25 = vld [vmem:[%s8928_s23 + $0x3f4] sm:$0xf]  ;;  %v6922_v47 = vld [vmem:[%s8928_s23 + $0x414] sm:$0xf0] }
 0x177   : > { %v3387_v10 = vpop.f32.mrf.mxu0 }
 0x178   : > { %v9416_v45 = vadd.f32 %v3385_v41, %v3217_v17 }
 0x17b   : > { %v3049_v31 = vpop.f32.mrf.mxu2 }
 0x17c   : > { %v3050_v29 = vadd.f32 %v3049_v31, %v2881_v1  ;;  %v3218_v49 = vpop.f32.mrf.mxu3  ;;  %v2717_v1 = vadd.f32 %v9320_v13, %v9255_v44  ;;  %v6928_v31 = vld [vmem:[%s8928_s23 + $0x3f8] sm:$0xf]  ;;  %v2720_v44 = vadd.f32 %v9320_v13, %v9271_v21 }
 0x17d   : > { %v2883_v61 = vpop.f32.mrf.mxu1  ;;  %v8225_v21 = vld [vmem:[%s11330_s1 + $0x198] sm:$0xff] }
 0x17e   : > { %v3219_v33 = vadd.f32 %v3218_v49, %v3050_v29  ;;  %v2884_v41 = vadd.f32 %v2883_v61, %v2715_v3  ;;  %v8017_v3 = vld [vmem:[%s8928_s23 + $0x418] sm:$0xf0]  ;;  %v6930_v49 = vld [vmem:[%s8928_s23 + $0x41c] sm:$0xf0]  ;;  %3698 = vmatpush.bf16.msra.mxu2 %v8225_v21 }
 0x17f   : > { %v3390_v50 = vpop.f32.mrf.mxu0  ;;  %v8013_v29 = vld [vmem:[%s8928_s23 + $0x3fc] sm:$0xf] }
 0x180   : > { %2922 = vmatmul.bf16.gmra.mxu1 %v6889_v8  ;;  %3091 = vmatmul.bf16.gmra.mxu2 %v6893_v27  ;;  %v9426_v17 = vadd.f32 %v3387_v10, %v3219_v33  ;;  %v6936_v8 = vld [vmem:[%s8928_s23 + $0x400] sm:$0xf]  ;;  %v8018_v27 = vld [vmem:[%s8928_s23 + $0x420] sm:$0xf0]  ;;  %v6925_v33 = vor.u32 %v8012_v25, %v6922_v47 }
 0x181   : > { %3260 = vmatmul.bf16.gmra.mxu3 %v6897_v51 }
 0x182   : > { %3429 = vmatmul.bf16.gmra.mxu0 %v6901_v19 }
 0x183   : > { %v3052_v37 = vpop.f32.mrf.mxu2 }
 0x184   : > { %v3053_v59 = vadd.f32 %v3052_v37, %v2884_v41  ;;  %v3221_v5 = vpop.f32.mrf.mxu3  ;;  %v6929_v41 = vor.u32 %v8017_v3, %v6928_v31 }
 0x185   : > { %v2885_v39 = vpop.f32.mrf.mxu1 }
 0x186   : > { %v3222_v35 = vadd.f32 %v3221_v5, %v3053_v59  ;;  %v2886_v7 = vadd.f32 %v2885_v39, %v2717_v1  ;;  %v6933_v1 = vor.u32 %v8013_v29, %v6930_v49  ;;  %v6937_v59 = vor.u32 %v8018_v27, %v6936_v8  ;;  %v8217_v27 = vld [vmem:[%s11330_s1 + $0x158] sm:$0xff] }
 0x187   : > { %v3392_v60 = vpop.f32.mrf.mxu0  ;;  %3529 = vmatpush.bf16.msra.mxu1 %v8217_v27 }
 0x188   : > { %v9432_v10 = vadd.f32 %v3390_v50, %v3222_v35 }
 0x18b   : > { %v3054_v61 = vpop.f32.mrf.mxu2 }
 0x18c   : > { %v3055_v51 = vadd.f32 %v3054_v61, %v2886_v7  ;;  %v3223_v19 = vpop.f32.mrf.mxu3  ;;  %v8233_v7 = vld [vmem:[%s11330_s1 + $0x1d8] sm:$0xff] }
 0x18d   : > { %v2888_v37 = vpop.f32.mrf.mxu1  ;;  %3867 = vmatpush.bf16.msra.mxu3 %v8233_v7  ;;  %v8241_v61 = vld [vmem:[%s11330_s1 + $0x218] sm:$0xff] }
 0x18e   : > { %v3224_v5 = vadd.f32 %v3223_v19, %v3055_v51  ;;  %v2889_v50 = vadd.f32 %v2888_v37, %v2720_v44  ;;  %v8021_v44 = vld [vmem:[%s8928_s23 + $0x43c] sm:$0xf]  ;;  %4036 = vmatpush.bf16.msra.mxu0 %v8241_v61  ;;  %v6964_v19 = vld [vmem:[%s8928_s23 + $0x440] sm:$0xf]  ;;  %v6966_v37 = vld [vmem:[%s8928_s23 + $0x464] sm:$0xf0] }
 0x18f   : > { %v3395_v39 = vpop.f32.mrf.mxu0 }
 0x190   : > { %2927 = vmatmul.bf16.gmra.mxu1 %v6925_v33  ;;  %3096 = vmatmul.bf16.gmra.mxu2 %v6929_v41  ;;  %v9442_v35 = vadd.f32 %v3392_v60, %v3224_v5  ;;  %v2722_v60 = vadd.f32 %v9320_v13, %v9285_v55  ;;  %v6958_v55 = vld [vmem:[%s8928_s23 + $0x45c] sm:$0xf0]  ;;  %v8026_v33 = vld [vmem:[%s8928_s23 + $0x460] sm:$0xf0] }
 0x191   : > { %3265 = vmatmul.bf16.gmra.mxu3 %v6933_v1  ;;  %v8022_v41 = vld [vmem:[%s8928_s23 + $0x444] sm:$0xf]  ;;  %v6972_v1 = vld [vmem:[%s8928_s23 + $0x448] sm:$0xf] }
 0x192   : > { %3434 = vmatmul.bf16.gmra.mxu0 %v6937_v59  ;;  %v8027_v59 = vld [vmem:[%s8928_s23 + $0x468] sm:$0xf0] }
 0x193   : > { %v3057_v25 = vpop.f32.mrf.mxu2 }
 0x194   : > { %v3058_v47 = vadd.f32 %v3057_v25, %v2889_v50  ;;  %v3226_v31 = vpop.f32.mrf.mxu3  ;;  %v2725_v50 = vadd.f32 %v9320_v13, %v9307_v53  ;;  %v6961_v25 = vor.u32 %v8021_v44, %v6958_v55 }
 0x195   : > { %v2890_v3 = vpop.f32.mrf.mxu1 }
 0x196   : > { %v3227_v29 = vadd.f32 %v3226_v31, %v3058_v47  ;;  %v2891_v49 = vadd.f32 %v2890_v3, %v2722_v60  ;;  %v6965_v60 = vor.u32 %v8026_v33, %v6964_v19  ;;  %v6969_v31 = vor.u32 %v8022_v41, %v6966_v37 }
 0x197   : > { %v3397_v8 = vpop.f32.mrf.mxu0  ;;  %v6973_v3 = vor.u32 %v8027_v59, %v6972_v1  ;;  %v8030_v1 = vld [vmem:[%s8928_s23 + $0x484] sm:$0xf]  ;;  %v6994_v59 = vld [vmem:[%s8928_s23 + $0x4a4] sm:$0xf0] }
 0x198   : > { %v9460_v51 = vadd.f32 %v3395_v39, %v3227_v29 }
 0x19b   : > { %v3059_v5 = vpop.f32.mrf.mxu2 }
 0x19c   : > { %v3060_v21 = vadd.f32 %v3059_v5, %v2891_v49  ;;  %v3228_v7 = vpop.f32.mrf.mxu3  ;;  %v2727_v49 = vadd.f32 %v9320_v13, %v9315_v12  ;;  %v7000_v5 = vld [vmem:[%s8928_s23 + $0x488] sm:$0xf]  ;;  %v2730_v12 = vadd.f32 %v9320_v13, %v9113_v22 }
 0x19d   : > { %v2893_v47 = vpop.f32.mrf.mxu1 }
 0x19e   : > { %v3229_v27 = vadd.f32 %v3228_v7, %v3060_v21  ;;  %v2894_v39 = vadd.f32 %v2893_v47, %v2725_v50  ;;  %v8035_v50 = vld [vmem:[%s8928_s23 + $0x4a8] sm:$0xf0]  ;;  %v7002_v7 = vld [vmem:[%s8928_s23 + $0x4ac] sm:$0xf0] }
 0x19f   : > { %v3400_v29 = vpop.f32.mrf.mxu0  ;;  %v8031_v21 = vld [vmem:[%s8928_s23 + $0x48c] sm:$0xf] }
 0x1a0   : > { %2932 = vmatmul.bf16.gmra.mxu1 %v6961_v25  ;;  %3101 = vmatmul.bf16.gmra.mxu2 %v6965_v60  ;;  %v9470_v61 = vadd.f32 %v3397_v8, %v3229_v27  ;;  %v7008_v25 = vld [vmem:[%s8928_s23 + $0x490] sm:$0xf]  ;;  %v8036_v60 = vld [vmem:[%s8928_s23 + $0x4b0] sm:$0xf0]  ;;  %v6997_v27 = vor.u32 %v8030_v1, %v6994_v59 }
 0x1a1   : > { %3270 = vmatmul.bf16.gmra.mxu3 %v6969_v31 }
 0x1a2   : > { %3439 = vmatmul.bf16.gmra.mxu0 %v6973_v3 }
 0x1a3   : > { %v3062_v53 = vpop.f32.mrf.mxu2 }
 0x1a4   : > { %v3063_v44 = vadd.f32 %v3062_v53, %v2894_v39  ;;  %v3231_v55 = vpop.f32.mrf.mxu3  ;;  %v7001_v39 = vor.u32 %v8035_v50, %v7000_v5 }
 0x1a5   : > { %v2895_v19 = vpop.f32.mrf.mxu1 }
 0x1a6   : > { %v3232_v33 = vadd.f32 %v3231_v55, %v3063_v44  ;;  %v2896_v41 = vadd.f32 %v2895_v19, %v2727_v49  ;;  %v7005_v49 = vor.u32 %v8031_v21, %v7002_v7  ;;  %v7009_v44 = vor.u32 %v8036_v60, %v7008_v25  ;;  %v8039_v25 = vld [vmem:[%s8928_s23 + $0x4cc] sm:$0xf]  ;;  %v7030_v60 = vld [vmem:[%s8928_s23 + $0x4ec] sm:$0xf0] }
 0x1a7   : > { %v3402_v37 = vpop.f32.mrf.mxu0 }
 0x1a8   : > { %v9476_v8 = vadd.f32 %v3400_v29, %v3232_v33 }
 0x1ab   : > { %v3064_v47 = vpop.f32.mrf.mxu2 }
 0x1ac   : > { %v3065_v31 = vadd.f32 %v3064_v47, %v2896_v41  ;;  %v3233_v3 = vpop.f32.mrf.mxu3  ;;  %v2732_v41 = vadd.f32 %v9320_v13, %v9121_v28  ;;  %v7036_v47 = vld [vmem:[%s8928_s23 + $0x4d0] sm:$0xf]  ;;  %v2735_v28 = vadd.f32 %v9320_v13, %v9137_v42 }
 0x1ad   : > { %v2898_v53 = vpop.f32.mrf.mxu1 }
 0x1ae   : > { %v3234_v55 = vadd.f32 %v3233_v3, %v3065_v31  ;;  %v2899_v29 = vadd.f32 %v2898_v53, %v2730_v12  ;;  %v8044_v12 = vld [vmem:[%s8928_s23 + $0x4f0] sm:$0xf0]  ;;  %v7038_v3 = vld [vmem:[%s8928_s23 + $0x4f4] sm:$0xf0] }
 0x1af   : > { %v3405_v19 = vpop.f32.mrf.mxu0  ;;  %v8040_v31 = vld [vmem:[%s8928_s23 + $0x4d4] sm:$0xf] }
 0x1b0   : > { %2937 = vmatmul.bf16.gmra.mxu1 %v6997_v27  ;;  %3106 = vmatmul.bf16.gmra.mxu2 %v7001_v39  ;;  %v9486_v33 = vadd.f32 %v3402_v37, %v3234_v55  ;;  %v7044_v27 = vld [vmem:[%s8928_s23 + $0x4d8] sm:$0xf]  ;;  %v8045_v39 = vld [vmem:[%s8928_s23 + $0x4f8] sm:$0xf0]  ;;  %v7033_v55 = vor.u32 %v8039_v25, %v7030_v60 }
 0x1b1   : > { %3275 = vmatmul.bf16.gmra.mxu3 %v7005_v49 }
 0x1b2   : > { %3444 = vmatmul.bf16.gmra.mxu0 %v7009_v44 }
 0x1b3   : > { %v3067_v22 = vpop.f32.mrf.mxu2 }
 0x1b4   : > { %v3068_v1 = vadd.f32 %v3067_v22, %v2899_v29  ;;  %v3236_v59 = vpop.f32.mrf.mxu3  ;;  %v7037_v29 = vor.u32 %v8044_v12, %v7036_v47 }
 0x1b5   : > { %v2900_v5 = vpop.f32.mrf.mxu1 }
 0x1b6   : > { %v3237_v50 = vadd.f32 %v3236_v59, %v3068_v1  ;;  %v2901_v21 = vadd.f32 %v2900_v5, %v2732_v41  ;;  %v7041_v41 = vor.u32 %v8040_v31, %v7038_v3  ;;  %v7045_v1 = vor.u32 %v8045_v39, %v7044_v27  ;;  %v8048_v27 = vld [vmem:[%s8928_s23 + $0x514] sm:$0xf]  ;;  %v7066_v39 = vld [vmem:[%s8928_s23 + $0x534] sm:$0xf0] }
 0x1b7   : > { %v3407_v7 = vpop.f32.mrf.mxu0 }
 0x1b8   : > { %v9492_v37 = vadd.f32 %v3405_v19, %v3237_v50 }
 0x1bb   : > { %v3069_v53 = vpop.f32.mrf.mxu2 }
 0x1bc   : > { %v3070_v49 = vadd.f32 %v3069_v53, %v2901_v21  ;;  %v3238_v44 = vpop.f32.mrf.mxu3  ;;  %v2737_v21 = vadd.f32 %v9320_v13, %v9145_v48  ;;  %v7072_v53 = vld [vmem:[%s8928_s23 + $0x518] sm:$0xf]  ;;  %v2740_v48 = vadd.f32 %v9320_v13, %v9161_v62  ;;  %v8224_v62 = vld [vmem:[%s11330_s1 + $0x190] sm:$0xff] }
 0x1bd   : > { %v2903_v22 = vpop.f32.mrf.mxu1  ;;  %3699 = vmatpush.bf16.msra.mxu2 %v8224_v62 }
 0x1be   : > { %v3239_v59 = vadd.f32 %v3238_v44, %v3070_v49  ;;  %v2904_v19 = vadd.f32 %v2903_v22, %v2735_v28  ;;  %v8053_v28 = vld [vmem:[%s8928_s23 + $0x538] sm:$0xf0]  ;;  %v7074_v44 = vld [vmem:[%s8928_s23 + $0x53c] sm:$0xf0] }
 0x1bf   : > { %v3410_v5 = vpop.f32.mrf.mxu0  ;;  %v8049_v49 = vld [vmem:[%s8928_s23 + $0x51c] sm:$0xf] }
 0x1c0   : > { %2942 = vmatmul.bf16.gmra.mxu1 %v7033_v55  ;;  %3111 = vmatmul.bf16.gmra.mxu2 %v7037_v29  ;;  %v9502_v50 = vadd.f32 %v3407_v7, %v3239_v59  ;;  %v7080_v55 = vld [vmem:[%s8928_s23 + $0x520] sm:$0xf]  ;;  %v8054_v29 = vld [vmem:[%s8928_s23 + $0x540] sm:$0xf0]  ;;  %v7069_v59 = vor.u32 %v8048_v27, %v7066_v39 }
 0x1c1   : > { %3280 = vmatmul.bf16.gmra.mxu3 %v7041_v41 }
 0x1c2   : > { %3449 = vmatmul.bf16.gmra.mxu0 %v7045_v1 }
 0x1c3   : > { %v3072_v42 = vpop.f32.mrf.mxu2 }
 0x1c4   : > { %v3073_v25 = vadd.f32 %v3072_v42, %v2904_v19  ;;  %v3241_v60 = vpop.f32.mrf.mxu3  ;;  %v7073_v19 = vor.u32 %v8053_v28, %v7072_v53 }
 0x1c5   : > { %v2905_v47 = vpop.f32.mrf.mxu1 }
 0x1c6   : > { %v3242_v12 = vadd.f32 %v3241_v60, %v3073_v25  ;;  %v2906_v31 = vadd.f32 %v2905_v47, %v2737_v21  ;;  %v7077_v21 = vor.u32 %v8049_v49, %v7074_v44  ;;  %v7081_v25 = vor.u32 %v8054_v29, %v7080_v55  ;;  %v8216_v29 = vld [vmem:[%s11330_s1 + $0x150] sm:$0xff] }
 0x1c7   : > { %v3412_v3 = vpop.f32.mrf.mxu0  ;;  %3530 = vmatpush.bf16.msra.mxu1 %v8216_v29 }
 0x1c8   : > { %v9508_v7 = vadd.f32 %v3410_v5, %v3242_v12 }
 0x1cb   : > { %v3074_v22 = vpop.f32.mrf.mxu2 }
 0x1cc   : > { %v3075_v41 = vadd.f32 %v3074_v22, %v2906_v31  ;;  %v3243_v1 = vpop.f32.mrf.mxu3  ;;  %v8232_v31 = vld [vmem:[%s11330_s1 + $0x1d0] sm:$0xff] }
 0x1cd   : > { %v2908_v42 = vpop.f32.mrf.mxu1  ;;  %3868 = vmatpush.bf16.msra.mxu3 %v8232_v31  ;;  %v8240_v22 = vld [vmem:[%s11330_s1 + $0x210] sm:$0xff] }
 0x1ce   : > { %v3244_v60 = vadd.f32 %v3243_v1, %v3075_v41  ;;  %v2909_v5 = vadd.f32 %v2908_v42, %v2740_v48  ;;  %v8057_v48 = vld [vmem:[%s8928_s23 + $0x55c] sm:$0xf]  ;;  %4037 = vmatpush.bf16.msra.mxu0 %v8240_v22  ;;  %v7108_v1 = vld [vmem:[%s8928_s23 + $0x560] sm:$0xf]  ;;  %v7110_v42 = vld [vmem:[%s8928_s23 + $0x584] sm:$0xf0] }
 0x1cf   : > { %v3415_v47 = vpop.f32.mrf.mxu0 }
 0x1d0   : > { %2947 = vmatmul.bf16.gmra.mxu1 %v7069_v59  ;;  %3116 = vmatmul.bf16.gmra.mxu2 %v7073_v19  ;;  %v9518_v12 = vadd.f32 %v3412_v3, %v3244_v60  ;;  %v2742_v3 = vadd.f32 %v9320_v13, %v9175_v6  ;;  %v7102_v6 = vld [vmem:[%s8928_s23 + $0x57c] sm:$0xf0]  ;;  %v8062_v59 = vld [vmem:[%s8928_s23 + $0x580] sm:$0xf0] }
 0x1d1   : > { %3285 = vmatmul.bf16.gmra.mxu3 %v7077_v21  ;;  %v8058_v19 = vld [vmem:[%s8928_s23 + $0x564] sm:$0xf]  ;;  %v7116_v21 = vld [vmem:[%s8928_s23 + $0x568] sm:$0xf] }
 0x1d2   : > { %3454 = vmatmul.bf16.gmra.mxu0 %v7081_v25  ;;  %v8063_v25 = vld [vmem:[%s8928_s23 + $0x588] sm:$0xf0] }
 0x1d3   : > { %v3077_v27 = vpop.f32.mrf.mxu2 }
 0x1d4   : > { %v3078_v39 = vadd.f32 %v3077_v27, %v2909_v5  ;;  %v3246_v53 = vpop.f32.mrf.mxu3  ;;  %v2745_v5 = vadd.f32 %v9320_v13, %v9197_v23  ;;  %v7105_v27 = vor.u32 %v8057_v48, %v7102_v6 }
 0x1d5   : > { %v2910_v28 = vpop.f32.mrf.mxu1 }
 0x1d6   : > { %v3247_v49 = vadd.f32 %v3246_v53, %v3078_v39  ;;  %v2911_v44 = vadd.f32 %v2910_v28, %v2742_v3  ;;  %v7109_v3 = vor.u32 %v8062_v59, %v7108_v1  ;;  %v7113_v53 = vor.u32 %v8058_v19, %v7110_v42 }
 0x1d7   : > { %v3417_v55 = vpop.f32.mrf.mxu0  ;;  %v7117_v28 = vor.u32 %v8063_v25, %v7116_v21  ;;  %v8066_v21 = vld [vmem:[%s8928_s23 + $0x5a4] sm:$0xf]  ;;  %v7138_v25 = vld [vmem:[%s8928_s23 + $0x5c4] sm:$0xf0] }
 0x1d8   : > { %v9536_v41 = vadd.f32 %v3415_v47, %v3247_v49 }
 0x1db   : > { %v3079_v60 = vpop.f32.mrf.mxu2 }
 0x1dc   : > { %v3080_v62 = vadd.f32 %v3079_v60, %v2911_v44  ;;  %v3248_v31 = vpop.f32.mrf.mxu3  ;;  %v2747_v44 = vadd.f32 %v9320_v13, %v9205_v34  ;;  %v7144_v60 = vld [vmem:[%s8928_s23 + $0x5a8] sm:$0xf]  ;;  %v2750_v34 = vadd.f32 %v9320_v13, %v9221_v56 }
 0x1dd   : > { %v2913_v39 = vpop.f32.mrf.mxu1 }
 0x1de   : > { %v3249_v29 = vadd.f32 %v3248_v31, %v3080_v62  ;;  %v2914_v47 = vadd.f32 %v2913_v39, %v2745_v5  ;;  %v8071_v5 = vld [vmem:[%s8928_s23 + $0x5c8] sm:$0xf0]  ;;  %v7146_v31 = vld [vmem:[%s8928_s23 + $0x5cc] sm:$0xf0] }
 0x1df   : > { %v3420_v49 = vpop.f32.mrf.mxu0  ;;  %v8067_v62 = vld [vmem:[%s8928_s23 + $0x5ac] sm:$0xf] }
 0x1e0   : > { %2952 = vmatmul.bf16.gmra.mxu1 %v7105_v27  ;;  %3121 = vmatmul.bf16.gmra.mxu2 %v7109_v3  ;;  %v9546_v22 = vadd.f32 %v3417_v55, %v3249_v29  ;;  %v7152_v27 = vld [vmem:[%s8928_s23 + $0x5b0] sm:$0xf]  ;;  %v8072_v3 = vld [vmem:[%s8928_s23 + $0x5d0] sm:$0xf0]  ;;  %v7141_v29 = vor.u32 %v8066_v21, %v7138_v25 }
 0x1e1   : > { %3290 = vmatmul.bf16.gmra.mxu3 %v7113_v53 }
 0x1e2   : > { %3459 = vmatmul.bf16.gmra.mxu0 %v7117_v28 }
 0x1e3   : > { %v3082_v23 = vpop.f32.mrf.mxu2 }
 0x1e4   : > { %v3083_v48 = vadd.f32 %v3082_v23, %v2914_v47  ;;  %v3251_v6 = vpop.f32.mrf.mxu3  ;;  %v7145_v47 = vor.u32 %v8071_v5, %v7144_v60 }
 0x1e5   : > { %v2915_v1 = vpop.f32.mrf.mxu1 }
 0x1e6   : > { %v3252_v59 = vadd.f32 %v3251_v6, %v3083_v48  ;;  %v2916_v19 = vadd.f32 %v2915_v1, %v2747_v44  ;;  %v7149_v44 = vor.u32 %v8067_v62, %v7146_v31  ;;  %v7153_v48 = vor.u32 %v8072_v3, %v7152_v27  ;;  %v8075_v27 = vld [vmem:[%s8928_s23 + $0x5ec] sm:$0xf]  ;;  %v7174_v3 = vld [vmem:[%s8928_s23 + $0x60c] sm:$0xf0] }
 0x1e7   : > { %v3422_v42 = vpop.f32.mrf.mxu0 }
 0x1e8   : > { %v9552_v55 = vadd.f32 %v3420_v49, %v3252_v59 }
 0x1eb   : > { %v3084_v39 = vpop.f32.mrf.mxu2 }
 0x1ec   : > { %v3085_v53 = vadd.f32 %v3084_v39, %v2916_v19  ;;  %v3253_v28 = vpop.f32.mrf.mxu3  ;;  %v2752_v19 = vadd.f32 %v9320_v13, %v9229_v2  ;;  %v7180_v39 = vld [vmem:[%s8928_s23 + $0x5f0] sm:$0xf]  ;;  %v2755_v2 = vadd.f32 %v9320_v13, %v9245_v24 }
 0x1ed   : > { %v2918_v23 = vpop.f32.mrf.mxu1 }
 0x1ee   : > { %v3254_v6 = vadd.f32 %v3253_v28, %v3085_v53  ;;  %v2919_v49 = vadd.f32 %v2918_v23, %v2750_v34  ;;  %v8080_v34 = vld [vmem:[%s8928_s23 + $0x610] sm:$0xf0]  ;;  %v7182_v28 = vld [vmem:[%s8928_s23 + $0x614] sm:$0xf0] }
 0x1ef   : > { %v3425_v1 = vpop.f32.mrf.mxu0  ;;  %v8076_v53 = vld [vmem:[%s8928_s23 + $0x5f4] sm:$0xf] }
 0x1f0   : > { %2957 = vmatmul.bf16.gmra.mxu1 %v7141_v29  ;;  %3126 = vmatmul.bf16.gmra.mxu2 %v7145_v47  ;;  %v9562_v59 = vadd.f32 %v3422_v42, %v3254_v6  ;;  %v7188_v29 = vld [vmem:[%s8928_s23 + $0x5f8] sm:$0xf]  ;;  %v8081_v47 = vld [vmem:[%s8928_s23 + $0x618] sm:$0xf0]  ;;  %v7177_v6 = vor.u32 %v8075_v27, %v7174_v3 }
 0x1f1   : > { %3295 = vmatmul.bf16.gmra.mxu3 %v7149_v44 }
 0x1f2   : > { %3464 = vmatmul.bf16.gmra.mxu0 %v7153_v48 }
 0x1f3   : > { %v3087_v56 = vpop.f32.mrf.mxu2 }
 0x1f4   : > { %v3088_v21 = vadd.f32 %v3087_v56, %v2919_v49  ;;  %v3256_v25 = vpop.f32.mrf.mxu3  ;;  %v7181_v49 = vor.u32 %v8080_v34, %v7180_v39 }
 0x1f5   : > { %v2920_v60 = vpop.f32.mrf.mxu1 }
 0x1f6   : > { %v3257_v5 = vadd.f32 %v3256_v25, %v3088_v21  ;;  %v2921_v62 = vadd.f32 %v2920_v60, %v2752_v19  ;;  %v7185_v19 = vor.u32 %v8076_v53, %v7182_v28  ;;  %v7189_v21 = vor.u32 %v8081_v47, %v7188_v29  ;;  %v8084_v29 = vld [vmem:[%s8928_s23 + $0x634] sm:$0xf]  ;;  %v7210_v47 = vld [vmem:[%s8928_s23 + $0x654] sm:$0xf0] }
 0x1f7   : > { %v3427_v31 = vpop.f32.mrf.mxu0 }
 0x1f8   : > { %v9568_v42 = vadd.f32 %v3425_v1, %v3257_v5 }
 0x1fb   : > { %v3089_v23 = vpop.f32.mrf.mxu2 }
 0x1fc   : > { %v3090_v44 = vadd.f32 %v3089_v23, %v2921_v62  ;;  %v3258_v48 = vpop.f32.mrf.mxu3  ;;  %v2757_v62 = vadd.f32 %v9320_v13, %v9253_v43  ;;  %v7216_v23 = vld [vmem:[%s8928_s23 + $0x638] sm:$0xf]  ;;  %v2760_v43 = vadd.f32 %v9320_v13, %v9269_v14  ;;  %v8223_v14 = vld [vmem:[%s11330_s1 + $0x188] sm:$0xff] }
 0x1fd   : > { %v2923_v56 = vpop.f32.mrf.mxu1  ;;  %v8231_v13 = vld [vmem:[%s11330_s1 + $0x1c8] sm:$0xff]  ;;  %3700 = vmatpush.bf16.msra.mxu2 %v8223_v14 }
 0x1fe   : > { %v3259_v25 = vadd.f32 %v3258_v48, %v3090_v44  ;;  %v2924_v1 = vadd.f32 %v2923_v56, %v2755_v2  ;;  %v8089_v2 = vld [vmem:[%s8928_s23 + $0x658] sm:$0xf0]  ;;  %v7218_v48 = vld [vmem:[%s8928_s23 + $0x65c] sm:$0xf0]  ;;  %3869 = vmatpush.bf16.msra.mxu3 %v8231_v13 }
 0x1ff   : > { %v3430_v60 = vpop.f32.mrf.mxu0  ;;  %v8085_v44 = vld [vmem:[%s8928_s23 + $0x63c] sm:$0xf] }
 0x200   : > { %2962 = vmatmul.bf16.gmra.mxu1 %v7177_v6  ;;  %3131 = vmatmul.bf16.gmra.mxu2 %v7181_v49  ;;  %v9578_v5 = vadd.f32 %v3427_v31, %v3259_v25  ;;  %v7224_v6 = vld [vmem:[%s8928_s23 + $0x640] sm:$0xf]  ;;  %v8090_v49 = vld [vmem:[%s8928_s23 + $0x660] sm:$0xf0]  ;;  %v7213_v25 = vor.u32 %v8084_v29, %v7210_v47 }
 0x201   : > { %3300 = vmatmul.bf16.gmra.mxu3 %v7185_v19 }
 0x202   : > { %3469 = vmatmul.bf16.gmra.mxu0 %v7189_v21 }
 0x203   : > { %v3092_v24 = vpop.f32.mrf.mxu2 }
 0x204   : > { %v3093_v27 = vadd.f32 %v3092_v24, %v2924_v1  ;;  %v3261_v3 = vpop.f32.mrf.mxu3  ;;  %v7217_v1 = vor.u32 %v8089_v2, %v7216_v23 }
 0x205   : > { %v2925_v39 = vpop.f32.mrf.mxu1 }
 0x206   : > { %v3262_v34 = vadd.f32 %v3261_v3, %v3093_v27  ;;  %v2926_v53 = vadd.f32 %v2925_v39, %v2757_v62  ;;  %v7221_v62 = vor.u32 %v8085_v44, %v7218_v48  ;;  %v7225_v27 = vor.u32 %v8090_v49, %v7224_v6  ;;  %v8215_v49 = vld [vmem:[%s11330_s1 + $0x148] sm:$0xff] }
 0x207   : > { %v3432_v28 = vpop.f32.mrf.mxu0  ;;  %3531 = vmatpush.bf16.msra.mxu1 %v8215_v49 }
 0x208   : > { %v9584_v31 = vadd.f32 %v3430_v60, %v3262_v34 }
 0x20b   : > { %v3094_v56 = vpop.f32.mrf.mxu2 }
 0x20c   : > { %v3095_v19 = vadd.f32 %v3094_v56, %v2926_v53  ;;  %v3263_v21 = vpop.f32.mrf.mxu3  ;;  %v8239_v56 = vld [vmem:[%s11330_s1 + $0x208] sm:$0xff] }
 0x20d   : > { %v2928_v24 = vpop.f32.mrf.mxu1  ;;  %4038 = vmatpush.bf16.msra.mxu0 %v8239_v56 }
 0x20e   : > { %v3264_v3 = vadd.f32 %v3263_v21, %v3095_v19  ;;  %v2929_v60 = vadd.f32 %v2928_v24, %v2760_v43  ;;  %v8093_v43 = vld [vmem:[%s8928_s23 + $0x67c] sm:$0xf]  ;;  %v7252_v21 = vld [vmem:[%s8928_s23 + $0x680] sm:$0xf]  ;;  %v7254_v24 = vld [vmem:[%s8928_s23 + $0x6a4] sm:$0xf0] }
 0x20f   : > { %v3435_v39 = vpop.f32.mrf.mxu0 }
 0x210   : > { %2967 = vmatmul.bf16.gmra.mxu1 %v7213_v25  ;;  %3136 = vmatmul.bf16.gmra.mxu2 %v7217_v1  ;;  %v9594_v34 = vadd.f32 %v3432_v28, %v3264_v3  ;;  %v9605_v28 = vld [vmem:[%s11331_s2] ss:$0 sm:$0xff]  ;;  %v8098_v25 = vld [vmem:[%s8928_s23 + $0x6a0] sm:$0xf0] }
 0x211   : > { %3305 = vmatmul.bf16.gmra.mxu3 %v7221_v62  ;;  %v2762_v29 = vadd.f32 %v9605_v28, %v9283_v54  ;;  %v7246_v54 = vld [vmem:[%s8928_s23 + $0x69c] sm:$0xf0]  ;;  %v8094_v1 = vld [vmem:[%s8928_s23 + $0x684] sm:$0xf]  ;;  %v7260_v62 = vld [vmem:[%s8928_s23 + $0x688] sm:$0xf] }
 0x212   : > { %3474 = vmatmul.bf16.gmra.mxu0 %v7225_v27  ;;  %v8099_v27 = vld [vmem:[%s8928_s23 + $0x6a8] sm:$0xf0] }
 0x213   : > { %v3097_v53 = vpop.f32.mrf.mxu2 }
 0x214   : > { %v3098_v47 = vadd.f32 %v3097_v53, %v2929_v60  ;;  %v3266_v23 = vpop.f32.mrf.mxu3  ;;  %v2765_v60 = vadd.f32 %v9605_v28, %v9305_v0  ;;  %v7249_v53 = vor.u32 %v8093_v43, %v7246_v54 }
 0x215   : > { %v2930_v2 = vpop.f32.mrf.mxu1 }
 0x216   : > { %v3267_v44 = vadd.f32 %v3266_v23, %v3098_v47  ;;  %v2931_v48 = vadd.f32 %v2930_v2, %v2762_v29  ;;  %v7253_v29 = vor.u32 %v8098_v25, %v7252_v21  ;;  %v7257_v23 = vor.u32 %v8094_v1, %v7254_v24 }
 0x217   : > { %v3437_v6 = vpop.f32.mrf.mxu0  ;;  %v7261_v2 = vor.u32 %v8099_v27, %v7260_v62  ;;  %v8102_v62 = vld [vmem:[%s8928_s23 + $0x6c4] sm:$0xf]  ;;  %v7282_v27 = vld [vmem:[%s8928_s23 + $0x6e4] sm:$0xf0] }
 0x218   : > { %v9617_v19 = vadd.f32 %v3435_v39, %v3267_v44 }
 0x21b   : > { %v3099_v3 = vpop.f32.mrf.mxu2 }
 0x21c   : > { %v3100_v14 = vadd.f32 %v3099_v3, %v2931_v48  ;;  %v3268_v13 = vpop.f32.mrf.mxu3  ;;  %v2767_v48 = vadd.f32 %v9605_v28, %v9313_v9  ;;  %v7288_v3 = vld [vmem:[%s8928_s23 + $0x6c8] sm:$0xf]  ;;  %v2770_v9 = vadd.f32 %v9605_v28, %v9117_v26 }
 0x21d   : > { %v2933_v47 = vpop.f32.mrf.mxu1 }
 0x21e   : > { %v3269_v49 = vadd.f32 %v3268_v13, %v3100_v14  ;;  %v2934_v39 = vadd.f32 %v2933_v47, %v2765_v60  ;;  %v8107_v60 = vld [vmem:[%s8928_s23 + $0x6e8] sm:$0xf0]  ;;  %v7290_v13 = vld [vmem:[%s8928_s23 + $0x6ec] sm:$0xf0] }
 0x21f   : > { %v3440_v44 = vpop.f32.mrf.mxu0  ;;  %v8103_v14 = vld [vmem:[%s8928_s23 + $0x6cc] sm:$0xf] }
 0x220   : > { %2972 = vmatmul.bf16.gmra.mxu1 %v7249_v53  ;;  %3141 = vmatmul.bf16.gmra.mxu2 %v7253_v29  ;;  %v9627_v56 = vadd.f32 %v3437_v6, %v3269_v49  ;;  %v7296_v53 = vld [vmem:[%s8928_s23 + $0x6d0] sm:$0xf]  ;;  %v8108_v29 = vld [vmem:[%s8928_s23 + $0x6f0] sm:$0xf0]  ;;  %v7285_v49 = vor.u32 %v8102_v62, %v7282_v27 }
 0x221   : > { %3310 = vmatmul.bf16.gmra.mxu3 %v7257_v23 }
 0x222   : > { %3479 = vmatmul.bf16.gmra.mxu0 %v7261_v2 }
 0x223   : > { %v3102_v0 = vpop.f32.mrf.mxu2 }
 0x224   : > { %v3103_v43 = vadd.f32 %v3102_v0, %v2934_v39  ;;  %v3271_v54 = vpop.f32.mrf.mxu3  ;;  %v7289_v39 = vor.u32 %v8107_v60, %v7288_v3 }
 0x225   : > { %v2935_v21 = vpop.f32.mrf.mxu1 }
 0x226   : > { %v3272_v25 = vadd.f32 %v3271_v54, %v3103_v43  ;;  %v2936_v1 = vadd.f32 %v2935_v21, %v2767_v48  ;;  %v7293_v48 = vor.u32 %v8103_v14, %v7290_v13  ;;  %v7297_v43 = vor.u32 %v8108_v29, %v7296_v53  ;;  %v8111_v53 = vld [vmem:[%s8928_s23 + $0x70c] sm:$0xf]  ;;  %v7318_v29 = vld [vmem:[%s8928_s23 + $0x72c] sm:$0xf0] }
 0x227   : > { %v3442_v24 = vpop.f32.mrf.mxu0 }
 0x228   : > { %v9633_v6 = vadd.f32 %v3440_v44, %v3272_v25 }
 0x22b   : > { %v3104_v47 = vpop.f32.mrf.mxu2 }
 0x22c   : > { %v3105_v23 = vadd.f32 %v3104_v47, %v2936_v1  ;;  %v3273_v2 = vpop.f32.mrf.mxu3  ;;  %v2772_v1 = vadd.f32 %v9605_v28, %v9133_v38  ;;  %v7324_v47 = vld [vmem:[%s8928_s23 + $0x710] sm:$0xf]  ;;  %v2775_v38 = vadd.f32 %v9605_v28, %v9141_v46 }
 0x22d   : > { %v2938_v0 = vpop.f32.mrf.mxu1 }
 0x22e   : > { %v3274_v54 = vadd.f32 %v3273_v2, %v3105_v23  ;;  %v2939_v44 = vadd.f32 %v2938_v0, %v2770_v9  ;;  %v8116_v9 = vld [vmem:[%s8928_s23 + $0x730] sm:$0xf0]  ;;  %v7326_v2 = vld [vmem:[%s8928_s23 + $0x734] sm:$0xf0] }
 0x22f   : > { %v3445_v21 = vpop.f32.mrf.mxu0  ;;  %v8112_v23 = vld [vmem:[%s8928_s23 + $0x714] sm:$0xf] }
 0x230   : > { %2977 = vmatmul.bf16.gmra.mxu1 %v7285_v49  ;;  %3146 = vmatmul.bf16.gmra.mxu2 %v7289_v39  ;;  %v9643_v25 = vadd.f32 %v3442_v24, %v3274_v54  ;;  %v7332_v49 = vld [vmem:[%s8928_s23 + $0x718] sm:$0xf]  ;;  %v8117_v39 = vld [vmem:[%s8928_s23 + $0x738] sm:$0xf0]  ;;  %v7321_v54 = vor.u32 %v8111_v53, %v7318_v29 }
 0x231   : > { %3315 = vmatmul.bf16.gmra.mxu3 %v7293_v48 }
 0x232   : > { %3484 = vmatmul.bf16.gmra.mxu0 %v7297_v43 }
 0x233   : > { %v3107_v26 = vpop.f32.mrf.mxu2 }
 0x234   : > { %v3108_v62 = vadd.f32 %v3107_v26, %v2939_v44  ;;  %v3276_v27 = vpop.f32.mrf.mxu3  ;;  %v7325_v44 = vor.u32 %v8116_v9, %v7324_v47 }
 0x235   : > { %v2940_v3 = vpop.f32.mrf.mxu1 }
 0x236   : > { %v3277_v60 = vadd.f32 %v3276_v27, %v3108_v62  ;;  %v2941_v14 = vadd.f32 %v2940_v3, %v2772_v1  ;;  %v7329_v1 = vor.u32 %v8112_v23, %v7326_v2  ;;  %v7333_v62 = vor.u32 %v8117_v39, %v7332_v49  ;;  %v8120_v49 = vld [vmem:[%s8928_s23 + $0x754] sm:$0xf]  ;;  %v7354_v39 = vld [vmem:[%s8928_s23 + $0x774] sm:$0xf0] }
 0x237   : > { %v3447_v13 = vpop.f32.mrf.mxu0 }
 0x238   : > { %v9649_v24 = vadd.f32 %v3445_v21, %v3277_v60 }
 0x23b   : > { %v3109_v0 = vpop.f32.mrf.mxu2 }
 0x23c   : > { %v3110_v48 = vadd.f32 %v3109_v0, %v2941_v14  ;;  %v3278_v43 = vpop.f32.mrf.mxu3  ;;  %v2777_v14 = vadd.f32 %v9605_v28, %v9157_v58  ;;  %v7360_v0 = vld [vmem:[%s8928_s23 + $0x758] sm:$0xf]  ;;  %v2780_v58 = vadd.f32 %v9605_v28, %v9171_v4  ;;  %v8222_v4 = vld [vmem:[%s11330_s1 + $0x180] sm:$0xff] }
 0x23d   : > { %v2943_v26 = vpop.f32.mrf.mxu1  ;;  %3701 = vmatpush.bf16.msra.mxu2 %v8222_v4 }
 0x23e   : > { %v3279_v27 = vadd.f32 %v3278_v43, %v3110_v48  ;;  %v2944_v21 = vadd.f32 %v2943_v26, %v2775_v38  ;;  %v8125_v38 = vld [vmem:[%s8928_s23 + $0x778] sm:$0xf0]  ;;  %v7362_v43 = vld [vmem:[%s8928_s23 + $0x77c] sm:$0xf0] }
 0x23f   : > { %v3450_v3 = vpop.f32.mrf.mxu0  ;;  %v8121_v48 = vld [vmem:[%s8928_s23 + $0x75c] sm:$0xf] }
 0x240   : > { %2982 = vmatmul.bf16.gmra.mxu1 %v7321_v54  ;;  %3151 = vmatmul.bf16.gmra.mxu2 %v7325_v44  ;;  %v9659_v60 = vadd.f32 %v3447_v13, %v3279_v27  ;;  %v7368_v54 = vld [vmem:[%s8928_s23 + $0x760] sm:$0xf]  ;;  %v8126_v44 = vld [vmem:[%s8928_s23 + $0x780] sm:$0xf0]  ;;  %v7357_v27 = vor.u32 %v8120_v49, %v7354_v39 }
 0x241   : > { %3320 = vmatmul.bf16.gmra.mxu3 %v7329_v1 }
 0x242   : > { %3489 = vmatmul.bf16.gmra.mxu0 %v7333_v62 }
 0x243   : > { %v3112_v46 = vpop.f32.mrf.mxu2 }
 0x244   : > { %v3113_v53 = vadd.f32 %v3112_v46, %v2944_v21  ;;  %v3281_v29 = vpop.f32.mrf.mxu3  ;;  %v7361_v21 = vor.u32 %v8125_v38, %v7360_v0 }
 0x245   : > { %v2945_v47 = vpop.f32.mrf.mxu1 }
 0x246   : > { %v3282_v9 = vadd.f32 %v3281_v29, %v3113_v53  ;;  %v2946_v23 = vadd.f32 %v2945_v47, %v2777_v14  ;;  %v7365_v14 = vor.u32 %v8121_v48, %v7362_v43  ;;  %v7369_v53 = vor.u32 %v8126_v44, %v7368_v54  ;;  %v8214_v44 = vld [vmem:[%s11330_s1 + $0x140] sm:$0xff] }
 0x247   : > { %v3452_v2 = vpop.f32.mrf.mxu0  ;;  %3532 = vmatpush.bf16.msra.mxu1 %v8214_v44 }
 0x248   : > { %v9665_v13 = vadd.f32 %v3450_v3, %v3282_v9 }
 0x24b   : > { %v3114_v26 = vpop.f32.mrf.mxu2 }
 0x24c   : > { %v3115_v1 = vadd.f32 %v3114_v26, %v2946_v23  ;;  %v3283_v62 = vpop.f32.mrf.mxu3  ;;  %v8230_v23 = vld [vmem:[%s11330_s1 + $0x1c0] sm:$0xff] }
 0x24d   : > { %v2948_v46 = vpop.f32.mrf.mxu1  ;;  %3870 = vmatpush.bf16.msra.mxu3 %v8230_v23  ;;  %v8238_v26 = vld [vmem:[%s11330_s1 + $0x200] sm:$0xff] }
 0x24e   : > { %v3284_v29 = vadd.f32 %v3283_v62, %v3115_v1  ;;  %v2949_v3 = vadd.f32 %v2948_v46, %v2780_v58  ;;  %v8129_v58 = vld [vmem:[%s8928_s23 + $0x79c] sm:$0xf]  ;;  %4039 = vmatpush.bf16.msra.mxu0 %v8238_v26  ;;  %v7396_v62 = vld [vmem:[%s8928_s23 + $0x7a0] sm:$0xf]  ;;  %v7398_v46 = vld [vmem:[%s8928_s23 + $0x7c4] sm:$0xf0] }
 0x24f   : > { %v3455_v47 = vpop.f32.mrf.mxu0 }
 0x250   : > { %2987 = vmatmul.bf16.gmra.mxu1 %v7357_v27  ;;  %3156 = vmatmul.bf16.gmra.mxu2 %v7361_v21  ;;  %v9675_v9 = vadd.f32 %v3452_v2, %v3284_v29  ;;  %v2782_v2 = vadd.f32 %v9605_v28, %v9193_v18  ;;  %v7390_v18 = vld [vmem:[%s8928_s23 + $0x7bc] sm:$0xf0]  ;;  %v8134_v27 = vld [vmem:[%s8928_s23 + $0x7c0] sm:$0xf0] }
 0x251   : > { %3325 = vmatmul.bf16.gmra.mxu3 %v7365_v14  ;;  %v8130_v21 = vld [vmem:[%s8928_s23 + $0x7a4] sm:$0xf]  ;;  %v7404_v14 = vld [vmem:[%s8928_s23 + $0x7a8] sm:$0xf] }
 0x252   : > { %11362 = vst [vmem:[#allocation27_spill] sm:$0xff] %v9675_v9  ;;  %3494 = vmatmul.bf16.gmra.mxu0 %v7369_v53  ;;  %v8135_v53 = vld [vmem:[%s8928_s23 + $0x7c8] sm:$0xf0] }
 0x253   : > { %v3117_v49 = vpop.f32.mrf.mxu2 }
 0x254   : > { %v3118_v39 = vadd.f32 %v3117_v49, %v2949_v3  ;;  %v3286_v0 = vpop.f32.mrf.mxu3  ;;  %v2785_v3 = vadd.f32 %v9605_v28, %v9201_v32  ;;  %v7393_v49 = vor.u32 %v8129_v58, %v7390_v18 }
 0x255   : > { %v2950_v38 = vpop.f32.mrf.mxu1 }
 0x256   : > { %v3287_v48 = vadd.f32 %v3286_v0, %v3118_v39  ;;  %v2951_v43 = vadd.f32 %v2950_v38, %v2782_v2  ;;  %v7397_v2 = vor.u32 %v8134_v27, %v7396_v62  ;;  %v7401_v0 = vor.u32 %v8130_v21, %v7398_v46 }
 0x257   : > { %v3457_v54 = vpop.f32.mrf.mxu0  ;;  %v7405_v38 = vor.u32 %v8135_v53, %v7404_v14  ;;  %v8138_v14 = vld [vmem:[%s8928_s23 + $0x7e4] sm:$0xf]  ;;  %v7426_v53 = vld [vmem:[%s8928_s23 + $0x804] sm:$0xf0] }
 0x258   : > { %v9693_v1 = vadd.f32 %v3455_v47, %v3287_v48 }
 0x25a   : > { %11363 = vst [vmem:[#allocation28_spill] sm:$0xff] %v9693_v1 }
 0x25b   : > { %v3119_v29 = vpop.f32.mrf.mxu2 }
 0x25c   : > { %v3120_v4 = vadd.f32 %v3119_v29, %v2951_v43  ;;  %v3288_v23 = vpop.f32.mrf.mxu3  ;;  %v2787_v43 = vadd.f32 %v9605_v28, %v9217_v52  ;;  %v7432_v29 = vld [vmem:[%s8928_s23 + $0x7e8] sm:$0xf]  ;;  %v2790_v52 = vadd.f32 %v9605_v28, %v9225_v63 }
 0x25d   : > { %v2953_v39 = vpop.f32.mrf.mxu1 }
 0x25e   : > { %v3289_v44 = vadd.f32 %v3288_v23, %v3120_v4  ;;  %v2954_v47 = vadd.f32 %v2953_v39, %v2785_v3  ;;  %v8143_v3 = vld [vmem:[%s8928_s23 + $0x808] sm:$0xf0]  ;;  %v7434_v23 = vld [vmem:[%s8928_s23 + $0x80c] sm:$0xf0] }
 0x25f   : > { %v3460_v48 = vpop.f32.mrf.mxu0  ;;  %v8139_v4 = vld [vmem:[%s8928_s23 + $0x7ec] sm:$0xf] }
 0x260   : > { %2992 = vmatmul.bf16.gmra.mxu1 %v7393_v49  ;;  %3161 = vmatmul.bf16.gmra.mxu2 %v7397_v2  ;;  %v9703_v26 = vadd.f32 %v3457_v54, %v3289_v44  ;;  %v7440_v49 = vld [vmem:[%s8928_s23 + $0x7f0] sm:$0xf]  ;;  %v8144_v2 = vld [vmem:[%s8928_s23 + $0x810] sm:$0xf0]  ;;  %v7429_v44 = vor.u32 %v8138_v14, %v7426_v53 }
 0x261   : > { %3330 = vmatmul.bf16.gmra.mxu3 %v7401_v0 }
 0x262   : > { %11364 = vst [vmem:[#allocation29_spill] sm:$0xff] %v9703_v26  ;;  %3499 = vmatmul.bf16.gmra.mxu0 %v7405_v38 }
 0x263   : > { %v3122_v32 = vpop.f32.mrf.mxu2 }
 0x264   : > { %v3123_v58 = vadd.f32 %v3122_v32, %v2954_v47  ;;  %v3291_v18 = vpop.f32.mrf.mxu3  ;;  %v7433_v47 = vor.u32 %v8143_v3, %v7432_v29 }
 0x265   : > { %v2955_v62 = vpop.f32.mrf.mxu1 }
 0x266   : > { %v3292_v27 = vadd.f32 %v3291_v18, %v3123_v58  ;;  %v2956_v21 = vadd.f32 %v2955_v62, %v2787_v43  ;;  %v7437_v43 = vor.u32 %v8139_v4, %v7434_v23  ;;  %v7441_v58 = vor.u32 %v8144_v2, %v7440_v49  ;;  %v8147_v49 = vld [vmem:[%s8928_s23 + $0x82c] sm:$0xf]  ;;  %v7462_v2 = vld [vmem:[%s8928_s23 + $0x84c] sm:$0xf0] }
 0x267   : > { %v3462_v46 = vpop.f32.mrf.mxu0 }
 0x268   : > { %v9709_v54 = vadd.f32 %v3460_v48, %v3292_v27 }
 0x26a   : > { %11365 = vst [vmem:[#allocation30_spill] sm:$0xff] %v9709_v54 }
 0x26b   : > { %v3124_v39 = vpop.f32.mrf.mxu2 }
 0x26c   : > { %v3125_v0 = vadd.f32 %v3124_v39, %v2956_v21  ;;  %v3293_v38 = vpop.f32.mrf.mxu3  ;;  %v2792_v21 = vadd.f32 %v9605_v28, %v9241_v16  ;;  %v7468_v39 = vld [vmem:[%s8928_s23 + $0x830] sm:$0xf] }
 0x26d   : > { %v2958_v32 = vpop.f32.mrf.mxu1 }
 0x26e   : > { %v3294_v18 = vadd.f32 %v3293_v38, %v3125_v0  ;;  %v2959_v48 = vadd.f32 %v2958_v32, %v2790_v52  ;;  %v8152_v52 = vld [vmem:[%s8928_s23 + $0x850] sm:$0xf0]  ;;  %v7470_v38 = vld [vmem:[%s8928_s23 + $0x854] sm:$0xf0] }
 0x26f   : > { %v3465_v62 = vpop.f32.mrf.mxu0  ;;  %v8148_v0 = vld [vmem:[%s8928_s23 + $0x834] sm:$0xf] }
 0x270   : > { %2997 = vmatmul.bf16.gmra.mxu1 %v7429_v44  ;;  %3166 = vmatmul.bf16.gmra.mxu2 %v7433_v47  ;;  %v9719_v27 = vadd.f32 %v3462_v46, %v3294_v18  ;;  %v7476_v44 = vld [vmem:[%s8928_s23 + $0x838] sm:$0xf]  ;;  %v8153_v47 = vld [vmem:[%s8928_s23 + $0x858] sm:$0xf0] }
 0x271   : > { %3335 = vmatmul.bf16.gmra.mxu3 %v7437_v43  ;;  %v11368_v43 = vld [vmem:[#allocation14_spill] sm:$0xff] }
 0x272   : > { %11366 = vst [vmem:[#allocation31_spill] sm:$0xff] %v9719_v27  ;;  %3504 = vmatmul.bf16.gmra.mxu0 %v7441_v58  ;;  %v2795_v16 = vadd.f32 %v9605_v28, %v11368_v43  ;;  %v7498_v43 = vld [vmem:[%s8928_s23 + $0x894] sm:$0xf0] }
 0x273   : > { %v3127_v63 = vpop.f32.mrf.mxu2 }
 0x274   : > { %v3128_v14 = vadd.f32 %v3127_v63, %v2959_v48  ;;  %v3296_v53 = vpop.f32.mrf.mxu3  ;;  %v7465_v48 = vor.u32 %v8147_v49, %v7462_v2  ;;  %v7469_v63 = vor.u32 %v8152_v52, %v7468_v39  ;;  %v11370_v49 = vld [vmem:[#allocation16_spill] sm:$0xff] }
 0x275   : > { %v2960_v29 = vpop.f32.mrf.mxu1  ;;  %v2797_v2 = vadd.f32 %v9605_v28, %v11370_v49 }
 0x276   : > { %v3297_v3 = vadd.f32 %v3296_v53, %v3128_v14  ;;  %v2961_v4 = vadd.f32 %v2960_v29, %v2792_v21  ;;  %v7473_v14 = vor.u32 %v8148_v0, %v7470_v38  ;;  %v7477_v53 = vor.u32 %v8153_v47, %v7476_v44 }
 0x277   : > { %v3467_v23 = vpop.f32.mrf.mxu0 }
 0x278   : > { %v9725_v46 = vadd.f32 %v3465_v62, %v3297_v3 }
 0x27a   : > { %11367 = vst [vmem:[#allocation32_spill] sm:$0xff] %v9725_v46 }
 0x27b   : > { %v3129_v32 = vpop.f32.mrf.mxu2 }
 0x27c   : > { %v3130_v58 = vadd.f32 %v3129_v32, %v2961_v4  ;;  %v3298_v18 = vpop.f32.mrf.mxu3  ;;  %v8156_v32 = vld [vmem:[%s8928_s23 + $0x874] sm:$0xf] }
 0x27d   : > { %v2963_v21 = vpop.f32.mrf.mxu1  ;;  %v7501_v49 = vor.u32 %v8156_v32, %v7498_v43  ;;  %v11374_v32 = vld [vmem:[#allocation20_spill] sm:$0xff] }
 0x27e   : > { %v3299_v29 = vadd.f32 %v3298_v18, %v3130_v58  ;;  %v2964_v62 = vadd.f32 %v2963_v21, %v2795_v16  ;;  %v7504_v16 = vld [vmem:[%s8928_s23 + $0x878] sm:$0xf]  ;;  %v8161_v58 = vld [vmem:[%s8928_s23 + $0x898] sm:$0xf0]  ;;  %v8162_v21 = vld [vmem:[%s8928_s23 + $0x8a0] sm:$0xf0]  ;;  %v2802_v43 = vadd.f32 %v9605_v28, %v11374_v32 }
 0x27f   : > { %v3470_v3 = vpop.f32.mrf.mxu0  ;;  %v8157_v18 = vld [vmem:[%s8928_s23 + $0x87c] sm:$0xf] }
 0x280   : > { %3002 = vmatmul.bf16.gmra.mxu1 %v7465_v48  ;;  %3171 = vmatmul.bf16.gmra.mxu2 %v7469_v63  ;;  %v9735_v46 = vadd.f32 %v3467_v23, %v3299_v29  ;;  %v7506_v48 = vld [vmem:[%s8928_s23 + $0x89c] sm:$0xf0] }
 0x281   : > { %3340 = vmatmul.bf16.gmra.mxu3 %v7473_v14  ;;  %v7512_v63 = vld [vmem:[%s8928_s23 + $0x880] sm:$0xf] }
 0x282   : > { %11369 = vst [vmem:[#allocation14_spill] sm:$0xff] %v9735_v46  ;;  %3509 = vmatmul.bf16.gmra.mxu0 %v7477_v53  ;;  %v11372_v53 = vld [vmem:[#allocation18_spill] sm:$0xff] }
 0x283   : > { %v3132_v4 = vpop.f32.mrf.mxu2  ;;  %v2800_v29 = vadd.f32 %v9605_v28, %v11372_v53  ;;  %v7534_v53 = vld [vmem:[%s8928_s23 + $0x8dc] sm:$0xf0] }
 0x284   : > { %v3133_v39 = vadd.f32 %v3132_v4, %v2964_v62  ;;  %v3301_v52 = vpop.f32.mrf.mxu3 }
 0x285   : > { %v2965_v0 = vpop.f32.mrf.mxu1 }
 0x286   : > { %v3302_v38 = vadd.f32 %v3301_v52, %v3133_v39  ;;  %v2966_v44 = vadd.f32 %v2965_v0, %v2797_v2  ;;  %v7505_v39 = vor.u32 %v8161_v58, %v7504_v16  ;;  %v7509_v52 = vor.u32 %v8157_v18, %v7506_v48 }
 0x287   : > { %v3472_v47 = vpop.f32.mrf.mxu0  ;;  %v7513_v0 = vor.u32 %v8162_v21, %v7512_v63 }
 0x288   : > { %v9741_v23 = vadd.f32 %v3470_v3, %v3302_v38 }
 0x28a   : > { %11371 = vst [vmem:[#allocation16_spill] sm:$0xff] %v9741_v23 }
 0x28b   : > { %v3134_v14 = vpop.f32.mrf.mxu2 }
 0x28c   : > { %v3135_v62 = vadd.f32 %v3134_v14, %v2966_v44  ;;  %v3303_v4 = vpop.f32.mrf.mxu3  ;;  %v8165_v14 = vld [vmem:[%s8928_s23 + $0x8bc] sm:$0xf] }
 0x28d   : > { %v2968_v2 = vpop.f32.mrf.mxu1  ;;  %v7537_v32 = vor.u32 %v8165_v14, %v7534_v53  ;;  %v11378_v14 = vld [vmem:[#allocation24_spill] sm:$0xff] }
 0x28e   : > { %v3304_v46 = vadd.f32 %v3303_v4, %v3135_v62  ;;  %v2969_v3 = vadd.f32 %v2968_v2, %v2800_v29  ;;  %v8170_v29 = vld [vmem:[%s8928_s23 + $0x8e0] sm:$0xf0]  ;;  %v7542_v4 = vld [vmem:[%s8928_s23 + $0x8e4] sm:$0xf0]  ;;  %v2807_v53 = vadd.f32 %v9605_v28, %v11378_v14 }
 0x28f   : > { %v3475_v38 = vpop.f32.mrf.mxu0  ;;  %v8166_v62 = vld [vmem:[%s8928_s23 + $0x8c4] sm:$0xf] }
 0x290   : > { %3007 = vmatmul.bf16.gmra.mxu1 %v7501_v49  ;;  %3176 = vmatmul.bf16.gmra.mxu2 %v7505_v39  ;;  %v9751_v23 = vadd.f32 %v3472_v47, %v3304_v46  ;;  %v7540_v47 = vld [vmem:[%s8928_s23 + $0x8c0] sm:$0xf]  ;;  %v7548_v49 = vld [vmem:[%s8928_s23 + $0x8c8] sm:$0xf]  ;;  %v8171_v39 = vld [vmem:[%s8928_s23 + $0x8e8] sm:$0xf0] }
 0x291   : > { %3345 = vmatmul.bf16.gmra.mxu3 %v7509_v52  ;;  %v11376_v52 = vld [vmem:[#allocation22_spill] sm:$0xff] }
 0x292   : > { %11373 = vst [vmem:[#allocation18_spill] sm:$0xff] %v9751_v23  ;;  %3514 = vmatmul.bf16.gmra.mxu0 %v7513_v0  ;;  %v2805_v0 = vadd.f32 %v9605_v28, %v11376_v52  ;;  %v6434_v52 = vld [vmem:[%s8928_s23 + $0x34] sm:$0xf0] }
 0x293   : > { %v3137_v44 = vpop.f32.mrf.mxu2 }
 0x294   : > { %v3138_v16 = vadd.f32 %v3137_v44, %v2969_v3  ;;  %v3306_v58 = vpop.f32.mrf.mxu3 }
 0x295   : > { %v2970_v18 = vpop.f32.mrf.mxu1 }
 0x296   : > { %v3307_v48 = vadd.f32 %v3306_v58, %v3138_v16  ;;  %v2971_v63 = vadd.f32 %v2970_v18, %v2802_v43  ;;  %v7541_v16 = vor.u32 %v8170_v29, %v7540_v47  ;;  %v7545_v58 = vor.u32 %v8166_v62, %v7542_v4 }
 0x297   : > { %v3477_v21 = vpop.f32.mrf.mxu0  ;;  %v7549_v18 = vor.u32 %v8171_v39, %v7548_v49 }
 0x298   : > { %v9757_v46 = vadd.f32 %v3475_v38, %v3307_v48 }
 0x29a   : > { %11375 = vst [vmem:[#allocation20_spill] sm:$0xff] %v9757_v46 }
 0x29b   : > { %v3139_v2 = vpop.f32.mrf.mxu2 }
 0x29c   : > { %v3140_v3 = vadd.f32 %v3139_v2, %v2971_v63  ;;  %v3308_v44 = vpop.f32.mrf.mxu3  ;;  %v7888_v2 = vld [vmem:[%s8928_s23 + $0x14] sm:$0xf] }
 0x29d   : > { %v2973_v43 = vpop.f32.mrf.mxu1  ;;  %v6437_v14 = vor.u32 %v7888_v2, %v6434_v52  ;;  %v11382_v2 = vld [vmem:[#allocation5_spill] sm:$0xff] }
 0x29e   : > { %v3309_v23 = vadd.f32 %v3308_v44, %v3140_v3  ;;  %v2974_v38 = vadd.f32 %v2973_v43, %v2805_v0  ;;  %v7893_v0 = vld [vmem:[%s8928_s23 + $0x38] sm:$0xf0]  ;;  %v6442_v44 = vld [vmem:[%s8928_s23 + $0x3c] sm:$0xf0]  ;;  %v2812_v52 = vadd.f32 %v9605_v28, %v11382_v2 }
 0x29f   : > { %v3480_v48 = vpop.f32.mrf.mxu0  ;;  %v7889_v3 = vld [vmem:[%s8928_s23 + $0x1c] sm:$0xf] }
 0x2a0   : > { %3012 = vmatmul.bf16.gmra.mxu1 %v7537_v32  ;;  %3181 = vmatmul.bf16.gmra.mxu2 %v7541_v16  ;;  %v9767_v46 = vadd.f32 %v3477_v21, %v3309_v23  ;;  %v6440_v21 = vld [vmem:[%s8928_s23 + $0x18] sm:$0xf]  ;;  %v6448_v32 = vld [vmem:[%s8928_s23 + $0x20] sm:$0xf]  ;;  %v7894_v16 = vld [vmem:[%s8928_s23 + $0x40] sm:$0xf0] }
 0x2a1   : > { %3350 = vmatmul.bf16.gmra.mxu3 %v7545_v58  ;;  %v11380_v58 = vld [vmem:[#allocation4_spill] sm:$0xff] }
 0x2a2   : > { %11377 = vst [vmem:[#allocation22_spill] sm:$0xff] %v9767_v46  ;;  %3519 = vmatmul.bf16.gmra.mxu0 %v7549_v18  ;;  %v2810_v18 = vadd.f32 %v9605_v28, %v11380_v58  ;;  %v6470_v58 = vld [vmem:[%s8928_s23 + $0x7c] sm:$0xf0] }
 0x2a3   : > { %v3142_v63 = vpop.f32.mrf.mxu2 }
 0x2a4   : > { %v3143_v47 = vadd.f32 %v3142_v63, %v2974_v38  ;;  %v3311_v29 = vpop.f32.mrf.mxu3 }
 0x2a5   : > { %v2975_v62 = vpop.f32.mrf.mxu1 }
 0x2a6   : > { %v3312_v4 = vadd.f32 %v3311_v29, %v3143_v47  ;;  %v2976_v49 = vadd.f32 %v2975_v62, %v2807_v53  ;;  %v6441_v47 = vor.u32 %v7893_v0, %v6440_v21  ;;  %v6445_v29 = vor.u32 %v7889_v3, %v6442_v44 }
 0x2a7   : > { %v3482_v39 = vpop.f32.mrf.mxu0  ;;  %v6449_v62 = vor.u32 %v7894_v16, %v6448_v32 }
 0x2a8   : > { %v9773_v23 = vadd.f32 %v3480_v48, %v3312_v4 }
 0x2aa   : > { %11379 = vst [vmem:[#allocation24_spill] sm:$0xff] %v9773_v23 }
 0x2ab   : > { %v3144_v43 = vpop.f32.mrf.mxu2 }
 0x2ac   : > { %v3145_v38 = vadd.f32 %v3144_v43, %v2976_v49  ;;  %v3313_v63 = vpop.f32.mrf.mxu3  ;;  %v7897_v43 = vld [vmem:[%s8928_s23 + $0x5c] sm:$0xf] }
 0x2ad   : > { %v2978_v53 = vpop.f32.mrf.mxu1  ;;  %v6473_v2 = vor.u32 %v7897_v43, %v6470_v58  ;;  %v11386_v43 = vld [vmem:[#allocation7_spill] sm:$0xff] }
 0x2ae   : > { %v3314_v46 = vadd.f32 %v3313_v63, %v3145_v38  ;;  %v2979_v48 = vadd.f32 %v2978_v53, %v2810_v18  ;;  %v7902_v18 = vld [vmem:[%s8928_s23 + $0x80] sm:$0xf0]  ;;  %v6478_v63 = vld [vmem:[%s8928_s23 + $0x84] sm:$0xf0]  ;;  %v2817_v58 = vadd.f32 %v9605_v28, %v11386_v43 }
 0x2af   : > { %v3485_v4 = vpop.f32.mrf.mxu0  ;;  %v7898_v38 = vld [vmem:[%s8928_s23 + $0x64] sm:$0xf] }
 0x2b0   : > { %3533 = vmatmul.bf16.vlgmr.msra.gmra.mxu1 %v6437_v14  ;;  %3702 = vmatmul.bf16.vlgmr.msra.gmra.mxu2 %v6441_v47  ;;  %v9783_v23 = vadd.f32 %v3482_v39, %v3314_v46  ;;  %v6476_v39 = vld [vmem:[%s8928_s23 + $0x60] sm:$0xf]  ;;  %v6484_v14 = vld [vmem:[%s8928_s23 + $0x68] sm:$0xf]  ;;  %v7903_v47 = vld [vmem:[%s8928_s23 + $0x88] sm:$0xf0] }
 0x2b1   : > { %3871 = vmatmul.bf16.vlgmr.msra.gmra.mxu3 %v6445_v29  ;;  %v11384_v29 = vld [vmem:[#allocation6_spill] sm:$0xff] }
 0x2b2   : > { %11381 = vst [vmem:[#allocation4_spill] sm:$0xff] %v9783_v23  ;;  %4040 = vmatmul.bf16.vlgmr.msra.gmra.mxu0 %v6449_v62  ;;  %v2815_v62 = vadd.f32 %v9605_v28, %v11384_v29  ;;  %v6506_v29 = vld [vmem:[%s8928_s23 + $0xc4] sm:$0xf0] }
 0x2b3   : > { %v3147_v49 = vpop.f32.mrf.mxu2 }
 0x2b4   : > { %v3148_v21 = vadd.f32 %v3147_v49, %v2979_v48  ;;  %v3316_v0 = vpop.f32.mrf.mxu3 }
 0x2b5   : > { %v2980_v3 = vpop.f32.mrf.mxu1 }
 0x2b6   : > { %v3317_v44 = vadd.f32 %v3316_v0, %v3148_v21  ;;  %v2981_v32 = vadd.f32 %v2980_v3, %v2812_v52  ;;  %v6477_v21 = vor.u32 %v7902_v18, %v6476_v39  ;;  %v6481_v0 = vor.u32 %v7898_v38, %v6478_v63 }
 0x2b7   : > { %v3487_v16 = vpop.f32.mrf.mxu0  ;;  %v6485_v3 = vor.u32 %v7903_v47, %v6484_v14 }
 0x2b8   : > { %v9789_v46 = vadd.f32 %v3485_v4, %v3317_v44 }
 0x2ba   : > { %11383 = vst [vmem:[#allocation5_spill] sm:$0xff] %v9789_v46 }
 0x2bb   : > { %v3149_v53 = vpop.f32.mrf.mxu2 }
 0x2bc   : > { %v3150_v48 = vadd.f32 %v3149_v53, %v2981_v32  ;;  %v3318_v49 = vpop.f32.mrf.mxu3  ;;  %v7906_v53 = vld [vmem:[%s8928_s23 + $0xa4] sm:$0xf] }
 0x2bd   : > { %v2983_v52 = vpop.f32.mrf.mxu1  ;;  %v6509_v43 = vor.u32 %v7906_v53, %v6506_v29  ;;  %v11390_v53 = vld [vmem:[#allocation9_spill] sm:$0xff] }
 0x2be   : > { %v3319_v23 = vadd.f32 %v3318_v49, %v3150_v48  ;;  %v2984_v4 = vadd.f32 %v2983_v52, %v2815_v62  ;;  %v7911_v62 = vld [vmem:[%s8928_s23 + $0xc8] sm:$0xf0]  ;;  %v6514_v49 = vld [vmem:[%s8928_s23 + $0xcc] sm:$0xf0]  ;;  %v2822_v29 = vadd.f32 %v9605_v28, %v11390_v53 }
 0x2bf   : > { %v3490_v44 = vpop.f32.mrf.mxu0  ;;  %v7907_v48 = vld [vmem:[%s8928_s23 + $0xac] sm:$0xf] }
 0x2c0   : > { %3538 = vmatmul.bf16.gmra.mxu1 %v6473_v2  ;;  %3707 = vmatmul.bf16.gmra.mxu2 %v6477_v21  ;;  %v9799_v46 = vadd.f32 %v3487_v16, %v3319_v23  ;;  %v6512_v16 = vld [vmem:[%s8928_s23 + $0xa8] sm:$0xf]  ;;  %v6520_v2 = vld [vmem:[%s8928_s23 + $0xb0] sm:$0xf]  ;;  %v7912_v21 = vld [vmem:[%s8928_s23 + $0xd0] sm:$0xf0] }
 0x2c1   : > { %3876 = vmatmul.bf16.gmra.mxu3 %v6481_v0  ;;  %v11388_v0 = vld [vmem:[#allocation8_spill] sm:$0xff] }
 0x2c2   : > { %11385 = vst [vmem:[#allocation6_spill] sm:$0xff] %v9799_v46  ;;  %4045 = vmatmul.bf16.gmra.mxu0 %v6485_v3  ;;  %v2820_v3 = vadd.f32 %v9605_v28, %v11388_v0  ;;  %v6542_v0 = vld [vmem:[%s8928_s23 + $0x10c] sm:$0xf0] }
 0x2c3   : > { %v3152_v32 = vpop.f32.mrf.mxu2 }
 0x2c4   : > { %v3153_v39 = vadd.f32 %v3152_v32, %v2984_v4  ;;  %v3321_v18 = vpop.f32.mrf.mxu3 }
 0x2c5   : > { %v2985_v38 = vpop.f32.mrf.mxu1 }
 0x2c6   : > { %v3322_v63 = vadd.f32 %v3321_v18, %v3153_v39  ;;  %v2986_v14 = vadd.f32 %v2985_v38, %v2817_v58  ;;  %v6513_v39 = vor.u32 %v7911_v62, %v6512_v16  ;;  %v6517_v18 = vor.u32 %v7907_v48, %v6514_v49 }
 0x2c7   : > { %v3492_v47 = vpop.f32.mrf.mxu0  ;;  %v6521_v38 = vor.u32 %v7912_v21, %v6520_v2 }
 0x2c8   : > { %v9805_v23 = vadd.f32 %v3490_v44, %v3322_v63 }
 0x2ca   : > { %11387 = vst [vmem:[#allocation7_spill] sm:$0xff] %v9805_v23 }
 0x2cb   : > { %v3154_v52 = vpop.f32.mrf.mxu2 }
 0x2cc   : > { %v3155_v4 = vadd.f32 %v3154_v52, %v2986_v14  ;;  %v3323_v32 = vpop.f32.mrf.mxu3  ;;  %v7915_v52 = vld [vmem:[%s8928_s23 + $0xec] sm:$0xf] }
 0x2cd   : > { %v2988_v58 = vpop.f32.mrf.mxu1  ;;  %v6545_v53 = vor.u32 %v7915_v52, %v6542_v0  ;;  %v11394_v52 = vld [vmem:[#allocation11_spill] sm:$0xff] }
 0x2ce   : > { %v3324_v46 = vadd.f32 %v3323_v32, %v3155_v4  ;;  %v2989_v44 = vadd.f32 %v2988_v58, %v2820_v3  ;;  %v7920_v3 = vld [vmem:[%s8928_s23 + $0x110] sm:$0xf0]  ;;  %v6550_v32 = vld [vmem:[%s8928_s23 + $0x114] sm:$0xf0]  ;;  %v2827_v0 = vadd.f32 %v9605_v28, %v11394_v52 }
 0x2cf   : > { %v3495_v63 = vpop.f32.mrf.mxu0  ;;  %v7916_v4 = vld [vmem:[%s8928_s23 + $0xf4] sm:$0xf] }
 0x2d0   : > { %3543 = vmatmul.bf16.gmra.mxu1 %v6509_v43  ;;  %3712 = vmatmul.bf16.gmra.mxu2 %v6513_v39  ;;  %v9815_v23 = vadd.f32 %v3492_v47, %v3324_v46  ;;  %v6548_v47 = vld [vmem:[%s8928_s23 + $0xf0] sm:$0xf]  ;;  %v6556_v43 = vld [vmem:[%s8928_s23 + $0xf8] sm:$0xf]  ;;  %v7921_v39 = vld [vmem:[%s8928_s23 + $0x118] sm:$0xf0] }
 0x2d1   : > { %3881 = vmatmul.bf16.gmra.mxu3 %v6517_v18  ;;  %v11392_v18 = vld [vmem:[#allocation10_spill] sm:$0xff] }
 0x2d2   : > { %11389 = vst [vmem:[#allocation8_spill] sm:$0xff] %v9815_v23  ;;  %4050 = vmatmul.bf16.gmra.mxu0 %v6521_v38  ;;  %v2825_v38 = vadd.f32 %v9605_v28, %v11392_v18  ;;  %v6578_v18 = vld [vmem:[%s8928_s23 + $0x154] sm:$0xf0] }
 0x2d3   : > { %v3157_v14 = vpop.f32.mrf.mxu2 }
 0x2d4   : > { %v3158_v16 = vadd.f32 %v3157_v14, %v2989_v44  ;;  %v3326_v62 = vpop.f32.mrf.mxu3 }
 0x2d5   : > { %v2990_v48 = vpop.f32.mrf.mxu1 }
 0x2d6   : > { %v3327_v49 = vadd.f32 %v3326_v62, %v3158_v16  ;;  %v2991_v2 = vadd.f32 %v2990_v48, %v2822_v29  ;;  %v6549_v16 = vor.u32 %v7920_v3, %v6548_v47  ;;  %v6553_v62 = vor.u32 %v7916_v4, %v6550_v32 }
 0x2d7   : > { %v3497_v21 = vpop.f32.mrf.mxu0  ;;  %v6557_v48 = vor.u32 %v7921_v39, %v6556_v43 }
 0x2d8   : > { %v9821_v46 = vadd.f32 %v3495_v63, %v3327_v49 }
 0x2da   : > { %11391 = vst [vmem:[#allocation9_spill] sm:$0xff] %v9821_v46 }
 0x2db   : > { %v3159_v58 = vpop.f32.mrf.mxu2 }
 0x2dc   : > { %v3160_v44 = vadd.f32 %v3159_v58, %v2991_v2  ;;  %v3328_v14 = vpop.f32.mrf.mxu3  ;;  %v7924_v58 = vld [vmem:[%s8928_s23 + $0x134] sm:$0xf] }
 0x2dd   : > { %v2993_v29 = vpop.f32.mrf.mxu1  ;;  %v6581_v52 = vor.u32 %v7924_v58, %v6578_v18  ;;  %v11398_v58 = vld [vmem:[#allocation13_spill] sm:$0xff] }
 0x2de   : > { %v3329_v23 = vadd.f32 %v3328_v14, %v3160_v44  ;;  %v2994_v63 = vadd.f32 %v2993_v29, %v2825_v38  ;;  %v7929_v38 = vld [vmem:[%s8928_s23 + $0x158] sm:$0xf0]  ;;  %v6586_v14 = vld [vmem:[%s8928_s23 + $0x15c] sm:$0xf0]  ;;  %v2832_v18 = vadd.f32 %v9605_v28, %v11398_v58 }
 0x2df   : > { %v3500_v49 = vpop.f32.mrf.mxu0  ;;  %v7925_v44 = vld [vmem:[%s8928_s23 + $0x13c] sm:$0xf] }
 0x2e0   : > { %3548 = vmatmul.bf16.gmra.mxu1 %v6545_v53  ;;  %3717 = vmatmul.bf16.gmra.mxu2 %v6549_v16  ;;  %v9831_v46 = vadd.f32 %v3497_v21, %v3329_v23  ;;  %v6584_v21 = vld [vmem:[%s8928_s23 + $0x138] sm:$0xf]  ;;  %v6592_v53 = vld [vmem:[%s8928_s23 + $0x140] sm:$0xf]  ;;  %v7930_v16 = vld [vmem:[%s8928_s23 + $0x160] sm:$0xf0] }
 0x2e1   : > { %3886 = vmatmul.bf16.gmra.mxu3 %v6553_v62  ;;  %v11396_v62 = vld [vmem:[#allocation12_spill] sm:$0xff] }
 0x2e2   : > { %11393 = vst [vmem:[#allocation10_spill] sm:$0xff] %v9831_v46  ;;  %4055 = vmatmul.bf16.gmra.mxu0 %v6557_v48  ;;  %v2830_v48 = vadd.f32 %v9605_v28, %v11396_v62  ;;  %v6614_v62 = vld [vmem:[%s8928_s23 + $0x19c] sm:$0xf0] }
 0x2e3   : > { %v3162_v2 = vpop.f32.mrf.mxu2 }
 0x2e4   : > { %v3163_v47 = vadd.f32 %v3162_v2, %v2994_v63  ;;  %v3331_v3 = vpop.f32.mrf.mxu3 }
 0x2e5   : > { %v2995_v4 = vpop.f32.mrf.mxu1 }
 0x2e6   : > { %v3332_v32 = vadd.f32 %v3331_v3, %v3163_v47  ;;  %v2996_v43 = vadd.f32 %v2995_v4, %v2827_v0  ;;  %v6585_v47 = vor.u32 %v7929_v38, %v6584_v21  ;;  %v6589_v3 = vor.u32 %v7925_v44, %v6586_v14 }
 0x2e7   : > { %v3502_v39 = vpop.f32.mrf.mxu0  ;;  %v6593_v4 = vor.u32 %v7930_v16, %v6592_v53 }
 0x2e8   : > { %v9837_v23 = vadd.f32 %v3500_v49, %v3332_v32 }
 0x2ea   : > { %11395 = vst [vmem:[#allocation11_spill] sm:$0xff] %v9837_v23 }
 0x2eb   : > { %v3164_v29 = vpop.f32.mrf.mxu2 }
 0x2ec   : > { %v3165_v63 = vadd.f32 %v3164_v29, %v2996_v43  ;;  %v3333_v2 = vpop.f32.mrf.mxu3  ;;  %v7933_v29 = vld [vmem:[%s8928_s23 + $0x17c] sm:$0xf] }
 0x2ed   : > { %v2998_v0 = vpop.f32.mrf.mxu1  ;;  %v6617_v58 = vor.u32 %v7933_v29, %v6614_v62  ;;  %v11402_v29 = vld [vmem:[#allocation17_spill] sm:$0xff] }
 0x2ee   : > { %v3334_v46 = vadd.f32 %v3333_v2, %v3165_v63  ;;  %v2999_v49 = vadd.f32 %v2998_v0, %v2830_v48  ;;  %v7938_v48 = vld [vmem:[%s8928_s23 + $0x1a0] sm:$0xf0]  ;;  %v6622_v2 = vld [vmem:[%s8928_s23 + $0x1a4] sm:$0xf0] }
 0x2ef   : > { %v3505_v32 = vpop.f32.mrf.mxu0  ;;  %v7934_v63 = vld [vmem:[%s8928_s23 + $0x184] sm:$0xf] }
 0x2f0   : > { %3553 = vmatmul.bf16.gmra.mxu1 %v6581_v52  ;;  %3722 = vmatmul.bf16.gmra.mxu2 %v6585_v47  ;;  %v9847_v23 = vadd.f32 %v3502_v39, %v3334_v46  ;;  %v6620_v39 = vld [vmem:[%s8928_s23 + $0x180] sm:$0xf]  ;;  %v6628_v52 = vld [vmem:[%s8928_s23 + $0x188] sm:$0xf]  ;;  %v7939_v47 = vld [vmem:[%s8928_s23 + $0x1a8] sm:$0xf0] }
 0x2f1   : > { %3891 = vmatmul.bf16.gmra.mxu3 %v6589_v3  ;;  %v11400_v3 = vld [vmem:[#allocation15_spill] sm:$0xff] }
 0x2f2   : > { %11397 = vst [vmem:[#allocation12_spill] sm:$0xff] %v9847_v23  ;;  %4060 = vmatmul.bf16.gmra.mxu0 %v6593_v4  ;;  %v2835_v4 = vadd.f32 %v9605_v28, %v11400_v3  ;;  %v6656_v3 = vld [vmem:[%s8928_s23 + $0x1c8] sm:$0xf] }
 0x2f3   : > { %v3167_v43 = vpop.f32.mrf.mxu2 }
 0x2f4   : > { %v3168_v21 = vadd.f32 %v3167_v43, %v2999_v49  ;;  %v3336_v38 = vpop.f32.mrf.mxu3 }
 0x2f5   : > { %v3000_v44 = vpop.f32.mrf.mxu1 }
 0x2f6   : > { %v3337_v14 = vadd.f32 %v3336_v38, %v3168_v21  ;;  %v3001_v53 = vadd.f32 %v3000_v44, %v2832_v18  ;;  %v6621_v21 = vor.u32 %v7938_v48, %v6620_v39  ;;  %v6625_v38 = vor.u32 %v7934_v63, %v6622_v2 }
 0x2f7   : > { %v3507_v16 = vpop.f32.mrf.mxu0  ;;  %v6629_v44 = vor.u32 %v7939_v47, %v6628_v52  ;;  %v7942_v52 = vld [vmem:[%s8928_s23 + $0x1c4] sm:$0xf]  ;;  %v6650_v47 = vld [vmem:[%s8928_s23 + $0x1e4] sm:$0xf0] }
 0x2f8   : > { %v9853_v46 = vadd.f32 %v3505_v32, %v3337_v14 }
 0x2fa   : > { %11399 = vst [vmem:[#allocation13_spill] sm:$0xff] %v9853_v46 }
 0x2fb   : > { %v3169_v0 = vpop.f32.mrf.mxu2 }
 0x2fc   : > { %v3170_v49 = vadd.f32 %v3169_v0, %v3001_v53  ;;  %v3338_v43 = vpop.f32.mrf.mxu3  ;;  %v9868_v53 = vld [vmem:[%s11331_s2] ss:$0 sm:$0xff] }
 0x2fd   : > { %v3003_v18 = vpop.f32.mrf.mxu1  ;;  %v2837_v62 = vadd.f32 %v9868_v53, %v11402_v29  ;;  %v6653_v29 = vor.u32 %v7942_v52, %v6650_v47  ;;  %v11406_v52 = vld [vmem:[#allocation21_spill] sm:$0xff] }
 0x2fe   : > { %v3339_v23 = vadd.f32 %v3338_v43, %v3170_v49  ;;  %v3004_v32 = vadd.f32 %v3003_v18, %v2835_v4  ;;  %v7947_v4 = vld [vmem:[%s8928_s23 + $0x1e8] sm:$0xf0]  ;;  %v6658_v43 = vld [vmem:[%s8928_s23 + $0x1ec] sm:$0xf0]  ;;  %v2842_v47 = vadd.f32 %v9868_v53, %v11406_v52 }
 0x2ff   : > { %v3510_v14 = vpop.f32.mrf.mxu0  ;;  %v7943_v49 = vld [vmem:[%s8928_s23 + $0x1cc] sm:$0xf] }
 0x300   : > { %3558 = vmatmul.bf16.gmra.mxu1 %v6617_v58  ;;  %3727 = vmatmul.bf16.gmra.mxu2 %v6621_v21  ;;  %v9863_v46 = vadd.f32 %v3507_v16, %v3339_v23  ;;  %v6664_v58 = vld [vmem:[%s8928_s23 + $0x1d0] sm:$0xf]  ;;  %v7948_v21 = vld [vmem:[%s8928_s23 + $0x1f0] sm:$0xf0] }
 0x301   : > { %3896 = vmatmul.bf16.gmra.mxu3 %v6625_v38  ;;  %v11404_v38 = vld [vmem:[#allocation19_spill] sm:$0xff] }
 0x302   : > { %11401 = vst [vmem:[#allocation15_spill] sm:$0xff] %v9863_v46  ;;  %4065 = vmatmul.bf16.gmra.mxu0 %v6629_v44  ;;  %v2840_v44 = vadd.f32 %v9868_v53, %v11404_v38  ;;  %v6686_v38 = vld [vmem:[%s8928_s23 + $0x22c] sm:$0xf0] }
 0x303   : > { %v3172_v28 = vpop.f32.mrf.mxu2 }
 0x304   : > { %v3173_v39 = vadd.f32 %v3172_v28, %v3004_v32  ;;  %v3341_v48 = vpop.f32.mrf.mxu3 }
 0x305   : > { %v3005_v23 = vpop.f32.mrf.mxu1 }
 0x306   : > { %v3342_v16 = vadd.f32 %v3341_v48, %v3173_v39  ;;  %v3006_v63 = vadd.f32 %v3005_v23, %v2837_v62  ;;  %v6657_v39 = vor.u32 %v7947_v4, %v6656_v3  ;;  %v6661_v48 = vor.u32 %v7943_v49, %v6658_v43 }
 0x307   : > { %v3512_v2 = vpop.f32.mrf.mxu0  ;;  %v6665_v23 = vor.u32 %v7948_v21, %v6664_v58 }
 0x308   : > { %v9874_v0 = vadd.f32 %v3510_v14, %v3342_v16 }
 0x30a   : > { %11403 = vst [vmem:[#allocation17_spill] sm:$0xff] %v9874_v0 }
 0x30b   : > { %v3174_v18 = vpop.f32.mrf.mxu2 }
 0x30c   : > { %v3175_v32 = vadd.f32 %v3174_v18, %v3006_v63  ;;  %v3343_v28 = vpop.f32.mrf.mxu3  ;;  %v7951_v18 = vld [vmem:[%s8928_s23 + $0x20c] sm:$0xf] }
 0x30d   : > { %v3008_v62 = vpop.f32.mrf.mxu1  ;;  %v6689_v52 = vor.u32 %v7951_v18, %v6686_v38  ;;  %v11410_v18 = vld [vmem:[#allocation25_spill] sm:$0xff] }
 0x30e   : > { %v3344_v46 = vadd.f32 %v3343_v28, %v3175_v32  ;;  %v3009_v14 = vadd.f32 %v3008_v62, %v2840_v44  ;;  %v7956_v44 = vld [vmem:[%s8928_s23 + $0x230] sm:$0xf0]  ;;  %v6694_v28 = vld [vmem:[%s8928_s23 + $0x234] sm:$0xf0]  ;;  %v2847_v38 = vadd.f32 %v9868_v53, %v11410_v18 }
 0x30f   : > { %v3515_v16 = vpop.f32.mrf.mxu0  ;;  %v7952_v32 = vld [vmem:[%s8928_s23 + $0x214] sm:$0xf] }
 0x310   : > { %3563 = vmatmul.bf16.gmra.mxu1 %v6653_v29  ;;  %3732 = vmatmul.bf16.gmra.mxu2 %v6657_v39  ;;  %v9884_v0 = vadd.f32 %v3512_v2, %v3344_v46  ;;  %v6692_v2 = vld [vmem:[%s8928_s23 + $0x210] sm:$0xf]  ;;  %v6700_v29 = vld [vmem:[%s8928_s23 + $0x218] sm:$0xf]  ;;  %v7957_v39 = vld [vmem:[%s8928_s23 + $0x238] sm:$0xf0] }
 0x311   : > { %3901 = vmatmul.bf16.gmra.mxu3 %v6661_v48  ;;  %v11408_v48 = vld [vmem:[#allocation23_spill] sm:$0xff] }
 0x312   : > { %11405 = vst [vmem:[#allocation19_spill] sm:$0xff] %v9884_v0  ;;  %4070 = vmatmul.bf16.gmra.mxu0 %v6665_v23  ;;  %v2845_v23 = vadd.f32 %v9868_v53, %v11408_v48  ;;  %v6722_v48 = vld [vmem:[%s8928_s23 + $0x274] sm:$0xf0] }
 0x313   : > { %v3177_v63 = vpop.f32.mrf.mxu2 }
 0x314   : > { %v3178_v3 = vadd.f32 %v3177_v63, %v3009_v14  ;;  %v3346_v4 = vpop.f32.mrf.mxu3 }
 0x315   : > { %v3010_v49 = vpop.f32.mrf.mxu1 }
 0x316   : > { %v3347_v43 = vadd.f32 %v3346_v4, %v3178_v3  ;;  %v3011_v58 = vadd.f32 %v3010_v49, %v2842_v47  ;;  %v6693_v3 = vor.u32 %v7956_v44, %v6692_v2  ;;  %v6697_v4 = vor.u32 %v7952_v32, %v6694_v28 }
 0x317   : > { %v3517_v21 = vpop.f32.mrf.mxu0  ;;  %v6701_v49 = vor.u32 %v7957_v39, %v6700_v29 }
 0x318   : > { %v9890_v46 = vadd.f32 %v3515_v16, %v3347_v43 }
 0x31a   : > { %11407 = vst [vmem:[#allocation21_spill] sm:$0xff] %v9890_v46 }
 0x31b   : > { %v3179_v62 = vpop.f32.mrf.mxu2 }
 0x31c   : > { %v3180_v14 = vadd.f32 %v3179_v62, %v3011_v58  ;;  %v3348_v63 = vpop.f32.mrf.mxu3  ;;  %v7960_v62 = vld [vmem:[%s8928_s23 + $0x254] sm:$0xf] }
 0x31d   : > { %v3013_v47 = vpop.f32.mrf.mxu1  ;;  %v6725_v53 = vor.u32 %v7960_v62, %v6722_v48 }
 0x31e   : > { %v3349_v0 = vadd.f32 %v3348_v63, %v3180_v14  ;;  %v3014_v16 = vadd.f32 %v3013_v47, %v2845_v23  ;;  %v7965_v23 = vld [vmem:[%s8928_s23 + $0x278] sm:$0xf0]  ;;  %v6730_v63 = vld [vmem:[%s8928_s23 + $0x27c] sm:$0xf0] }
 0x31f   : > { %v3520_v43 = vpop.f32.mrf.mxu0  ;;  %v7961_v14 = vld [vmem:[%s8928_s23 + $0x25c] sm:$0xf] }
 0x320   : > { %3568 = vmatmul.bf16.gmra.mxu1 %v6689_v52  ;;  %3737 = vmatmul.bf16.gmra.mxu2 %v6693_v3  ;;  %v9900_v46 = vadd.f32 %v3517_v21, %v3349_v0  ;;  %v6728_v21 = vld [vmem:[%s8928_s23 + $0x258] sm:$0xf]  ;;  %v6736_v52 = vld [vmem:[%s8928_s23 + $0x260] sm:$0xf]  ;;  %v7966_v3 = vld [vmem:[%s8928_s23 + $0x280] sm:$0xf0]  ;;  %v6733_v18 = vor.u32 %v7961_v14, %v6730_v63 }
 0x321   : > { %3906 = vmatmul.bf16.gmra.mxu3 %v6697_v4  ;;  %v7969_v63 = vld [vmem:[%s8928_s23 + $0x29c] sm:$0xf] }
 0x322   : > { %11409 = vst [vmem:[#allocation23_spill] sm:$0xff] %v9900_v46  ;;  %4075 = vmatmul.bf16.gmra.mxu0 %v6701_v49 }
 0x323   : > { %v3182_v58 = vpop.f32.mrf.mxu2 }
 0x324   : > { %v3183_v2 = vadd.f32 %v3182_v58, %v3014_v16  ;;  %v3351_v44 = vpop.f32.mrf.mxu3  ;;  %v6729_v16 = vor.u32 %v7965_v23, %v6728_v21 }
 0x325   : > { %v3015_v32 = vpop.f32.mrf.mxu1 }
 0x326   : > { %v3352_v28 = vadd.f32 %v3351_v44, %v3183_v2  ;;  %v3016_v29 = vadd.f32 %v3015_v32, %v2847_v38  ;;  %v6737_v38 = vor.u32 %v7966_v3, %v6736_v52  ;;  %v11413_v32 = vld [vmem:[#allocation26_spill] sm:$0xff]  ;;  %v6758_v52 = vld [vmem:[%s8928_s23 + $0x2bc] sm:$0xf0] }
 0x327   : > { %v3522_v39 = vpop.f32.mrf.mxu0  ;;  %v6764_v3 = vld [vmem:[%s8928_s23 + $0x2a0] sm:$0xf] }
 0x328   : > { %v9906_v0 = vadd.f32 %v3520_v43, %v3352_v28 }
 0x32a   : > { %11411 = vst [vmem:[#allocation25_spill] sm:$0xff] %v9906_v0 }
 0x32b   : > { %v3184_v47 = vpop.f32.mrf.mxu2 }
 0x32c   : > { %v3185_v4 = vadd.f32 %v3184_v47, %v3016_v29  ;;  %v3353_v49 = vpop.f32.mrf.mxu3  ;;  %v7974_v47 = vld [vmem:[%s8928_s23 + $0x2c0] sm:$0xf0] }
 0x32d   : > { %v3534_v58 = vpop.f32.mrf.mxu1 }
 0x32e   : > { %v3354_v2 = vadd.f32 %v3353_v49, %v3185_v4  ;;  %v3535_v28 = vadd.f32 %v3534_v58, %v11413_v32  ;;  %v7970_v4 = vld [vmem:[%s8928_s23 + $0x2a4] sm:$0xf]  ;;  %v6766_v49 = vld [vmem:[%s8928_s23 + $0x2c4] sm:$0xf0]  ;;  %v7975_v58 = vld [vmem:[%s8928_s23 + $0x2c8] sm:$0xf0] }
 0x32f   : > { %v4041_v44 = vpop.f32.mrf.mxu0 }
 0x330   : > { %3573 = vmatmul.bf16.gmra.mxu1 %v6725_v53  ;;  %3742 = vmatmul.bf16.gmra.mxu2 %v6729_v16  ;;  %v9914_v43 = vadd.f32 %v3522_v39, %v3354_v2  ;;  %v6772_v53 = vld [vmem:[%s8928_s23 + $0x2a8] sm:$0xf] }
 0x331   : > { %3911 = vmatmul.bf16.gmra.mxu3 %v6733_v18 }
 0x332   : > { %11412 = vst [vmem:[#allocation33_spill] sm:$0xff] %v9914_v43  ;;  %4080 = vmatmul.bf16.gmra.mxu0 %v6737_v38 }
 0x333   : > { %v3703_v29 = vpop.f32.mrf.mxu2 }
 0x334   : > { %v3704_v62 = vadd.f32 %v3703_v29, %v3535_v28  ;;  %v3872_v48 = vpop.f32.mrf.mxu3  ;;  %v6761_v29 = vor.u32 %v7969_v63, %v6758_v52 }
 0x335   : > { %v3536_v21 = vpop.f32.mrf.mxu1 }
 0x336   : > { %v3873_v23 = vadd.f32 %v3872_v48, %v3704_v62  ;;  %v3537_v16 = vadd.f32 %v3536_v21, %v9350_v57  ;;  %v6765_v62 = vor.u32 %v7974_v47, %v6764_v3 }
 0x337   : > { %v4043_v14 = vpop.f32.mrf.mxu0 }
 0x338   : > { %v4042_v39 = vadd.f32 %v4041_v44, %v3873_v23  ;;  %v6769_v44 = vor.u32 %v7970_v4, %v6766_v49  ;;  %v6773_v23 = vor.u32 %v7975_v58, %v6772_v53 }
 0x33a   : > { %v4201_v18 = vmul.f32 0.999, %v4042_v39  ;;  %v4265_v38 = vmul.f32 0.001, %v4042_v39 }
 0x33b   : > { %v3705_v2 = vpop.f32.mrf.mxu2 }
 0x33c   : > { %v3706_v32 = vadd.f32 %v3705_v2, %v3537_v16  ;;  %v3874_v28 = vpop.f32.mrf.mxu3  ;;  %v4329_v48 = vadd.f32 %v4265_v38, %v4201_v18  ;;  %v6794_v18 = vld [vmem:[%s8928_s23 + $0x304] sm:$0xf0]  ;;  %v7983_v2 = vld [vmem:[%s8928_s23 + $0x308] sm:$0xf0] }
 0x33d   : > { %v3539_v43 = vpop.f32.mrf.mxu1  ;;  %v6800_v38 = vld [vmem:[%s8928_s23 + $0x2e8] sm:$0xf] }
 0x33e   : > { %v3875_v0 = vadd.f32 %v3874_v28, %v3706_v32  ;;  %v9929_v27 = vsub.f32 %v4042_v39, %v4329_v48  ;;  %5673 = vst [vmem:[%s9932_s18] sm:$0xff] %v4329_v48  ;;  %v3540_v63 = vadd.f32 %v3539_v43, %v9356_v40  ;;  %v7978_v40 = vld [vmem:[%s8928_s23 + $0x2e4] sm:$0xf]  ;;  %v7979_v32 = vld [vmem:[%s8928_s23 + $0x2ec] sm:$0xf]  ;;  %v6802_v28 = vld [vmem:[%s8928_s23 + $0x30c] sm:$0xf0] }
 0x33f   : > { %v4046_v46 = vpop.f32.mrf.mxu0  ;;  %v7984_v48 = vld [vmem:[%s8928_s23 + $0x310] sm:$0xf0] }
 0x340   : > { %v4044_v57 = vadd.f32 %v4043_v14, %v3875_v0  ;;  %3578 = vmatmul.bf16.gmra.mxu1 %v6761_v29  ;;  %3747 = vmatmul.bf16.gmra.mxu2 %v6765_v62  ;;  %v4457_v21 = vmul.f32 %v9929_v27, %v9929_v27  ;;  %v6808_v29 = vld [vmem:[%s8928_s23 + $0x2f0] sm:$0xf] }
 0x341   : > { %3916 = vmatmul.bf16.gmra.mxu3 %v6769_v44 }
 0x342   : > { %4085 = vmatmul.bf16.gmra.mxu0 %v6773_v23  ;;  %4521 = vadd.xlane.f32.xlu0 %v4457_v21  ;;  %v4202_v39 = vmul.f32 0.999, %v4044_v57  ;;  %v4266_v52 = vmul.f32 0.001, %v4044_v57 }
 0x343   : > { %v3708_v3 = vpop.f32.mrf.mxu2 }
 0x344   : > { %v3709_v0 = vadd.f32 %v3708_v3, %v3540_v63  ;;  %v3877_v14 = vpop.f32.mrf.mxu3  ;;  %v4330_v47 = vadd.f32 %v4266_v52, %v4202_v39  ;;  %v6801_v39 = vor.u32 %v7983_v2, %v6800_v38 }
 0x345   : > { %v3541_v4 = vpop.f32.mrf.mxu1 }
 0x346   : > { %v3878_v49 = vadd.f32 %v3877_v14, %v3709_v0  ;;  %v9938_v16 = vsub.f32 %v4044_v57, %v4330_v47  ;;  %5674 = vst [vmem:[%s9932_s18 + $0x8] sm:$0xff] %v4330_v47  ;;  %v3542_v62 = vadd.f32 %v3541_v4, %v9366_v36  ;;  %v6805_v0 = vor.u32 %v7979_v32, %v6802_v28 }
 0x347   : > { %v4048_v53 = vpop.f32.mrf.mxu0  ;;  %v6809_v14 = vor.u32 %v7984_v48, %v6808_v29 }
 0x348   : > { %v4047_v43 = vadd.f32 %v4046_v46, %v3878_v49  ;;  %v4458_v58 = vmul.f32 %v9938_v16, %v9938_v16  ;;  %v6797_v46 = vor.u32 %v7978_v40, %v6794_v18 }
 0x34a   : > { %4523 = vadd.xlane.f32.xlu0 %v4458_v58  ;;  %v4203_v44 = vmul.f32 0.999, %v4047_v43  ;;  %v4267_v23 = vmul.f32 0.001, %v4047_v43 }
 0x34b   : > { %v3710_v57 = vpop.f32.mrf.mxu2 }
 0x34c   : > { %v3711_v21 = vadd.f32 %v3710_v57, %v3542_v62  ;;  %v3879_v63 = vpop.f32.mrf.mxu3  ;;  %v4331_v52 = vadd.f32 %v4267_v23, %v4203_v44  ;;  %v6830_v23 = vld [vmem:[%s8928_s23 + $0x34c] sm:$0xf0] }
 0x34d   : > { %v3544_v3 = vpop.f32.mrf.mxu1  ;;  %v6836_v57 = vld [vmem:[%s8928_s23 + $0x330] sm:$0xf] }
 0x34e   : > { %v3880_v47 = vadd.f32 %v3879_v63, %v3711_v21  ;;  %v9952_v54 = vsub.f32 %v4047_v43, %v4331_v52  ;;  %5675 = vst [vmem:[%s9932_s18 + $0x10] sm:$0xff] %v4331_v52  ;;  %v3545_v40 = vadd.f32 %v3544_v3, %v9384_v15  ;;  %v7987_v15 = vld [vmem:[%s8928_s23 + $0x32c] sm:$0xf]  ;;  %v7992_v21 = vld [vmem:[%s8928_s23 + $0x350] sm:$0xf0] }
 0x34f   : > { %v4051_v49 = vpop.f32.mrf.mxu0  ;;  %v7988_v63 = vld [vmem:[%s8928_s23 + $0x334] sm:$0xf]  ;;  %v7993_v3 = vld [vmem:[%s8928_s23 + $0x358] sm:$0xf0] }
 0x350   : > { %v4049_v36 = vadd.f32 %v4048_v53, %v3880_v47  ;;  %3583 = vmatmul.bf16.gmra.mxu1 %v6797_v46  ;;  %3752 = vmatmul.bf16.gmra.mxu2 %v6801_v39  ;;  %v4459_v4 = vmul.f32 %v9952_v54, %v9952_v54  ;;  %v6838_v46 = vld [vmem:[%s8928_s23 + $0x354] sm:$0xf0] }
 0x351   : > { %3921 = vmatmul.bf16.gmra.mxu3 %v6805_v0  ;;  %v6844_v39 = vld [vmem:[%s8928_s23 + $0x338] sm:$0xf] }
 0x352   : > { %4090 = vmatmul.bf16.gmra.mxu0 %v6809_v14  ;;  %4525 = vadd.xlane.f32.xlu1 %v4459_v4  ;;  %v4204_v58 = vmul.f32 0.999, %v4049_v36  ;;  %v4268_v43 = vmul.f32 0.001, %v4049_v36 }
 0x353   : > { %v3713_v18 = vpop.f32.mrf.mxu2 }
 0x354   : > { %v3714_v53 = vadd.f32 %v3713_v18, %v3545_v40  ;;  %v3882_v38 = vpop.f32.mrf.mxu3  ;;  %v4332_v2 = vadd.f32 %v4268_v43, %v4204_v58  ;;  %v6837_v40 = vor.u32 %v7992_v21, %v6836_v57  ;;  %v6841_v18 = vor.u32 %v7988_v63, %v6838_v46 }
 0x355   : > { %v3546_v32 = vpop.f32.mrf.mxu1 }
 0x356   : > { %v3883_v28 = vadd.f32 %v3882_v38, %v3714_v53  ;;  %v9958_v62 = vsub.f32 %v4049_v36, %v4332_v2  ;;  %5676 = vst [vmem:[%s9932_s18 + $0x18] sm:$0xff] %v4332_v2  ;;  %v3547_v52 = vadd.f32 %v3546_v32, %v9394_v20  ;;  %v6845_v53 = vor.u32 %v7993_v3, %v6844_v39 }
 0x357   : > { %v4053_v29 = vpop.f32.mrf.mxu0 }
 0x358   : > { %v4052_v48 = vadd.f32 %v4051_v49, %v3883_v28  ;;  %v4460_v44 = vmul.f32 %v9958_v62, %v9958_v62  ;;  %v6833_v49 = vor.u32 %v7987_v15, %v6830_v23 }
 0x35a   : > { %4527 = vadd.xlane.f32.xlu1 %v4460_v44  ;;  %v4205_v0 = vmul.f32 0.999, %v4052_v48  ;;  %v4269_v14 = vmul.f32 0.001, %v4052_v48 }
 0x35b   : > { %v3715_v47 = vpop.f32.mrf.mxu2 }
 0x35c   : > { %v3716_v36 = vadd.f32 %v3715_v47, %v3547_v52  ;;  %v3884_v4 = vpop.f32.mrf.mxu3  ;;  %v4333_v58 = vadd.f32 %v4269_v14, %v4205_v0  ;;  %v6866_v14 = vld [vmem:[%s8928_s23 + $0x394] sm:$0xf0] }
 0x35d   : > { %v3549_v43 = vpop.f32.mrf.mxu1  ;;  %v6872_v47 = vld [vmem:[%s8928_s23 + $0x378] sm:$0xf] }
 0x35e   : > { %v3885_v38 = vadd.f32 %v3884_v4, %v3716_v36  ;;  %v9972_v28 = vsub.f32 %v4052_v48, %v4333_v58  ;;  %5677 = vst [vmem:[%s9932_s18 + $0x20] sm:$0xff] %v4333_v58  ;;  %v3550_v15 = vadd.f32 %v3549_v43, %v9400_v11  ;;  %v7996_v11 = vld [vmem:[%s8928_s23 + $0x374] sm:$0xf]  ;;  %v8001_v36 = vld [vmem:[%s8928_s23 + $0x398] sm:$0xf0] }
 0x35f   : > { %v4056_v2 = vpop.f32.mrf.mxu0  ;;  %v7997_v4 = vld [vmem:[%s8928_s23 + $0x37c] sm:$0xf] }
 0x360   : > { %v4054_v20 = vadd.f32 %v4053_v29, %v3885_v38  ;;  %3588 = vmatmul.bf16.gmra.mxu1 %v6833_v49  ;;  %3757 = vmatmul.bf16.gmra.mxu2 %v6837_v40  ;;  %v4461_v32 = vmul.f32 %v9972_v28, %v9972_v28  ;;  %v6874_v49 = vld [vmem:[%s8928_s23 + $0x39c] sm:$0xf0] }
 0x361   : > { %3926 = vmatmul.bf16.gmra.mxu3 %v6841_v18  ;;  %v6880_v40 = vld [vmem:[%s8928_s23 + $0x380] sm:$0xf] }
 0x362   : > { %4095 = vmatmul.bf16.gmra.mxu0 %v6845_v53  ;;  %4529 = vadd.xlane.f32.xlu2 %v4461_v32  ;;  %v4206_v44 = vmul.f32 0.999, %v4054_v20  ;;  %v4270_v48 = vmul.f32 0.001, %v4054_v20  ;;  %v8002_v53 = vld [vmem:[%s8928_s23 + $0x3a0] sm:$0xf0] }
 0x363   : > { %v3718_v23 = vpop.f32.mrf.mxu2 }
 0x364   : > { %v3719_v29 = vadd.f32 %v3718_v23, %v3550_v15  ;;  %v3887_v57 = vpop.f32.mrf.mxu3  ;;  %v4334_v21 = vadd.f32 %v4270_v48, %v4206_v44  ;;  %v6873_v15 = vor.u32 %v8001_v36, %v6872_v47  ;;  %v6877_v23 = vor.u32 %v7997_v4, %v6874_v49 }
 0x365   : > { %v3551_v63 = vpop.f32.mrf.mxu1 }
 0x366   : > { %v3888_v46 = vadd.f32 %v3887_v57, %v3719_v29  ;;  %v9978_v52 = vsub.f32 %v4054_v20, %v4334_v21  ;;  %5678 = vst [vmem:[%s9932_s18 + $0x28] sm:$0xff] %v4334_v21  ;;  %v3552_v18 = vadd.f32 %v3551_v63, %v9410_v30  ;;  %v6881_v29 = vor.u32 %v8002_v53, %v6880_v40  ;;  %v6908_v53 = vld [vmem:[%s8928_s23 + $0x3c0] sm:$0xf] }
 0x367   : > { %v4058_v39 = vpop.f32.mrf.mxu0 }
 0x368   : > { %v4057_v3 = vadd.f32 %v4056_v2, %v3888_v46  ;;  %v4462_v0 = vmul.f32 %v9978_v52, %v9978_v52  ;;  %v6869_v2 = vor.u32 %v7996_v11, %v6866_v14 }
 0x36a   : > { %v4207_v58 = vmul.f32 0.999, %v4057_v3  ;;  %v4271_v43 = vmul.f32 0.001, %v4057_v3  ;;  %4531 = vadd.xlane.f32.xlu2 %v4462_v0 }
 0x36b   : > { %v3720_v38 = vpop.f32.mrf.mxu2 }
 0x36c   : > { %v3721_v20 = vadd.f32 %v3720_v38, %v3552_v18  ;;  %v3889_v32 = vpop.f32.mrf.mxu3  ;;  %v4335_v44 = vadd.f32 %v4271_v43, %v4207_v58  ;;  %v6902_v18 = vld [vmem:[%s8928_s23 + $0x3dc] sm:$0xf0]  ;;  %v8010_v38 = vld [vmem:[%s8928_s23 + $0x3e0] sm:$0xf0] }
 0x36d   : > { %v3554_v48 = vpop.f32.mrf.mxu1 }
 0x36e   : > { %v3890_v57 = vadd.f32 %v3889_v32, %v3721_v20  ;;  %v9992_v46 = vsub.f32 %v4057_v3, %v4335_v44  ;;  %5679 = vst [vmem:[%s9932_s18 + $0x30] sm:$0xff] %v4335_v44  ;;  %v3555_v63 = vadd.f32 %v3554_v48, %v9416_v45  ;;  %v8005_v45 = vld [vmem:[%s8928_s23 + $0x3bc] sm:$0xf]  ;;  %v8006_v20 = vld [vmem:[%s8928_s23 + $0x3c4] sm:$0xf] }
 0x36f   : > { %v4061_v21 = vpop.f32.mrf.mxu0  ;;  %v6910_v32 = vld [vmem:[%s8928_s23 + $0x3e4] sm:$0xf0] }
 0x370   : > { %v4059_v26 = vadd.f32 %v4058_v39, %v3890_v57  ;;  %3593 = vmatmul.bf16.gmra.mxu1 %v6869_v2  ;;  %3762 = vmatmul.bf16.gmra.mxu2 %v6873_v15  ;;  %v4463_v30 = vmul.f32 %v9992_v46, %v9992_v46  ;;  %v6916_v2 = vld [vmem:[%s8928_s23 + $0x3c8] sm:$0xf] }
 0x371   : > { %3931 = vmatmul.bf16.gmra.mxu3 %v6877_v23 }
 0x372   : > { %4100 = vmatmul.bf16.gmra.mxu0 %v6881_v29  ;;  %4533 = vadd.xlane.f32.xlu0 %v4463_v30  ;;  %v4208_v11 = vmul.f32 0.999, %v4059_v26  ;;  %v4272_v3 = vmul.f32 0.001, %v4059_v26  ;;  %v6909_v30 = vor.u32 %v8010_v38, %v6908_v53 }
 0x373   : > { %v3723_v0 = vpop.f32.mrf.mxu2 }
 0x374   : > { %v3724_v39 = vadd.f32 %v3723_v0, %v3555_v63  ;;  %v3892_v14 = vpop.f32.mrf.mxu3  ;;  %v4336_v47 = vadd.f32 %v4272_v3, %v4208_v11  ;;  %v6913_v3 = vor.u32 %v8006_v20, %v6910_v32 }
 0x375   : > { %v3556_v36 = vpop.f32.mrf.mxu1 }
 0x376   : > { %v3893_v4 = vadd.f32 %v3892_v14, %v3724_v39  ;;  %v9998_v40 = vsub.f32 %v4059_v26, %v4336_v47  ;;  %5680 = vst [vmem:[%s9932_s18 + $0x38] sm:$0xff] %v4336_v47  ;;  %v3557_v48 = vadd.f32 %v3556_v36, %v9426_v17  ;;  %v8011_v26 = vld [vmem:[%s8928_s23 + $0x3e8] sm:$0xf0] }
 0x377   : > { %v4063_v49 = vpop.f32.mrf.mxu0  ;;  %v6917_v0 = vor.u32 %v8011_v26, %v6916_v2  ;;  %v6944_v26 = vld [vmem:[%s8928_s23 + $0x408] sm:$0xf] }
 0x378   : > { %v4062_v58 = vadd.f32 %v4061_v21, %v3893_v4  ;;  %v4464_v43 = vmul.f32 %v9998_v40, %v9998_v40  ;;  %v6905_v21 = vor.u32 %v8005_v45, %v6902_v18 }
 0x37a   : > { %v4209_v15 = vmul.f32 0.999, %v4062_v58  ;;  %v4273_v44 = vmul.f32 0.001, %v4062_v58  ;;  %4535 = vadd.xlane.f32.xlu1 %v4464_v43 }
 0x37b   : > { %v3725_v23 = vpop.f32.mrf.mxu2 }
 0x37c   : > { %v3726_v29 = vadd.f32 %v3725_v23, %v3557_v48  ;;  %v3894_v57 = vpop.f32.mrf.mxu3  ;;  %v4337_v63 = vadd.f32 %v4273_v44, %v4209_v15  ;;  %v6938_v48 = vld [vmem:[%s8928_s23 + $0x424] sm:$0xf0]  ;;  %v8019_v23 = vld [vmem:[%s8928_s23 + $0x428] sm:$0xf0] }
 0x37d   : > { %v3559_v11 = vpop.f32.mrf.mxu1 }
 0x37e   : > { %v3895_v39 = vadd.f32 %v3894_v57, %v3726_v29  ;;  %v10012_v47 = vsub.f32 %v4062_v58, %v4337_v63  ;;  %5681 = vst [vmem:[%s9932_s18 + $0x40] sm:$0xff] %v4337_v63  ;;  %v3560_v36 = vadd.f32 %v3559_v11, %v9432_v10  ;;  %v8014_v10 = vld [vmem:[%s8928_s23 + $0x404] sm:$0xf]  ;;  %v8015_v29 = vld [vmem:[%s8928_s23 + $0x40c] sm:$0xf] }
 0x37f   : > { %v4066_v14 = vpop.f32.mrf.mxu0  ;;  %v6946_v57 = vld [vmem:[%s8928_s23 + $0x42c] sm:$0xf0] }
 0x380   : > { %v4064_v4 = vadd.f32 %v4063_v49, %v3895_v39  ;;  %3598 = vmatmul.bf16.gmra.mxu1 %v6905_v21  ;;  %3767 = vmatmul.bf16.gmra.mxu2 %v6909_v30  ;;  %v4465_v17 = vmul.f32 %v10012_v47, %v10012_v47  ;;  %v6952_v21 = vld [vmem:[%s8928_s23 + $0x410] sm:$0xf] }
 0x381   : > { %3936 = vmatmul.bf16.gmra.mxu3 %v6913_v3  ;;  %v8020_v3 = vld [vmem:[%s8928_s23 + $0x430] sm:$0xf0] }
 0x382   : > { %4105 = vmatmul.bf16.gmra.mxu0 %v6917_v0  ;;  %4537 = vadd.xlane.f32.xlu2 %v4465_v17  ;;  %v4210_v45 = vmul.f32 0.999, %v4064_v4  ;;  %v4274_v58 = vmul.f32 0.001, %v4064_v4  ;;  %v6945_v17 = vor.u32 %v8019_v23, %v6944_v26 }
 0x383   : > { %v3728_v43 = vpop.f32.mrf.mxu2 }
 0x384   : > { %v3729_v49 = vadd.f32 %v3728_v43, %v3560_v36  ;;  %v3897_v18 = vpop.f32.mrf.mxu3  ;;  %v4338_v53 = vadd.f32 %v4274_v58, %v4210_v45  ;;  %v6949_v58 = vor.u32 %v8015_v29, %v6946_v57  ;;  %v6953_v43 = vor.u32 %v8020_v3, %v6952_v21  ;;  %v6980_v3 = vld [vmem:[%s8928_s23 + $0x450] sm:$0xf] }
 0x385   : > { %v3561_v38 = vpop.f32.mrf.mxu1 }
 0x386   : > { %v3898_v20 = vadd.f32 %v3897_v18, %v3729_v49  ;;  %v10018_v2 = vsub.f32 %v4064_v4, %v4338_v53  ;;  %5682 = vst [vmem:[%s9932_s18 + $0x48] sm:$0xff] %v4338_v53  ;;  %v3562_v11 = vadd.f32 %v3561_v38, %v9442_v35 }
 0x387   : > { %v4068_v32 = vpop.f32.mrf.mxu0 }
 0x388   : > { %v4067_v15 = vadd.f32 %v4066_v14, %v3898_v20  ;;  %v4466_v44 = vmul.f32 %v10018_v2, %v10018_v2  ;;  %v6941_v14 = vor.u32 %v8014_v10, %v6938_v48 }
 0x38a   : > { %v4211_v30 = vmul.f32 0.999, %v4067_v15  ;;  %v4275_v63 = vmul.f32 0.001, %v4067_v15  ;;  %4539 = vadd.xlane.f32.xlu0 %v4466_v44 }
 0x38b   : > { %v3730_v0 = vpop.f32.mrf.mxu2 }
 0x38c   : > { %v3731_v39 = vadd.f32 %v3730_v0, %v3562_v11  ;;  %v3899_v4 = vpop.f32.mrf.mxu3  ;;  %v4339_v36 = vadd.f32 %v4275_v63, %v4211_v30  ;;  %v6974_v11 = vld [vmem:[%s8928_s23 + $0x46c] sm:$0xf0]  ;;  %v8028_v0 = vld [vmem:[%s8928_s23 + $0x470] sm:$0xf0] }
 0x38d   : > { %v3564_v45 = vpop.f32.mrf.mxu1 }
 0x38e   : > { %v3900_v49 = vadd.f32 %v3899_v4, %v3731_v39  ;;  %v10032_v53 = vsub.f32 %v4067_v15, %v4339_v36  ;;  %5683 = vst [vmem:[%s9932_s18 + $0x50] sm:$0xff] %v4339_v36  ;;  %v3565_v38 = vadd.f32 %v3564_v45, %v9460_v51  ;;  %v8023_v51 = vld [vmem:[%s8928_s23 + $0x44c] sm:$0xf]  ;;  %v8024_v39 = vld [vmem:[%s8928_s23 + $0x454] sm:$0xf] }
 0x38f   : > { %v4071_v18 = vpop.f32.mrf.mxu0  ;;  %v6982_v4 = vld [vmem:[%s8928_s23 + $0x474] sm:$0xf0] }
 0x390   : > { %v4069_v20 = vadd.f32 %v4068_v32, %v3900_v49  ;;  %3603 = vmatmul.bf16.gmra.mxu1 %v6941_v14  ;;  %3772 = vmatmul.bf16.gmra.mxu2 %v6945_v17  ;;  %v4467_v35 = vmul.f32 %v10032_v53, %v10032_v53  ;;  %v6988_v14 = vld [vmem:[%s8928_s23 + $0x458] sm:$0xf] }
 0x391   : > { %3941 = vmatmul.bf16.gmra.mxu3 %v6949_v58  ;;  %v8029_v58 = vld [vmem:[%s8928_s23 + $0x478] sm:$0xf0] }
 0x392   : > { %4110 = vmatmul.bf16.gmra.mxu0 %v6953_v43  ;;  %4541 = vadd.xlane.f32.xlu1 %v4467_v35  ;;  %v4212_v10 = vmul.f32 0.999, %v4069_v20  ;;  %v4276_v15 = vmul.f32 0.001, %v4069_v20  ;;  %v6981_v35 = vor.u32 %v8028_v0, %v6980_v3 }
 0x393   : > { %v3733_v44 = vpop.f32.mrf.mxu2 }
 0x394   : > { %v3734_v32 = vadd.f32 %v3733_v44, %v3565_v38  ;;  %v3902_v48 = vpop.f32.mrf.mxu3  ;;  %v4340_v26 = vadd.f32 %v4276_v15, %v4212_v10  ;;  %v6985_v15 = vor.u32 %v8024_v39, %v6982_v4  ;;  %v6989_v44 = vor.u32 %v8029_v58, %v6988_v14  ;;  %v7016_v58 = vld [vmem:[%s8928_s23 + $0x498] sm:$0xf] }
 0x395   : > { %v3566_v23 = vpop.f32.mrf.mxu1 }
 0x396   : > { %v3903_v29 = vadd.f32 %v3902_v48, %v3734_v32  ;;  %v10038_v21 = vsub.f32 %v4069_v20, %v4340_v26  ;;  %5684 = vst [vmem:[%s9932_s18 + $0x58] sm:$0xff] %v4340_v26  ;;  %v3567_v45 = vadd.f32 %v3566_v23, %v9470_v61 }
 0x397   : > { %v4073_v57 = vpop.f32.mrf.mxu0 }
 0x398   : > { %v4072_v30 = vadd.f32 %v4071_v18, %v3903_v29  ;;  %v4468_v63 = vmul.f32 %v10038_v21, %v10038_v21  ;;  %v6977_v18 = vor.u32 %v8023_v51, %v6974_v11 }
 0x39a   : > { %v4213_v17 = vmul.f32 0.999, %v4072_v30  ;;  %v4277_v36 = vmul.f32 0.001, %v4072_v30  ;;  %4543 = vadd.xlane.f32.xlu2 %v4468_v63 }
 0x39b   : > { %v3735_v43 = vpop.f32.mrf.mxu2 }
 0x39c   : > { %v3736_v49 = vadd.f32 %v3735_v43, %v3567_v45  ;;  %v3904_v20 = vpop.f32.mrf.mxu3  ;;  %v4341_v38 = vadd.f32 %v4277_v36, %v4213_v17  ;;  %v7010_v45 = vld [vmem:[%s8928_s23 + $0x4b4] sm:$0xf0]  ;;  %v8037_v43 = vld [vmem:[%s8928_s23 + $0x4b8] sm:$0xf0] }
 0x39d   : > { %v3569_v10 = vpop.f32.mrf.mxu1 }
 0x39e   : > { %v3905_v32 = vadd.f32 %v3904_v20, %v3736_v49  ;;  %v10052_v26 = vsub.f32 %v4072_v30, %v4341_v38  ;;  %5685 = vst [vmem:[%s9932_s18 + $0x60] sm:$0xff] %v4341_v38  ;;  %v3570_v23 = vadd.f32 %v3569_v10, %v9476_v8  ;;  %v8032_v8 = vld [vmem:[%s8928_s23 + $0x494] sm:$0xf]  ;;  %v8033_v49 = vld [vmem:[%s8928_s23 + $0x49c] sm:$0xf] }
 0x39f   : > { %v4076_v48 = vpop.f32.mrf.mxu0  ;;  %v7018_v20 = vld [vmem:[%s8928_s23 + $0x4bc] sm:$0xf0] }
 0x3a0   : > { %v4074_v29 = vadd.f32 %v4073_v57, %v3905_v32  ;;  %3608 = vmatmul.bf16.gmra.mxu1 %v6977_v18  ;;  %3777 = vmatmul.bf16.gmra.mxu2 %v6981_v35  ;;  %v4469_v61 = vmul.f32 %v10052_v26, %v10052_v26  ;;  %v7024_v18 = vld [vmem:[%s8928_s23 + $0x4a0] sm:$0xf] }
 0x3a1   : > { %3946 = vmatmul.bf16.gmra.mxu3 %v6985_v15  ;;  %v8038_v15 = vld [vmem:[%s8928_s23 + $0x4c0] sm:$0xf0] }
 0x3a2   : > { %4115 = vmatmul.bf16.gmra.mxu0 %v6989_v44  ;;  %4545 = vadd.xlane.f32.xlu0 %v4469_v61  ;;  %v4214_v51 = vmul.f32 0.999, %v4074_v29  ;;  %v4278_v30 = vmul.f32 0.001, %v4074_v29  ;;  %v7017_v61 = vor.u32 %v8037_v43, %v7016_v58 }
 0x3a3   : > { %v3738_v63 = vpop.f32.mrf.mxu2 }
 0x3a4   : > { %v3739_v57 = vadd.f32 %v3738_v63, %v3570_v23  ;;  %v3907_v11 = vpop.f32.mrf.mxu3  ;;  %v4342_v3 = vadd.f32 %v4278_v30, %v4214_v51  ;;  %v7021_v30 = vor.u32 %v8033_v49, %v7018_v20  ;;  %v7025_v63 = vor.u32 %v8038_v15, %v7024_v18  ;;  %v7052_v15 = vld [vmem:[%s8928_s23 + $0x4e0] sm:$0xf] }
 0x3a5   : > { %v3571_v0 = vpop.f32.mrf.mxu1 }
 0x3a6   : > { %v3908_v39 = vadd.f32 %v3907_v11, %v3739_v57  ;;  %v10058_v14 = vsub.f32 %v4074_v29, %v4342_v3  ;;  %5686 = vst [vmem:[%s9932_s18 + $0x68] sm:$0xff] %v4342_v3  ;;  %v3572_v10 = vadd.f32 %v3571_v0, %v9486_v33 }
 0x3a7   : > { %v4078_v4 = vpop.f32.mrf.mxu0 }
 0x3a8   : > { %v4077_v17 = vadd.f32 %v4076_v48, %v3908_v39  ;;  %v4470_v36 = vmul.f32 %v10058_v14, %v10058_v14  ;;  %v7013_v48 = vor.u32 %v8032_v8, %v7010_v45 }
 0x3aa   : > { %v4215_v35 = vmul.f32 0.999, %v4077_v17  ;;  %v4279_v38 = vmul.f32 0.001, %v4077_v17  ;;  %4547 = vadd.xlane.f32.xlu1 %v4470_v36 }
 0x3ab   : > { %v3740_v44 = vpop.f32.mrf.mxu2 }
 0x3ac   : > { %v3741_v32 = vadd.f32 %v3740_v44, %v3572_v10  ;;  %v3909_v29 = vpop.f32.mrf.mxu3  ;;  %v4343_v23 = vadd.f32 %v4279_v38, %v4215_v35  ;;  %v8041_v35 = vld [vmem:[%s8928_s23 + $0x4dc] sm:$0xf]  ;;  %v7046_v10 = vld [vmem:[%s8928_s23 + $0x4fc] sm:$0xf0]  ;;  %v8046_v44 = vld [vmem:[%s8928_s23 + $0x500] sm:$0xf0] }
 0x3ad   : > { %v3574_v51 = vpop.f32.mrf.mxu1 }
 0x3ae   : > { %v3910_v57 = vadd.f32 %v3909_v29, %v3741_v32  ;;  %v10072_v3 = vsub.f32 %v4077_v17, %v4343_v23  ;;  %5687 = vst [vmem:[%s9932_s18 + $0x70] sm:$0xff] %v4343_v23  ;;  %v3575_v0 = vadd.f32 %v3574_v51, %v9492_v37  ;;  %v8042_v29 = vld [vmem:[%s8928_s23 + $0x4e4] sm:$0xf] }
 0x3af   : > { %v4081_v11 = vpop.f32.mrf.mxu0 }
 0x3b0   : > { %v4079_v39 = vadd.f32 %v4078_v4, %v3910_v57  ;;  %3613 = vmatmul.bf16.gmra.mxu1 %v7013_v48  ;;  %3782 = vmatmul.bf16.gmra.mxu2 %v7017_v61  ;;  %v4471_v33 = vmul.f32 %v10072_v3, %v10072_v3  ;;  %v7054_v48 = vld [vmem:[%s8928_s23 + $0x504] sm:$0xf0] }
 0x3b1   : > { %3951 = vmatmul.bf16.gmra.mxu3 %v7021_v30  ;;  %v7060_v61 = vld [vmem:[%s8928_s23 + $0x4e8] sm:$0xf] }
 0x3b2   : > { %4120 = vmatmul.bf16.gmra.mxu0 %v7025_v63  ;;  %4549 = vadd.xlane.f32.xlu2 %v4471_v33  ;;  %v4216_v8 = vmul.f32 0.999, %v4079_v39  ;;  %v4280_v36 = vmul.f32 0.001, %v4079_v39  ;;  %v8047_v63 = vld [vmem:[%s8928_s23 + $0x508] sm:$0xf0] }
 0x3b3   : > { %v3743_v17 = vpop.f32.mrf.mxu2 }
 0x3b4   : > { %v3744_v45 = vadd.f32 %v3743_v17, %v3575_v0  ;;  %v3912_v4 = vpop.f32.mrf.mxu3  ;;  %v4344_v58 = vadd.f32 %v4280_v36, %v4216_v8  ;;  %v7049_v0 = vor.u32 %v8041_v35, %v7046_v10  ;;  %v7053_v8 = vor.u32 %v8046_v44, %v7052_v15 }
 0x3b5   : > { %v3576_v43 = vpop.f32.mrf.mxu1  ;;  %v10078_v49 = vpop.xlane.xlu0 %4521 }
 0x3b6   : > { %v3913_v20 = vadd.f32 %v3912_v4, %v3744_v45  ;;  %8430 = vrsqrt.f32 %v10078_v49  ;;  %5688 = vst [vmem:[%s9932_s18 + $0x78] sm:$0xff] %v4344_v58  ;;  %v10082_v18 = vsub.f32 %v4079_v39, %v4344_v58  ;;  %v3577_v30 = vadd.f32 %v3576_v43, %v9502_v50 }
 0x3b7   : > { %v4083_v37 = vpop.f32.mrf.mxu0  ;;  %v7057_v58 = vor.u32 %v8042_v29, %v7054_v48  ;;  %vm4656_vm0 = vcmp.eq.f32.partialorder %v10078_v49, inf  ;;  %vm4658_vm1 = vcmp.eq.f32.partialorder %v10078_v49, 0.0 }
 0x3b8   : > { %11414 = vst [vmem:[#allocation26_spill] sm:$0xff] %v10082_v18  ;;  %v4082_v38 = vadd.f32 %v4081_v11, %v3913_v20  ;;  %v4472_v32 = vmul.f32 %v10082_v18, %v10082_v18  ;;  %v7061_v20 = vor.u32 %v8047_v63, %v7060_v61 }
 0x3ba   : > { %v4217_v23 = vmul.f32 0.999, %v4082_v38  ;;  %v4281_v51 = vmul.f32 0.001, %v4082_v38  ;;  %4551 = vadd.xlane.f32.xlu0 %v4472_v32 }
 0x3bb   : > { %v3745_v57 = vpop.f32.mrf.mxu2 }
 0x3bc   : > { %v8431_v39 = vpop.eup %8430  ;;  %v3746_v33 = vadd.f32 %v3745_v57, %v3577_v30  ;;  %v3914_v11 = vpop.f32.mrf.mxu3  ;;  %v4345_v36 = vadd.f32 %v4281_v51, %v4217_v23 }
 0x3bd   : > { %v4650_v17 = vmul.f32 %v8431_v39, %v10078_v49  ;;  %v3579_v45 = vpop.f32.mrf.mxu1  ;;  %v10096_v4 = vpop.xlane.xlu0 %4523 }
 0x3be   : > { %v3915_v1 = vadd.f32 %v3914_v11, %v3746_v33  ;;  %8432 = vrsqrt.f32 %v10096_v4  ;;  %5689 = vst [vmem:[%s9932_s18 + $0x80] sm:$0xff] %v4345_v36  ;;  %v10100_v32 = vsub.f32 %v4082_v38, %v4345_v36  ;;  %v3580_v15 = vadd.f32 %v3579_v45, %v9508_v7  ;;  %v8050_v36 = vld [vmem:[%s8928_s23 + $0x524] sm:$0xf] }
 0x3bf   : > { %v4086_v50 = vpop.f32.mrf.mxu0  ;;  %v4651_v43 = vmul.f32 %v8431_v39, %v4650_v17  ;;  %v7082_v17 = vld [vmem:[%s8928_s23 + $0x544] sm:$0xf0]  ;;  %v4659_v45 = vand.u32 2147483648, %v10078_v49  ;;  %vm4668_vm2 = vcmp.eq.f32.partialorder %v10096_v4, inf  ;;  %vm4670_vm3 = vcmp.eq.f32.partialorder %v10096_v4, 0.0 }
 0x3c0   : > { %11415 = vst [vmem:[#allocation34_spill] sm:$0xff] %v10100_v32  ;;  %v4084_v30 = vadd.f32 %v4083_v37, %v3915_v1  ;;  %3618 = vmatmul.bf16.gmra.mxu1 %v7049_v0  ;;  %3787 = vmatmul.bf16.gmra.mxu2 %v7053_v8  ;;  %v4473_v10 = vmul.f32 %v10100_v32, %v10100_v32 }
 0x3c1   : > { %v4652_v35 = vmul.f32 0.5, %v4651_v43  ;;  %3956 = vmatmul.bf16.gmra.mxu3 %v7057_v58  ;;  %v8055_v43 = vld [vmem:[%s8928_s23 + $0x548] sm:$0xf0] }
 0x3c2   : > { %4125 = vmatmul.bf16.gmra.mxu0 %v7061_v20  ;;  %v4218_v44 = vmul.f32 0.999, %v4084_v30  ;;  %v4282_v29 = vmul.f32 0.001, %v4084_v30  ;;  %4553 = vadd.xlane.f32.xlu1 %v4473_v10 }
 0x3c3   : > { %v4653_v48 = vsub.f32 1.5, %v4652_v35  ;;  %v3748_v61 = vpop.f32.mrf.mxu2  ;;  %v8051_v35 = vld [vmem:[%s8928_s23 + $0x52c] sm:$0xf] }
 0x3c4   : > { %v8433_v38 = vpop.eup %8432  ;;  %v3749_v1 = vadd.f32 %v3748_v61, %v3580_v15  ;;  %v3917_v37 = vpop.f32.mrf.mxu3  ;;  %v4346_v23 = vadd.f32 %v4282_v29, %v4218_v44  ;;  %v7090_v29 = vld [vmem:[%s8928_s23 + $0x54c] sm:$0xf0] }
 0x3c5   : > { %v4654_v51 = vmul.f32 %v8431_v39, %v4653_v48  ;;  %v4662_v63 = vmul.f32 %v8433_v38, %v10096_v4  ;;  %v3581_v57 = vpop.f32.mrf.mxu1  ;;  %v10106_v7 = vpop.xlane.xlu1 %4525  ;;  %v7088_v39 = vld [vmem:[%s8928_s23 + $0x528] sm:$0xf]  ;;  %v7096_v48 = vld [vmem:[%s8928_s23 + $0x530] sm:$0xf] }
 0x3c6   : > { %v3918_v33 = vadd.f32 %v3917_v37, %v3749_v1  ;;  %8434 = vrsqrt.f32 %v10106_v7  ;;  %5690 = vst [vmem:[%s9932_s18 + $0x88] sm:$0xff] %v4346_v23  ;;  %v10116_v20 = vsub.f32 %v4084_v30, %v4346_v23  ;;  %v3582_v44 = vadd.f32 %v3581_v57, %v9518_v12 }
 0x3c7   : > { %v4088_v11 = vpop.f32.mrf.mxu0  ;;  %v4655_v0 = vmul.f32 %v4654_v51, %v10078_v49  ;;  %v4663_v8 = vmul.f32 %v8433_v38, %v4662_v63  ;;  %v7093_v12 = vor.u32 %v8051_v35, %v7090_v29  ;;  %vm4680_vm4 = vcmp.eq.f32.partialorder %v10106_v7, inf }
 0x3c8   : > { %v4087_v58 = vadd.f32 %v4086_v50, %v3918_v33  ;;  %11416 = vst [vmem:[#allocation35_spill] sm:$0xff] %v10116_v20  ;;  %v4474_v51 = vmul.f32 %v10116_v20, %v10116_v20  ;;  %v8056_v50 = vld [vmem:[%s8928_s23 + $0x550] sm:$0xf0]  ;;  %v7085_v33 = vor.u32 %v8050_v36, %v7082_v17  ;;  %vm4682_vm5 = vcmp.eq.f32.partialorder %v10106_v7, 0.0 }
 0x3c9   : > { %v4657_v10 = vsel %vm4656_vm0, %v10078_v49, %v4655_v0  ;;  %v4664_v15 = vmul.f32 0.5, %v4663_v8  ;;  %v7089_v8 = vor.u32 %v8055_v43, %v7088_v39  ;;  %v7097_v20 = vor.u32 %v8056_v50, %v7096_v48 }
 0x3ca   : > { %v4660_v61 = vsel %vm4658_vm1, %v4659_v45, %v4657_v10  ;;  %v4219_v1 = vmul.f32 0.999, %v4087_v58  ;;  %v4283_v37 = vmul.f32 0.001, %v4087_v58  ;;  %4555 = vadd.xlane.f32.xlu2 %v4474_v51  ;;  %v4671_v39 = vand.u32 2147483648, %v10096_v4 }
 0x3cb   : > { %v5417_v30 = vadd.f32 1e-07, %v4660_v61  ;;  %v4665_v23 = vsub.f32 1.5, %v4664_v15  ;;  %v3750_v63 = vpop.f32.mrf.mxu2 }
 0x3cc   : > { %v8435_v32 = vpop.eup %8434  ;;  %v3751_v49 = vadd.f32 %v3750_v63, %v3582_v44  ;;  %v3919_v0 = vpop.f32.mrf.mxu3  ;;  %v4347_v57 = vadd.f32 %v4283_v37, %v4219_v1 }
 0x3cd   : > { %8436 = vrcp.f32 %v5417_v30  ;;  %v4666_v45 = vmul.f32 %v8433_v38, %v4665_v23  ;;  %v4674_v10 = vmul.f32 %v8435_v32, %v10106_v7  ;;  %v3584_v18 = vpop.f32.mrf.mxu1  ;;  %v10129_v9 = vpop.xlane.xlu1 %4527 }
 0x3ce   : > { %v3920_v61 = vadd.f32 %v3919_v0, %v3751_v49  ;;  %8438 = vrsqrt.f32 %v10129_v9  ;;  %5691 = vst [vmem:[%s9932_s18 + $0x90] sm:$0xff] %v4347_v57  ;;  %v10136_v38 = vsub.f32 %v4087_v58, %v4347_v57  ;;  %v3585_v29 = vadd.f32 %v3584_v18, %v9536_v41 }
 0x3cf   : > { %v4091_v36 = vpop.f32.mrf.mxu0  ;;  %v4667_v17 = vmul.f32 %v4666_v45, %v10096_v4  ;;  %v4675_v15 = vmul.f32 %v8435_v32, %v4674_v10  ;;  %v7118_v45 = vld [vmem:[%s8928_s23 + $0x58c] sm:$0xf0]  ;;  %vm4692_vm6 = vcmp.eq.f32.partialorder %v10129_v9, inf  ;;  %vm4694_vm7 = vcmp.eq.f32.partialorder %v10129_v9, 0.0 }
 0x3d0   : > { %v4089_v43 = vadd.f32 %v4088_v11, %v3920_v61  ;;  %3623 = vmatmul.bf16.gmra.mxu1 %v7085_v33  ;;  %3792 = vmatmul.bf16.gmra.mxu2 %v7089_v8  ;;  %v4475_v1 = vmul.f32 %v10136_v38, %v10136_v38  ;;  %v7124_v10 = vld [vmem:[%s8928_s23 + $0x570] sm:$0xf]  ;;  %v4683_v61 = vand.u32 2147483648, %v10106_v7 }
 0x3d1   : > { %v4669_v35 = vsel %vm4668_vm2, %v10096_v4, %v4667_v17  ;;  %v4676_v44 = vmul.f32 0.5, %v4675_v15  ;;  %3961 = vmatmul.bf16.gmra.mxu3 %v7093_v12  ;;  %v8059_v12 = vld [vmem:[%s8928_s23 + $0x56c] sm:$0xf] }
 0x3d2   : > { %4130 = vmatmul.bf16.gmra.mxu0 %v7097_v20  ;;  %v4672_v48 = vsel %vm4670_vm3, %v4671_v39, %v4669_v35  ;;  %v4220_v37 = vmul.f32 0.999, %v4089_v43  ;;  %v4284_v51 = vmul.f32 0.001, %v4089_v43  ;;  %4557 = vadd.xlane.f32.xlu0 %v4475_v1  ;;  %v8064_v39 = vld [vmem:[%s8928_s23 + $0x590] sm:$0xf0] }
 0x3d3   : > { %v8437_v11 = vpop.eup %8436  ;;  %v5418_v50 = vadd.f32 1e-07, %v4672_v48  ;;  %v4677_v58 = vsub.f32 1.5, %v4676_v44  ;;  %v3753_v30 = vpop.f32.mrf.mxu2  ;;  %v8060_v35 = vld [vmem:[%s8928_s23 + $0x574] sm:$0xf] }
 0x3d4   : > { %v8439_v23 = vpop.eup %8438  ;;  %v5545_v4 = vmul.f32 %v8437_v11, %v9929_v27  ;;  %v3754_v63 = vadd.f32 %v3753_v30, %v3585_v29  ;;  %v3922_v41 = vpop.f32.mrf.mxu3  ;;  %v4348_v18 = vadd.f32 %v4284_v51, %v4220_v37  ;;  %v7126_v1 = vld [vmem:[%s8928_s23 + $0x594] sm:$0xf0] }
 0x3d5   : > { %8440 = vrcp.f32 %v5418_v50  ;;  %v4678_v20 = vmul.f32 %v8435_v32, %v4677_v58  ;;  %v4686_v33 = vmul.f32 %v8439_v23, %v10129_v9  ;;  %v3586_v49 = vpop.f32.mrf.mxu1  ;;  %v10145_v0 = vpop.xlane.xlu2 %4529  ;;  %v7132_v37 = vld [vmem:[%s8928_s23 + $0x578] sm:$0xf] }
 0x3d6   : > { %5609 = vst [vmem:[%s10148_s14] sm:$0xff] %v5545_v4  ;;  %v3923_v27 = vadd.f32 %v3922_v41, %v3754_v63  ;;  %8442 = vrsqrt.f32 %v10145_v0  ;;  %v10159_v15 = vsub.f32 %v4089_v43, %v4348_v18  ;;  %v3587_v48 = vadd.f32 %v3586_v49, %v9546_v22 }
 0x3d7   : > { %v4093_v8 = vpop.f32.mrf.mxu0  ;;  %v4679_v57 = vmul.f32 %v4678_v20, %v10106_v7  ;;  %v4687_v32 = vmul.f32 %v8439_v23, %v4686_v33  ;;  %5692 = vst [vmem:[%s9932_s18 + $0x98] sm:$0xff] %v4348_v18  ;;  %v7121_v41 = vor.u32 %v8059_v12, %v7118_v45  ;;  %v7125_v18 = vor.u32 %v8064_v39, %v7124_v10 }
 0x3d8   : > { %v4092_v17 = vadd.f32 %v4091_v36, %v3923_v27  ;;  %v4476_v58 = vmul.f32 %v10159_v15, %v10159_v15  ;;  %v8065_v36 = vld [vmem:[%s8928_s23 + $0x598] sm:$0xf0]  ;;  %v7129_v49 = vor.u32 %v8060_v35, %v7126_v1  ;;  %v4695_v39 = vand.u32 2147483648, %v10129_v9 }
 0x3d9   : > { %v4681_v44 = vsel %vm4680_vm4, %v10106_v7, %v4679_v57  ;;  %v4688_v29 = vmul.f32 0.5, %v4687_v32  ;;  %vm4704_vm8 = vcmp.eq.f32.partialorder %v10145_v0, inf  ;;  %vm4706_vm9 = vcmp.eq.f32.partialorder %v10145_v0, 0.0 }
 0x3da   : > { %v4684_v51 = vsel %vm4682_vm5, %v4683_v61, %v4681_v44  ;;  %v4221_v11 = vmul.f32 0.999, %v4092_v17  ;;  %v4285_v50 = vmul.f32 0.001, %v4092_v17  ;;  %4559 = vadd.xlane.f32.xlu1 %v4476_v58 }
 0x3db   : > { %v8441_v43 = vpop.eup %8440  ;;  %v5419_v30 = vadd.f32 1e-07, %v4684_v51  ;;  %v4689_v4 = vsub.f32 1.5, %v4688_v29  ;;  %v3755_v63 = vpop.f32.mrf.mxu2  ;;  %v7133_v29 = vor.u32 %v8065_v36, %v7132_v37 }
 0x3dc   : > { %v8443_v7 = vpop.eup %8442  ;;  %v5546_v20 = vmul.f32 %v8441_v43, %v9938_v16  ;;  %v3756_v22 = vadd.f32 %v3755_v63, %v3587_v48  ;;  %v3924_v33 = vpop.f32.mrf.mxu3  ;;  %v4349_v27 = vadd.f32 %v4285_v50, %v4221_v11 }
 0x3dd   : > { %8444 = vrcp.f32 %v5419_v30  ;;  %v4690_v57 = vmul.f32 %v8439_v23, %v4689_v4  ;;  %v4698_v32 = vmul.f32 %v8443_v7, %v10145_v0  ;;  %v3589_v61 = vpop.f32.mrf.mxu1  ;;  %v10173_v44 = vpop.xlane.xlu2 %4531 }
 0x3de   : > { %5610 = vst [vmem:[%s10148_s14 + $0x8] sm:$0xff] %v5546_v20  ;;  %v3925_v12 = vadd.f32 %v3924_v33, %v3756_v22  ;;  %8446 = vrsqrt.f32 %v10173_v44  ;;  %v10181_v35 = vsub.f32 %v4092_v17, %v4349_v27  ;;  %v3590_v37 = vadd.f32 %v3589_v61, %v9552_v55 }
 0x3df   : > { %v4096_v45 = vpop.f32.mrf.mxu0  ;;  %v4691_v16 = vmul.f32 %v4690_v57, %v10129_v9  ;;  %v4699_v10 = vmul.f32 %v8443_v7, %v4698_v32  ;;  %5693 = vst [vmem:[%s9932_s18 + $0xa0] sm:$0xff] %v4349_v27  ;;  %v7160_v32 = vld [vmem:[%s8928_s23 + $0x5b8] sm:$0xf]  ;;  %v4707_v61 = vand.u32 2147483648, %v10145_v0  ;;  %vm4716_vm10 = vcmp.eq.f32.partialorder %v10173_v44, inf }
 0x3e0   : > { %v4094_v23 = vadd.f32 %v4093_v8, %v3925_v12  ;;  %3628 = vmatmul.bf16.gmra.mxu1 %v7121_v41  ;;  %3797 = vmatmul.bf16.gmra.mxu2 %v7125_v18  ;;  %v4477_v11 = vmul.f32 %v10181_v35, %v10181_v35  ;;  %vm4718_vm11 = vcmp.eq.f32.partialorder %v10173_v44, 0.0 }
 0x3e1   : > { %v4693_v48 = vsel %vm4692_vm6, %v10129_v9, %v4691_v16  ;;  %v4700_v1 = vmul.f32 0.5, %v4699_v10  ;;  %3966 = vmatmul.bf16.gmra.mxu3 %v7129_v49  ;;  %v8068_v49 = vld [vmem:[%s8928_s23 + $0x5b4] sm:$0xf]  ;;  %v8073_v16 = vld [vmem:[%s8928_s23 + $0x5d8] sm:$0xf0] }
 0x3e2   : > { %4135 = vmatmul.bf16.gmra.mxu0 %v7133_v29  ;;  %v4696_v51 = vsel %vm4694_vm7, %v4695_v39, %v4693_v48  ;;  %v4222_v50 = vmul.f32 0.999, %v4094_v23  ;;  %v4286_v58 = vmul.f32 0.001, %v4094_v23  ;;  %4561 = vadd.xlane.f32.xlu2 %v4477_v11  ;;  %v8069_v10 = vld [vmem:[%s8928_s23 + $0x5bc] sm:$0xf] }
 0x3e3   : > { %v8445_v8 = vpop.eup %8444  ;;  %v5420_v36 = vadd.f32 1e-07, %v4696_v51  ;;  %v4701_v17 = vsub.f32 1.5, %v4700_v1  ;;  %v3758_v43 = vpop.f32.mrf.mxu2  ;;  %v7168_v51 = vld [vmem:[%s8928_s23 + $0x5c0] sm:$0xf] }
 0x3e4   : > { %v8447_v30 = vpop.eup %8446  ;;  %v5547_v9 = vmul.f32 %v8445_v8, %v9952_v54  ;;  %v3759_v55 = vadd.f32 %v3758_v43, %v3590_v37  ;;  %v3927_v4 = vpop.f32.mrf.mxu3  ;;  %v4350_v63 = vadd.f32 %v4286_v58, %v4222_v50  ;;  %v7162_v37 = vld [vmem:[%s8928_s23 + $0x5dc] sm:$0xf0] }
 0x3e5   : > { %8448 = vrcp.f32 %v5420_v36  ;;  %v4702_v41 = vmul.f32 %v8443_v7, %v4701_v17  ;;  %v4710_v18 = vmul.f32 %v8447_v30, %v10173_v44  ;;  %v3591_v20 = vpop.f32.mrf.mxu1  ;;  %v10190_v22 = vpop.xlane.xlu0 %4533  ;;  %v7154_v7 = vld [vmem:[%s8928_s23 + $0x5d4] sm:$0xf0] }
 0x3e6   : > { %5611 = vst [vmem:[%s10148_s14 + $0x10] sm:$0xff] %v5547_v9  ;;  %v3928_v33 = vadd.f32 %v3927_v4, %v3759_v55  ;;  %8450 = vrsqrt.f32 %v10190_v22  ;;  %v10201_v12 = vsub.f32 %v4094_v23, %v4350_v63  ;;  %v3592_v1 = vadd.f32 %v3591_v20, %v9562_v59 }
 0x3e7   : > { %v4098_v54 = vpop.f32.mrf.mxu0  ;;  %v4703_v27 = vmul.f32 %v4702_v41, %v10145_v0  ;;  %v4711_v57 = vmul.f32 %v8447_v30, %v4710_v18  ;;  %5694 = vst [vmem:[%s9932_s18 + $0xa8] sm:$0xff] %v4350_v63  ;;  %v7157_v9 = vor.u32 %v8068_v49, %v7154_v7  ;;  %v7161_v55 = vor.u32 %v8073_v16, %v7160_v32 }
 0x3e8   : > { %v4097_v29 = vadd.f32 %v4096_v45, %v3928_v33  ;;  %v4478_v8 = vmul.f32 %v10201_v12, %v10201_v12  ;;  %v8074_v45 = vld [vmem:[%s8928_s23 + $0x5e0] sm:$0xf0]  ;;  %v7165_v41 = vor.u32 %v8069_v10, %v7162_v37  ;;  %v4719_v16 = vand.u32 2147483648, %v10173_v44 }
 0x3e9   : > { %v4705_v39 = vsel %vm4704_vm8, %v10145_v0, %v4703_v27  ;;  %v4712_v48 = vmul.f32 0.5, %v4711_v57  ;;  %vm4728_vm12 = vcmp.eq.f32.partialorder %v10190_v22, inf  ;;  %vm4730_vm13 = vcmp.eq.f32.partialorder %v10190_v22, 0.0 }
 0x3ea   : > { %v4708_v11 = vsel %vm4706_vm9, %v4707_v61, %v4705_v39  ;;  %v4223_v50 = vmul.f32 0.999, %v4097_v29  ;;  %v4287_v58 = vmul.f32 0.001, %v4097_v29  ;;  %4563 = vadd.xlane.f32.xlu0 %v4478_v8  ;;  %v7169_v61 = vor.u32 %v8074_v45, %v7168_v51 }
 0x3eb   : > { %v8449_v23 = vpop.eup %8448  ;;  %v5421_v36 = vadd.f32 1e-07, %v4708_v11  ;;  %v4713_v17 = vsub.f32 1.5, %v4712_v48  ;;  %v3760_v43 = vpop.f32.mrf.mxu2 }
 0x3ec   : > { %v8451_v0 = vpop.eup %8450  ;;  %v5548_v4 = vmul.f32 %v8449_v23, %v9958_v62  ;;  %v3761_v59 = vadd.f32 %v3760_v43, %v3592_v1  ;;  %v3929_v63 = vpop.f32.mrf.mxu3  ;;  %v4351_v18 = vadd.f32 %v4287_v58, %v4223_v50 }
 0x3ed   : > { %8452 = vrcp.f32 %v5421_v36  ;;  %v4714_v20 = vmul.f32 %v8447_v30, %v4713_v17  ;;  %v4722_v33 = vmul.f32 %v8451_v0, %v10190_v22  ;;  %v3594_v27 = vpop.f32.mrf.mxu1  ;;  %v10215_v57 = vpop.xlane.xlu1 %4535 }
 0x3ee   : > { %5612 = vst [vmem:[%s10148_s14 + $0x18] sm:$0xff] %v5548_v4  ;;  %v3930_v49 = vadd.f32 %v3929_v63, %v3761_v59  ;;  %8454 = vrsqrt.f32 %v10215_v57  ;;  %v10223_v10 = vsub.f32 %v4097_v29, %v4351_v18  ;;  %v3595_v1 = vadd.f32 %v3594_v27, %v9568_v42  ;;  %v8077_v59 = vld [vmem:[%s8928_s23 + $0x5fc] sm:$0xf] }
 0x3ef   : > { %v4101_v7 = vpop.f32.mrf.mxu0  ;;  %v4715_v62 = vmul.f32 %v4714_v20, %v10173_v44  ;;  %v4723_v32 = vmul.f32 %v8451_v0, %v4722_v33  ;;  %5695 = vst [vmem:[%s9932_s18 + $0xb0] sm:$0xff] %v4351_v18  ;;  %v7196_v18 = vld [vmem:[%s8928_s23 + $0x600] sm:$0xf]  ;;  %v4731_v20 = vand.u32 2147483648, %v10190_v22  ;;  %vm4740_vm14 = vcmp.eq.f32.partialorder %v10215_v57, inf }
 0x3f0   : > { %v4099_v30 = vadd.f32 %v4098_v54, %v3930_v49  ;;  %3633 = vmatmul.bf16.gmra.mxu1 %v7157_v9  ;;  %3802 = vmatmul.bf16.gmra.mxu2 %v7161_v55  ;;  %v4479_v51 = vmul.f32 %v10223_v10, %v10223_v10  ;;  %v8078_v49 = vld [vmem:[%s8928_s23 + $0x604] sm:$0xf]  ;;  %vm4742_vm15 = vcmp.eq.f32.partialorder %v10215_v57, 0.0 }
 0x3f1   : > { %v4717_v39 = vsel %vm4716_vm10, %v10173_v44, %v4715_v62  ;;  %v4724_v48 = vmul.f32 0.5, %v4723_v32  ;;  %3971 = vmatmul.bf16.gmra.mxu3 %v7165_v41 }
 0x3f2   : > { %4140 = vmatmul.bf16.gmra.mxu0 %v7169_v61  ;;  %v4720_v37 = vsel %vm4718_vm11, %v4719_v16, %v4717_v39  ;;  %v4224_v11 = vmul.f32 0.999, %v4099_v30  ;;  %v4288_v50 = vmul.f32 0.001, %v4099_v30  ;;  %4565 = vadd.xlane.f32.xlu1 %v4479_v51  ;;  %v8082_v61 = vld [vmem:[%s8928_s23 + $0x620] sm:$0xf0] }
 0x3f3   : > { %v8453_v54 = vpop.eup %8452  ;;  %v5422_v58 = vadd.f32 1e-07, %v4720_v37  ;;  %v4725_v29 = vsub.f32 1.5, %v4724_v48  ;;  %v3763_v8 = vpop.f32.mrf.mxu2  ;;  %v7198_v39 = vld [vmem:[%s8928_s23 + $0x624] sm:$0xf0] }
 0x3f4   : > { %v8455_v45 = vpop.eup %8454  ;;  %v5549_v44 = vmul.f32 %v8453_v54, %v9972_v28  ;;  %v3764_v42 = vadd.f32 %v3763_v8, %v3595_v1  ;;  %v3932_v23 = vpop.f32.mrf.mxu3  ;;  %v4352_v36 = vadd.f32 %v4288_v50, %v4224_v11  ;;  %v7204_v48 = vld [vmem:[%s8928_s23 + $0x608] sm:$0xf]  ;;  %v7197_v8 = vor.u32 %v8082_v61, %v7196_v18 }
 0x3f5   : > { %8456 = vrcp.f32 %v5422_v58  ;;  %v4726_v17 = vmul.f32 %v8451_v0, %v4725_v29  ;;  %v4734_v43 = vmul.f32 %v8455_v45, %v10215_v57  ;;  %v3596_v9 = vpop.f32.mrf.mxu1  ;;  %v10232_v55 = vpop.xlane.xlu2 %4537  ;;  %v7190_v0 = vld [vmem:[%s8928_s23 + $0x61c] sm:$0xf0]  ;;  %v4743_v18 = vand.u32 2147483648, %v10215_v57 }
 0x3f6   : > { %5613 = vst [vmem:[%s10148_s14 + $0x20] sm:$0xff] %v5549_v44  ;;  %v3933_v4 = vadd.f32 %v3932_v23, %v3764_v42  ;;  %8458 = vrsqrt.f32 %v10232_v55  ;;  %v10243_v27 = vsub.f32 %v4099_v30, %v4352_v36  ;;  %v3597_v16 = vadd.f32 %v3596_v9, %v9578_v5 }
 0x3f7   : > { %v4103_v28 = vpop.f32.mrf.mxu0  ;;  %v4727_v63 = vmul.f32 %v4726_v17, %v10190_v22  ;;  %v4735_v41 = vmul.f32 %v8455_v45, %v4734_v43  ;;  %5696 = vst [vmem:[%s9932_s18 + $0xb8] sm:$0xff] %v4352_v36  ;;  %v7193_v29 = vor.u32 %v8077_v59, %v7190_v0  ;;  %v7201_v23 = vor.u32 %v8078_v49, %v7198_v39 }
 0x3f8   : > { %v4102_v33 = vadd.f32 %v4101_v7, %v3933_v4  ;;  %v4480_v11 = vmul.f32 %v10243_v27, %v10243_v27  ;;  %v8083_v7 = vld [vmem:[%s8928_s23 + $0x628] sm:$0xf0]  ;;  %vm4752_vm0 = vcmp.eq.f32.partialorder %v10232_v55, inf  ;;  %vm4754_vm1 = vcmp.eq.f32.partialorder %v10232_v55, 0.0 }
 0x3f9   : > { %v4729_v62 = vsel %vm4728_vm12, %v10190_v22, %v4727_v63  ;;  %v4736_v32 = vmul.f32 0.5, %v4735_v41  ;;  %v7205_v63 = vor.u32 %v8083_v7, %v7204_v48 }
 0x3fa   : > { %v4732_v1 = vsel %vm4730_vm13, %v4731_v20, %v4729_v62  ;;  %v4225_v37 = vmul.f32 0.999, %v4102_v33  ;;  %v4289_v51 = vmul.f32 0.001, %v4102_v33  ;;  %4567 = vadd.xlane.f32.xlu2 %v4480_v11 }
 0x3fb   : > { %v8457_v30 = vpop.eup %8456  ;;  %v5423_v50 = vadd.f32 1e-07, %v4732_v1  ;;  %v4737_v54 = vsub.f32 1.5, %v4736_v32  ;;  %v3765_v58 = vpop.f32.mrf.mxu2 }
 0x3fc   : > { %v8459_v22 = vpop.eup %8458  ;;  %v5550_v44 = vmul.f32 %v8457_v30, %v9978_v52  ;;  %v3766_v5 = vadd.f32 %v3765_v58, %v3597_v16  ;;  %v3934_v42 = vpop.f32.mrf.mxu3  ;;  %v4353_v36 = vadd.f32 %v4289_v51, %v4225_v37 }
 0x3fd   : > { %8460 = vrcp.f32 %v5423_v50  ;;  %v4738_v17 = vmul.f32 %v8455_v45, %v4737_v54  ;;  %v4746_v43 = vmul.f32 %v8459_v22, %v10232_v55  ;;  %v3599_v9 = vpop.f32.mrf.mxu1  ;;  %v10257_v4 = vpop.xlane.xlu0 %4539 }
 0x3fe   : > { %5614 = vst [vmem:[%s10148_s14 + $0x28] sm:$0xff] %v5550_v44  ;;  %v3935_v59 = vadd.f32 %v3934_v42, %v3766_v5  ;;  %8462 = vrsqrt.f32 %v10257_v4  ;;  %v10265_v20 = vsub.f32 %v4102_v33, %v4353_v36  ;;  %v3600_v62 = vadd.f32 %v3599_v9, %v9584_v31  ;;  %v7232_v42 = vld [vmem:[%s8928_s23 + $0x648] sm:$0xf]  ;;  %v8087_v9 = vld [vmem:[%s8928_s23 + $0x64c] sm:$0xf] }
 0x3ff   : > { %v4106_v41 = vpop.f32.mrf.mxu0  ;;  %v4739_v52 = vmul.f32 %v4738_v17, %v10215_v57  ;;  %v4747_v0 = vmul.f32 %v8459_v22, %v4746_v43  ;;  %5697 = vst [vmem:[%s9932_s18 + $0xc0] sm:$0xff] %v4353_v36  ;;  %v8091_v43 = vld [vmem:[%s8928_s23 + $0x668] sm:$0xf0]  ;;  %vm4764_vm2 = vcmp.eq.f32.partialorder %v10257_v4, inf  ;;  %vm4766_vm3 = vcmp.eq.f32.partialorder %v10257_v4, 0.0 }
 0x400   : > { %v4104_v45 = vadd.f32 %v4103_v28, %v3935_v59  ;;  %3638 = vmatmul.bf16.gmra.mxu1 %v7193_v29  ;;  %3807 = vmatmul.bf16.gmra.mxu2 %v7197_v8  ;;  %v4481_v16 = vmul.f32 %v10265_v20, %v10265_v20  ;;  %v8086_v8 = vld [vmem:[%s8928_s23 + $0x644] sm:$0xf] }
 0x401   : > { %v4741_v61 = vsel %vm4740_vm14, %v10215_v57, %v4739_v52  ;;  %v4748_v49 = vmul.f32 0.5, %v4747_v0  ;;  %3976 = vmatmul.bf16.gmra.mxu3 %v7201_v23  ;;  %v4755_v23 = vand.u32 2147483648, %v10232_v55  ;;  %v7234_v0 = vld [vmem:[%s8928_s23 + $0x66c] sm:$0xf0] }
 0x402   : > { %4145 = vmatmul.bf16.gmra.mxu0 %v7205_v63  ;;  %v4744_v32 = vsel %vm4742_vm15, %v4743_v18, %v4741_v61  ;;  %v4226_v39 = vmul.f32 0.999, %v4104_v45  ;;  %v4290_v48 = vmul.f32 0.001, %v4104_v45  ;;  %4569 = vadd.xlane.f32.xlu0 %v4481_v16  ;;  %v7240_v18 = vld [vmem:[%s8928_s23 + $0x650] sm:$0xf] }
 0x403   : > { %v8461_v28 = vpop.eup %8460  ;;  %v5424_v1 = vadd.f32 1e-07, %v4744_v32  ;;  %v4749_v33 = vsub.f32 1.5, %v4748_v49  ;;  %v3768_v37 = vpop.f32.mrf.mxu2 }
 0x404   : > { %v8463_v51 = vpop.eup %8462  ;;  %v5551_v57 = vmul.f32 %v8461_v28, %v9992_v46  ;;  %v3769_v31 = vadd.f32 %v3768_v37, %v3600_v62  ;;  %v3937_v11 = vpop.f32.mrf.mxu3  ;;  %v4354_v7 = vadd.f32 %v4290_v48, %v4226_v39 }
 0x405   : > { %8464 = vrcp.f32 %v5424_v1  ;;  %v4750_v30 = vmul.f32 %v8459_v22, %v4749_v33  ;;  %v4758_v50 = vmul.f32 %v8463_v51, %v10257_v4  ;;  %v3601_v54 = vpop.f32.mrf.mxu1  ;;  %v10274_v58 = vpop.xlane.xlu1 %4541  ;;  %v7226_v22 = vld [vmem:[%s8928_s23 + $0x664] sm:$0xf0]  ;;  %v7233_v1 = vor.u32 %v8091_v43, %v7232_v42 }
 0x406   : > { %5615 = vst [vmem:[%s10148_s14 + $0x30] sm:$0xff] %v5551_v57  ;;  %v3938_v29 = vadd.f32 %v3937_v11, %v3769_v31  ;;  %8466 = vrsqrt.f32 %v10274_v58  ;;  %v10285_v17 = vsub.f32 %v4104_v45, %v4354_v7  ;;  %v3602_v52 = vadd.f32 %v3601_v54, %v9594_v34 }
 0x407   : > { %v4108_v46 = vpop.f32.mrf.mxu0  ;;  %v4751_v44 = vmul.f32 %v4750_v30, %v10232_v55  ;;  %v4759_v5 = vmul.f32 %v8463_v51, %v4758_v50  ;;  %5698 = vst [vmem:[%s9932_s18 + $0xc8] sm:$0xff] %v4354_v7  ;;  %v7229_v28 = vor.u32 %v8086_v8, %v7226_v22  ;;  %v7237_v57 = vor.u32 %v8087_v9, %v7234_v0 }
 0x408   : > { %v4107_v36 = vadd.f32 %v4106_v41, %v3938_v29  ;;  %v4482_v32 = vmul.f32 %v10285_v17, %v10285_v17  ;;  %v8092_v41 = vld [vmem:[%s8928_s23 + $0x670] sm:$0xf0]  ;;  %vm4776_vm4 = vcmp.eq.f32.partialorder %v10274_v58, inf  ;;  %vm4778_vm5 = vcmp.eq.f32.partialorder %v10274_v58, 0.0 }
 0x409   : > { %v4753_v63 = vsel %vm4752_vm0, %v10232_v55, %v4751_v44  ;;  %v4760_v59 = vmul.f32 0.5, %v4759_v5  ;;  %v7241_v54 = vor.u32 %v8092_v41, %v7240_v18  ;;  %v4767_v5 = vand.u32 2147483648, %v10257_v4 }
 0x40a   : > { %v4756_v61 = vsel %vm4754_vm1, %v4755_v23, %v4753_v63  ;;  %v4227_v49 = vmul.f32 0.999, %v4107_v36  ;;  %v4291_v62 = vmul.f32 0.001, %v4107_v36  ;;  %4571 = vadd.xlane.f32.xlu1 %v4482_v32 }
 0x40b   : > { %v8465_v45 = vpop.eup %8464  ;;  %v5425_v16 = vadd.f32 1e-07, %v4756_v61  ;;  %v4761_v39 = vsub.f32 1.5, %v4760_v59  ;;  %v3770_v48 = vpop.f32.mrf.mxu2 }
 0x40c   : > { %v8467_v55 = vpop.eup %8466  ;;  %v5552_v33 = vmul.f32 %v8465_v45, %v9998_v40  ;;  %v3771_v34 = vadd.f32 %v3770_v48, %v3602_v52  ;;  %v3939_v37 = vpop.f32.mrf.mxu3  ;;  %v4355_v31 = vadd.f32 %v4291_v62, %v4227_v49  ;;  %v8095_v48 = vld [vmem:[%s8928_s23 + $0x68c] sm:$0xf] }
 0x40d   : > { %8468 = vrcp.f32 %v5425_v16  ;;  %v4762_v11 = vmul.f32 %v8463_v51, %v4761_v39  ;;  %v4770_v7 = vmul.f32 %v8467_v55, %v10274_v58  ;;  %v3604_v30 = vpop.f32.mrf.mxu1  ;;  %v10299_v50 = vpop.xlane.xlu2 %4543 }
 0x40e   : > { %5616 = vst [vmem:[%s10148_s14 + $0x38] sm:$0xff] %v5552_v33  ;;  %v3940_v29 = vadd.f32 %v3939_v37, %v3771_v34  ;;  %8470 = vrsqrt.f32 %v10299_v50  ;;  %v10307_v22 = vsub.f32 %v4107_v36, %v4355_v31  ;;  %v3605_v43 = vadd.f32 %v3604_v30, %v9617_v19  ;;  %v7268_v33 = vld [vmem:[%s8928_s23 + $0x690] sm:$0xf] }
 0x40f   : > { %v4111_v8 = vpop.f32.mrf.mxu0  ;;  %v4763_v40 = vmul.f32 %v4762_v11, %v10257_v4  ;;  %v4771_v44 = vmul.f32 %v8467_v55, %v4770_v7  ;;  %5699 = vst [vmem:[%s9932_s18 + $0xd0] sm:$0xff] %v4355_v31  ;;  %v4779_v34 = vand.u32 2147483648, %v10274_v58  ;;  %v8100_v31 = vld [vmem:[%s8928_s23 + $0x6b0] sm:$0xf0]  ;;  %vm4788_vm6 = vcmp.eq.f32.partialorder %v10299_v50, inf }
 0x410   : > { %v4109_v51 = vadd.f32 %v4108_v46, %v3940_v29  ;;  %3643 = vmatmul.bf16.gmra.mxu1 %v7229_v28  ;;  %3812 = vmatmul.bf16.gmra.mxu2 %v7233_v1  ;;  %v4483_v63 = vmul.f32 %v10307_v22, %v10307_v22  ;;  %v8096_v11 = vld [vmem:[%s8928_s23 + $0x694] sm:$0xf]  ;;  %v7270_v29 = vld [vmem:[%s8928_s23 + $0x6b4] sm:$0xf0]  ;;  %vm4790_vm7 = vcmp.eq.f32.partialorder %v10299_v50, 0.0 }
 0x411   : > { %v4765_v42 = vsel %vm4764_vm2, %v10257_v4, %v4763_v40  ;;  %v4772_v23 = vmul.f32 0.5, %v4771_v44  ;;  %3981 = vmatmul.bf16.gmra.mxu3 %v7237_v57  ;;  %v7276_v40 = vld [vmem:[%s8928_s23 + $0x698] sm:$0xf] }
 0x412   : > { %4150 = vmatmul.bf16.gmra.mxu0 %v7241_v54  ;;  %v4768_v9 = vsel %vm4766_vm3, %v4767_v5, %v4765_v42  ;;  %v4228_v59 = vmul.f32 0.999, %v4109_v51  ;;  %v4292_v52 = vmul.f32 0.001, %v4109_v51  ;;  %4573 = vadd.xlane.f32.xlu2 %v4483_v63 }
 0x413   : > { %v8469_v46 = vpop.eup %8468  ;;  %v5426_v0 = vadd.f32 1e-07, %v4768_v9  ;;  %v4773_v36 = vsub.f32 1.5, %v4772_v23  ;;  %v3773_v18 = vpop.f32.mrf.mxu2 }
 0x414   : > { %v8471_v61 = vpop.eup %8470  ;;  %v5553_v4 = vmul.f32 %v8469_v46, %v10012_v47  ;;  %v3774_v19 = vadd.f32 %v3773_v18, %v3605_v43  ;;  %v3942_v49 = vpop.f32.mrf.mxu3  ;;  %v4356_v62 = vadd.f32 %v4292_v52, %v4228_v59  ;;  %v7269_v52 = vor.u32 %v8100_v31, %v7268_v33 }
 0x415   : > { %8472 = vrcp.f32 %v5426_v0  ;;  %v4774_v32 = vmul.f32 %v8467_v55, %v4773_v36  ;;  %v4782_v41 = vmul.f32 %v8471_v61, %v10299_v50  ;;  %v3606_v45 = vpop.f32.mrf.mxu1  ;;  %v10316_v16 = vpop.xlane.xlu0 %4545  ;;  %v7262_v55 = vld [vmem:[%s8928_s23 + $0x6ac] sm:$0xf0]  ;;  %v7273_v36 = vor.u32 %v8096_v11, %v7270_v29 }
 0x416   : > { %5617 = vst [vmem:[%s10148_s14 + $0x40] sm:$0xff] %v5553_v4  ;;  %v3943_v39 = vadd.f32 %v3942_v49, %v3774_v19  ;;  %8474 = vrsqrt.f32 %v10316_v16  ;;  %v10327_v57 = vsub.f32 %v4109_v51, %v4356_v62  ;;  %v3607_v54 = vadd.f32 %v3606_v45, %v9627_v56 }
 0x417   : > { %v4113_v47 = vpop.f32.mrf.mxu0  ;;  %v4775_v28 = vmul.f32 %v4774_v32, %v10274_v58  ;;  %v4783_v1 = vmul.f32 %v8471_v61, %v4782_v41  ;;  %5700 = vst [vmem:[%s9932_s18 + $0xd8] sm:$0xff] %v4356_v62  ;;  %v7265_v59 = vor.u32 %v8095_v48, %v7262_v55  ;;  %v4791_v48 = vand.u32 2147483648, %v10299_v50 }
 0x418   : > { %v4112_v37 = vadd.f32 %v4111_v8, %v3943_v39  ;;  %v4484_v23 = vmul.f32 %v10327_v57, %v10327_v57  ;;  %v8101_v8 = vld [vmem:[%s8928_s23 + $0x6b8] sm:$0xf0]  ;;  %vm4800_vm8 = vcmp.eq.f32.partialorder %v10316_v16, inf  ;;  %vm4802_vm9 = vcmp.eq.f32.partialorder %v10316_v16, 0.0 }
 0x419   : > { %v4777_v7 = vsel %vm4776_vm4, %v10274_v58, %v4775_v28  ;;  %v4784_v30 = vmul.f32 0.5, %v4783_v1  ;;  %v7277_v32 = vor.u32 %v8101_v8, %v7276_v40 }
 0x41a   : > { %v4780_v44 = vsel %vm4778_vm5, %v4779_v34, %v4777_v7  ;;  %v4229_v5 = vmul.f32 0.999, %v4112_v37  ;;  %v4293_v42 = vmul.f32 0.001, %v4112_v37  ;;  %4575 = vadd.xlane.f32.xlu0 %v4484_v23 }
 0x41b   : > { %v8473_v51 = vpop.eup %8472  ;;  %v5427_v43 = vadd.f32 1e-07, %v4780_v44  ;;  %v4785_v9 = vsub.f32 1.5, %v4784_v30  ;;  %v3775_v63 = vpop.f32.mrf.mxu2 }
 0x41c   : > { %v8475_v58 = vpop.eup %8474  ;;  %v5554_v46 = vmul.f32 %v8473_v51, %v10018_v2  ;;  %v3776_v56 = vadd.f32 %v3775_v63, %v3607_v54  ;;  %v3944_v0 = vpop.f32.mrf.mxu3  ;;  %v4357_v18 = vadd.f32 %v4293_v42, %v4229_v5 }
 0x41d   : > { %8476 = vrcp.f32 %v5427_v43  ;;  %v4786_v4 = vmul.f32 %v8471_v61, %v4785_v9  ;;  %v4794_v19 = vmul.f32 %v8475_v58, %v10316_v16  ;;  %v3609_v49 = vpop.f32.mrf.mxu1  ;;  %v10341_v62 = vpop.xlane.xlu1 %4547  ;;  %v8104_v43 = vld [vmem:[%s8928_s23 + $0x6d4] sm:$0xf] }
 0x41e   : > { %5618 = vst [vmem:[%s10148_s14 + $0x48] sm:$0xff] %v5554_v46  ;;  %v3945_v41 = vadd.f32 %v3944_v0, %v3776_v56  ;;  %8478 = vrsqrt.f32 %v10341_v62  ;;  %v10349_v28 = vsub.f32 %v4112_v37, %v4357_v18  ;;  %v3610_v33 = vadd.f32 %v3609_v49, %v9633_v6  ;;  %v8109_v0 = vld [vmem:[%s8928_s23 + $0x6f8] sm:$0xf0]  ;;  %v7306_v49 = vld [vmem:[%s8928_s23 + $0x6fc] sm:$0xf0] }
 0x41f   : > { %v4116_v45 = vpop.f32.mrf.mxu0  ;;  %v4787_v2 = vmul.f32 %v4786_v4, %v10299_v50  ;;  %v4795_v39 = vmul.f32 %v8475_v58, %v4794_v19  ;;  %5701 = vst [vmem:[%s9932_s18 + $0xe0] sm:$0xff] %v4357_v18  ;;  %vm4812_vm10 = vcmp.eq.f32.partialorder %v10341_v62, inf  ;;  %vm4814_vm11 = vcmp.eq.f32.partialorder %v10341_v62, 0.0 }
 0x420   : > { %v4114_v61 = vadd.f32 %v4113_v47, %v3945_v41  ;;  %3648 = vmatmul.bf16.gmra.mxu1 %v7265_v59  ;;  %3817 = vmatmul.bf16.gmra.mxu2 %v7269_v52  ;;  %v4485_v31 = vmul.f32 %v10349_v28, %v10349_v28  ;;  %v7298_v59 = vld [vmem:[%s8928_s23 + $0x6f4] sm:$0xf0] }
 0x421   : > { %v4789_v1 = vsel %vm4788_vm6, %v10299_v50, %v4787_v2  ;;  %v4796_v55 = vmul.f32 0.5, %v4795_v39  ;;  %3986 = vmatmul.bf16.gmra.mxu3 %v7273_v36  ;;  %v7304_v52 = vld [vmem:[%s8928_s23 + $0x6d8] sm:$0xf]  ;;  %v8105_v36 = vld [vmem:[%s8928_s23 + $0x6dc] sm:$0xf] }
 0x422   : > { %4155 = vmatmul.bf16.gmra.mxu0 %v7277_v32  ;;  %v4792_v34 = vsel %vm4790_vm7, %v4791_v48, %v4789_v1  ;;  %v4230_v11 = vmul.f32 0.999, %v4114_v61  ;;  %v4294_v7 = vmul.f32 0.001, %v4114_v61  ;;  %4577 = vadd.xlane.f32.xlu1 %v4485_v31  ;;  %v7312_v32 = vld [vmem:[%s8928_s23 + $0x6e0] sm:$0xf]  ;;  %v7305_v31 = vor.u32 %v8109_v0, %v7304_v52 }
 0x423   : > { %v8477_v47 = vpop.eup %8476  ;;  %v5428_v30 = vadd.f32 1e-07, %v4792_v34  ;;  %v4797_v37 = vsub.f32 1.5, %v4796_v55  ;;  %v3778_v54 = vpop.f32.mrf.mxu2  ;;  %v7301_v34 = vor.u32 %v8104_v43, %v7298_v59 }
 0x424   : > { %v8479_v29 = vpop.eup %8478  ;;  %v5555_v50 = vmul.f32 %v8477_v47, %v10032_v53  ;;  %v3779_v6 = vadd.f32 %v3778_v54, %v3610_v33  ;;  %v3947_v40 = vpop.f32.mrf.mxu3  ;;  %v4358_v44 = vadd.f32 %v4294_v7, %v4230_v11  ;;  %v7309_v47 = vor.u32 %v8105_v36, %v7306_v49 }
 0x425   : > { %8480 = vrcp.f32 %v5428_v30  ;;  %v4798_v5 = vmul.f32 %v8475_v58, %v4797_v37  ;;  %v4806_v42 = vmul.f32 %v8479_v29, %v10341_v62  ;;  %v3611_v23 = vpop.f32.mrf.mxu1  ;;  %v10358_v8 = vpop.xlane.xlu2 %4549  ;;  %v4803_v58 = vand.u32 2147483648, %v10316_v16 }
 0x426   : > { %5619 = vst [vmem:[%s10148_s14 + $0x50] sm:$0xff] %v5555_v50  ;;  %v3948_v51 = vadd.f32 %v3947_v40, %v3779_v6  ;;  %8482 = vrsqrt.f32 %v10358_v8  ;;  %v10369_v56 = vsub.f32 %v4114_v61, %v4358_v44  ;;  %v3612_v19 = vadd.f32 %v3611_v23, %v9643_v25 }
 0x427   : > { %v4118_v53 = vpop.f32.mrf.mxu0  ;;  %v4799_v9 = vmul.f32 %v4798_v5, %v10316_v16  ;;  %v4807_v63 = vmul.f32 %v8479_v29, %v4806_v42  ;;  %5702 = vst [vmem:[%s9932_s18 + $0xe8] sm:$0xff] %v4358_v44  ;;  %vm4824_vm12 = vcmp.eq.f32.partialorder %v10358_v8, inf  ;;  %vm4826_vm13 = vcmp.eq.f32.partialorder %v10358_v8, 0.0 }
 0x428   : > { %v4117_v46 = vadd.f32 %v4116_v45, %v3948_v51  ;;  %v4486_v48 = vmul.f32 %v10369_v56, %v10369_v56  ;;  %v8110_v45 = vld [vmem:[%s8928_s23 + $0x700] sm:$0xf0] }
 0x429   : > { %v4801_v18 = vsel %vm4800_vm8, %v10316_v16, %v4799_v9  ;;  %v4808_v4 = vmul.f32 0.5, %v4807_v63  ;;  %v7313_v6 = vor.u32 %v8110_v45, %v7312_v32 }
 0x42a   : > { %v4804_v41 = vsel %vm4802_vm9, %v4803_v58, %v4801_v18  ;;  %v4231_v2 = vmul.f32 0.999, %v4117_v46  ;;  %v4295_v39 = vmul.f32 0.001, %v4117_v46  ;;  %4579 = vadd.xlane.f32.xlu2 %v4486_v48 }
 0x42b   : > { %v8481_v61 = vpop.eup %8480  ;;  %v5429_v1 = vadd.f32 1e-07, %v4804_v41  ;;  %v4809_v55 = vsub.f32 1.5, %v4808_v4  ;;  %v3780_v33 = vpop.f32.mrf.mxu2 }
 0x42c   : > { %v8483_v16 = vpop.eup %8482  ;;  %v5556_v11 = vmul.f32 %v8481_v61, %v10038_v21  ;;  %v3781_v25 = vadd.f32 %v3780_v33, %v3612_v19  ;;  %v3949_v7 = vpop.f32.mrf.mxu3  ;;  %v4359_v30 = vadd.f32 %v4295_v39, %v4231_v2  ;;  %v8113_v61 = vld [vmem:[%s8928_s23 + $0x71c] sm:$0xf]  ;;  %v7340_v33 = vld [vmem:[%s8928_s23 + $0x720] sm:$0xf] }
 0x42d   : > { %8484 = vrcp.f32 %v5429_v1  ;;  %v4810_v37 = vmul.f32 %v8479_v29, %v4809_v55  ;;  %v4818_v54 = vmul.f32 %v8483_v16, %v10358_v8  ;;  %v3614_v50 = vpop.f32.mrf.mxu1  ;;  %v10384_v44 = vpop.xlane.xlu0 %4551  ;;  %v4815_v29 = vand.u32 2147483648, %v10341_v62  ;;  %v7334_v1 = vld [vmem:[%s8928_s23 + $0x73c] sm:$0xf0] }
 0x42e   : > { %5620 = vst [vmem:[%s10148_s14 + $0x58] sm:$0xff] %v5556_v11  ;;  %v3950_v40 = vadd.f32 %v3949_v7, %v3781_v25  ;;  %v10386_v42 = vsub.f32 %v4117_v46, %v4359_v30  ;;  %8486 = vrsqrt.f32 %v10384_v44  ;;  %v3615_v52 = vadd.f32 %v3614_v50, %v9649_v24  ;;  %v8114_v7 = vld [vmem:[%s8928_s23 + $0x724] sm:$0xf]  ;;  %v8119_v50 = vld [vmem:[%s8928_s23 + $0x748] sm:$0xf0] }
 0x42f   : > { %v4121_v5 = vpop.f32.mrf.mxu0  ;;  %v4811_v21 = vmul.f32 %v4810_v37, %v10341_v62  ;;  %v4819_v23 = vmul.f32 %v8483_v16, %v4818_v54  ;;  %5703 = vst [vmem:[%s9932_s18 + $0xf0] sm:$0xff] %v4359_v30  ;;  %v7348_v54 = vld [vmem:[%s8928_s23 + $0x728] sm:$0xf]  ;;  %vm4836_vm14 = vcmp.eq.f32.partialorder %v10384_v44, inf  ;;  %vm4838_vm15 = vcmp.eq.f32.partialorder %v10384_v44, 0.0 }
 0x430   : > { %v4119_v51 = vadd.f32 %v4118_v53, %v3950_v40  ;;  %3653 = vmatmul.bf16.gmra.mxu1 %v7301_v34  ;;  %3822 = vmatmul.bf16.gmra.mxu2 %v7305_v31  ;;  %v4487_v43 = vmul.f32 %v10386_v42, %v10386_v42  ;;  %v8118_v34 = vld [vmem:[%s8928_s23 + $0x740] sm:$0xf0]  ;;  %v4827_v31 = vand.u32 2147483648, %v10358_v8 }
 0x431   : > { %v4813_v9 = vsel %vm4812_vm10, %v10341_v62, %v4811_v21  ;;  %v4820_v63 = vmul.f32 0.5, %v4819_v23  ;;  %3991 = vmatmul.bf16.gmra.mxu3 %v7309_v47  ;;  %v7342_v47 = vld [vmem:[%s8928_s23 + $0x744] sm:$0xf0] }
 0x432   : > { %4160 = vmatmul.bf16.gmra.mxu0 %v7313_v6  ;;  %v4816_v59 = vsel %vm4814_vm11, %v4815_v29, %v4813_v9  ;;  %4581 = vadd.xlane.f32.xlu0 %v4487_v43  ;;  %v4232_v58 = vmul.f32 0.999, %v4119_v51  ;;  %v4296_v46 = vmul.f32 0.001, %v4119_v51  ;;  %v7337_v43 = vor.u32 %v8113_v61, %v7334_v1 }
 0x433   : > { %v8485_v53 = vpop.eup %8484  ;;  %v5430_v0 = vadd.f32 1e-07, %v4816_v59  ;;  %v4821_v36 = vsub.f32 1.5, %v4820_v63  ;;  %v3783_v18 = vpop.f32.mrf.mxu2  ;;  %v7341_v9 = vor.u32 %v8118_v34, %v7340_v33 }
 0x434   : > { %v5557_v4 = vmul.f32 %v8485_v53, %v10052_v26  ;;  %v3784_v19 = vadd.f32 %v3783_v18, %v3615_v52  ;;  %v3952_v62 = vpop.f32.mrf.mxu3  ;;  %v4360_v49 = vadd.f32 %v4296_v46, %v4232_v58  ;;  %v8487_v32 = vpop.eup %8486  ;;  %v7345_v53 = vor.u32 %v8114_v7, %v7342_v47 }
 0x435   : > { %8488 = vrcp.f32 %v5430_v0  ;;  %v4822_v24 = vmul.f32 %v8483_v16, %v4821_v36  ;;  %v3616_v41 = vpop.f32.mrf.mxu1  ;;  %v4830_v2 = vmul.f32 %v8487_v32, %v10384_v44  ;;  %v10401_v48 = vpop.xlane.xlu1 %4553  ;;  %v7349_v0 = vor.u32 %v8119_v50, %v7348_v54 }
 0x436   : > { %5621 = vst [vmem:[%s10148_s14 + $0x60] sm:$0xff] %v5557_v4  ;;  %v3953_v39 = vadd.f32 %v3952_v62, %v3784_v19  ;;  %v10403_v26 = vsub.f32 %v4119_v51, %v4360_v49  ;;  %8490 = vrsqrt.f32 %v10401_v48  ;;  %v3617_v37 = vadd.f32 %v3616_v41, %v9659_v60 }
 0x437   : > { %v4123_v45 = vpop.f32.mrf.mxu0  ;;  %v4823_v55 = vmul.f32 %v4822_v24, %v10358_v8  ;;  %5704 = vst [vmem:[%s9932_s18 + $0xf8] sm:$0xff] %v4360_v49  ;;  %v4831_v16 = vmul.f32 %v8487_v32, %v4830_v2  ;;  %vm4848_vm0 = vcmp.eq.f32.partialorder %v10401_v48, inf  ;;  %vm4850_vm1 = vcmp.eq.f32.partialorder %v10401_v48, 0.0 }
 0x438   : > { %v4122_v11 = vadd.f32 %v4121_v5, %v3953_v39  ;;  %v4488_v25 = vmul.f32 %v10403_v26, %v10403_v26 }
 0x439   : > { %v4825_v30 = vsel %vm4824_vm12, %v10358_v8, %v4823_v55  ;;  %v4832_v40 = vmul.f32 0.5, %v4831_v16 }
 0x43a   : > { %v4828_v6 = vsel %vm4826_vm13, %v4827_v31, %v4825_v30  ;;  %v4233_v21 = vmul.f32 0.999, %v4122_v11  ;;  %v4297_v23 = vmul.f32 0.001, %v4122_v11  ;;  %4583 = vadd.xlane.f32.xlu1 %v4488_v25 }
 0x43b   : > { %v8489_v5 = vpop.eup %8488  ;;  %v5431_v29 = vadd.f32 1e-07, %v4828_v6  ;;  %v3785_v51 = vpop.f32.mrf.mxu2  ;;  %v4833_v59 = vsub.f32 1.5, %v4832_v40  ;;  %v8122_v6 = vld [vmem:[%s8928_s23 + $0x764] sm:$0xf] }
 0x43c   : > { %v5558_v63 = vmul.f32 %v8489_v5, %v10058_v14  ;;  %v3786_v52 = vadd.f32 %v3785_v51, %v3617_v37  ;;  %v3954_v8 = vpop.f32.mrf.mxu3  ;;  %v4361_v60 = vadd.f32 %v4297_v23, %v4233_v21  ;;  %v8491_v58 = vpop.eup %8490  ;;  %v7370_v23 = vld [vmem:[%s8928_s23 + $0x784] sm:$0xf0] }
 0x43d   : > { %8492 = vrcp.f32 %v5431_v29  ;;  %v3619_v46 = vpop.f32.mrf.mxu1  ;;  %v4834_v36 = vmul.f32 %v8487_v32, %v4833_v59  ;;  %v4842_v18 = vmul.f32 %v8491_v58, %v10401_v48  ;;  %v10427_v62 = vpop.xlane.xlu2 %4555  ;;  %v4839_v32 = vand.u32 2147483648, %v10384_v44  ;;  %v7376_v5 = vld [vmem:[%s8928_s23 + $0x768] sm:$0xf] }
 0x43e   : > { %5622 = vst [vmem:[%s10148_s14 + $0x68] sm:$0xff] %v5558_v63  ;;  %v3955_v4 = vadd.f32 %v3954_v8, %v3786_v52  ;;  %v10429_v14 = vsub.f32 %v4122_v11, %v4361_v60  ;;  %8494 = vrsqrt.f32 %v10427_v62  ;;  %v3620_v2 = vadd.f32 %v3619_v46, %v9665_v13  ;;  %v7378_v8 = vld [vmem:[%s8928_s23 + $0x78c] sm:$0xf0] }
 0x43f   : > { %v4126_v19 = vpop.f32.mrf.mxu0  ;;  %5705 = vst [vmem:[%s9932_s18 + $0x100] sm:$0xff] %v4361_v60  ;;  %v4835_v49 = vmul.f32 %v4834_v36, %v10384_v44  ;;  %v4843_v24 = vmul.f32 %v8491_v58, %v4842_v18  ;;  %v4851_v63 = vand.u32 2147483648, %v10401_v48  ;;  %v7384_v60 = vld [vmem:[%s8928_s23 + $0x770] sm:$0xf]  ;;  %v8128_v18 = vld [vmem:[%s8928_s23 + $0x790] sm:$0xf0] }
 0x440   : > { %v4124_v41 = vadd.f32 %v4123_v45, %v3955_v4  ;;  %3658 = vmatmul.bf16.gmra.mxu1 %v7337_v43  ;;  %3827 = vmatmul.bf16.gmra.mxu2 %v7341_v9  ;;  %v4489_v39 = vmul.f32 %v10429_v14, %v10429_v14  ;;  %v8127_v43 = vld [vmem:[%s8928_s23 + $0x788] sm:$0xf0]  ;;  %vm4860_vm2 = vcmp.eq.f32.partialorder %v10427_v62, inf  ;;  %vm4862_vm3 = vcmp.eq.f32.partialorder %v10427_v62, 0.0 }
 0x441   : > { %3996 = vmatmul.bf16.gmra.mxu3 %v7345_v53  ;;  %v4837_v61 = vsel %vm4836_vm14, %v10384_v44, %v4835_v49  ;;  %v4844_v45 = vmul.f32 0.5, %v4843_v24  ;;  %v8123_v9 = vld [vmem:[%s8928_s23 + $0x76c] sm:$0xf]  ;;  %v7373_v24 = vor.u32 %v8122_v6, %v7370_v23  ;;  %v11419_v23 = vld [vmem:[#allocation28_spill] sm:$0xff] }
 0x442   : > { %4165 = vmatmul.bf16.gmra.mxu0 %v7349_v0  ;;  %v4234_v1 = vmul.f32 0.999, %v4124_v41  ;;  %v4298_v55 = vmul.f32 0.001, %v4124_v41  ;;  %v4840_v34 = vsel %vm4838_vm15, %v4839_v32, %v4837_v61  ;;  %4585 = vadd.xlane.f32.xlu2 %v4489_v39  ;;  %v11417_v0 = vld [vmem:[#allocation27_spill] sm:$0xff]  ;;  %v7377_v61 = vor.u32 %v8127_v43, %v7376_v5 }
 0x443   : > { %v8493_v33 = vpop.eup %8492  ;;  %v3788_v31 = vpop.f32.mrf.mxu2  ;;  %v5432_v16 = vadd.f32 1e-07, %v4840_v34  ;;  %v4845_v11 = vsub.f32 1.5, %v4844_v45  ;;  %v7381_v34 = vor.u32 %v8123_v9, %v7378_v8 }
 0x444   : > { %v5559_v13 = vmul.f32 %v8493_v33, %v10072_v3  ;;  %v3789_v25 = vadd.f32 %v3788_v31, %v3620_v2  ;;  %v3957_v7 = vpop.f32.mrf.mxu3  ;;  %v4362_v44 = vadd.f32 %v4298_v55, %v4234_v1  ;;  %v8495_v30 = vpop.eup %8494  ;;  %v11418_v1 = vld [vmem:[#allocation26_spill] sm:$0xff]  ;;  %v7385_v31 = vor.u32 %v8128_v18, %v7384_v60 }
 0x445   : > { %v3621_v47 = vpop.f32.mrf.mxu1  ;;  %8496 = vrcp.f32 %v5432_v16  ;;  %v4846_v37 = vmul.f32 %v8491_v58, %v4845_v11  ;;  %v4854_v3 = vmul.f32 %v8495_v30, %v10427_v62  ;;  %v10446_v40 = vpop.xlane.xlu0 %4557 }
 0x446   : > { %5623 = vst [vmem:[%s10148_s14 + $0x70] sm:$0xff] %v5559_v13  ;;  %v3958_v54 = vadd.f32 %v3957_v7, %v3789_v25  ;;  %v10448_v21 = vsub.f32 %v4124_v41, %v4362_v44  ;;  %8498 = vrsqrt.f32 %v10446_v40  ;;  %v3622_v36 = vadd.f32 %v3621_v47, %v11417_v0 }
 0x447   : > { %v4128_v50 = vpop.f32.mrf.mxu0  ;;  %5706 = vst [vmem:[%s9932_s18 + $0x108] sm:$0xff] %v4362_v44  ;;  %v4847_v29 = vmul.f32 %v4846_v37, %v10401_v48  ;;  %v4855_v59 = vmul.f32 %v8495_v30, %v4854_v3  ;;  %vm4872_vm4 = vcmp.eq.f32.partialorder %v10446_v40, inf  ;;  %vm4874_vm5 = vcmp.eq.f32.partialorder %v10446_v40, 0.0 }
 0x448   : > { %v4127_v51 = vadd.f32 %v4126_v19, %v3958_v54  ;;  %v4490_v52 = vmul.f32 %v10448_v21, %v10448_v21 }
 0x449   : > { %v4849_v58 = vsel %vm4848_vm0, %v10401_v48, %v4847_v29  ;;  %v4856_v19 = vmul.f32 0.5, %v4855_v59 }
 0x44a   : > { %v4235_v46 = vmul.f32 0.999, %v4127_v51  ;;  %v4299_v53 = vmul.f32 0.001, %v4127_v51  ;;  %v4852_v4 = vsel %vm4850_vm1, %v4851_v63, %v4849_v58  ;;  %4587 = vadd.xlane.f32.xlu0 %v4490_v52  ;;  %v11420_v58 = vld [vmem:[#allocation34_spill] sm:$0xff] }
 0x44b   : > { %v3790_v49 = vpop.f32.mrf.mxu2  ;;  %v8497_v41 = vpop.eup %8496  ;;  %v5433_v32 = vadd.f32 1e-07, %v4852_v4  ;;  %v4857_v55 = vsub.f32 1.5, %v4856_v19 }
 0x44c   : > { %v3791_v2 = vadd.f32 %v3790_v49, %v3622_v36  ;;  %v3959_v39 = vpop.f32.mrf.mxu3  ;;  %v4363_v45 = vadd.f32 %v4299_v53, %v4235_v46  ;;  %v5560_v48 = vmul.f32 %v8497_v41, %v11418_v1  ;;  %v8499_v13 = vpop.eup %8498  ;;  %v8131_v49 = vld [vmem:[%s8928_s23 + $0x7ac] sm:$0xf]  ;;  %v8132_v1 = vld [vmem:[%s8928_s23 + $0x7b4] sm:$0xf] }
 0x44d   : > { %v3624_v33 = vpop.f32.mrf.mxu1  ;;  %8500 = vrcp.f32 %v5433_v32  ;;  %v4858_v7 = vmul.f32 %v8495_v30, %v4857_v55  ;;  %v4866_v47 = vmul.f32 %v8499_v13, %v10446_v40  ;;  %v10473_v44 = vpop.xlane.xlu1 %4559  ;;  %v4863_v30 = vand.u32 2147483648, %v10427_v62 }
 0x44e   : > { %v3960_v16 = vadd.f32 %v3959_v39, %v3791_v2  ;;  %v10468_v25 = vsub.f32 %v4127_v51, %v4363_v45  ;;  %5707 = vst [vmem:[%s9932_s18 + $0x110] sm:$0xff] %v4363_v45  ;;  %8502 = vrsqrt.f32 %v10473_v44  ;;  %v3625_v5 = vadd.f32 %v3624_v33, %v11419_v23  ;;  %v7406_v2 = vld [vmem:[%s8928_s23 + $0x7cc] sm:$0xf0]  ;;  %v8136_v45 = vld [vmem:[%s8928_s23 + $0x7d0] sm:$0xf0] }
 0x44f   : > { %v4131_v11 = vpop.f32.mrf.mxu0  ;;  %5624 = vst [vmem:[%s10148_s14 + $0x78] sm:$0xff] %v5560_v48  ;;  %v4859_v54 = vmul.f32 %v4858_v7, %v10427_v62  ;;  %v4867_v6 = vmul.f32 %v8499_v13, %v4866_v47  ;;  %v7412_v39 = vld [vmem:[%s8928_s23 + $0x7b0] sm:$0xf]  ;;  %v7414_v48 = vld [vmem:[%s8928_s23 + $0x7d4] sm:$0xf0]  ;;  %vm4884_vm6 = vcmp.eq.f32.partialorder %v10473_v44, inf }
 0x450   : > { %v4129_v37 = vadd.f32 %v4128_v50, %v3960_v16  ;;  %3663 = vmatmul.bf16.gmra.mxu1 %v7373_v24  ;;  %3832 = vmatmul.bf16.gmra.mxu2 %v7377_v61  ;;  %v4491_v3 = vmul.f32 %v10468_v25, %v10468_v25  ;;  %v4875_v16 = vand.u32 2147483648, %v10446_v40  ;;  %vm4886_vm7 = vcmp.eq.f32.partialorder %v10473_v44, 0.0 }
 0x451   : > { %4001 = vmatmul.bf16.gmra.mxu3 %v7381_v34  ;;  %v4861_v51 = vsel %vm4860_vm2, %v10427_v62, %v4859_v54  ;;  %v4868_v43 = vmul.f32 0.5, %v4867_v6 }
 0x452   : > { %4170 = vmatmul.bf16.gmra.mxu0 %v7385_v31  ;;  %v4236_v29 = vmul.f32 0.999, %v4129_v37  ;;  %v4300_v50 = vmul.f32 0.001, %v4129_v37  ;;  %4589 = vadd.xlane.f32.xlu1 %v4491_v3  ;;  %v4864_v59 = vsel %vm4862_vm3, %v4863_v30, %v4861_v51  ;;  %v7420_v31 = vld [vmem:[%s8928_s23 + $0x7b8] sm:$0xf]  ;;  %v7409_v30 = vor.u32 %v8131_v49, %v7406_v2 }
 0x453   : > { %v3793_v9 = vpop.f32.mrf.mxu2  ;;  %v8501_v63 = vpop.eup %8500  ;;  %v5434_v53 = vadd.f32 1e-07, %v4864_v59  ;;  %v4869_v0 = vsub.f32 1.5, %v4868_v43 }
 0x454   : > { %v3794_v52 = vadd.f32 %v3793_v9, %v3625_v5  ;;  %v3962_v8 = vpop.f32.mrf.mxu3  ;;  %v4364_v60 = vadd.f32 %v4300_v50, %v4236_v29  ;;  %v5561_v46 = vmul.f32 %v8501_v63, %v11420_v58  ;;  %v8503_v62 = vpop.eup %8502  ;;  %v7413_v50 = vor.u32 %v8136_v45, %v7412_v39  ;;  %v11422_v58 = vld [vmem:[#allocation35_spill] sm:$0xff] }
 0x455   : > { %v3626_v36 = vpop.f32.mrf.mxu1  ;;  %8504 = vrcp.f32 %v5434_v53  ;;  %v4870_v24 = vmul.f32 %v8499_v13, %v4869_v0  ;;  %v4878_v41 = vmul.f32 %v8503_v62, %v10473_v44  ;;  %v10491_v32 = vpop.xlane.xlu2 %4561  ;;  %v8137_v13 = vld [vmem:[%s8928_s23 + $0x7d8] sm:$0xf0]  ;;  %v4887_v39 = vand.u32 2147483648, %v10473_v44 }
 0x456   : > { %v3963_v18 = vadd.f32 %v3962_v8, %v3794_v52  ;;  %v10485_v19 = vsub.f32 %v4129_v37, %v4364_v60  ;;  %5708 = vst [vmem:[%s9932_s18 + $0x118] sm:$0xff] %v4364_v60  ;;  %8506 = vrsqrt.f32 %v10491_v32  ;;  %v7417_v52 = vor.u32 %v8132_v1, %v7414_v48 }
 0x457   : > { %v4133_v4 = vpop.f32.mrf.mxu0  ;;  %5625 = vst [vmem:[%s10148_s14 + $0x80] sm:$0xff] %v5561_v46  ;;  %v4871_v55 = vmul.f32 %v4870_v24, %v10446_v40  ;;  %v4879_v33 = vmul.f32 %v8503_v62, %v4878_v41  ;;  %v7421_v8 = vor.u32 %v8137_v13, %v7420_v31  ;;  %vm4896_vm8 = vcmp.eq.f32.partialorder %v10491_v32, inf }
 0x458   : > { %v4132_v61 = vadd.f32 %v4131_v11, %v3963_v18  ;;  %v4492_v34 = vmul.f32 %v10485_v19, %v10485_v19  ;;  %v11421_v11 = vld [vmem:[#allocation29_spill] sm:$0xff]  ;;  %vm4898_vm9 = vcmp.eq.f32.partialorder %v10491_v32, 0.0 }
 0x459   : > { %v3627_v37 = vadd.f32 %v3626_v36, %v11421_v11  ;;  %v4873_v54 = vsel %vm4872_vm4, %v10446_v40, %v4871_v55  ;;  %v4880_v6 = vmul.f32 0.5, %v4879_v33 }
 0x45a   : > { %v4237_v7 = vmul.f32 0.999, %v4132_v61  ;;  %v4301_v47 = vmul.f32 0.001, %v4132_v61  ;;  %4591 = vadd.xlane.f32.xlu2 %v4492_v34  ;;  %v4876_v23 = vsel %vm4874_vm5, %v4875_v16, %v4873_v54 }
 0x45b   : > { %v3795_v3 = vpop.f32.mrf.mxu2  ;;  %v8505_v43 = vpop.eup %8504  ;;  %v5435_v9 = vadd.f32 1e-07, %v4876_v23  ;;  %v4881_v63 = vsub.f32 1.5, %v4880_v6  ;;  %v8140_v23 = vld [vmem:[%s8928_s23 + $0x7f4] sm:$0xf] }
 0x45c   : > { %v3796_v5 = vadd.f32 %v3795_v3, %v3627_v37  ;;  %v3964_v29 = vpop.f32.mrf.mxu3  ;;  %v4365_v51 = vadd.f32 %v4301_v47, %v4237_v7  ;;  %v8507_v60 = vpop.eup %8506  ;;  %v5562_v40 = vmul.f32 %v8505_v43, %v11422_v58  ;;  %v7448_v43 = vld [vmem:[%s8928_s23 + $0x7f8] sm:$0xf]  ;;  %v7456_v58 = vld [vmem:[%s8928_s23 + $0x800] sm:$0xf] }
 0x45d   : > { %v3629_v59 = vpop.f32.mrf.mxu1  ;;  %8508 = vrcp.f32 %v5435_v9  ;;  %v4882_v36 = vmul.f32 %v8503_v62, %v4881_v63  ;;  %v4890_v18 = vmul.f32 %v8507_v60, %v10491_v32  ;;  %v10514_v49 = vpop.xlane.xlu0 %4563  ;;  %v8145_v9 = vld [vmem:[%s8928_s23 + $0x818] sm:$0xf0] }
 0x45e   : > { %v3965_v46 = vadd.f32 %v3964_v29, %v3796_v5  ;;  %v10510_v0 = vsub.f32 %v4132_v61, %v4365_v51  ;;  %5709 = vst [vmem:[%s9932_s18 + $0x120] sm:$0xff] %v4365_v51  ;;  %8510 = vrsqrt.f32 %v10514_v49  ;;  %v11423_v61 = vld [vmem:[#allocation30_spill] sm:$0xff]  ;;  %v7442_v51 = vld [vmem:[%s8928_s23 + $0x814] sm:$0xf0]  ;;  %v8141_v63 = vld [vmem:[%s8928_s23 + $0x7fc] sm:$0xf] }
 0x45f   : > { %v4136_v53 = vpop.f32.mrf.mxu0  ;;  %5626 = vst [vmem:[%s10148_s14 + $0x88] sm:$0xff] %v5562_v40  ;;  %v4883_v41 = vmul.f32 %v4882_v36, %v10473_v44  ;;  %v4891_v2 = vmul.f32 %v8507_v60, %v4890_v18  ;;  %v3630_v45 = vadd.f32 %v3629_v59, %v11423_v61  ;;  %v7450_v59 = vld [vmem:[%s8928_s23 + $0x81c] sm:$0xf0]  ;;  %v8146_v40 = vld [vmem:[%s8928_s23 + $0x820] sm:$0xf0]  ;;  %vm4908_vm10 = vcmp.eq.f32.partialorder %v10514_v49, inf }
 0x460   : > { %v4134_v24 = vadd.f32 %v4133_v4, %v3965_v46  ;;  %3668 = vmatmul.bf16.gmra.mxu1 %v7409_v30  ;;  %3837 = vmatmul.bf16.gmra.mxu2 %v7413_v50  ;;  %v4493_v62 = vmul.f32 %v10510_v0, %v10510_v0  ;;  %v4899_v46 = vand.u32 2147483648, %v10491_v32  ;;  %vm4910_vm11 = vcmp.eq.f32.partialorder %v10514_v49, 0.0 }
 0x461   : > { %4006 = vmatmul.bf16.gmra.mxu3 %v7417_v52  ;;  %v4885_v48 = vsel %vm4884_vm6, %v10473_v44, %v4883_v41  ;;  %v4892_v55 = vmul.f32 0.5, %v4891_v2 }
 0x462   : > { %4175 = vmatmul.bf16.gmra.mxu0 %v7421_v8  ;;  %v4238_v1 = vmul.f32 0.999, %v4134_v24  ;;  %v4302_v4 = vmul.f32 0.001, %v4134_v24  ;;  %4593 = vadd.xlane.f32.xlu0 %v4493_v62  ;;  %v4888_v34 = vsel %vm4886_vm7, %v4887_v39, %v4885_v48  ;;  %v7445_v39 = vor.u32 %v8140_v23, %v7442_v51 }
 0x463   : > { %v3798_v33 = vpop.f32.mrf.mxu2  ;;  %v8509_v7 = vpop.eup %8508  ;;  %v5436_v47 = vadd.f32 1e-07, %v4888_v34  ;;  %v4893_v11 = vsub.f32 1.5, %v4892_v55  ;;  %v4911_v51 = vand.u32 2147483648, %v10514_v49 }
 0x464   : > { %v3799_v31 = vadd.f32 %v3798_v33, %v3630_v45  ;;  %v3967_v13 = vpop.f32.mrf.mxu3  ;;  %v4366_v16 = vadd.f32 %v4302_v4, %v4238_v1  ;;  %v8511_v54 = vpop.eup %8510  ;;  %v5563_v44 = vmul.f32 %v8509_v7, %v10136_v38  ;;  %v7449_v4 = vor.u32 %v8145_v9, %v7448_v43  ;;  %v11425_v43 = vld [vmem:[#allocation32_spill] sm:$0xff] }
 0x465   : > { %v3631_v37 = vpop.f32.mrf.mxu1  ;;  %8512 = vrcp.f32 %v5436_v47  ;;  %v4894_v5 = vmul.f32 %v8507_v60, %v4893_v11  ;;  %v4902_v29 = vmul.f32 %v8511_v54, %v10514_v49  ;;  %v10532_v50 = vpop.xlane.xlu1 %4565 }
 0x466   : > { %v3968_v6 = vadd.f32 %v3967_v13, %v3799_v31  ;;  %v10527_v30 = vsub.f32 %v4134_v24, %v4366_v16  ;;  %5710 = vst [vmem:[%s9932_s18 + $0x128] sm:$0xff] %v4366_v16  ;;  %8514 = vrsqrt.f32 %v10532_v50  ;;  %v11424_v24 = vld [vmem:[#allocation31_spill] sm:$0xff]  ;;  %v7453_v13 = vor.u32 %v8141_v63, %v7450_v59 }
 0x467   : > { %v4138_v3 = vpop.f32.mrf.mxu0  ;;  %5627 = vst [vmem:[%s10148_s14 + $0x90] sm:$0xff] %v5563_v44  ;;  %v4895_v52 = vmul.f32 %v4894_v5, %v10491_v32  ;;  %v4903_v8 = vmul.f32 %v8511_v54, %v4902_v29  ;;  %v7457_v16 = vor.u32 %v8146_v40, %v7456_v58  ;;  %vm4920_vm12 = vcmp.eq.f32.partialorder %v10532_v50, inf }
 0x468   : > { %v4137_v38 = vadd.f32 %v4136_v53, %v3968_v6  ;;  %v4494_v60 = vmul.f32 %v10527_v30, %v10527_v30  ;;  %v3632_v53 = vadd.f32 %v3631_v37, %v11424_v24  ;;  %vm4922_vm13 = vcmp.eq.f32.partialorder %v10532_v50, 0.0 }
 0x469   : > { %v4897_v41 = vsel %vm4896_vm8, %v10491_v32, %v4895_v52  ;;  %v4904_v2 = vmul.f32 0.5, %v4903_v8 }
 0x46a   : > { %v4239_v36 = vmul.f32 0.999, %v4137_v38  ;;  %v4303_v18 = vmul.f32 0.001, %v4137_v38  ;;  %4595 = vadd.xlane.f32.xlu1 %v4494_v60  ;;  %v4900_v61 = vsel %vm4898_vm9, %v4899_v46, %v4897_v41 }
 0x46b   : > { %v3800_v62 = vpop.f32.mrf.mxu2  ;;  %v8513_v55 = vpop.eup %8512  ;;  %v5437_v33 = vadd.f32 1e-07, %v4900_v61  ;;  %v4905_v34 = vsub.f32 1.5, %v4904_v2 }
 0x46c   : > { %v3801_v45 = vadd.f32 %v3800_v62, %v3632_v53  ;;  %v3969_v1 = vpop.f32.mrf.mxu3  ;;  %v4367_v48 = vadd.f32 %v4303_v18, %v4239_v36  ;;  %v8515_v7 = vpop.eup %8514  ;;  %v5564_v32 = vmul.f32 %v8513_v55, %v10159_v15  ;;  %v8154_v55 = vld [vmem:[%s8928_s23 + $0x860] sm:$0xf0] }
 0x46d   : > { %v3634_v31 = vpop.f32.mrf.mxu1  ;;  %8516 = vrcp.f32 %v5437_v33  ;;  %v4906_v44 = vmul.f32 %v8511_v54, %v4905_v34  ;;  %v4914_v6 = vmul.f32 %v8515_v7, %v10532_v50  ;;  %v10556_v23 = vpop.xlane.xlu2 %4567  ;;  %v8150_v33 = vld [vmem:[%s8928_s23 + $0x844] sm:$0xf]  ;;  %v7486_v34 = vld [vmem:[%s8928_s23 + $0x864] sm:$0xf0] }
 0x46e   : > { %v3970_v47 = vadd.f32 %v3969_v1, %v3801_v45  ;;  %v10552_v37 = vsub.f32 %v4137_v38, %v4367_v48  ;;  %5711 = vst [vmem:[%s9932_s18 + $0x130] sm:$0xff] %v4367_v48  ;;  %8518 = vrsqrt.f32 %v10556_v23  ;;  %v3635_v9 = vadd.f32 %v3634_v31, %v11425_v43  ;;  %v7484_v48 = vld [vmem:[%s8928_s23 + $0x840] sm:$0xf] }
 0x46f   : > { %v4141_v11 = vpop.f32.mrf.mxu0  ;;  %5628 = vst [vmem:[%s10148_s14 + $0x98] sm:$0xff] %v5564_v32  ;;  %v4907_v29 = vmul.f32 %v4906_v44, %v10514_v49  ;;  %v4915_v15 = vmul.f32 %v8515_v7, %v4914_v6  ;;  %v8155_v32 = vld [vmem:[%s8928_s23 + $0x868] sm:$0xf0]  ;;  %vm4932_vm14 = vcmp.eq.f32.partialorder %v10556_v23, inf  ;;  %vm4934_vm15 = vcmp.eq.f32.partialorder %v10556_v23, 0.0 }
 0x470   : > { %v4139_v5 = vadd.f32 %v4138_v3, %v3970_v47  ;;  %3673 = vmatmul.bf16.gmra.mxu1 %v7445_v39  ;;  %3842 = vmatmul.bf16.gmra.mxu2 %v7449_v4  ;;  %v4495_v54 = vmul.f32 %v10552_v37, %v10552_v37  ;;  %v8149_v39 = vld [vmem:[%s8928_s23 + $0x83c] sm:$0xf]  ;;  %v7478_v4 = vld [vmem:[%s8928_s23 + $0x85c] sm:$0xf0]  ;;  %v4923_v47 = vand.u32 2147483648, %v10532_v50 }
 0x471   : > { %4011 = vmatmul.bf16.gmra.mxu3 %v7453_v13  ;;  %v4909_v63 = vsel %vm4908_vm10, %v10514_v49, %v4907_v29  ;;  %v4916_v59 = vmul.f32 0.5, %v4915_v15 }
 0x472   : > { %4180 = vmatmul.bf16.gmra.mxu0 %v7457_v16  ;;  %v4240_v38 = vmul.f32 0.999, %v4139_v5  ;;  %v4304_v3 = vmul.f32 0.001, %v4139_v5  ;;  %4597 = vadd.xlane.f32.xlu2 %v4495_v54  ;;  %v4912_v8 = vsel %vm4910_vm11, %v4911_v51, %v4909_v63  ;;  %v7481_v51 = vor.u32 %v8149_v39, %v7478_v4 }
 0x473   : > { %v3803_v52 = vpop.f32.mrf.mxu2  ;;  %v8517_v46 = vpop.eup %8516  ;;  %v5438_v36 = vadd.f32 1e-07, %v4912_v8  ;;  %v4917_v18 = vsub.f32 1.5, %v4916_v59  ;;  %v4935_v4 = vand.u32 2147483648, %v10556_v23 }
 0x474   : > { %v3804_v60 = vadd.f32 %v3803_v52, %v3635_v9  ;;  %v3972_v58 = vpop.f32.mrf.mxu3  ;;  %v4368_v40 = vadd.f32 %v4304_v3, %v4240_v38  ;;  %v8519_v53 = vpop.eup %8518  ;;  %v5565_v49 = vmul.f32 %v8517_v46, %v10181_v35  ;;  %v7485_v3 = vor.u32 %v8154_v55, %v7484_v48 }
 0x475   : > { %v3636_v24 = vpop.f32.mrf.mxu1  ;;  %8520 = vrcp.f32 %v5438_v36  ;;  %v4918_v61 = vmul.f32 %v8515_v7, %v4917_v18  ;;  %v4926_v45 = vmul.f32 %v8519_v53, %v10556_v23  ;;  %v10574_v1 = vpop.xlane.xlu0 %4569  ;;  %v7492_v7 = vld [vmem:[%s8928_s23 + $0x848] sm:$0xf] }
 0x476   : > { %v3973_v41 = vadd.f32 %v3972_v58, %v3804_v60  ;;  %v10569_v62 = vsub.f32 %v4139_v5, %v4368_v40  ;;  %5712 = vst [vmem:[%s9932_s18 + $0x138] sm:$0xff] %v4368_v40  ;;  %8522 = vrsqrt.f32 %v10574_v1  ;;  %v11426_v5 = vld [vmem:[#allocation14_spill] sm:$0xff]  ;;  %v7489_v58 = vor.u32 %v8150_v33, %v7486_v34 }
 0x477   : > { %v4143_v2 = vpop.f32.mrf.mxu0  ;;  %5629 = vst [vmem:[%s10148_s14 + $0xa0] sm:$0xff] %v5565_v49  ;;  %v4919_v31 = vmul.f32 %v4918_v61, %v10532_v50  ;;  %v4927_v13 = vmul.f32 %v8519_v53, %v4926_v45  ;;  %v7493_v40 = vor.u32 %v8155_v32, %v7492_v7  ;;  %vm4944_vm0 = vcmp.eq.f32.partialorder %v10574_v1, inf }
 0x478   : > { %v4142_v35 = vadd.f32 %v4141_v11, %v3973_v41  ;;  %v4496_v16 = vmul.f32 %v10569_v62, %v10569_v62  ;;  %v3637_v11 = vadd.f32 %v3636_v24, %v11426_v5  ;;  %vm4946_vm1 = vcmp.eq.f32.partialorder %v10574_v1, 0.0 }
 0x479   : > { %v4921_v29 = vsel %vm4920_vm12, %v10532_v50, %v4919_v31  ;;  %v4928_v15 = vmul.f32 0.5, %v4927_v13 }
 0x47a   : > { %v4241_v44 = vmul.f32 0.999, %v4142_v35  ;;  %v4305_v6 = vmul.f32 0.001, %v4142_v35  ;;  %4599 = vadd.xlane.f32.xlu0 %v4496_v16  ;;  %v4924_v43 = vsel %vm4922_vm13, %v4923_v47, %v4921_v29 }
 0x47b   : > { %v3805_v54 = vpop.f32.mrf.mxu2  ;;  %v8521_v59 = vpop.eup %8520  ;;  %v5439_v52 = vadd.f32 1e-07, %v4924_v43  ;;  %v4929_v8 = vsub.f32 1.5, %v4928_v15 }
 0x47c   : > { %v3806_v9 = vadd.f32 %v3805_v54, %v3637_v11  ;;  %v3974_v38 = vpop.f32.mrf.mxu3  ;;  %v4369_v63 = vadd.f32 %v4305_v6, %v4241_v44  ;;  %v8523_v46 = vpop.eup %8522  ;;  %v5566_v50 = vmul.f32 %v8521_v59, %v10201_v12  ;;  %v8163_v59 = vld [vmem:[%s8928_s23 + $0x8a8] sm:$0xf0] }
 0x47d   : > { %v3639_v60 = vpop.f32.mrf.mxu1  ;;  %8524 = vrcp.f32 %v5439_v52  ;;  %v4930_v49 = vmul.f32 %v8519_v53, %v4929_v8  ;;  %v4938_v41 = vmul.f32 %v8523_v46, %v10574_v1  ;;  %v10598_v39 = vpop.xlane.xlu1 %4571  ;;  %v8159_v52 = vld [vmem:[%s8928_s23 + $0x88c] sm:$0xf]  ;;  %v7522_v8 = vld [vmem:[%s8928_s23 + $0x8ac] sm:$0xf0] }
 0x47e   : > { %v3975_v36 = vadd.f32 %v3974_v38, %v3806_v9  ;;  %v10594_v24 = vsub.f32 %v4142_v35, %v4369_v63  ;;  %5713 = vst [vmem:[%s9932_s18 + $0x140] sm:$0xff] %v4369_v63  ;;  %8526 = vrsqrt.f32 %v10598_v39  ;;  %v11427_v35 = vld [vmem:[#allocation16_spill] sm:$0xff]  ;;  %v7520_v63 = vld [vmem:[%s8928_s23 + $0x888] sm:$0xf]  ;;  %vm4956_vm2 = vcmp.eq.f32.partialorder %v10598_v39, inf }
 0x47f   : > { %v4146_v18 = vpop.f32.mrf.mxu0  ;;  %5630 = vst [vmem:[%s10148_s14 + $0xa8] sm:$0xff] %v5566_v50  ;;  %v4931_v45 = vmul.f32 %v4930_v49, %v10556_v23  ;;  %v4939_v12 = vmul.f32 %v8523_v46, %v4938_v41  ;;  %v8164_v50 = vld [vmem:[%s8928_s23 + $0x8b0] sm:$0xf0]  ;;  %vm4958_vm3 = vcmp.eq.f32.partialorder %v10598_v39, 0.0 }
 0x480   : > { %v4144_v61 = vadd.f32 %v4143_v2, %v3975_v36  ;;  %3678 = vmatmul.bf16.gmra.mxu1 %v7481_v51  ;;  %3847 = vmatmul.bf16.gmra.mxu2 %v7485_v3  ;;  %v4497_v53 = vmul.f32 %v10594_v24, %v10594_v24  ;;  %v3640_v2 = vadd.f32 %v3639_v60, %v11427_v35  ;;  %v8158_v51 = vld [vmem:[%s8928_s23 + $0x884] sm:$0xf]  ;;  %v7514_v3 = vld [vmem:[%s8928_s23 + $0x8a4] sm:$0xf0]  ;;  %v4947_v36 = vand.u32 2147483648, %v10574_v1 }
 0x481   : > { %4016 = vmatmul.bf16.gmra.mxu3 %v7489_v58  ;;  %v4933_v33 = vsel %vm4932_vm14, %v10556_v23, %v4931_v45  ;;  %v4940_v34 = vmul.f32 0.5, %v4939_v12 }
 0x482   : > { %4185 = vmatmul.bf16.gmra.mxu0 %v7493_v40  ;;  %v4242_v48 = vmul.f32 0.999, %v4144_v61  ;;  %v4306_v55 = vmul.f32 0.001, %v4144_v61  ;;  %4601 = vadd.xlane.f32.xlu1 %v4497_v53  ;;  %v4936_v13 = vsel %vm4934_vm15, %v4935_v4, %v4933_v33  ;;  %v7517_v4 = vor.u32 %v8158_v51, %v7514_v3 }
 0x483   : > { %v3808_v31 = vpop.f32.mrf.mxu2  ;;  %v8525_v47 = vpop.eup %8524  ;;  %v5440_v44 = vadd.f32 1e-07, %v4936_v13  ;;  %v4941_v6 = vsub.f32 1.5, %v4940_v34  ;;  %v4959_v3 = vand.u32 2147483648, %v10598_v39 }
 0x484   : > { %v3809_v16 = vadd.f32 %v3808_v31, %v3640_v2  ;;  %v3977_v7 = vpop.f32.mrf.mxu3  ;;  %v4370_v32 = vadd.f32 %v4306_v55, %v4242_v48  ;;  %v8527_v11 = vpop.eup %8526  ;;  %v5567_v23 = vmul.f32 %v8525_v47, %v10223_v10  ;;  %v7521_v2 = vor.u32 %v8163_v59, %v7520_v63 }
 0x485   : > { %v3641_v5 = vpop.f32.mrf.mxu1  ;;  %8528 = vrcp.f32 %v5440_v44  ;;  %v4942_v43 = vmul.f32 %v8523_v46, %v4941_v6  ;;  %v4950_v9 = vmul.f32 %v8527_v11, %v10598_v39  ;;  %v10616_v38 = vpop.xlane.xlu2 %4573  ;;  %v7528_v46 = vld [vmem:[%s8928_s23 + $0x890] sm:$0xf] }
 0x486   : > { %v3978_v29 = vadd.f32 %v3977_v7, %v3809_v16  ;;  %v10611_v54 = vsub.f32 %v4144_v61, %v4370_v32  ;;  %5714 = vst [vmem:[%s9932_s18 + $0x148] sm:$0xff] %v4370_v32  ;;  %8530 = vrsqrt.f32 %v10616_v38  ;;  %v11428_v61 = vld [vmem:[#allocation18_spill] sm:$0xff]  ;;  %v7525_v7 = vor.u32 %v8159_v52, %v7522_v8 }
 0x487   : > { %v4148_v15 = vpop.f32.mrf.mxu0  ;;  %5631 = vst [vmem:[%s10148_s14 + $0xb0] sm:$0xff] %v5567_v23  ;;  %v4943_v60 = vmul.f32 %v4942_v43, %v10574_v1  ;;  %v4951_v58 = vmul.f32 %v8527_v11, %v4950_v9  ;;  %v7529_v32 = vor.u32 %v8164_v50, %v7528_v46  ;;  %vm4968_vm4 = vcmp.eq.f32.partialorder %v10616_v38, inf }
 0x488   : > { %v4147_v10 = vadd.f32 %v4146_v18, %v3978_v29  ;;  %v4498_v40 = vmul.f32 %v10611_v54, %v10611_v54  ;;  %v3642_v18 = vadd.f32 %v3641_v5, %v11428_v61  ;;  %vm4970_vm5 = vcmp.eq.f32.partialorder %v10616_v38, 0.0 }
 0x489   : > { %v4945_v45 = vsel %vm4944_vm0, %v10574_v1, %v4943_v60  ;;  %v4952_v12 = vmul.f32 0.5, %v4951_v58 }
 0x48a   : > { %v4243_v49 = vmul.f32 0.999, %v4147_v10  ;;  %v4307_v41 = vmul.f32 0.001, %v4147_v10  ;;  %4603 = vadd.xlane.f32.xlu2 %v4498_v40  ;;  %v4948_v48 = vsel %vm4946_vm1, %v4947_v36, %v4945_v45 }
 0x48b   : > { %v3810_v53 = vpop.f32.mrf.mxu2  ;;  %v8529_v34 = vpop.eup %8528  ;;  %v5441_v31 = vadd.f32 1e-07, %v4948_v48  ;;  %v4953_v13 = vsub.f32 1.5, %v4952_v12 }
 0x48c   : > { %v3811_v55 = vadd.f32 %v3810_v53, %v3642_v18  ;;  %v3979_v35 = vpop.f32.mrf.mxu3  ;;  %v4371_v33 = vadd.f32 %v4307_v41, %v4243_v49  ;;  %v8531_v47 = vpop.eup %8530  ;;  %v5568_v1 = vmul.f32 %v8529_v34, %v10243_v27  ;;  %v8172_v34 = vld [vmem:[%s8928_s23 + $0x8f0] sm:$0xf0] }
 0x48d   : > { %v3644_v16 = vpop.f32.mrf.mxu1  ;;  %8532 = vrcp.f32 %v5441_v31  ;;  %v4954_v23 = vmul.f32 %v8527_v11, %v4953_v13  ;;  %v4962_v29 = vmul.f32 %v8531_v47, %v10616_v38  ;;  %v10640_v51 = vpop.xlane.xlu0 %4575  ;;  %v8168_v31 = vld [vmem:[%s8928_s23 + $0x8d4] sm:$0xf]  ;;  %v7558_v13 = vld [vmem:[%s8928_s23 + $0x8f4] sm:$0xf0] }
 0x48e   : > { %v3980_v44 = vadd.f32 %v3979_v35, %v3811_v55  ;;  %v10636_v5 = vsub.f32 %v4147_v10, %v4371_v33  ;;  %5715 = vst [vmem:[%s9932_s18 + $0x150] sm:$0xff] %v4371_v33  ;;  %8534 = vrsqrt.f32 %v10640_v51  ;;  %v11429_v10 = vld [vmem:[#allocation20_spill] sm:$0xff]  ;;  %v7556_v33 = vld [vmem:[%s8928_s23 + $0x8d0] sm:$0xf]  ;;  %vm4980_vm6 = vcmp.eq.f32.partialorder %v10640_v51, inf }
 0x48f   : > { %v4151_v6 = vpop.f32.mrf.mxu0  ;;  %5632 = vst [vmem:[%s10148_s14 + $0xb8] sm:$0xff] %v5568_v1  ;;  %v4955_v9 = vmul.f32 %v4954_v23, %v10598_v39  ;;  %v4963_v27 = vmul.f32 %v8531_v47, %v4962_v29  ;;  %v8173_v1 = vld [vmem:[%s8928_s23 + $0x8f8] sm:$0xf0]  ;;  %vm4982_vm7 = vcmp.eq.f32.partialorder %v10640_v51, 0.0 }
 0x490   : > { %v4149_v43 = vadd.f32 %v4148_v15, %v3980_v44  ;;  %3683 = vmatmul.bf16.gmra.mxu1 %v7517_v4  ;;  %3852 = vmatmul.bf16.gmra.mxu2 %v7521_v2  ;;  %v4499_v11 = vmul.f32 %v10636_v5, %v10636_v5  ;;  %v3645_v15 = vadd.f32 %v3644_v16, %v11429_v10  ;;  %v8167_v4 = vld [vmem:[%s8928_s23 + $0x8cc] sm:$0xf]  ;;  %v7550_v2 = vld [vmem:[%s8928_s23 + $0x8ec] sm:$0xf0]  ;;  %v4971_v44 = vand.u32 2147483648, %v10616_v38 }
 0x491   : > { %4021 = vmatmul.bf16.gmra.mxu3 %v7525_v7  ;;  %v4957_v52 = vsel %vm4956_vm2, %v10598_v39, %v4955_v9  ;;  %v4964_v8 = vmul.f32 0.5, %v4963_v27 }
 0x492   : > { %4190 = vmatmul.bf16.gmra.mxu0 %v7529_v32  ;;  %v4244_v63 = vmul.f32 0.999, %v4149_v43  ;;  %v4308_v59 = vmul.f32 0.001, %v4149_v43  ;;  %4605 = vadd.xlane.f32.xlu0 %v4499_v11  ;;  %v4960_v58 = vsel %vm4958_vm3, %v4959_v3, %v4957_v52  ;;  %v7553_v3 = vor.u32 %v8167_v4, %v7550_v2 }
 0x493   : > { %v3813_v60 = vpop.f32.mrf.mxu2  ;;  %v8533_v36 = vpop.eup %8532  ;;  %v5442_v49 = vadd.f32 1e-07, %v4960_v58  ;;  %v4965_v41 = vsub.f32 1.5, %v4964_v8  ;;  %v4983_v2 = vand.u32 2147483648, %v10640_v51 }
 0x494   : > { %v3814_v40 = vadd.f32 %v3813_v60, %v3645_v15  ;;  %v3982_v46 = vpop.f32.mrf.mxu3  ;;  %v4372_v50 = vadd.f32 %v4308_v59, %v4244_v63  ;;  %v8535_v18 = vpop.eup %8534  ;;  %v5569_v39 = vmul.f32 %v8533_v36, %v10265_v20  ;;  %v7557_v15 = vor.u32 %v8172_v34, %v7556_v33 }
 0x495   : > { %v3646_v61 = vpop.f32.mrf.mxu1  ;;  %8536 = vrcp.f32 %v5442_v49  ;;  %v4966_v48 = vmul.f32 %v8531_v47, %v4965_v41  ;;  %v4974_v55 = vmul.f32 %v8535_v18, %v10640_v51  ;;  %v10658_v35 = vpop.xlane.xlu1 %4577  ;;  %v7564_v47 = vld [vmem:[%s8928_s23 + $0x8d8] sm:$0xf]  ;;  %s5749_s23 = ssub.s32 (%p8895_p4), 211, %s8909_s7 }
 0x496   : > { %v3983_v45 = vadd.f32 %v3982_v46, %v3814_v40  ;;  %v10653_v53 = vsub.f32 %v4149_v43, %v4372_v50  ;;  %5716 = vst [vmem:[%s9932_s18 + $0x158] sm:$0xff] %v4372_v50  ;;  %8538 = vrsqrt.f32 %v10658_v35  ;;  %v11430_v43 = vld [vmem:[#allocation22_spill] sm:$0xff]  ;;  %v7561_v46 = vor.u32 %v8168_v31, %v7558_v13  ;;  %p5750_p8 = scmp.lt.s32.totalorder (%p8895_p4), %s5749_s23, 64 }
 0x497   : > { %v4153_v12 = vpop.f32.mrf.mxu0  ;;  %5633 = vst [vmem:[%s10148_s14 + $0xc0] sm:$0xff] %v5569_v39  ;;  %v4967_v16 = vmul.f32 %v4966_v48, %v10616_v38  ;;  %v4975_v7 = vmul.f32 %v8535_v18, %v4974_v55  ;;  %v7565_v50 = vor.u32 %v8173_v1, %v7564_v47  ;;  %vm4992_vm8 = vcmp.eq.f32.partialorder %v10658_v35, inf }
 0x498   : > { %v4152_v20 = vadd.f32 %v4151_v6, %v3983_v45  ;;  %v4500_v32 = vmul.f32 %v10653_v53, %v10653_v53  ;;  %v3647_v6 = vadd.f32 %v3646_v61, %v11430_v43  ;;  %vm4994_vm9 = vcmp.eq.f32.partialorder %v10658_v35, 0.0 }
 0x499   : > { %v4969_v9 = vsel %vm4968_vm4, %v10616_v38, %v4967_v16  ;;  %v4976_v27 = vmul.f32 0.5, %v4975_v7 }
 0x49a   : > { %v4245_v23 = vmul.f32 0.999, %v4152_v20  ;;  %v4309_v29 = vmul.f32 0.001, %v4152_v20  ;;  %4607 = vadd.xlane.f32.xlu1 %v4500_v32  ;;  %v4972_v63 = vsel %vm4970_vm5, %v4971_v44, %v4969_v9 }
 0x49b   : > { %v3815_v11 = vpop.f32.mrf.mxu2  ;;  %v8537_v8 = vpop.eup %8536  ;;  %v5443_v60 = vadd.f32 1e-07, %v4972_v63  ;;  %v4977_v58 = vsub.f32 1.5, %v4976_v27 }
 0x49c   : > { %v3816_v59 = vadd.f32 %v3815_v11, %v3647_v6  ;;  %v3984_v10 = vpop.f32.mrf.mxu3  ;;  %v4373_v52 = vadd.f32 %v4309_v29, %v4245_v23  ;;  %v8539_v36 = vpop.eup %8538  ;;  %v5570_v38 = vmul.f32 %v8537_v8, %v10285_v17 }
 0x49d   : > { %v3649_v40 = vpop.f32.mrf.mxu1  ;;  %8540 = vrcp.f32 %v5443_v60  ;;  %v4978_v39 = vmul.f32 %v8535_v18, %v4977_v58  ;;  %v4986_v45 = vmul.f32 %v8539_v36, %v10658_v35  ;;  %v10682_v4 = vpop.xlane.xlu2 %4579  ;;  %v11432_v58 = vld [vmem:[#allocation4_spill] sm:$0xff] }
 0x49e   : > { %v3985_v49 = vadd.f32 %v3984_v10, %v3816_v59  ;;  %v10678_v61 = vsub.f32 %v4152_v20, %v4373_v52  ;;  %5717 = vst [vmem:[%s9932_s18 + $0x160] sm:$0xff] %v4373_v52  ;;  %8542 = vrsqrt.f32 %v10682_v4  ;;  %v11431_v20 = vld [vmem:[#allocation24_spill] sm:$0xff]  ;;  %v4995_v52 = vand.u32 2147483648, %v10658_v35 }
 0x49f   : > { %v4156_v41 = vpop.f32.mrf.mxu0  ;;  %5634 = vst [vmem:[%s10148_s14 + $0xc8] sm:$0xff] %v5570_v38  ;;  %v4979_v55 = vmul.f32 %v4978_v39, %v10640_v51  ;;  %v4987_v17 = vmul.f32 %v8539_v36, %v4986_v45  ;;  %vm5004_vm10 = vcmp.eq.f32.partialorder %v10682_v4, inf  ;;  %vm5006_vm11 = vcmp.eq.f32.partialorder %v10682_v4, 0.0 }
 0x4a0   : > { %v4154_v48 = vadd.f32 %v4153_v12, %v3985_v49  ;;  %3688 = vmatmul.bf16.gmra.mxu1 %v7553_v3  ;;  %3857 = vmatmul.bf16.gmra.mxu2 %v7557_v15  ;;  %v4501_v18 = vmul.f32 %v10678_v61, %v10678_v61  ;;  %v3650_v12 = vadd.f32 %v3649_v40, %v11431_v20 }
 0x4a1   : > { %4026 = vmatmul.bf16.gmra.mxu3 %v7561_v46  ;;  %v4981_v31 = vsel %vm4980_vm6, %v10640_v51, %v4979_v55  ;;  %v4988_v13 = vmul.f32 0.5, %v4987_v17 }
 0x4a2   : > { %4195 = vmatmul.bf16.gmra.mxu0 %v7565_v50  ;;  %v4246_v33 = vmul.f32 0.999, %v4154_v48  ;;  %v4310_v34 = vmul.f32 0.001, %v4154_v48  ;;  %4609 = vadd.xlane.f32.xlu2 %v4501_v18  ;;  %v4984_v7 = vsel %vm4982_vm7, %v4983_v2, %v4981_v31 }
 0x4a3   : > { %v3818_v16 = vpop.f32.mrf.mxu2  ;;  %v8541_v44 = vpop.eup %8540  ;;  %v5444_v23 = vadd.f32 1e-07, %v4984_v7  ;;  %v4989_v29 = vsub.f32 1.5, %v4988_v13 }
 0x4a4   : > { %v3819_v32 = vadd.f32 %v3818_v16, %v3650_v12  ;;  %v3987_v47 = vpop.f32.mrf.mxu3  ;;  %v4374_v1 = vadd.f32 %v4310_v34, %v4246_v33  ;;  %v8543_v9 = vpop.eup %8542  ;;  %v5571_v27 = vmul.f32 %v8541_v44, %v10307_v22 }
 0x4a5   : > { %v3651_v43 = vpop.f32.mrf.mxu1  ;;  %v10694_v6 = vpop.xlane.xlu0 %4581  ;;  %v4990_v3 = vmul.f32 %v8539_v36, %v4989_v29  ;;  %v4998_v63 = vmul.f32 %v8543_v9, %v10682_v4 }
 0x4a6   : > { %v3988_v11 = vadd.f32 %v3987_v47, %v3819_v32  ;;  %8544 = vrsqrt.f32 %v10694_v6  ;;  %5718 = vst [vmem:[%s9932_s18 + $0x168] sm:$0xff] %v4374_v1  ;;  %v10701_v10 = vsub.f32 %v4154_v48, %v4374_v1  ;;  %v3652_v40 = vadd.f32 %v3651_v43, %v11432_v58 }
 0x4a7   : > { %v4158_v51 = vpop.f32.mrf.mxu0  ;;  %8546 = vrcp.f32 %v5444_v23  ;;  %5635 = vst [vmem:[%s10148_s14 + $0xd0] sm:$0xff] %v5571_v27  ;;  %v4991_v15 = vmul.f32 %v4990_v3, %v10658_v35  ;;  %v4999_v22 = vmul.f32 %v8543_v9, %v4998_v63  ;;  %v5007_v47 = vand.u32 2147483648, %v10682_v4  ;;  %v11433_v23 = vld [vmem:[#allocation5_spill] sm:$0xff] }
 0x4a8   : > { %v4157_v59 = vadd.f32 %v4156_v41, %v3988_v11  ;;  %v4502_v46 = vmul.f32 %v10701_v10, %v10701_v10  ;;  %vm5016_vm12 = vcmp.eq.f32.partialorder %v10694_v6, inf  ;;  %vm5018_vm13 = vcmp.eq.f32.partialorder %v10694_v6, 0.0 }
 0x4a9   : > { %v4993_v50 = vsel %vm4992_vm8, %v10658_v35, %v4991_v15  ;;  %v5000_v36 = vmul.f32 0.5, %v4999_v22 }
 0x4aa   : > { %v4247_v8 = vmul.f32 0.999, %v4157_v59  ;;  %v4311_v60 = vmul.f32 0.001, %v4157_v59  ;;  %v4996_v41 = vsel %vm4994_vm9, %v4995_v52, %v4993_v50  ;;  %4611 = vadd.xlane.f32.xlu0 %v4502_v46 }
 0x4ab   : > { %v3820_v38 = vpop.f32.mrf.mxu2  ;;  %v5445_v17 = vadd.f32 1e-07, %v4996_v41  ;;  %v5001_v18 = vsub.f32 1.5, %v5000_v36 }
 0x4ac   : > { %v8545_v49 = vpop.eup %8544  ;;  %v3821_v39 = vadd.f32 %v3820_v38, %v3652_v40  ;;  %v3989_v45 = vpop.f32.mrf.mxu3  ;;  %v4375_v48 = vadd.f32 %v4311_v60, %v4247_v8 }
 0x4ad   : > { %v8547_v55 = vpop.eup %8546  ;;  %v5010_v2 = vmul.f32 %v8545_v49, %v10694_v6  ;;  %v3654_v33 = vpop.f32.mrf.mxu1  ;;  %v5002_v31 = vmul.f32 %v8543_v9, %v5001_v18 }
 0x4ae   : > { %v10712_v34 = vpop.xlane.xlu1 %4583  ;;  %v5572_v35 = vmul.f32 %v8547_v55, %v10327_v57  ;;  %v3990_v20 = vadd.f32 %v3989_v45, %v3821_v39  ;;  %5719 = vst [vmem:[%s9932_s18 + $0x170] sm:$0xff] %v4375_v48  ;;  %v10718_v7 = vsub.f32 %v4157_v59, %v4375_v48  ;;  %v3655_v29 = vadd.f32 %v3654_v33, %v11433_v23 }
 0x4af   : > { %8548 = vrsqrt.f32 %v10712_v34  ;;  %v4161_v12 = vpop.f32.mrf.mxu0  ;;  %v5011_v13 = vmul.f32 %v8545_v49, %v5010_v2  ;;  %v5003_v32 = vmul.f32 %v5002_v31, %v10682_v4  ;;  %v11434_v2 = vld [vmem:[#allocation6_spill] sm:$0xff]  ;;  %vm5028_vm14 = vcmp.eq.f32.partialorder %v10712_v34, inf }
 0x4b0   : > { %8550 = vrcp.f32 %v5445_v17  ;;  %5636 = vst [vmem:[%s10148_s14 + $0xd8] sm:$0xff] %v5572_v35  ;;  %v4159_v16 = vadd.f32 %v4158_v51, %v3990_v20  ;;  %v4503_v43 = vmul.f32 %v10718_v7, %v10718_v7  ;;  %vm5030_vm15 = vcmp.eq.f32.partialorder %v10712_v34, 0.0 }
 0x4b1   : > { %v5012_v1 = vmul.f32 0.5, %v5011_v13  ;;  %v5005_v9 = vsel %vm5004_vm10, %v10682_v4, %v5003_v32 }
 0x4b2   : > { %v4248_v57 = vmul.f32 0.999, %v4159_v16  ;;  %v4312_v44 = vmul.f32 0.001, %v4159_v16  ;;  %v5008_v3 = vsel %vm5006_vm11, %v5007_v47, %v5005_v9  ;;  %4613 = vadd.xlane.f32.xlu1 %v4503_v43 }
 0x4b3   : > { %v5013_v27 = vsub.f32 1.5, %v5012_v1  ;;  %v3823_v11 = vpop.f32.mrf.mxu2  ;;  %v5446_v22 = vadd.f32 1e-07, %v5008_v3 }
 0x4b4   : > { %v3824_v63 = vadd.f32 %v3823_v11, %v3655_v29  ;;  %v3992_v59 = vpop.f32.mrf.mxu3  ;;  %v4376_v15 = vadd.f32 %v4312_v44, %v4248_v57  ;;  %v5031_v11 = vand.u32 2147483648, %v10712_v34 }
 0x4b5   : > { %v8549_v51 = vpop.eup %8548  ;;  %v5014_v8 = vmul.f32 %v8545_v49, %v5013_v27  ;;  %v3656_v58 = vpop.f32.mrf.mxu1  ;;  %8552 = vrcp.f32 %v5446_v22  ;;  %v5019_v49 = vand.u32 2147483648, %v10694_v6  ;;  %v11435_v22 = vld [vmem:[#allocation7_spill] sm:$0xff] }
 0x4b6   : > { %v8551_v52 = vpop.eup %8550  ;;  %v5022_v60 = vmul.f32 %v8549_v51, %v10712_v34  ;;  %v3993_v46 = vadd.f32 %v3992_v59, %v3824_v63  ;;  %v10730_v4 = vpop.xlane.xlu2 %4585  ;;  %v10732_v36 = vsub.f32 %v4159_v16, %v4376_v15  ;;  %5720 = vst [vmem:[%s9932_s18 + $0x178] sm:$0xff] %v4376_v15  ;;  %v3657_v33 = vadd.f32 %v3656_v58, %v11434_v2 }
 0x4b7   : > { %v5573_v40 = vmul.f32 %v8551_v52, %v10349_v28  ;;  %v4163_v50 = vpop.f32.mrf.mxu0  ;;  %v5015_v38 = vmul.f32 %v5014_v8, %v10694_v6  ;;  %8554 = vrsqrt.f32 %v10730_v4  ;;  %vm5040_vm0 = vcmp.eq.f32.partialorder %v10730_v4, inf }
 0x4b8   : > { %v5023_v41 = vmul.f32 %v8549_v51, %v5022_v60  ;;  %v4162_v39 = vadd.f32 %v4161_v12, %v3993_v46  ;;  %v4504_v48 = vmul.f32 %v10732_v36, %v10732_v36  ;;  %vm5042_vm1 = vcmp.eq.f32.partialorder %v10730_v4, 0.0 }
 0x4b9   : > { %5637 = vst [vmem:[%s10148_s14 + $0xe0] sm:$0xff] %v5573_v40  ;;  %v5017_v28 = vsel %vm5016_vm12, %v10694_v6, %v5015_v38 }
 0x4ba   : > { %v5024_v45 = vmul.f32 0.5, %v5023_v41  ;;  %v5020_v55 = vsel %vm5018_vm13, %v5019_v49, %v5017_v28  ;;  %v4249_v17 = vmul.f32 0.999, %v4162_v39  ;;  %v4313_v18 = vmul.f32 0.001, %v4162_v39  ;;  %4615 = vadd.xlane.f32.xlu2 %v4504_v48 }
 0x4bb   : > { %v5447_v35 = vadd.f32 1e-07, %v5020_v55  ;;  %v3825_v12 = vpop.f32.mrf.mxu2  ;;  %v8553_v32 = vpop.eup %8552 }
 0x4bc   : > { %v5025_v20 = vsub.f32 1.5, %v5024_v45  ;;  %v3826_v31 = vadd.f32 %v3825_v12, %v3657_v33  ;;  %v3994_v13 = vpop.f32.mrf.mxu3  ;;  %v4377_v16 = vadd.f32 %v4313_v18, %v4249_v17  ;;  %v5574_v57 = vmul.f32 %v8553_v32, %v10369_v56  ;;  %v11436_v32 = vld [vmem:[#allocation8_spill] sm:$0xff] }
 0x4bd   : > { %8556 = vrcp.f32 %v5447_v35  ;;  %v3659_v47 = vpop.f32.mrf.mxu1  ;;  %v8555_v1 = vpop.eup %8554  ;;  %v5043_v12 = vand.u32 2147483648, %v10730_v4 }
 0x4be   : > { %v5026_v6 = vmul.f32 %v8549_v51, %v5025_v20  ;;  %v3995_v44 = vadd.f32 %v3994_v13, %v3826_v31  ;;  %v10746_v23 = vpop.xlane.xlu0 %4587  ;;  %v10748_v43 = vsub.f32 %v4162_v39, %v4377_v16  ;;  %5721 = vst [vmem:[%s9932_s18 + $0x180] sm:$0xff] %v4377_v16  ;;  %v5034_v27 = vmul.f32 %v8555_v1, %v10730_v4 }
 0x4bf   : > { %v4166_v29 = vpop.f32.mrf.mxu0  ;;  %8558 = vrsqrt.f32 %v10746_v23  ;;  %5638 = vst [vmem:[%s10148_s14 + $0xe8] sm:$0xff] %v5574_v57  ;;  %v3660_v8 = vadd.f32 %v3659_v47, %v11435_v22  ;;  %vm5052_vm2 = vcmp.eq.f32.partialorder %v10746_v23, inf  ;;  %vm5054_vm3 = vcmp.eq.f32.partialorder %v10746_v23, 0.0 }
 0x4c0   : > { %v5027_v9 = vmul.f32 %v5026_v6, %v10712_v34  ;;  %v4164_v51 = vadd.f32 %v4163_v50, %v3995_v44  ;;  %v4505_v56 = vmul.f32 %v10748_v43, %v10748_v43  ;;  %v5035_v63 = vmul.f32 %v8555_v1, %v5034_v27 }
 0x4c2   : > { %v5029_v3 = vsel %vm5028_vm14, %v10712_v34, %v5027_v9  ;;  %v4250_v15 = vmul.f32 0.999, %v4164_v51  ;;  %v4314_v52 = vmul.f32 0.001, %v4164_v51  ;;  %4617 = vadd.xlane.f32.xlu0 %v4505_v56  ;;  %v5036_v40 = vmul.f32 0.5, %v5035_v63 }
 0x4c3   : > { %v5032_v59 = vsel %vm5030_vm15, %v5031_v11, %v5029_v3  ;;  %v8557_v60 = vpop.eup %8556  ;;  %v3828_v46 = vpop.f32.mrf.mxu2 }
 0x4c4   : > { %v5448_v58 = vadd.f32 1e-07, %v5032_v59  ;;  %v5575_v50 = vmul.f32 %v8557_v60, %v10386_v42  ;;  %v3829_v38 = vadd.f32 %v3828_v46, %v3660_v8  ;;  %v3997_v41 = vpop.f32.mrf.mxu3  ;;  %v4378_v49 = vadd.f32 %v4314_v52, %v4250_v15 }
 0x4c5   : > { %v8559_v39 = vpop.eup %8558  ;;  %v5037_v34 = vsub.f32 1.5, %v5036_v40  ;;  %v3661_v28 = vpop.f32.mrf.mxu1  ;;  %v11437_v40 = vld [vmem:[#allocation9_spill] sm:$0xff] }
 0x4c6   : > { %8560 = vrcp.f32 %v5448_v58  ;;  %5639 = vst [vmem:[%s10148_s14 + $0xf0] sm:$0xff] %v5575_v50  ;;  %v5046_v45 = vmul.f32 %v8559_v39, %v10746_v23  ;;  %v3998_v48 = vadd.f32 %v3997_v41, %v3829_v38  ;;  %v10765_v55 = vpop.xlane.xlu1 %4589  ;;  %v10767_v18 = vsub.f32 %v4164_v51, %v4378_v49 }
 0x4c7   : > { %v4168_v17 = vpop.f32.mrf.mxu0  ;;  %v5038_v2 = vmul.f32 %v8555_v1, %v5037_v34  ;;  %8562 = vrsqrt.f32 %v10765_v55  ;;  %5722 = vst [vmem:[%s9932_s18 + $0x188] sm:$0xff] %v4378_v49  ;;  %v3662_v6 = vadd.f32 %v3661_v28, %v11436_v32  ;;  %v5055_v58 = vand.u32 2147483648, %v10746_v23 }
 0x4c8   : > { %v5047_v42 = vmul.f32 %v8559_v39, %v5046_v45  ;;  %v4167_v33 = vadd.f32 %v4166_v29, %v3998_v48  ;;  %v4506_v35 = vmul.f32 %v10767_v18, %v10767_v18  ;;  %vm5064_vm4 = vcmp.eq.f32.partialorder %v10765_v55, inf }
 0x4c9   : > { %v5039_v20 = vmul.f32 %v5038_v2, %v10730_v4  ;;  %vm5066_vm5 = vcmp.eq.f32.partialorder %v10765_v55, 0.0 }
 0x4ca   : > { %v5048_v31 = vmul.f32 0.5, %v5047_v42  ;;  %v4251_v13 = vmul.f32 0.999, %v4167_v33  ;;  %v4315_v16 = vmul.f32 0.001, %v4167_v33  ;;  %4619 = vadd.xlane.f32.xlu1 %v4506_v35 }
 0x4cb   : > { %v5041_v1 = vsel %vm5040_vm0, %v10730_v4, %v5039_v20  ;;  %v3830_v57 = vpop.f32.mrf.mxu2 }
 0x4cc   : > { %v8561_v47 = vpop.eup %8560  ;;  %v5044_v29 = vsel %vm5042_vm1, %v5043_v12, %v5041_v1  ;;  %v5049_v9 = vsub.f32 1.5, %v5048_v31  ;;  %v3831_v27 = vadd.f32 %v3830_v57, %v3662_v6  ;;  %v3999_v11 = vpop.f32.mrf.mxu3  ;;  %v4379_v63 = vadd.f32 %v4315_v16, %v4251_v13 }
 0x4cd   : > { %v5576_v44 = vmul.f32 %v8561_v47, %v10403_v26  ;;  %v8563_v51 = vpop.eup %8562  ;;  %v5449_v56 = vadd.f32 1e-07, %v5044_v29  ;;  %v3664_v3 = vpop.f32.mrf.mxu1 }
 0x4ce   : > { %v5050_v59 = vmul.f32 %v8559_v39, %v5049_v9  ;;  %v5058_v15 = vmul.f32 %v8563_v51, %v10765_v55  ;;  %v4000_v52 = vadd.f32 %v3999_v11, %v3831_v27  ;;  %v10782_v22 = vpop.xlane.xlu2 %4591  ;;  %5723 = vst [vmem:[%s9932_s18 + $0x190] sm:$0xff] %v4379_v63  ;;  %v3665_v46 = vadd.f32 %v3664_v3, %v11437_v40  ;;  %v11438_v11 = vld [vmem:[#allocation10_spill] sm:$0xff] }
 0x4cf   : > { %5640 = vst [vmem:[%s10148_s14 + $0xf8] sm:$0xff] %v5576_v44  ;;  %v4171_v4 = vpop.f32.mrf.mxu0  ;;  %8564 = vrcp.f32 %v5449_v56  ;;  %v10791_v50 = vsub.f32 %v4167_v33, %v4379_v63  ;;  %vm5076_vm6 = vcmp.eq.f32.partialorder %v10782_v22, inf  ;;  %vm5078_vm7 = vcmp.eq.f32.partialorder %v10782_v22, 0.0 }
 0x4d0   : > { %v5051_v26 = vmul.f32 %v5050_v59, %v10746_v23  ;;  %v5059_v8 = vmul.f32 %v8563_v51, %v5058_v15  ;;  %v4169_v60 = vadd.f32 %v4168_v17, %v4000_v52  ;;  %8566 = vrsqrt.f32 %v10782_v22 }
 0x4d1   : > { %v4507_v28 = vmul.f32 %v10791_v50, %v10791_v50 }
 0x4d2   : > { %v5053_v38 = vsel %vm5052_vm2, %v10746_v23, %v5051_v26  ;;  %v5060_v41 = vmul.f32 0.5, %v5059_v8  ;;  %v4252_v49 = vmul.f32 0.999, %v4169_v60  ;;  %v4316_v39 = vmul.f32 0.001, %v4169_v60 }
 0x4d3   : > { %v5056_v34 = vsel %vm5054_vm3, %v5055_v58, %v5053_v38  ;;  %v3833_v45 = vpop.f32.mrf.mxu2  ;;  %4621 = vadd.xlane.f32.xlu2 %v4507_v28 }
 0x4d4   : > { %v5450_v48 = vadd.f32 1e-07, %v5056_v34  ;;  %v5061_v17 = vsub.f32 1.5, %v5060_v41  ;;  %v3834_v2 = vadd.f32 %v3833_v45, %v3665_v46  ;;  %v4002_v42 = vpop.f32.mrf.mxu3  ;;  %v4380_v35 = vadd.f32 %v4316_v39, %v4252_v49 }
 0x4d5   : > { %v8565_v20 = vpop.eup %8564  ;;  %v3666_v33 = vpop.f32.mrf.mxu1 }
 0x4d6   : > { %v8567_v12 = vpop.eup %8566  ;;  %v5577_v23 = vmul.f32 %v8565_v20, %v10429_v14  ;;  %8568 = vrcp.f32 %v5450_v48  ;;  %v5062_v31 = vmul.f32 %v8563_v51, %v5061_v17  ;;  %v4003_v13 = vadd.f32 %v4002_v42, %v3834_v2  ;;  %v10797_v16 = vpop.xlane.xlu0 %4593  ;;  %5724 = vst [vmem:[%s9932_s18 + $0x198] sm:$0xff] %v4380_v35  ;;  %v11439_v17 = vld [vmem:[#allocation11_spill] sm:$0xff] }
 0x4d7   : > { %v4173_v32 = vpop.f32.mrf.mxu0  ;;  %v5070_v6 = vmul.f32 %v8567_v12, %v10782_v22  ;;  %8570 = vrsqrt.f32 %v10797_v16  ;;  %v5067_v14 = vand.u32 2147483648, %v10765_v55  ;;  %v10807_v44 = vsub.f32 %v4169_v60, %v4380_v35 }
 0x4d8   : > { %5641 = vst [vmem:[%s10148_s14 + $0x100] sm:$0xff] %v5577_v23  ;;  %v5063_v47 = vmul.f32 %v5062_v31, %v10765_v55  ;;  %v4172_v1 = vadd.f32 %v4171_v4, %v4003_v13  ;;  %v3667_v51 = vadd.f32 %v3666_v33, %v11438_v11  ;;  %v5079_v48 = vand.u32 2147483648, %v10782_v22 }
 0x4d9   : > { %v5071_v57 = vmul.f32 %v8567_v12, %v5070_v6  ;;  %v4508_v63 = vmul.f32 %v10807_v44, %v10807_v44  ;;  %vm5088_vm8 = vcmp.eq.f32.partialorder %v10797_v16, inf  ;;  %vm5090_vm9 = vcmp.eq.f32.partialorder %v10797_v16, 0.0 }
 0x4da   : > { %v5065_v29 = vsel %vm5064_vm4, %v10765_v55, %v5063_v47  ;;  %v4253_v9 = vmul.f32 0.999, %v4172_v1  ;;  %v4317_v27 = vmul.f32 0.001, %v4172_v1 }
 0x4db   : > { %v5068_v56 = vsel %vm5066_vm5, %v5067_v14, %v5065_v29  ;;  %v5072_v3 = vmul.f32 0.5, %v5071_v57  ;;  %v3835_v59 = vpop.f32.mrf.mxu2  ;;  %4623 = vadd.xlane.f32.xlu0 %v4508_v63 }
 0x4dc   : > { %v8569_v15 = vpop.eup %8568  ;;  %v5451_v52 = vadd.f32 1e-07, %v5068_v56  ;;  %v3836_v4 = vadd.f32 %v3835_v59, %v3667_v51  ;;  %v4004_v26 = vpop.f32.mrf.mxu3  ;;  %v4381_v8 = vadd.f32 %v4317_v27, %v4253_v9 }
 0x4dd   : > { %v8571_v60 = vpop.eup %8570  ;;  %v5578_v55 = vmul.f32 %v8569_v15, %v10448_v21  ;;  %v5073_v58 = vsub.f32 1.5, %v5072_v3  ;;  %v3669_v40 = vpop.f32.mrf.mxu1  ;;  %v11440_v15 = vld [vmem:[#allocation12_spill] sm:$0xff] }
 0x4de   : > { %8572 = vrcp.f32 %v5451_v52  ;;  %v5082_v46 = vmul.f32 %v8571_v60, %v10797_v16  ;;  %v4005_v38 = vadd.f32 %v4004_v26, %v3836_v4  ;;  %v10815_v41 = vpop.xlane.xlu1 %4595  ;;  %5725 = vst [vmem:[%s9932_s18 + $0x1a0] sm:$0xff] %v4381_v8  ;;  %v10820_v45 = vsub.f32 %v4172_v1, %v4381_v8 }
 0x4df   : > { %v4176_v49 = vpop.f32.mrf.mxu0  ;;  %5642 = vst [vmem:[%s10148_s14 + $0x108] sm:$0xff] %v5578_v55  ;;  %v5074_v39 = vmul.f32 %v8567_v12, %v5073_v58  ;;  %8574 = vrsqrt.f32 %v10815_v41  ;;  %v3670_v2 = vadd.f32 %v3669_v40, %v11439_v17  ;;  %vm5100_vm10 = vcmp.eq.f32.partialorder %v10815_v41, inf }
 0x4e0   : > { %v5083_v34 = vmul.f32 %v8571_v60, %v5082_v46  ;;  %v4174_v28 = vadd.f32 %v4173_v32, %v4005_v38  ;;  %v4509_v33 = vmul.f32 %v10820_v45, %v10820_v45  ;;  %vm5102_vm11 = vcmp.eq.f32.partialorder %v10815_v41, 0.0 }
 0x4e1   : > { %v5075_v21 = vmul.f32 %v5074_v39, %v10782_v22 }
 0x4e2   : > { %v5084_v42 = vmul.f32 0.5, %v5083_v34  ;;  %v4254_v35 = vmul.f32 0.999, %v4174_v28  ;;  %v4318_v20 = vmul.f32 0.001, %v4174_v28  ;;  %4625 = vadd.xlane.f32.xlu1 %v4509_v33 }
 0x4e3   : > { %v5077_v12 = vsel %vm5076_vm6, %v10782_v22, %v5075_v21  ;;  %v3838_v23 = vpop.f32.mrf.mxu2 }
 0x4e4   : > { %v8573_v31 = vpop.eup %8572  ;;  %v5080_v13 = vsel %vm5078_vm7, %v5079_v48, %v5077_v12  ;;  %v5085_v32 = vsub.f32 1.5, %v5084_v42  ;;  %v3839_v6 = vadd.f32 %v3838_v23, %v3670_v2  ;;  %v4007_v47 = vpop.f32.mrf.mxu3  ;;  %v4382_v1 = vadd.f32 %v4318_v20, %v4254_v35 }
 0x4e5   : > { %v8575_v14 = vpop.eup %8574  ;;  %v5579_v57 = vmul.f32 %v8573_v31, %v10468_v25  ;;  %v5452_v29 = vadd.f32 1e-07, %v5080_v13  ;;  %v3671_v9 = vpop.f32.mrf.mxu1  ;;  %v5091_v25 = vand.u32 2147483648, %v10797_v16 }
 0x4e6   : > { %v5086_v27 = vmul.f32 %v8571_v60, %v5085_v32  ;;  %v5094_v11 = vmul.f32 %v8575_v14, %v10815_v41  ;;  %v4008_v51 = vadd.f32 %v4007_v47, %v3839_v6  ;;  %v10832_v22 = vpop.xlane.xlu2 %4597  ;;  %5726 = vst [vmem:[%s9932_s18 + $0x1a8] sm:$0xff] %v4382_v1  ;;  %v3672_v52 = vadd.f32 %v3671_v9, %v11440_v15 }
 0x4e7   : > { %v4178_v56 = vpop.f32.mrf.mxu0  ;;  %5643 = vst [vmem:[%s10148_s14 + $0x110] sm:$0xff] %v5579_v57  ;;  %8576 = vrcp.f32 %v5452_v29  ;;  %v10842_v4 = vsub.f32 %v4174_v28, %v4382_v1  ;;  %v11441_v1 = vld [vmem:[#allocation13_spill] sm:$0xff]  ;;  %vm5112_vm12 = vcmp.eq.f32.partialorder %v10832_v22, inf  ;;  %vm5114_vm13 = vcmp.eq.f32.partialorder %v10832_v22, 0.0 }
 0x4e8   : > { %v5087_v3 = vmul.f32 %v5086_v27, %v10797_v16  ;;  %v5095_v63 = vmul.f32 %v8575_v14, %v5094_v11  ;;  %v4177_v59 = vadd.f32 %v4176_v49, %v4008_v51  ;;  %8578 = vrsqrt.f32 %v10832_v22 }
 0x4e9   : > { %v4510_v40 = vmul.f32 %v10842_v4, %v10842_v4 }
 0x4ea   : > { %v5089_v26 = vsel %vm5088_vm8, %v10797_v16, %v5087_v3  ;;  %v5096_v8 = vmul.f32 0.5, %v5095_v63  ;;  %v4255_v60 = vmul.f32 0.999, %v4177_v59  ;;  %v4319_v55 = vmul.f32 0.001, %v4177_v59 }
 0x4eb   : > { %v5092_v58 = vsel %vm5090_vm9, %v5091_v25, %v5089_v26  ;;  %v3840_v46 = vpop.f32.mrf.mxu2  ;;  %4627 = vadd.xlane.f32.xlu2 %v4510_v40 }
 0x4ec   : > { %v5453_v38 = vadd.f32 1e-07, %v5092_v58  ;;  %v5097_v49 = vsub.f32 1.5, %v5096_v8  ;;  %v3841_v39 = vadd.f32 %v3840_v46, %v3672_v52  ;;  %v4009_v34 = vpop.f32.mrf.mxu3  ;;  %v4383_v21 = vadd.f32 %v4319_v55, %v4255_v60 }
 0x4ed   : > { %v8577_v48 = vpop.eup %8576  ;;  %v3674_v28 = vpop.f32.mrf.mxu1 }
 0x4ee   : > { %v8579_v17 = vpop.eup %8578  ;;  %v5580_v16 = vmul.f32 %v8577_v48, %v10485_v19  ;;  %8580 = vrcp.f32 %v5453_v38  ;;  %v5098_v2 = vmul.f32 %v8575_v14, %v5097_v49  ;;  %v4010_v42 = vadd.f32 %v4009_v34, %v3841_v39  ;;  %v10848_v35 = vpop.xlane.xlu0 %4599  ;;  %5727 = vst [vmem:[%s9932_s18 + $0x1b0] sm:$0xff] %v4383_v21  ;;  %v11442_v49 = vld [vmem:[#allocation15_spill] sm:$0xff] }
 0x4ef   : > { %v4181_v20 = vpop.f32.mrf.mxu0  ;;  %v5106_v33 = vmul.f32 %v8579_v17, %v10832_v22  ;;  %8582 = vrsqrt.f32 %v10848_v35  ;;  %v5103_v19 = vand.u32 2147483648, %v10815_v41  ;;  %v10858_v13 = vsub.f32 %v4177_v59, %v4383_v21 }
 0x4f0   : > { %5644 = vst [vmem:[%s10148_s14 + $0x118] sm:$0xff] %v5580_v16  ;;  %v5099_v12 = vmul.f32 %v5098_v2, %v10815_v41  ;;  %v4179_v23 = vadd.f32 %v4178_v56, %v4010_v42  ;;  %v3675_v14 = vadd.f32 %v3674_v28, %v11441_v1  ;;  %v5115_v38 = vand.u32 2147483648, %v10832_v22 }
 0x4f1   : > { %v5107_v31 = vmul.f32 %v8579_v17, %v5106_v33  ;;  %v4511_v9 = vmul.f32 %v10858_v13, %v10858_v13  ;;  %vm5124_vm14 = vcmp.eq.f32.partialorder %v10848_v35, inf  ;;  %vm5126_vm15 = vcmp.eq.f32.partialorder %v10848_v35, 0.0 }
 0x4f2   : > { %v5101_v32 = vsel %vm5100_vm10, %v10815_v41, %v5099_v12  ;;  %v4256_v6 = vmul.f32 0.999, %v4179_v23  ;;  %v4320_v47 = vmul.f32 0.001, %v4179_v23 }
 0x4f3   : > { %v5104_v57 = vsel %vm5102_vm11, %v5103_v19, %v5101_v32  ;;  %v5108_v29 = vmul.f32 0.5, %v5107_v31  ;;  %v3843_v27 = vpop.f32.mrf.mxu2  ;;  %4629 = vadd.xlane.f32.xlu0 %v4511_v9 }
 0x4f4   : > { %v8581_v11 = vpop.eup %8580  ;;  %v5454_v51 = vadd.f32 1e-07, %v5104_v57  ;;  %v3844_v56 = vadd.f32 %v3843_v27, %v3675_v14  ;;  %v4012_v3 = vpop.f32.mrf.mxu3  ;;  %v4384_v63 = vadd.f32 %v4320_v47, %v4256_v6 }
 0x4f5   : > { %v8583_v59 = vpop.eup %8582  ;;  %v5581_v41 = vmul.f32 %v8581_v11, %v10510_v0  ;;  %v5109_v25 = vsub.f32 1.5, %v5108_v29  ;;  %v3676_v15 = vpop.f32.mrf.mxu1  ;;  %v11443_v11 = vld [vmem:[#allocation17_spill] sm:$0xff] }
 0x4f6   : > { %8584 = vrcp.f32 %v5454_v51  ;;  %v5118_v52 = vmul.f32 %v8583_v59, %v10848_v35  ;;  %v4013_v26 = vadd.f32 %v4012_v3, %v3844_v56  ;;  %v10866_v8 = vpop.xlane.xlu1 %4601  ;;  %5728 = vst [vmem:[%s9932_s18 + $0x1b8] sm:$0xff] %v4384_v63  ;;  %v10871_v46 = vsub.f32 %v4179_v23, %v4384_v63 }
 0x4f7   : > { %v4183_v60 = vpop.f32.mrf.mxu0  ;;  %5645 = vst [vmem:[%s10148_s14 + $0x120] sm:$0xff] %v5581_v41  ;;  %v5110_v55 = vmul.f32 %v8579_v17, %v5109_v25  ;;  %8586 = vrsqrt.f32 %v10866_v8  ;;  %v3677_v39 = vadd.f32 %v3676_v15, %v11442_v49  ;;  %vm5136_vm0 = vcmp.eq.f32.partialorder %v10866_v8, inf }
 0x4f8   : > { %v5119_v58 = vmul.f32 %v8583_v59, %v5118_v52  ;;  %v4182_v40 = vadd.f32 %v4181_v20, %v4013_v26  ;;  %v4512_v28 = vmul.f32 %v10871_v46, %v10871_v46  ;;  %vm5138_vm1 = vcmp.eq.f32.partialorder %v10866_v8, 0.0 }
 0x4f9   : > { %v5111_v0 = vmul.f32 %v5110_v55, %v10832_v22 }
 0x4fa   : > { %v5120_v34 = vmul.f32 0.5, %v5119_v58  ;;  %v4257_v21 = vmul.f32 0.999, %v4182_v40  ;;  %v4321_v48 = vmul.f32 0.001, %v4182_v40  ;;  %4631 = vadd.xlane.f32.xlu1 %v4512_v28 }
 0x4fb   : > { %v5113_v17 = vsel %vm5112_vm12, %v10832_v22, %v5111_v0  ;;  %v3845_v16 = vpop.f32.mrf.mxu2 }
 0x4fc   : > { %v8585_v2 = vpop.eup %8584  ;;  %v5116_v42 = vsel %vm5114_vm13, %v5115_v38, %v5113_v17  ;;  %v5121_v20 = vsub.f32 1.5, %v5120_v34  ;;  %v3846_v33 = vadd.f32 %v3845_v16, %v3677_v39  ;;  %v4014_v12 = vpop.f32.mrf.mxu3  ;;  %v4385_v23 = vadd.f32 %v4321_v48, %v4257_v21 }
 0x4fd   : > { %v8587_v19 = vpop.eup %8586  ;;  %v5582_v31 = vmul.f32 %v8585_v2, %v10527_v30  ;;  %v5455_v32 = vadd.f32 1e-07, %v5116_v42  ;;  %v3679_v6 = vpop.f32.mrf.mxu1  ;;  %v5127_v30 = vand.u32 2147483648, %v10848_v35 }
 0x4fe   : > { %v5122_v47 = vmul.f32 %v8583_v59, %v5121_v20  ;;  %v5130_v1 = vmul.f32 %v8587_v19, %v10866_v8  ;;  %v4015_v14 = vadd.f32 %v4014_v12, %v3846_v33  ;;  %v10883_v22 = vpop.xlane.xlu2 %4603  ;;  %5729 = vst [vmem:[%s9932_s18 + $0x1c0] sm:$0xff] %v4385_v23  ;;  %v3680_v51 = vadd.f32 %v3679_v6, %v11443_v11 }
 0x4ff   : > { %v4186_v57 = vpop.f32.mrf.mxu0  ;;  %5646 = vst [vmem:[%s10148_s14 + $0x128] sm:$0xff] %v5582_v31  ;;  %8588 = vrcp.f32 %v5455_v32  ;;  %v10893_v56 = vsub.f32 %v4182_v40, %v4385_v23  ;;  %v11444_v23 = vld [vmem:[#allocation19_spill] sm:$0xff]  ;;  %vm5148_vm2 = vcmp.eq.f32.partialorder %v10883_v22, inf  ;;  %vm5150_vm3 = vcmp.eq.f32.partialorder %v10883_v22, 0.0 }
 0x500   : > { %v5123_v29 = vmul.f32 %v5122_v47, %v10848_v35  ;;  %v5131_v9 = vmul.f32 %v8587_v19, %v5130_v1  ;;  %v4184_v27 = vadd.f32 %v4183_v60, %v4015_v14  ;;  %8590 = vrsqrt.f32 %v10883_v22 }
 0x501   : > { %v4513_v15 = vmul.f32 %v10893_v56, %v10893_v56 }
 0x502   : > { %v5125_v3 = vsel %vm5124_vm14, %v10848_v35, %v5123_v29  ;;  %v5132_v63 = vmul.f32 0.5, %v5131_v9  ;;  %v4258_v59 = vmul.f32 0.999, %v4184_v27  ;;  %v4322_v41 = vmul.f32 0.001, %v4184_v27 }
 0x503   : > { %v5128_v25 = vsel %vm5126_vm15, %v5127_v30, %v5125_v3  ;;  %v3848_v52 = vpop.f32.mrf.mxu2  ;;  %4633 = vadd.xlane.f32.xlu2 %v4513_v15 }
 0x504   : > { %v5456_v26 = vadd.f32 1e-07, %v5128_v25  ;;  %v5133_v60 = vsub.f32 1.5, %v5132_v63  ;;  %v3849_v55 = vadd.f32 %v3848_v52, %v3680_v51  ;;  %v4017_v58 = vpop.f32.mrf.mxu3  ;;  %v4386_v0 = vadd.f32 %v4322_v41, %v4258_v59 }
 0x505   : > { %v8589_v38 = vpop.eup %8588  ;;  %v3681_v40 = vpop.f32.mrf.mxu1  ;;  %v5151_v52 = vand.u32 2147483648, %v10883_v22 }
 0x506   : > { %v8591_v49 = vpop.eup %8590  ;;  %v5583_v35 = vmul.f32 %v8589_v38, %v10552_v37  ;;  %8592 = vrcp.f32 %v5456_v26  ;;  %v5134_v39 = vmul.f32 %v8587_v19, %v5133_v60  ;;  %v4018_v34 = vadd.f32 %v4017_v58, %v3849_v55  ;;  %v10899_v21 = vpop.xlane.xlu0 %4605  ;;  %5730 = vst [vmem:[%s9932_s18 + $0x1c8] sm:$0xff] %v4386_v0  ;;  %v11445_v26 = vld [vmem:[#allocation21_spill] sm:$0xff] }
 0x507   : > { %v5142_v48 = vmul.f32 %v8591_v49, %v10883_v22  ;;  %8594 = vrsqrt.f32 %v10899_v21  ;;  %v4188_v28 = vpop.f32.mrf.mxu0  ;;  %v5139_v37 = vand.u32 2147483648, %v10866_v8  ;;  %v10909_v42 = vsub.f32 %v4184_v27, %v4386_v0 }
 0x508   : > { %5647 = vst [vmem:[%s10148_s14 + $0x130] sm:$0xff] %v5583_v35  ;;  %v5135_v17 = vmul.f32 %v5134_v39, %v10866_v8  ;;  %v4187_v16 = vadd.f32 %v4186_v57, %v4018_v34  ;;  %v3682_v19 = vadd.f32 %v3681_v40, %v11444_v23  ;;  %vm5160_vm4 = vcmp.eq.f32.partialorder %v10899_v21, inf }
 0x509   : > { %v5143_v2 = vmul.f32 %v8591_v49, %v5142_v48  ;;  %v4514_v6 = vmul.f32 %v10909_v42, %v10909_v42  ;;  %vm5162_vm5 = vcmp.eq.f32.partialorder %v10899_v21, 0.0 }
 0x50a   : > { %v5137_v20 = vsel %vm5136_vm0, %v10866_v8, %v5135_v17  ;;  %v4259_v33 = vmul.f32 0.999, %v4187_v16  ;;  %v4323_v12 = vmul.f32 0.001, %v4187_v16 }
 0x50b   : > { %v5140_v31 = vsel %vm5138_vm1, %v5139_v37, %v5137_v20  ;;  %v5144_v32 = vmul.f32 0.5, %v5143_v2  ;;  %v3850_v47 = vpop.f32.mrf.mxu2  ;;  %4635 = vadd.xlane.f32.xlu0 %v4514_v6 }
 0x50c   : > { %v8593_v1 = vpop.eup %8592  ;;  %v5457_v14 = vadd.f32 1e-07, %v5140_v31  ;;  %v3851_v57 = vadd.f32 %v3850_v47, %v3682_v19  ;;  %v4019_v29 = vpop.f32.mrf.mxu3  ;;  %v4387_v9 = vadd.f32 %v4323_v12, %v4259_v33  ;;  %v11446_v47 = vld [vmem:[#allocation23_spill] sm:$0xff] }
 0x50d   : > { %v8595_v27 = vpop.eup %8594  ;;  %v5584_v8 = vmul.f32 %v8593_v1, %v10569_v62  ;;  %v5145_v30 = vsub.f32 1.5, %v5144_v32  ;;  %v3684_v11 = vpop.f32.mrf.mxu1 }
 0x50e   : > { %8596 = vrcp.f32 %v5457_v14  ;;  %v5154_v51 = vmul.f32 %v8595_v27, %v10899_v21  ;;  %v4020_v3 = vadd.f32 %v4019_v29, %v3851_v57  ;;  %v10917_v63 = vpop.xlane.xlu1 %4607  ;;  %5731 = vst [vmem:[%s9932_s18 + $0x1d0] sm:$0xff] %v4387_v9  ;;  %v10922_v15 = vsub.f32 %v4187_v16, %v4387_v9 }
 0x50f   : > { %5648 = vst [vmem:[%s10148_s14 + $0x138] sm:$0xff] %v5584_v8  ;;  %v5146_v59 = vmul.f32 %v8591_v49, %v5145_v30  ;;  %8598 = vrsqrt.f32 %v10917_v63  ;;  %v3685_v60 = vadd.f32 %v3684_v11, %v11445_v26  ;;  %v4191_v55 = vpop.f32.mrf.mxu0  ;;  %vm5172_vm6 = vcmp.eq.f32.partialorder %v10917_v63, inf }
 0x510   : > { %v5155_v41 = vmul.f32 %v8595_v27, %v5154_v51  ;;  %v4189_v25 = vadd.f32 %v4188_v28, %v4020_v3  ;;  %v4515_v40 = vmul.f32 %v10922_v15, %v10922_v15  ;;  %vm5174_vm7 = vcmp.eq.f32.partialorder %v10917_v63, 0.0 }
 0x511   : > { %v5147_v62 = vmul.f32 %v5146_v59, %v10883_v22 }
 0x512   : > { %v5156_v58 = vmul.f32 0.5, %v5155_v41  ;;  %v4260_v0 = vmul.f32 0.999, %v4189_v25  ;;  %v4324_v38 = vmul.f32 0.001, %v4189_v25  ;;  %4637 = vadd.xlane.f32.xlu1 %v4515_v40 }
 0x513   : > { %v5149_v49 = vsel %vm5148_vm2, %v10883_v22, %v5147_v62  ;;  %v3853_v35 = vpop.f32.mrf.mxu2 }
 0x514   : > { %v8597_v39 = vpop.eup %8596  ;;  %v5152_v34 = vsel %vm5150_vm3, %v5151_v52, %v5149_v49  ;;  %v5157_v48 = vsub.f32 1.5, %v5156_v58  ;;  %v3854_v28 = vadd.f32 %v3853_v35, %v3685_v60  ;;  %v4022_v17 = vpop.f32.mrf.mxu3  ;;  %v4388_v16 = vadd.f32 %v4324_v38, %v4260_v0 }
 0x515   : > { %v8599_v37 = vpop.eup %8598  ;;  %v5585_v2 = vmul.f32 %v8597_v39, %v10594_v24  ;;  %v5458_v20 = vadd.f32 1e-07, %v5152_v34  ;;  %v3686_v33 = vpop.f32.mrf.mxu1  ;;  %v5163_v24 = vand.u32 2147483648, %v10899_v21 }
 0x516   : > { %v5158_v12 = vmul.f32 %v8595_v27, %v5157_v48  ;;  %v5166_v23 = vmul.f32 %v8599_v37, %v10917_v63  ;;  %v4023_v19 = vadd.f32 %v4022_v17, %v3854_v28  ;;  %v10934_v22 = vpop.xlane.xlu2 %4609  ;;  %5732 = vst [vmem:[%s9932_s18 + $0x1d8] sm:$0xff] %v4388_v16  ;;  %v3687_v1 = vadd.f32 %v3686_v33, %v11446_v47 }
 0x517   : > { %5649 = vst [vmem:[%s10148_s14 + $0x140] sm:$0xff] %v5585_v2  ;;  %8600 = vrcp.f32 %v5458_v20  ;;  %v10944_v14 = vsub.f32 %v4189_v25, %v4388_v16  ;;  %v4193_v30 = vpop.f32.mrf.mxu0  ;;  %v11447_v16 = vld [vmem:[#allocation25_spill] sm:$0xff]  ;;  %vm5184_vm8 = vcmp.eq.f32.partialorder %v10934_v22, inf  ;;  %vm5186_vm9 = vcmp.eq.f32.partialorder %v10934_v22, 0.0 }
 0x518   : > { %v5159_v31 = vmul.f32 %v5158_v12, %v10899_v21  ;;  %v5167_v32 = vmul.f32 %v8599_v37, %v5166_v23  ;;  %v4192_v6 = vadd.f32 %v4191_v55, %v4023_v19  ;;  %8602 = vrsqrt.f32 %v10934_v22 }
 0x519   : > { %v4516_v11 = vmul.f32 %v10944_v14, %v10944_v14 }
 0x51a   : > { %v5161_v57 = vsel %vm5160_vm4, %v10899_v21, %v5159_v31  ;;  %v5168_v29 = vmul.f32 0.5, %v5167_v32  ;;  %v4261_v9 = vmul.f32 0.999, %v4192_v6  ;;  %v4325_v27 = vmul.f32 0.001, %v4192_v6 }
 0x51b   : > { %v5164_v8 = vsel %vm5162_vm5, %v5163_v24, %v5161_v57  ;;  %v3855_v51 = vpop.f32.mrf.mxu2  ;;  %4639 = vadd.xlane.f32.xlu2 %v4516_v11 }
 0x51c   : > { %v5459_v3 = vadd.f32 1e-07, %v5164_v8  ;;  %v5169_v59 = vsub.f32 1.5, %v5168_v29  ;;  %v3856_v41 = vadd.f32 %v3855_v51, %v3687_v1  ;;  %v4024_v62 = vpop.f32.mrf.mxu3  ;;  %v4389_v52 = vadd.f32 %v4325_v27, %v4261_v9 }
 0x51d   : > { %v8601_v25 = vpop.eup %8600  ;;  %v3689_v26 = vpop.f32.mrf.mxu1 }
 0x51e   : > { %v8603_v21 = vpop.eup %8602  ;;  %v5586_v60 = vmul.f32 %v8601_v25, %v10611_v54  ;;  %8604 = vrcp.f32 %v5459_v3  ;;  %v5170_v55 = vmul.f32 %v8599_v37, %v5169_v59  ;;  %v4025_v58 = vadd.f32 %v4024_v62, %v3856_v41  ;;  %5733 = vst [vmem:[%s9932_s18 + $0x1e0] sm:$0xff] %v4389_v52  ;;  %v10952_v38 = vpop.xlane.xlu0 %4611  ;;  %v11448_v62 = vld [vmem:[#allocation33_spill] sm:$0xff] }
 0x51f   : > { %v5178_v0 = vmul.f32 %v8603_v21, %v10934_v22  ;;  %v10954_v40 = vsub.f32 %v4192_v6, %v4389_v52  ;;  %8606 = vrsqrt.f32 %v10952_v38  ;;  %v5175_v54 = vand.u32 2147483648, %v10917_v63  ;;  %v4196_v47 = vpop.f32.mrf.mxu0 }
 0x520   : > { %5650 = vst [vmem:[%s10148_s14 + $0x148] sm:$0xff] %v5586_v60  ;;  %v5171_v49 = vmul.f32 %v5170_v55, %v10917_v63  ;;  %v4194_v35 = vadd.f32 %v4193_v30, %v4025_v58  ;;  %v3690_v37 = vadd.f32 %v3689_v26, %v11447_v16  ;;  %v5187_v3 = vand.u32 2147483648, %v10934_v22 }
 0x521   : > { %v5179_v39 = vmul.f32 %v8603_v21, %v5178_v0  ;;  %v4517_v34 = vmul.f32 %v10954_v40, %v10954_v40  ;;  %vm5196_vm10 = vcmp.eq.f32.partialorder %v10952_v38, inf  ;;  %vm5198_vm11 = vcmp.eq.f32.partialorder %v10952_v38, 0.0 }
 0x522   : > { %v5173_v48 = vsel %vm5172_vm6, %v10917_v63, %v5171_v49  ;;  %v4262_v28 = vmul.f32 0.999, %v4194_v35  ;;  %v4326_v17 = vmul.f32 0.001, %v4194_v35 }
 0x523   : > { %v5176_v2 = vsel %vm5174_vm7, %v5175_v54, %v5173_v48  ;;  %v5180_v20 = vmul.f32 0.5, %v5179_v39  ;;  %4641 = vadd.xlane.f32.xlu0 %v4517_v34  ;;  %v3858_v33 = vpop.f32.mrf.mxu2 }
 0x524   : > { %v8605_v12 = vpop.eup %8604  ;;  %v5460_v23 = vadd.f32 1e-07, %v5176_v2  ;;  %v3859_v19 = vadd.f32 %v3858_v33, %v3690_v37  ;;  %v4027_v31 = vpop.f32.mrf.mxu3  ;;  %v4390_v32 = vadd.f32 %v4326_v17, %v4262_v28 }
 0x525   : > { %v5587_v6 = vmul.f32 %v8605_v12, %v10636_v5  ;;  %v5181_v24 = vsub.f32 1.5, %v5180_v20  ;;  %v8607_v63 = vpop.eup %8606  ;;  %v3691_v27 = vpop.f32.mrf.mxu1  ;;  %v5199_v12 = vand.u32 2147483648, %v10952_v38 }
 0x526   : > { %8608 = vrcp.f32 %v5460_v23  ;;  %v4028_v1 = vadd.f32 %v4027_v31, %v3859_v19  ;;  %v10967_v57 = vsub.f32 %v4194_v35, %v4390_v32  ;;  %5734 = vst [vmem:[%s9932_s18 + $0x1e8] sm:$0xff] %v4390_v32  ;;  %v5190_v9 = vmul.f32 %v8607_v63, %v10952_v38  ;;  %v10972_v8 = vpop.xlane.xlu1 %4613 }
 0x527   : > { %5651 = vst [vmem:[%s10148_s14 + $0x150] sm:$0xff] %v5587_v6  ;;  %v5182_v29 = vmul.f32 %v8603_v21, %v5181_v24  ;;  %8610 = vrsqrt.f32 %v10972_v8  ;;  %v3692_v52 = vadd.f32 %v3691_v27, %v11448_v62  ;;  %v4198_v37 = vpop.f32.mrf.mxu0  ;;  %vm5208_vm12 = vcmp.eq.f32.partialorder %v10972_v8, inf }
 0x528   : > { %v4197_v30 = vadd.f32 %v4196_v47, %v4028_v1  ;;  %v5191_v11 = vmul.f32 %v8607_v63, %v5190_v9  ;;  %v4518_v51 = vmul.f32 %v10967_v57, %v10967_v57  ;;  %vm5210_vm13 = vcmp.eq.f32.partialorder %v10972_v8, 0.0 }
 0x529   : > { %v5183_v5 = vmul.f32 %v5182_v29, %v10934_v22 }
 0x52a   : > { %v4263_v59 = vmul.f32 0.999, %v4197_v30  ;;  %v4327_v41 = vmul.f32 0.001, %v4197_v30  ;;  %v5192_v26 = vmul.f32 0.5, %v5191_v11  ;;  %4643 = vadd.xlane.f32.xlu1 %v4518_v51 }
 0x52b   : > { %v5185_v25 = vsel %vm5184_vm8, %v10934_v22, %v5183_v5  ;;  %v3860_v21 = vpop.f32.mrf.mxu2 }
 0x52c   : > { %v8609_v60 = vpop.eup %8608  ;;  %v5188_v55 = vsel %vm5186_vm9, %v5187_v3, %v5185_v25  ;;  %v3861_v58 = vadd.f32 %v3860_v21, %v3692_v52  ;;  %v4391_v0 = vadd.f32 %v4327_v41, %v4263_v59  ;;  %v5193_v54 = vsub.f32 1.5, %v5192_v26  ;;  %v4029_v39 = vpop.f32.mrf.mxu3 }
 0x52d   : > { %v5588_v49 = vmul.f32 %v8609_v60, %v10653_v53  ;;  %v5461_v35 = vadd.f32 1e-07, %v5188_v55  ;;  %v8611_v34 = vpop.eup %8610  ;;  %v10984_v28 = vpop.xlane.xlu2 %4615  ;;  %v5211_v3 = vand.u32 2147483648, %v10972_v8 }
 0x52e   : > { %v4030_v48 = vadd.f32 %v4029_v39, %v3861_v58  ;;  %v10986_v17 = vsub.f32 %v4197_v30, %v4391_v0  ;;  %5735 = vst [vmem:[%s9932_s18 + $0x1f0] sm:$0xff] %v4391_v0  ;;  %v5194_v22 = vmul.f32 %v8607_v63, %v5193_v54  ;;  %v5202_v16 = vmul.f32 %v8611_v34, %v10972_v8 }
 0x52f   : > { %5652 = vst [vmem:[%s10148_s14 + $0x158] sm:$0xff] %v5588_v49  ;;  %8612 = vrcp.f32 %v5461_v35  ;;  %vm5220_vm14 = vcmp.eq.f32.partialorder %v10984_v28, inf  ;;  %vm5222_vm15 = vcmp.eq.f32.partialorder %v10984_v28, 0.0 }
 0x530   : > { %v4199_v2 = vadd.f32 %v4198_v37, %v4030_v48  ;;  %8614 = vrsqrt.f32 %v10984_v28  ;;  %v5195_v53 = vmul.f32 %v5194_v22, %v10952_v38  ;;  %v5203_v20 = vmul.f32 %v8611_v34, %v5202_v16 }
 0x531   : > { %v4519_v33 = vmul.f32 %v10986_v17, %v10986_v17 }
 0x532   : > { %v4264_v23 = vmul.f32 0.999, %v4199_v2  ;;  %v4328_v19 = vmul.f32 0.001, %v4199_v2  ;;  %v5197_v31 = vsel %vm5196_vm10, %v10952_v38, %v5195_v53  ;;  %v5204_v32 = vmul.f32 0.5, %v5203_v20 }
 0x533   : > { %4645 = vadd.xlane.f32.xlu2 %v4519_v33  ;;  %v5200_v6 = vsel %vm5198_vm11, %v5199_v12, %v5197_v31 }
 0x534   : > { %v4392_v24 = vadd.f32 %v4328_v19, %v4264_v23  ;;  %v5462_v63 = vadd.f32 1e-07, %v5200_v6  ;;  %v5205_v1 = vsub.f32 1.5, %v5204_v32 }
 0x535   : > { %v8613_v47 = vpop.eup %8612  ;;  %v4618_v29 = vpop.xlane.xlu0 %4617 }
 0x536   : > { %v8615_v9 = vpop.eup %8614  ;;  %v5589_v27 = vmul.f32 %v8613_v47, %v10678_v61  ;;  %8616 = vrsqrt.f32 %v4618_v29  ;;  %5736 = vst [vmem:[%s9932_s18 + $0x1f8] sm:$0xff] %v4392_v24  ;;  %v5206_v30 = vmul.f32 %v8611_v34, %v5205_v1  ;;  %v11003_v38 = vsub.f32 %v4199_v2, %v4392_v24 }
 0x537   : > { %8618 = vrcp.f32 %v5462_v63  ;;  %v5214_v5 = vmul.f32 %v8615_v9, %v10984_v28  ;;  %vm5232_vm0 = vcmp.eq.f32.partialorder %v4618_v29, inf  ;;  %v5235_v12 = vand.u32 2147483648, %v4618_v29 }
 0x538   : > { %5653 = vst [vmem:[%s10148_s14 + $0x160] sm:$0xff] %v5589_v27  ;;  %v5207_v11 = vmul.f32 %v5206_v30, %v10972_v8  ;;  %v4520_v59 = vmul.f32 %v11003_v38, %v11003_v38  ;;  %vm5234_vm1 = vcmp.eq.f32.partialorder %v4618_v29, 0.0 }
 0x539   : > { %v5215_v51 = vmul.f32 %v8615_v9, %v5214_v5 }
 0x53a   : > { %v5209_v61 = vsel %vm5208_vm12, %v10972_v8, %v5207_v11  ;;  %4647 = vadd.xlane.f32.xlu0 %v4520_v59  ;;  %v5223_v8 = vand.u32 2147483648, %v10984_v28 }
 0x53b   : > { %v5216_v41 = vmul.f32 0.5, %v5215_v51  ;;  %v5212_v52 = vsel %vm5210_vm13, %v5211_v3, %v5209_v61 }
 0x53c   : > { %v8617_v62 = vpop.eup %8616  ;;  %v5463_v26 = vadd.f32 1e-07, %v5212_v52 }
 0x53d   : > { %v8619_v25 = vpop.eup %8618  ;;  %v5217_v21 = vsub.f32 1.5, %v5216_v41  ;;  %v5226_v60 = vmul.f32 %v8617_v62, %v4618_v29  ;;  %v4620_v55 = vpop.xlane.xlu1 %4619 }
 0x53e   : > { %v5590_v58 = vmul.f32 %v8619_v25, %v10701_v10  ;;  %8620 = vrsqrt.f32 %v4620_v55  ;;  %vm5244_vm2 = vcmp.eq.f32.partialorder %v4620_v55, inf  ;;  %vm5246_vm3 = vcmp.eq.f32.partialorder %v4620_v55, 0.0 }
 0x53f   : > { %8622 = vrcp.f32 %v5463_v26  ;;  %v5218_v0 = vmul.f32 %v8615_v9, %v5217_v21  ;;  %v5227_v49 = vmul.f32 %v8617_v62, %v5226_v60  ;;  %v5247_v9 = vand.u32 2147483648, %v4620_v55 }
 0x540   : > { %5654 = vst [vmem:[%s10148_s14 + $0x168] sm:$0xff] %v5590_v58 }
 0x541   : > { %v5219_v35 = vmul.f32 %v5218_v0, %v10984_v28  ;;  %v5228_v54 = vmul.f32 0.5, %v5227_v49 }
 0x543   : > { %v5221_v39 = vsel %vm5220_vm14, %v10984_v28, %v5219_v35  ;;  %v5229_v34 = vsub.f32 1.5, %v5228_v54 }
 0x544   : > { %v8621_v48 = vpop.eup %8620  ;;  %v5224_v10 = vsel %vm5222_vm15, %v5223_v8, %v5221_v39 }
 0x545   : > { %v8623_v22 = vpop.eup %8622  ;;  %v5464_v16 = vadd.f32 1e-07, %v5224_v10  ;;  %v5230_v37 = vmul.f32 %v8617_v62, %v5229_v34  ;;  %v5238_v2 = vmul.f32 %v8621_v48, %v4620_v55 }
 0x546   : > { %v5591_v53 = vmul.f32 %v8623_v22, %v10718_v7  ;;  %v4622_v23 = vpop.xlane.xlu2 %4621 }
 0x547   : > { %8624 = vrcp.f32 %v5464_v16  ;;  %v5231_v20 = vmul.f32 %v5230_v37, %v4618_v29  ;;  %v5239_v33 = vmul.f32 %v8621_v48, %v5238_v2  ;;  %vm5256_vm4 = vcmp.eq.f32.partialorder %v4622_v23, inf }
 0x548   : > { %5655 = vst [vmem:[%s10148_s14 + $0x170] sm:$0xff] %v5591_v53  ;;  %8626 = vrsqrt.f32 %v4622_v23  ;;  %vm5258_vm5 = vcmp.eq.f32.partialorder %v4622_v23, 0.0 }
 0x549   : > { %v5233_v19 = vsel %vm5232_vm0, %v4618_v29, %v5231_v20  ;;  %v5240_v28 = vmul.f32 0.5, %v5239_v33 }
 0x54a   : > { %v5236_v31 = vsel %vm5234_vm1, %v5235_v12, %v5233_v19 }
 0x54b   : > { %v5465_v32 = vadd.f32 1e-07, %v5236_v31  ;;  %v5241_v6 = vsub.f32 1.5, %v5240_v28 }
 0x54d   : > { %v8625_v24 = vpop.eup %8624  ;;  %8628 = vrcp.f32 %v5465_v32  ;;  %v5242_v47 = vmul.f32 %v8621_v48, %v5241_v6 }
 0x54e   : > { %v5592_v7 = vmul.f32 %v8625_v24, %v10732_v36  ;;  %v8627_v63 = vpop.eup %8626  ;;  %v4624_v30 = vpop.xlane.xlu0 %4623 }
 0x54f   : > { %v5243_v1 = vmul.f32 %v5242_v47, %v4620_v55  ;;  %v5250_v27 = vmul.f32 %v8627_v63, %v4622_v23  ;;  %8630 = vrsqrt.f32 %v4624_v30  ;;  %vm5268_vm6 = vcmp.eq.f32.partialorder %v4624_v30, inf }
 0x550   : > { %5656 = vst [vmem:[%s10148_s14 + $0x178] sm:$0xff] %v5592_v7  ;;  %v5271_v16 = vand.u32 2147483648, %v4624_v30  ;;  %vm5270_vm7 = vcmp.eq.f32.partialorder %v4624_v30, 0.0 }
 0x551   : > { %v5245_v5 = vsel %vm5244_vm2, %v4620_v55, %v5243_v1  ;;  %v5251_v11 = vmul.f32 %v8627_v63, %v5250_v27  ;;  %v5259_v55 = vand.u32 2147483648, %v4622_v23 }
 0x552   : > { %v5248_v29 = vsel %vm5246_vm3, %v5247_v9, %v5245_v5 }
 0x553   : > { %v8629_v51 = vpop.eup %8628  ;;  %v5466_v3 = vadd.f32 1e-07, %v5248_v29  ;;  %v5252_v61 = vmul.f32 0.5, %v5251_v11 }
 0x554   : > { %v5593_v59 = vmul.f32 %v8629_v51, %v10748_v43 }
 0x555   : > { %8632 = vrcp.f32 %v5466_v3  ;;  %v5253_v36 = vsub.f32 1.5, %v5252_v61  ;;  %v8631_v41 = vpop.eup %8630  ;;  %v4626_v62 = vpop.xlane.xlu1 %4625 }
 0x556   : > { %5657 = vst [vmem:[%s10148_s14 + $0x180] sm:$0xff] %v5593_v59  ;;  %v5262_v25 = vmul.f32 %v8631_v41, %v4624_v30  ;;  %8634 = vrsqrt.f32 %v4626_v62  ;;  %vm5280_vm8 = vcmp.eq.f32.partialorder %v4626_v62, inf  ;;  %v5283_v6 = vand.u32 2147483648, %v4626_v62 }
 0x557   : > { %v5254_v52 = vmul.f32 %v8627_v63, %v5253_v36  ;;  %vm5282_vm9 = vcmp.eq.f32.partialorder %v4626_v62, 0.0 }
 0x558   : > { %v5263_v21 = vmul.f32 %v8631_v41, %v5262_v25 }
 0x559   : > { %v5255_v26 = vmul.f32 %v5254_v52, %v4622_v23 }
 0x55a   : > { %v5264_v43 = vmul.f32 0.5, %v5263_v21 }
 0x55b   : > { %v8633_v60 = vpop.eup %8632  ;;  %v5257_v0 = vsel %vm5256_vm4, %v4622_v23, %v5255_v26 }
 0x55c   : > { %v5594_v58 = vmul.f32 %v8633_v60, %v10767_v18  ;;  %v5260_v49 = vsel %vm5258_vm5, %v5259_v55, %v5257_v0  ;;  %v8635_v35 = vpop.eup %8634  ;;  %v5265_v8 = vsub.f32 1.5, %v5264_v43 }
 0x55d   : > { %v5467_v54 = vadd.f32 1e-07, %v5260_v49  ;;  %v5274_v39 = vmul.f32 %v8635_v35, %v4626_v62 }
 0x55e   : > { %5658 = vst [vmem:[%s10148_s14 + $0x188] sm:$0xff] %v5594_v58  ;;  %v5266_v34 = vmul.f32 %v8631_v41, %v5265_v8  ;;  %v4628_v48 = vpop.xlane.xlu2 %4627 }
 0x55f   : > { %8636 = vrcp.f32 %v5467_v54  ;;  %v5275_v10 = vmul.f32 %v8635_v35, %v5274_v39  ;;  %vm5292_vm10 = vcmp.eq.f32.partialorder %v4628_v48, inf  ;;  %v5295_v59 = vand.u32 2147483648, %v4628_v48 }
 0x560   : > { %8638 = vrsqrt.f32 %v4628_v48  ;;  %v5267_v22 = vmul.f32 %v5266_v34, %v4624_v30  ;;  %vm5294_vm11 = vcmp.eq.f32.partialorder %v4628_v48, 0.0 }
 0x561   : > { %v5276_v37 = vmul.f32 0.5, %v5275_v10 }
 0x562   : > { %v5269_v18 = vsel %vm5268_vm6, %v4624_v30, %v5267_v22 }
 0x563   : > { %v5272_v2 = vsel %vm5270_vm7, %v5271_v16, %v5269_v18  ;;  %v5277_v53 = vsub.f32 1.5, %v5276_v37 }
 0x564   : > { %v5468_v33 = vadd.f32 1e-07, %v5272_v2 }
 0x565   : > { %v8637_v20 = vpop.eup %8636  ;;  %v5278_v19 = vmul.f32 %v8635_v35, %v5277_v53 }
 0x566   : > { %v8639_v12 = vpop.eup %8638  ;;  %v5595_v23 = vmul.f32 %v8637_v20, %v10791_v50  ;;  %8640 = vrcp.f32 %v5468_v33  ;;  %v4630_v31 = vpop.xlane.xlu0 %4629 }
 0x567   : > { %v5286_v28 = vmul.f32 %v8639_v12, %v4628_v48  ;;  %v5279_v32 = vmul.f32 %v5278_v19, %v4626_v62  ;;  %8642 = vrsqrt.f32 %v4630_v31  ;;  %vm5304_vm12 = vcmp.eq.f32.partialorder %v4630_v31, inf }
 0x568   : > { %5659 = vst [vmem:[%s10148_s14 + $0x190] sm:$0xff] %v5595_v23  ;;  %v5307_v43 = vand.u32 2147483648, %v4630_v31  ;;  %vm5306_vm13 = vcmp.eq.f32.partialorder %v4630_v31, 0.0 }
 0x569   : > { %v5287_v24 = vmul.f32 %v8639_v12, %v5286_v28  ;;  %v5281_v47 = vsel %vm5280_vm8, %v4626_v62, %v5279_v32 }
 0x56a   : > { %v5284_v7 = vsel %vm5282_vm9, %v5283_v6, %v5281_v47 }
 0x56b   : > { %v5288_v63 = vmul.f32 0.5, %v5287_v24  ;;  %v5469_v1 = vadd.f32 1e-07, %v5284_v7 }
 0x56c   : > { %v8641_v9 = vpop.eup %8640 }
 0x56d   : > { %v5289_v27 = vsub.f32 1.5, %v5288_v63  ;;  %v8643_v30 = vpop.eup %8642  ;;  %v5596_v50 = vmul.f32 %v8641_v9, %v10807_v44  ;;  %8644 = vrcp.f32 %v5469_v1  ;;  %v4632_v5 = vpop.xlane.xlu1 %4631 }
 0x56e   : > { %v5298_v11 = vmul.f32 %v8643_v30, %v4630_v31  ;;  %8646 = vrsqrt.f32 %v4632_v5  ;;  %vm5316_vm14 = vcmp.eq.f32.partialorder %v4632_v5, inf  ;;  %v5319_v18 = vand.u32 2147483648, %v4632_v5 }
 0x56f   : > { %v5290_v29 = vmul.f32 %v8639_v12, %v5289_v27  ;;  %5660 = vst [vmem:[%s10148_s14 + $0x198] sm:$0xff] %v5596_v50  ;;  %vm5318_vm15 = vcmp.eq.f32.partialorder %v4632_v5, 0.0 }
 0x570   : > { %v5299_v3 = vmul.f32 %v8643_v30, %v5298_v11 }
 0x571   : > { %v5291_v51 = vmul.f32 %v5290_v29, %v4628_v48 }
 0x572   : > { %v5300_v36 = vmul.f32 0.5, %v5299_v3 }
 0x573   : > { %v5293_v61 = vsel %vm5292_vm10, %v4628_v48, %v5291_v51  ;;  %v8645_v41 = vpop.eup %8644 }
 0x574   : > { %v5296_v62 = vsel %vm5294_vm11, %v5295_v59, %v5293_v61  ;;  %v8647_v52 = vpop.eup %8646  ;;  %v5597_v25 = vmul.f32 %v8645_v41, %v10820_v45  ;;  %v5301_v26 = vsub.f32 1.5, %v5300_v36 }
 0x575   : > { %v5470_v44 = vadd.f32 1e-07, %v5296_v62  ;;  %v5310_v21 = vmul.f32 %v8647_v52, %v4632_v5 }
 0x576   : > { %5661 = vst [vmem:[%s10148_s14 + $0x1a0] sm:$0xff] %v5597_v25  ;;  %v5302_v60 = vmul.f32 %v8643_v30, %v5301_v26  ;;  %v4634_v55 = vpop.xlane.xlu2 %4633 }
 0x577   : > { %8648 = vrcp.f32 %v5470_v44  ;;  %v5311_v58 = vmul.f32 %v8647_v52, %v5310_v21  ;;  %vm5328_vm0 = vcmp.eq.f32.partialorder %v4634_v55, inf  ;;  %v5331_v7 = vand.u32 2147483648, %v4634_v55 }
 0x578   : > { %8650 = vrsqrt.f32 %v4634_v55  ;;  %v5303_v0 = vmul.f32 %v5302_v60, %v4630_v31  ;;  %vm5330_vm1 = vcmp.eq.f32.partialorder %v4634_v55, 0.0 }
 0x579   : > { %v5312_v49 = vmul.f32 0.5, %v5311_v58 }
 0x57a   : > { %v5305_v35 = vsel %vm5304_vm12, %v4630_v31, %v5303_v0 }
 0x57b   : > { %v5308_v54 = vsel %vm5306_vm13, %v5307_v43, %v5305_v35  ;;  %v5313_v8 = vsub.f32 1.5, %v5312_v49 }
 0x57c   : > { %v5471_v45 = vadd.f32 1e-07, %v5308_v54 }
 0x57d   : > { %v8649_v39 = vpop.eup %8648  ;;  %v5314_v10 = vmul.f32 %v8647_v52, %v5313_v8 }
 0x57e   : > { %v8651_v34 = vpop.eup %8650  ;;  %v5598_v48 = vmul.f32 %v8649_v39, %v10842_v4  ;;  %8652 = vrcp.f32 %v5471_v45  ;;  %v4636_v16 = vpop.xlane.xlu0 %4635 }
 0x57f   : > { %v5322_v22 = vmul.f32 %v8651_v34, %v4634_v55  ;;  %v5315_v37 = vmul.f32 %v5314_v10, %v4632_v5  ;;  %8654 = vrsqrt.f32 %v4636_v16  ;;  %vm5340_vm2 = vcmp.eq.f32.partialorder %v4636_v16, inf }
 0x580   : > { %5662 = vst [vmem:[%s10148_s14 + $0x1a8] sm:$0xff] %v5598_v48  ;;  %v5343_v61 = vand.u32 2147483648, %v4636_v16  ;;  %vm5342_vm3 = vcmp.eq.f32.partialorder %v4636_v16, 0.0 }
 0x581   : > { %v5323_v2 = vmul.f32 %v8651_v34, %v5322_v22  ;;  %v5317_v53 = vsel %vm5316_vm14, %v4632_v5, %v5315_v37 }
 0x582   : > { %v5320_v20 = vsel %vm5318_vm15, %v5319_v18, %v5317_v53 }
 0x583   : > { %v5324_v33 = vmul.f32 0.5, %v5323_v2  ;;  %v5472_v12 = vadd.f32 1e-07, %v5320_v20 }
 0x584   : > { %v8653_v23 = vpop.eup %8652 }
 0x585   : > { %v5325_v19 = vsub.f32 1.5, %v5324_v33  ;;  %v8655_v28 = vpop.eup %8654  ;;  %v5599_v4 = vmul.f32 %v8653_v23, %v10858_v13  ;;  %8656 = vrcp.f32 %v5472_v12  ;;  %v4638_v31 = vpop.xlane.xlu1 %4637 }
 0x586   : > { %v5334_v6 = vmul.f32 %v8655_v28, %v4636_v16  ;;  %8658 = vrsqrt.f32 %v4638_v31  ;;  %vm5352_vm4 = vcmp.eq.f32.partialorder %v4638_v31, inf  ;;  %v5355_v0 = vand.u32 2147483648, %v4638_v31 }
 0x587   : > { %v5326_v32 = vmul.f32 %v8651_v34, %v5325_v19  ;;  %5663 = vst [vmem:[%s10148_s14 + $0x1b0] sm:$0xff] %v5599_v4  ;;  %vm5354_vm5 = vcmp.eq.f32.partialorder %v4638_v31, 0.0 }
 0x588   : > { %v5335_v47 = vmul.f32 %v8655_v28, %v5334_v6 }
 0x589   : > { %v5327_v24 = vmul.f32 %v5326_v32, %v4634_v55 }
 0x58a   : > { %v5336_v1 = vmul.f32 0.5, %v5335_v47 }
 0x58b   : > { %v5329_v63 = vsel %vm5328_vm0, %v4634_v55, %v5327_v24  ;;  %v8657_v9 = vpop.eup %8656 }
 0x58c   : > { %v5332_v27 = vsel %vm5330_vm1, %v5331_v7, %v5329_v63  ;;  %v8659_v30 = vpop.eup %8658  ;;  %v5600_v50 = vmul.f32 %v8657_v9, %v10871_v46  ;;  %v5337_v5 = vsub.f32 1.5, %v5336_v1 }
 0x58d   : > { %v5473_v13 = vadd.f32 1e-07, %v5332_v27  ;;  %v5346_v29 = vmul.f32 %v8659_v30, %v4638_v31 }
 0x58e   : > { %5664 = vst [vmem:[%s10148_s14 + $0x1b8] sm:$0xff] %v5600_v50  ;;  %v5338_v11 = vmul.f32 %v8655_v28, %v5337_v5  ;;  %v4640_v51 = vpop.xlane.xlu2 %4639 }
 0x58f   : > { %8660 = vrcp.f32 %v5473_v13  ;;  %v5347_v3 = vmul.f32 %v8659_v30, %v5346_v29  ;;  %vm5364_vm6 = vcmp.eq.f32.partialorder %v4640_v51, inf  ;;  %v5367_v2 = vand.u32 2147483648, %v4640_v51 }
 0x590   : > { %8662 = vrsqrt.f32 %v4640_v51  ;;  %v5339_v59 = vmul.f32 %v5338_v11, %v4636_v16  ;;  %vm5366_vm7 = vcmp.eq.f32.partialorder %v4640_v51, 0.0 }
 0x591   : > { %v5348_v36 = vmul.f32 0.5, %v5347_v3 }
 0x592   : > { %v5341_v41 = vsel %vm5340_vm2, %v4636_v16, %v5339_v59 }
 0x593   : > { %v5344_v62 = vsel %vm5342_vm3, %v5343_v61, %v5341_v41  ;;  %v5349_v52 = vsub.f32 1.5, %v5348_v36 }
 0x594   : > { %v5474_v46 = vadd.f32 1e-07, %v5344_v62 }
 0x595   : > { %v8661_v25 = vpop.eup %8660  ;;  %v5350_v60 = vmul.f32 %v8659_v30, %v5349_v52 }
 0x596   : > { %v4642_v44 = vpop.xlane.xlu0 %4641  ;;  %v8663_v26 = vpop.eup %8662  ;;  %v5601_v21 = vmul.f32 %v8661_v25, %v10893_v56 }
 0x597   : > { %8664 = vrsqrt.f32 %v4642_v44  ;;  %v5358_v55 = vmul.f32 %v8663_v26, %v4640_v51  ;;  %v5351_v58 = vmul.f32 %v5350_v60, %v4638_v31  ;;  %vm5376_vm8 = vcmp.eq.f32.partialorder %v4642_v44, inf }
 0x598   : > { %8666 = vrcp.f32 %v5474_v46  ;;  %5665 = vst [vmem:[%s10148_s14 + $0x1c0] sm:$0xff] %v5601_v21  ;;  %v5379_v6 = vand.u32 2147483648, %v4642_v44  ;;  %vm5378_vm9 = vcmp.eq.f32.partialorder %v4642_v44, 0.0 }
 0x599   : > { %v5359_v43 = vmul.f32 %v8663_v26, %v5358_v55  ;;  %v5353_v49 = vsel %vm5352_vm4, %v4638_v31, %v5351_v58 }
 0x59a   : > { %v5356_v35 = vsel %vm5354_vm5, %v5355_v0, %v5353_v49 }
 0x59b   : > { %v5360_v54 = vmul.f32 0.5, %v5359_v43  ;;  %v5475_v39 = vadd.f32 1e-07, %v5356_v35 }
 0x59d   : > { %v8665_v8 = vpop.eup %8664  ;;  %v5361_v34 = vsub.f32 1.5, %v5360_v54  ;;  %v4644_v56 = vpop.xlane.xlu1 %4643  ;;  %8668 = vrcp.f32 %v5475_v39 }
 0x59e   : > { %v8667_v45 = vpop.eup %8666  ;;  %v5370_v48 = vmul.f32 %v8665_v8, %v4642_v44  ;;  %8670 = vrsqrt.f32 %v4644_v56  ;;  %vm5388_vm10 = vcmp.eq.f32.partialorder %v4644_v56, inf  ;;  %vm5390_vm11 = vcmp.eq.f32.partialorder %v4644_v56, 0.0 }
 0x59f   : > { %v5602_v10 = vmul.f32 %v8667_v45, %v10909_v42  ;;  %v5362_v22 = vmul.f32 %v8663_v26, %v5361_v34 }
 0x5a0   : > { %v5371_v16 = vmul.f32 %v8665_v8, %v5370_v48 }
 0x5a1   : > { %5666 = vst [vmem:[%s10148_s14 + $0x1c8] sm:$0xff] %v5602_v10  ;;  %v5363_v37 = vmul.f32 %v5362_v22, %v4640_v51 }
 0x5a2   : > { %v5372_v18 = vmul.f32 0.5, %v5371_v16 }
 0x5a3   : > { %v5365_v53 = vsel %vm5364_vm6, %v4640_v51, %v5363_v37  ;;  %v8669_v33 = vpop.eup %8668  ;;  %v5391_v51 = vand.u32 2147483648, %v4644_v56 }
 0x5a4   : > { %v5373_v20 = vsub.f32 1.5, %v5372_v18  ;;  %v5368_v12 = vsel %vm5366_vm7, %v5367_v2, %v5365_v53  ;;  %v8671_v23 = vpop.eup %8670  ;;  %v5603_v19 = vmul.f32 %v8669_v33, %v10922_v15 }
 0x5a5   : > { %v5476_v28 = vadd.f32 1e-07, %v5368_v12  ;;  %v5382_v31 = vmul.f32 %v8671_v23, %v4644_v56 }
 0x5a6   : > { %v5374_v42 = vmul.f32 %v8665_v8, %v5373_v20  ;;  %v4646_v4 = vpop.xlane.xlu2 %4645  ;;  %5667 = vst [vmem:[%s10148_s14 + $0x1d0] sm:$0xff] %v5603_v19 }
 0x5a7   : > { %8672 = vrsqrt.f32 %v4646_v4  ;;  %v5383_v24 = vmul.f32 %v8671_v23, %v5382_v31  ;;  %vm5400_vm12 = vcmp.eq.f32.partialorder %v4646_v4, inf  ;;  %v5403_v26 = vand.u32 2147483648, %v4646_v4 }
 0x5a8   : > { %8674 = vrcp.f32 %v5476_v28  ;;  %v5375_v32 = vmul.f32 %v5374_v42, %v4642_v44  ;;  %vm5402_vm13 = vcmp.eq.f32.partialorder %v4646_v4, 0.0 }
 0x5a9   : > { %v5384_v63 = vmul.f32 0.5, %v5383_v24 }
 0x5aa   : > { %v5377_v47 = vsel %vm5376_vm8, %v4642_v44, %v5375_v32 }
 0x5ab   : > { %v5380_v7 = vsel %vm5378_vm9, %v5379_v6, %v5377_v47  ;;  %v5385_v27 = vsub.f32 1.5, %v5384_v63 }
 0x5ac   : > { %v5477_v1 = vadd.f32 1e-07, %v5380_v7 }
 0x5ad   : > { %v8673_v9 = vpop.eup %8672  ;;  %v5386_v13 = vmul.f32 %v8671_v23, %v5385_v27  ;;  %v4648_v5 = vpop.xlane.xlu0 %4647 }
 0x5ae   : > { %v8675_v15 = vpop.eup %8674  ;;  %8676 = vrcp.f32 %v5477_v1  ;;  %v5394_v30 = vmul.f32 %v8673_v9, %v4646_v4  ;;  %vm5412_vm14 = vcmp.eq.f32.partialorder %v4648_v5, inf  ;;  %v5415_v8 = vand.u32 2147483648, %v4648_v5 }
 0x5af   : > { %v5604_v50 = vmul.f32 %v8675_v15, %v10944_v14  ;;  %8678 = vrsqrt.f32 %v4648_v5  ;;  %v5387_v11 = vmul.f32 %v5386_v13, %v4644_v56  ;;  %vm5414_vm15 = vcmp.eq.f32.partialorder %v4648_v5, 0.0 }
 0x5b0   : > { %v5395_v29 = vmul.f32 %v8673_v9, %v5394_v30 }
 0x5b1   : > { %5668 = vst [vmem:[%s10148_s14 + $0x1d8] sm:$0xff] %v5604_v50  ;;  %v5389_v59 = vsel %vm5388_vm10, %v4644_v56, %v5387_v11 }
 0x5b2   : > { %v5396_v3 = vmul.f32 0.5, %v5395_v29  ;;  %v5392_v36 = vsel %vm5390_vm11, %v5391_v51, %v5389_v59 }
 0x5b3   : > { %v5478_v52 = vadd.f32 1e-07, %v5392_v36 }
 0x5b4   : > { %v8677_v61 = vpop.eup %8676  ;;  %v5397_v41 = vsub.f32 1.5, %v5396_v3 }
 0x5b5   : > { %v5605_v62 = vmul.f32 %v8677_v61, %v10954_v40  ;;  %v8679_v25 = vpop.eup %8678  ;;  %8680 = vrcp.f32 %v5478_v52 }
 0x5b6   : > { %v5398_v14 = vmul.f32 %v8673_v9, %v5397_v41  ;;  %v5406_v46 = vmul.f32 %v8679_v25, %v4648_v5 }
 0x5b7   : > { %5669 = vst [vmem:[%s10148_s14 + $0x1e0] sm:$0xff] %v5605_v62 }
 0x5b8   : > { %v5399_v44 = vmul.f32 %v5398_v14, %v4646_v4  ;;  %v5407_v21 = vmul.f32 %v8679_v25, %v5406_v46 }
 0x5ba   : > { %v5401_v60 = vsel %vm5400_vm12, %v4646_v4, %v5399_v44  ;;  %v5408_v58 = vmul.f32 0.5, %v5407_v21 }
 0x5bb   : > { %v5404_v55 = vsel %vm5402_vm13, %v5403_v26, %v5401_v60  ;;  %v8681_v43 = vpop.eup %8680 }
 0x5bc   : > { %v5479_v0 = vadd.f32 1e-07, %v5404_v55  ;;  %v5409_v49 = vsub.f32 1.5, %v5408_v58  ;;  %v5606_v40 = vmul.f32 %v8681_v43, %v10967_v57 }
 0x5be   : > { %8682 = vrcp.f32 %v5479_v0  ;;  %v5410_v35 = vmul.f32 %v8679_v25, %v5409_v49  ;;  %5670 = vst [vmem:[%s10148_s14 + $0x1e8] sm:$0xff] %v5606_v40 }
 0x5c0   : > { %v5411_v54 = vmul.f32 %v5410_v35, %v4648_v5 }
 0x5c2   : > { %v5413_v39 = vsel %vm5412_vm14, %v4648_v5, %v5411_v54 }
 0x5c3   : > { %v5416_v34 = vsel %vm5414_vm15, %v5415_v8, %v5413_v39 }
 0x5c4   : > { %v8683_v45 = vpop.eup %8682  ;;  %v5480_v56 = vadd.f32 1e-07, %v5416_v34 }
 0x5c5   : > { %v5607_v48 = vmul.f32 %v8683_v45, %v10986_v17 }
 0x5c6   : > { %8684 = vrcp.f32 %v5480_v56 }
 0x5c7   : > { %5671 = vst [vmem:[%s10148_s14 + $0x1f0] sm:$0xff] %v5607_v48 }
 0x5cb   : > { %5747 = sbr.rel (!%p8895_p4) target bundleno = 1552 (0x610), region = 40 }
 0x5cc   : > { %v8685_v10 = vpop.eup %8684 }
 0x5cd   : > { %v5608_v22 = vmul.f32 %v8685_v10, %v11003_v38 }
 0x5cf   : > { %5672 = vst [vmem:[%s10148_s14 + $0x1f8] sm:$0xff] %v5608_v22 }
 0x5d0   : > { %s11463_s23 = smov (!%p5750_p8, %s5749_s23), 64 }
 0x5d1   : > { %s7857_s22 = sshll.u32 %s11463_s23, 3 }
 0x5d2   : > { %p7860_p9 = scmp.eq.s32.totalorder %s7857_s22, 0 }
 0x5d3   : > { %s11068_s26 = sshrl.u32 (!%p7860_p9), %s11463_s23, 5 }
 0x5d4   : > { %5758 = sbr.rel (%p7860_p9) target bundleno = 1552 (0x610), region = 44  ;;  %p7861_p10 = scmp.le.s32.totalorder (!%p7860_p9), %s11068_s26, 0 }
 0x5d9   : > { %6319 = sbr.rel (%p7861_p10) target bundleno = 1535 (0x5ff), region = 195  ;;  %s11449_s27 = smov (!%p7861_p10), %s11062_s20 }
 0x5da   : > { %s11450_s28 = smov (!%p7861_p10), %s10148_s14  ;;  %s11077_s29 = smov (!%p7861_p10), 0  }
 0x5db   : > { %s11079_s30 = smov (!%p7861_p10), 0  }
 0x5de LB: >> { %v5883_v57 = vld [vmem:[%s8782_s28] sm:$0xff]  ;;  %v5885_v17 = vld [vmem:[%s8782_s28 + $0x8] sm:$0xff]  ;;  %v5887_v38 = vld [vmem:[%s8782_s28 + $0x10] sm:$0xff]  ;;  %s5947_s6 = sadd.s32 1, %s8786_s29  ;;  %s5877_s30 = sadd.s32 1, %s8790_s30   ;;  %s8790_s30 = sphi %s11079_s30, %s5877_s30   ;;  %s8786_s29 = sphi %s11077_s29, %s11453_s29   ;;  %s8782_s28 = sphi %s11450_s28, %s11452_s28   ;;  %s8778_s27 = sphi %s11449_s27, %s11451_s27  }
 0x5df   : >> { %5884 = vst [vmem:[%s8778_s27] sm:$0xff] %v5883_v57  ;;  %v5889_v16 = vld [vmem:[%s8782_s28 + $0x18] sm:$0xff]  ;;  %p5948_p11 = scmp.ge.s32.totalorder %s5947_s6, %s11068_s26  ;;  %v5891_v37 = vld [vmem:[%s8782_s28 + $0x20] sm:$0xff]  ;;  %v5893_v18 = vld [vmem:[%s8782_s28 + $0x28] sm:$0xff]  ;;  %p5876_p12 = scmp.ge.s32.totalorder %s5877_s30, %s11068_s26 }
 0x5e0   : >> { %5886 = vst [vmem:[%s8778_s27 + $0x8] sm:$0xff] %v5885_v17  ;;  %v5895_v2 = vld [vmem:[%s8782_s28 + $0x30] sm:$0xff]  ;;  %v5897_v53 = vld [vmem:[%s8782_s28 + $0x38] sm:$0xff]  ;;  %v5899_v20 = vld [vmem:[%s8782_s28 + $0x40] sm:$0xff] }
 0x5e1   : >> { %5888 = vst [vmem:[%s8778_s27 + $0x10] sm:$0xff] %v5887_v38  ;;  %s11465_s6 = smov (%p5948_p11, %s5947_s6), 0  ;;  %v5901_v33 = vld [vmem:[%s8782_s28 + $0x48] sm:$0xff]  ;;  %v5903_v12 = vld [vmem:[%s8782_s28 + $0x50] sm:$0xff]  ;;  %v5905_v23 = vld [vmem:[%s8782_s28 + $0x58] sm:$0xff] }
 0x5e2   : >> { %5890 = vst [vmem:[%s8778_s27 + $0x18] sm:$0xff] %v5889_v16  ;;  %s7862_s8 = sshll.u32 %s11465_s6, 8  ;;  %v5907_v19 = vld [vmem:[%s8782_s28 + $0x60] sm:$0xff]  ;;  %v5909_v28 = vld [vmem:[%s8782_s28 + $0x68] sm:$0xff]  ;;  %v5911_v42 = vld [vmem:[%s8782_s28 + $0x70] sm:$0xff]  ;;  %s11453_s29 = smov %s11465_s6 }
 0x5e3   : >> { %5892 = vst [vmem:[%s8778_s27 + $0x20] sm:$0xff] %v5891_v37  ;;  %s11111_s9 = scalar_lea.vmem %s10148_s14, %s7862_s8 [#allocation2]   ;;  %s11114_s10 = scalar_lea.vmem %s11062_s20, %s7862_s8   ;;  %v5913_v4 = vld [vmem:[%s8782_s28 + $0x78] sm:$0xff]  ;;  %v5915_v31 = vld [vmem:[%s8782_s28 + $0x80] sm:$0xff]  ;;  %v5917_v32 = vld [vmem:[%s8782_s28 + $0x88] sm:$0xff] }
 0x5e4   : >> { %5894 = vst [vmem:[%s8778_s27 + $0x28] sm:$0xff] %v5893_v18  ;;  %v5919_v6 = vld [vmem:[%s8782_s28 + $0x90] sm:$0xff]  ;;  %v5921_v24 = vld [vmem:[%s8782_s28 + $0x98] sm:$0xff]  ;;  %v5923_v47 = vld [vmem:[%s8782_s28 + $0xa0] sm:$0xff] }
 0x5e5   : >> { %5896 = vst [vmem:[%s8778_s27 + $0x30] sm:$0xff] %v5895_v2  ;;  %v5925_v7 = vld [vmem:[%s8782_s28 + $0xa8] sm:$0xff]  ;;  %v5927_v63 = vld [vmem:[%s8782_s28 + $0xb0] sm:$0xff]  ;;  %v5929_v1 = vld [vmem:[%s8782_s28 + $0xb8] sm:$0xff] }
 0x5e6   : >> { %5898 = vst [vmem:[%s8778_s27 + $0x38] sm:$0xff] %v5897_v53  ;;  %v5931_v9 = vld [vmem:[%s8782_s28 + $0xc0] sm:$0xff]  ;;  %v5933_v27 = vld [vmem:[%s8782_s28 + $0xc8] sm:$0xff]  ;;  %v5935_v15 = vld [vmem:[%s8782_s28 + $0xd0] sm:$0xff] }
 0x5e7   : >> { %5900 = vst [vmem:[%s8778_s27 + $0x40] sm:$0xff] %v5899_v20  ;;  %v5937_v30 = vld [vmem:[%s8782_s28 + $0xd8] sm:$0xff]  ;;  %v5939_v50 = vld [vmem:[%s8782_s28 + $0xe0] sm:$0xff]  ;;  %v5941_v13 = vld [vmem:[%s8782_s28 + $0xe8] sm:$0xff] }
 0x5e8   : >> { %5902 = vst [vmem:[%s8778_s27 + $0x48] sm:$0xff] %v5901_v33  ;;  %v5943_v5 = vld [vmem:[%s8782_s28 + $0xf0] sm:$0xff]  ;;  %v5945_v29 = vld [vmem:[%s8782_s28 + $0xf8] sm:$0xff]  ;;  %s11452_s28 = smov %s11111_s9 }
 0x5e9   : >> { %5904 = vst [vmem:[%s8778_s27 + $0x50] sm:$0xff] %v5903_v12 }
 0x5ea   : >> { %5906 = vst [vmem:[%s8778_s27 + $0x58] sm:$0xff] %v5905_v23 }
 0x5eb   : >> { %5908 = vst [vmem:[%s8778_s27 + $0x60] sm:$0xff] %v5907_v19 }
 0x5ec   : >> { %5910 = vst [vmem:[%s8778_s27 + $0x68] sm:$0xff] %v5909_v28 }
 0x5ed   : >> { %5912 = vst [vmem:[%s8778_s27 + $0x70] sm:$0xff] %v5911_v42 }
 0x5ee   : >> { %5914 = vst [vmem:[%s8778_s27 + $0x78] sm:$0xff] %v5913_v4 }
 0x5ef   : >> { %5916 = vst [vmem:[%s8778_s27 + $0x80] sm:$0xff] %v5915_v31 }
 0x5f0   : >> { %5918 = vst [vmem:[%s8778_s27 + $0x88] sm:$0xff] %v5917_v32 }
 0x5f1   : >> { %5920 = vst [vmem:[%s8778_s27 + $0x90] sm:$0xff] %v5919_v6 }
 0x5f2   : >> { %5922 = vst [vmem:[%s8778_s27 + $0x98] sm:$0xff] %v5921_v24 }
 0x5f3   : >> { %5924 = vst [vmem:[%s8778_s27 + $0xa0] sm:$0xff] %v5923_v47 }
 0x5f4   : >> { %5926 = vst [vmem:[%s8778_s27 + $0xa8] sm:$0xff] %v5925_v7 }
 0x5f5   : >> { %5928 = vst [vmem:[%s8778_s27 + $0xb0] sm:$0xff] %v5927_v63 }
 0x5f6   : >> { %5930 = vst [vmem:[%s8778_s27 + $0xb8] sm:$0xff] %v5929_v1 }
 0x5f7   : >> { %5932 = vst [vmem:[%s8778_s27 + $0xc0] sm:$0xff] %v5931_v9 }
 0x5f8   : >> { %5934 = vst [vmem:[%s8778_s27 + $0xc8] sm:$0xff] %v5933_v27 }
 0x5f9   : >> { %5936 = vst [vmem:[%s8778_s27 + $0xd0] sm:$0xff] %v5935_v15 }
 0x5fa   : >> { %5938 = vst [vmem:[%s8778_s27 + $0xd8] sm:$0xff] %v5937_v30  ;;  %5879 = sbr.rel (!%p5876_p12) target bundleno = 1502 (0x5de), region = 201 }
 0x5fb   : >> { %5940 = vst [vmem:[%s8778_s27 + $0xe0] sm:$0xff] %v5939_v50 }
 0x5fc   : >> { %5942 = vst [vmem:[%s8778_s27 + $0xe8] sm:$0xff] %v5941_v13 }
 0x5fd   : >> { %5944 = vst [vmem:[%s8778_s27 + $0xf0] sm:$0xff] %v5943_v5 }
 0x5fe   : >> { %5946 = vst [vmem:[%s8778_s27 + $0xf8] sm:$0xff] %v5945_v29  ;;  %s11451_s27 = smov %s11114_s10 }
 0x5ff PF: > { %s11179_s11 = sand.u32 31, %s11463_s23   ;;  %s8247_s12 = sshll.u32 %s11068_s26, 8 }
 0x600   : > { %s5958_s13 = scalar_lea.vmem %s10148_s14, %s8247_s12 [#allocation2]   ;;  %s5960_s15 = scalar_lea.vmem %s11062_s20, %s8247_s12  }
 0x601   : > { %p7867_p13 = scmp.le.s32.totalorder %s11179_s11, 0 }
 0x602   : > { %s8792_s16 = smov (!%p7867_p13), %s5960_s15   ;;  %s8796_s17 = smov (!%p7867_p13), %s5958_s13  }
 0x603   : > { %6333 = sbr.rel (%p7867_p13) target bundleno = 1552 (0x610), region = 206  ;;  %s8800_s22 = smov (!%p7867_p13), 0  }
 0x604   : > { %s8804_s6 = smov (!%p7867_p13), 0  }
 0x608 LB: >> { %v5970_v11 = vld [vmem:[%s8798_s17] sm:$0xff]  ;;  %s5972_s23 = sadd.s32 1, %s8802_s22  ;;  %s5964_s6 = sadd.s32 1, %s8806_s6   ;;  %s8806_s6 = sphi %s8804_s6, %s5964_s6   ;;  %s8802_s22 = sphi %s8800_s22, %s8801_s22   ;;  %s8798_s17 = sphi %s8796_s17, %s5977_s17   ;;  %s8794_s16 = sphi %s8792_s16, %s5978_s16  }
 0x609   : >> { %5971 = vst [vmem:[%s8794_s16] sm:$0xff] %v5970_v11  ;;  %p5973_p0 = scmp.ge.s32.totalorder %s5972_s23, %s11179_s11  ;;  %p5963_p1 = scmp.ge.s32.totalorder %s5964_s6, %s11179_s11 }
 0x60b   : >> { %s11467_s23 = smov (%p5973_p0, %s5972_s23), 0  ;;  %5966 = sbr.rel (!%p5963_p1) target bundleno = 1544 (0x608), region = 212 }
 0x60c   : >> { %s7868_s14 = sshll.u32 %s11467_s23, 3  ;;  %s8801_s22 = smov %s11467_s23  }
 0x60d   : >> { %s5977_s17 = scalar_lea.vmem %s5958_s13, %s7868_s14 [#allocation2]   ;;  %s5978_s16 = scalar_lea.vmem %s5960_s15, %s7868_s14  }
 0x610 PF: > { %5984 = sbr.rel (!%p8895_p4) target bundleno = 1621 (0x655), region = 92  ;;  %s5986_s20 = ssub.s32 (%p8895_p4), 211, %s8909_s7 }
 0x611   : > { %s8249_s26 = sshll.u32 (%p8895_p4), %s8883_s3, 9  ;;  %p5987_p2 = scmp.lt.s32.totalorder (%p8895_p4), %s5986_s20, 64 }
 0x612   : > { %s11194_s29 = scalar_lea.vmem (%p8895_p4), %s11334_s5, %s8249_s26  }
 0x615   : > { %s11469_s20 = smov (!%p5987_p2, %s5986_s20), 64 }
 0x616   : > { %s7871_s30 = sshll.u32 %s11469_s20, 3 }
 0x617   : > { %p7874_p3 = scmp.eq.s32.totalorder %s7871_s30, 0 }
 0x618   : > { %s11200_s8 = sshrl.u32 (!%p7874_p3), %s11469_s20, 5 }
 0x619   : > { %5995 = sbr.rel (%p7874_p3) target bundleno = 1621 (0x655), region = 96  ;;  %p7875_p4 = scmp.le.s32.totalorder (!%p7874_p3), %s11200_s8, 0 }
 0x61e   : > { %6347 = sbr.rel (%p7875_p4) target bundleno = 1604 (0x644), region = 217  ;;  %s11454_s3 = smov (!%p7875_p4), %s11194_s29 }
 0x61f   : > { %s11455_s25 = smov (!%p7875_p4), %s9932_s18  ;;  %s11209_s7 = smov (!%p7875_p4), 0  }
 0x620   : > { %s11211_s9 = smov (!%p7875_p4), 0  }
 0x623 LB: >> { %v6120_v51 = vld [vmem:[%s8814_s25] sm:$0xff]  ;;  %v6122_v3 = vld [vmem:[%s8814_s25 + $0x8] sm:$0xff]  ;;  %v6124_v59 = vld [vmem:[%s8814_s25 + $0x10] sm:$0xff]  ;;  %s6184_s10 = sadd.s32 1, %s8818_s7  ;;  %s6114_s9 = sadd.s32 1, %s8822_s9   ;;  %s8822_s9 = sphi %s11211_s9, %s6114_s9   ;;  %s8818_s7 = sphi %s11209_s7, %s11458_s7   ;;  %s8814_s25 = sphi %s11455_s25, %s11457_s25   ;;  %s8810_s3 = sphi %s11454_s3, %s11456_s3  }
 0x624   : >> { %6121 = vst [vmem:[%s8810_s3] sm:$0xff] %v6120_v51  ;;  %v6126_v61 = vld [vmem:[%s8814_s25 + $0x18] sm:$0xff]  ;;  %p6185_p5 = scmp.ge.s32.totalorder %s6184_s10, %s11200_s8  ;;  %v6128_v36 = vld [vmem:[%s8814_s25 + $0x20] sm:$0xff]  ;;  %v6130_v41 = vld [vmem:[%s8814_s25 + $0x28] sm:$0xff]  ;;  %p6113_p6 = scmp.ge.s32.totalorder %s6114_s9, %s11200_s8 }
 0x625   : >> { %6123 = vst [vmem:[%s8810_s3 + $0x8] sm:$0xff] %v6122_v3  ;;  %v6132_v62 = vld [vmem:[%s8814_s25 + $0x30] sm:$0xff]  ;;  %v6134_v52 = vld [vmem:[%s8814_s25 + $0x38] sm:$0xff]  ;;  %v6136_v25 = vld [vmem:[%s8814_s25 + $0x40] sm:$0xff] }
 0x626   : >> { %6125 = vst [vmem:[%s8810_s3 + $0x10] sm:$0xff] %v6124_v59  ;;  %s11471_s10 = smov (%p6185_p5, %s6184_s10), 0  ;;  %v6138_v14 = vld [vmem:[%s8814_s25 + $0x48] sm:$0xff]  ;;  %v6140_v46 = vld [vmem:[%s8814_s25 + $0x50] sm:$0xff]  ;;  %v6142_v44 = vld [vmem:[%s8814_s25 + $0x58] sm:$0xff] }
 0x627   : >> { %6127 = vst [vmem:[%s8810_s3 + $0x18] sm:$0xff] %v6126_v61  ;;  %s7876_s11 = sshll.u32 %s11471_s10, 8  ;;  %v6144_v26 = vld [vmem:[%s8814_s25 + $0x60] sm:$0xff]  ;;  %v6146_v21 = vld [vmem:[%s8814_s25 + $0x68] sm:$0xff]  ;;  %v6148_v60 = vld [vmem:[%s8814_s25 + $0x70] sm:$0xff]  ;;  %s11458_s7 = smov %s11471_s10 }
 0x628   : >> { %6129 = vst [vmem:[%s8810_s3 + $0x20] sm:$0xff] %v6128_v36  ;;  %s11243_s12 = scalar_lea.vmem %s9932_s18, %s7876_s11 [#allocation3]   ;;  %s11246_s13 = scalar_lea.vmem %s11194_s29, %s7876_s11   ;;  %v6150_v55 = vld [vmem:[%s8814_s25 + $0x78] sm:$0xff]  ;;  %v6152_v58 = vld [vmem:[%s8814_s25 + $0x80] sm:$0xff]  ;;  %v6154_v0 = vld [vmem:[%s8814_s25 + $0x88] sm:$0xff] }
 0x629   : >> { %6131 = vst [vmem:[%s8810_s3 + $0x28] sm:$0xff] %v6130_v41  ;;  %v6156_v43 = vld [vmem:[%s8814_s25 + $0x90] sm:$0xff]  ;;  %v6158_v49 = vld [vmem:[%s8814_s25 + $0x98] sm:$0xff]  ;;  %v6160_v40 = vld [vmem:[%s8814_s25 + $0xa0] sm:$0xff] }
 0x62a   : >> { %6133 = vst [vmem:[%s8810_s3 + $0x30] sm:$0xff] %v6132_v62  ;;  %v6162_v35 = vld [vmem:[%s8814_s25 + $0xa8] sm:$0xff]  ;;  %v6164_v54 = vld [vmem:[%s8814_s25 + $0xb0] sm:$0xff]  ;;  %v6166_v8 = vld [vmem:[%s8814_s25 + $0xb8] sm:$0xff] }
 0x62b   : >> { %6135 = vst [vmem:[%s8810_s3 + $0x38] sm:$0xff] %v6134_v52  ;;  %v6168_v39 = vld [vmem:[%s8814_s25 + $0xc0] sm:$0xff]  ;;  %v6170_v45 = vld [vmem:[%s8814_s25 + $0xc8] sm:$0xff]  ;;  %v6172_v34 = vld [vmem:[%s8814_s25 + $0xd0] sm:$0xff] }
 0x62c   : >> { %6137 = vst [vmem:[%s8810_s3 + $0x40] sm:$0xff] %v6136_v25  ;;  %v6174_v48 = vld [vmem:[%s8814_s25 + $0xd8] sm:$0xff]  ;;  %v6176_v56 = vld [vmem:[%s8814_s25 + $0xe0] sm:$0xff]  ;;  %v6178_v10 = vld [vmem:[%s8814_s25 + $0xe8] sm:$0xff] }
 0x62d   : >> { %6139 = vst [vmem:[%s8810_s3 + $0x48] sm:$0xff] %v6138_v14  ;;  %v6180_v22 = vld [vmem:[%s8814_s25 + $0xf0] sm:$0xff]  ;;  %v6182_v57 = vld [vmem:[%s8814_s25 + $0xf8] sm:$0xff]  ;;  %s11457_s25 = smov %s11243_s12 }
 0x62e   : >> { %6141 = vst [vmem:[%s8810_s3 + $0x50] sm:$0xff] %v6140_v46 }
 0x62f   : >> { %6143 = vst [vmem:[%s8810_s3 + $0x58] sm:$0xff] %v6142_v44 }
 0x630   : >> { %6145 = vst [vmem:[%s8810_s3 + $0x60] sm:$0xff] %v6144_v26 }
 0x631   : >> { %6147 = vst [vmem:[%s8810_s3 + $0x68] sm:$0xff] %v6146_v21 }
 0x632   : >> { %6149 = vst [vmem:[%s8810_s3 + $0x70] sm:$0xff] %v6148_v60 }
 0x633   : >> { %6151 = vst [vmem:[%s8810_s3 + $0x78] sm:$0xff] %v6150_v55 }
 0x634   : >> { %6153 = vst [vmem:[%s8810_s3 + $0x80] sm:$0xff] %v6152_v58 }
 0x635   : >> { %6155 = vst [vmem:[%s8810_s3 + $0x88] sm:$0xff] %v6154_v0 }
 0x636   : >> { %6157 = vst [vmem:[%s8810_s3 + $0x90] sm:$0xff] %v6156_v43 }
 0x637   : >> { %6159 = vst [vmem:[%s8810_s3 + $0x98] sm:$0xff] %v6158_v49 }
 0x638   : >> { %6161 = vst [vmem:[%s8810_s3 + $0xa0] sm:$0xff] %v6160_v40 }
 0x639   : >> { %6163 = vst [vmem:[%s8810_s3 + $0xa8] sm:$0xff] %v6162_v35 }
 0x63a   : >> { %6165 = vst [vmem:[%s8810_s3 + $0xb0] sm:$0xff] %v6164_v54 }
 0x63b   : >> { %6167 = vst [vmem:[%s8810_s3 + $0xb8] sm:$0xff] %v6166_v8 }
 0x63c   : >> { %6169 = vst [vmem:[%s8810_s3 + $0xc0] sm:$0xff] %v6168_v39 }
 0x63d   : >> { %6171 = vst [vmem:[%s8810_s3 + $0xc8] sm:$0xff] %v6170_v45 }
 0x63e   : >> { %6173 = vst [vmem:[%s8810_s3 + $0xd0] sm:$0xff] %v6172_v34 }
 0x63f   : >> { %6175 = vst [vmem:[%s8810_s3 + $0xd8] sm:$0xff] %v6174_v48  ;;  %6116 = sbr.rel (!%p6113_p6) target bundleno = 1571 (0x623), region = 223 }
 0x640   : >> { %6177 = vst [vmem:[%s8810_s3 + $0xe0] sm:$0xff] %v6176_v56 }
 0x641   : >> { %6179 = vst [vmem:[%s8810_s3 + $0xe8] sm:$0xff] %v6178_v10 }
 0x642   : >> { %6181 = vst [vmem:[%s8810_s3 + $0xf0] sm:$0xff] %v6180_v22 }
 0x643   : >> { %6183 = vst [vmem:[%s8810_s3 + $0xf8] sm:$0xff] %v6182_v57  ;;  %s11456_s3 = smov %s11246_s13 }
 0x644 PF: > { %s11311_s15 = sand.u32 31, %s11469_s20   ;;  %s8250_s16 = sshll.u32 %s11200_s8, 8 }
 0x645   : > { %s6195_s17 = scalar_lea.vmem %s9932_s18, %s8250_s16 [#allocation3]   ;;  %s6197_s22 = scalar_lea.vmem %s11194_s29, %s8250_s16  }
 0x646   : > { %p7881_p7 = scmp.le.s32.totalorder %s11311_s15, 0 }
 0x647   : > { %s8824_s6 = smov (!%p7881_p7), %s6197_s22   ;;  %s8828_s23 = smov (!%p7881_p7), %s6195_s17  }
 0x648   : > { %6361 = sbr.rel (%p7881_p7) target bundleno = 1621 (0x655), region = 228  ;;  %s8832_s14 = smov (!%p7881_p7), 0  }
 0x649   : > { %s8836_s26 = smov (!%p7881_p7), 0  }
 0x64d LB: >> { %v6207_v17 = vld [vmem:[%s8830_s23] sm:$0xff]  ;;  %s6209_s20 = sadd.s32 1, %s8834_s14  ;;  %s6201_s26 = sadd.s32 1, %s8838_s26   ;;  %s8838_s26 = sphi %s8836_s26, %s6201_s26   ;;  %s8834_s14 = sphi %s8832_s14, %s8833_s14   ;;  %s8830_s23 = sphi %s8828_s23, %s6214_s23   ;;  %s8826_s6 = sphi %s8824_s6, %s6215_s6  }
 0x64e   : >> { %6208 = vst [vmem:[%s8826_s6] sm:$0xff] %v6207_v17  ;;  %p6210_p8 = scmp.ge.s32.totalorder %s6209_s20, %s11311_s15  ;;  %p6200_p9 = scmp.ge.s32.totalorder %s6201_s26, %s11311_s15 }
 0x650   : >> { %s11473_s20 = smov (%p6210_p8, %s6209_s20), 0  ;;  %6203 = sbr.rel (!%p6200_p9) target bundleno = 1613 (0x64d), region = 234 }
 0x651   : >> { %s7882_s18 = sshll.u32 %s11473_s20, 3  ;;  %s8833_s14 = smov %s11473_s20  }
 0x652   : >> { %s6214_s23 = scalar_lea.vmem %s6195_s17, %s7882_s18 [#allocation3]   ;;  %s6215_s6 = scalar_lea.vmem %s6197_s22, %s7882_s18  }
 0x655 PF: > { %p13_p10 = scmp.ge.s32.totalorder %s8885_s21, 6   ;;  %s11459_s18 = smov %s8770_s19 }
 0x656   : > { %s11460_s19 = smov %s8893_s24  ;;  %s11461_s20 = smov %s8885_s21 }
 0x657   :  { %15 = sbr.rel (!%p13_p10) target bundleno = 2 (0x2), region = 245 }

</bundles_post_ra>
